<compile_context>
chip_gen: v7x
topology: tpu7x:2x2x1
jax: 0.10.0
libtpu: 0.0.40
codegen_flags: <defaults>
</compile_context>

<pallas_src>
import math
import functools

import jax
import jax.numpy as jnp
from jax.experimental import pallas as pl
from jax.experimental.pallas import tpu as pltpu


def _round_up(x, m):
    return (x + m - 1) // m * m


def _pick_tile(padded, candidates):
    for c in candidates:
        if padded % c == 0:
            return c
    return padded


# ------------------------- Pallas tiled matmul kernel -------------------------
def _mm_kernel(a_ref, b_ref, bias_ref, o_ref, acc_ref, *, act):
    @pl.when(pl.program_id(2) == 0)
    def _():
        acc_ref[...] = jnp.zeros_like(acc_ref)

    acc_ref[...] += jnp.dot(a_ref[...], b_ref[...],
                            preferred_element_type=jnp.float32)

    @pl.when(pl.program_id(2) == pl.num_programs(2) - 1)
    def _():
        r = acc_ref[...] + bias_ref[...]
        if act == "relu":
            r = jnp.maximum(r, 0.0)
        o_ref[...] = r.astype(o_ref.dtype)


def pallas_matmul(a, b, bias=None, act="none", out_dtype=jnp.bfloat16):
    """act(a @ b + bias): a:(M,K), b:(K,N), bias:(N,). bf16 operands, f32 acc."""
    M, K = a.shape
    K2, N = b.shape
    assert K == K2
    if bias is None:
        bias = jnp.zeros((N,), jnp.float32)

    a = a.astype(jnp.bfloat16)
    b = b.astype(jnp.bfloat16)

    Mp = _round_up(M, 16)          # bf16 sublane packing
    Kp = _round_up(K, 128)
    Np = _round_up(N, 128)

    tm = _pick_tile(Mp, (512, 256, 128, 64, 32, 16))
    tn = _pick_tile(Np, (256, 128))
    tk = _pick_tile(Kp, (512, 384, 256, 128))
    # keep >= 2 parallel output blocks so both v7x TensorCores get work
    if (Mp // tm) * (Np // tn) < 2 and tm > 16 and Mp % (tm // 2) == 0:
        tm //= 2

    if (Mp, Kp) != (M, K):
        a = jnp.pad(a, ((0, Mp - M), (0, Kp - K)))
    if (Kp, Np) != (K, N):
        b = jnp.pad(b, ((0, Kp - K), (0, Np - N)))
    biasp = jnp.pad(bias.astype(jnp.float32), (0, Np - N)).reshape(1, Np)

    grid = (Mp // tm, Np // tn, Kp // tk)
    out = pl.pallas_call(
        functools.partial(_mm_kernel, act=act),
        out_shape=jax.ShapeDtypeStruct((Mp, Np), out_dtype),
        grid_spec=pltpu.PrefetchScalarGridSpec(
            num_scalar_prefetch=0,
            grid=grid,
            in_specs=[
                pl.BlockSpec((tm, tk), lambda i, j, k: (i, k)),
                pl.BlockSpec((tk, tn), lambda i, j, k: (k, j)),
                pl.BlockSpec((1, tn), lambda i, j, k: (0, j)),
            ],
            out_specs=pl.BlockSpec((tm, tn), lambda i, j, k: (i, j)),
            scratch_shapes=[pltpu.VMEM((tm, tn), jnp.float32)],
        ),
        compiler_params=pltpu.CompilerParams(
            dimension_semantics=("parallel", "parallel", "arbitrary"),
            vmem_limit_bytes=32 * 1024 * 1024),
    )(a, b, biasp)
    if (Mp, Np) != (M, N):
        out = out[:M, :N]
    return out


# ------------------------------ conv / nn helpers ------------------------------
def conv2d_nhwc(x, wmat, bias, k, stride=1, pad=1, out_dtype=jnp.bfloat16):
    """x:(B,H,W,Cin) NHWC; wmat:(k*k*Cin, Cout) pre-transposed bf16 (rows ordered kh,kw,Cin)."""
    B, H, W, C = x.shape
    Ho = (H + 2 * pad - k) // stride + 1
    Wo = (W + 2 * pad - k) // stride + 1
    xp = jnp.pad(x, ((0, 0), (pad, pad), (pad, pad), (0, 0))) if pad else x
    cols = [xp[:, i:i + stride * (Ho - 1) + 1:stride,
               j:j + stride * (Wo - 1) + 1:stride, :]
            for i in range(k) for j in range(k)]
    A = cols[0] if len(cols) == 1 else jnp.concatenate(cols, axis=-1)
    A = A.reshape(B * Ho * Wo, k * k * C)          # contiguous -> free reshape
    out = pallas_matmul(A, wmat, bias, out_dtype=out_dtype)
    return out.reshape(B, Ho, Wo, -1)


def conv_transpose_subpixel(x, wmat, bias_full, s, out_dtype=jnp.bfloat16):
    """ConvTranspose2d with kernel==stride==s, padding 0, as sub-pixel conv.
    x:(B,H,W,Cin); wmat:(Cin, s*s*Cout) columns ordered (i, j, co)."""
    B, H, W, C = x.shape
    Cout = wmat.shape[1] // (s * s)
    out = pallas_matmul(x.reshape(B * H * W, C), wmat, bias_full,
                        out_dtype=out_dtype)
    out = out.reshape(B, H, W, s, s, Cout)
    out = out.transpose(0, 1, 3, 2, 4, 5).reshape(B, H * s, W * s, Cout)
    return out


def linear(x, p, out_dtype=jnp.float32):
    return pallas_matmul(x, p["w"], p["b"], out_dtype=out_dtype)


def gelu(x):  # torch nn.GELU() default = exact erf
    return jax.nn.gelu(x.astype(jnp.float32), approximate=False)


def batchnorm_gelu(x, g, b, eps=1e-5):
    # training-mode BatchNorm2d (batch statistics) fused with GELU by XLA.
    xf = x.astype(jnp.float32)
    mean = xf.mean(axis=(0, 1, 2), keepdims=True)
    var = ((xf - mean) ** 2).mean(axis=(0, 1, 2), keepdims=True)
    y = (xf - mean) * jax.lax.rsqrt(var + eps) * g + b
    return jax.nn.gelu(y, approximate=False).astype(jnp.bfloat16)


def groupnorm_relu(x, groups, g, b, eps=1e-5):
    B, H, W, C = x.shape
    xf = x.astype(jnp.float32).reshape(B, H, W, groups, C // groups)
    mean = xf.mean(axis=(1, 2, 4), keepdims=True)
    var = ((xf - mean) ** 2).mean(axis=(1, 2, 4), keepdims=True)
    y = ((xf - mean) * jax.lax.rsqrt(var + eps)).reshape(B, H, W, C) * g + b
    return jnp.maximum(y, 0.0).astype(jnp.bfloat16)


def maxpool2d(x, k):
    B, H, W, C = x.shape
    return x.reshape(B, H // k, k, W // k, k, C).max(axis=(2, 4))


def avgpool2d(x, k):
    B, H, W, C = x.shape
    xf = x.astype(jnp.float32)
    return xf.reshape(B, H // k, k, W // k, k, C).mean(axis=(2, 4))


# --------------------------------- parameters ---------------------------------
class KeyGen:
    def __init__(self, key):
        self._key = key

    def __call__(self):
        self._key, k = jax.random.split(self._key)
        return k


def conv_p(kg, cout, cin, k):
    bound = 1.0 / math.sqrt(cin * k * k)
    w = jax.random.uniform(kg(), (cout, cin, k, k), jnp.float32, -bound, bound)
    b = jax.random.uniform(kg(), (cout,), jnp.float32, -bound, bound)
    wmat = jnp.transpose(w, (2, 3, 1, 0)).reshape(k * k * cin, cout)  # (kh,kw,Cin)->rows
    return {"w": wmat.astype(jnp.bfloat16), "b": b}


def convT_p(kg, cin, cout, k):
    bound = 1.0 / math.sqrt(cout * k * k)   # torch fan_in for ConvTranspose2d
    w = jax.random.uniform(kg(), (cin, cout, k, k), jnp.float32, -bound, bound)
    b = jax.random.uniform(kg(), (cout,), jnp.float32, -bound, bound)
    wmat = jnp.transpose(w, (0, 2, 3, 1)).reshape(cin, k * k * cout)  # cols (i,j,co)
    return {"w": wmat.astype(jnp.bfloat16), "b": jnp.tile(b, (k * k,))}


def linear_p(kg, din, dout):
    bound = 1.0 / math.sqrt(din)
    w = jax.random.uniform(kg(), (dout, din), jnp.float32, -bound, bound)
    b = jax.random.uniform(kg(), (dout,), jnp.float32, -bound, bound)
    return {"w": w.T.astype(jnp.bfloat16), "b": b}


def norm_p(c):
    return {"g": jnp.ones((c,), jnp.float32), "b": jnp.zeros((c,), jnp.float32)}


def resblock_p(kg, cin, cout):
    return {"c1": conv_p(kg, cout, cin, 3), "n1": norm_p(cout),
            "c2": conv_p(kg, cout, cout, 3), "n2": norm_p(cout)}


def embedfc_p(kg, din, demb):
    return {"l1": linear_p(kg, din, demb), "l2": linear_p(kg, demb, demb)}


def unet_params(key, in_channels, n_feat, ctx_dim, up0_k):
    kg = KeyGen(key)
    return {
        "init": resblock_p(kg, in_channels, n_feat),
        "down1": resblock_p(kg, n_feat, n_feat),
        "down2": resblock_p(kg, n_feat, 2 * n_feat),
        "te1": embedfc_p(kg, 1, 2 * n_feat),
        "te2": embedfc_p(kg, 1, n_feat),
        "ce1": embedfc_p(kg, ctx_dim, 2 * n_feat),
        "ce2": embedfc_p(kg, ctx_dim, n_feat),
        "up0": convT_p(kg, 2 * n_feat, 2 * n_feat, up0_k),
        "up0_gn": norm_p(2 * n_feat),
        "up1": {"ct": convT_p(kg, 4 * n_feat, n_feat, 2),
                "r1": resblock_p(kg, n_feat, n_feat),
                "r2": resblock_p(kg, n_feat, n_feat)},
        "up2": {"ct": convT_p(kg, 2 * n_feat, n_feat, 2),
                "r1": resblock_p(kg, n_feat, n_feat),
                "r2": resblock_p(kg, n_feat, n_feat)},
        "out_c1": conv_p(kg, n_feat, 2 * n_feat, 3),
        "out_gn": norm_p(n_feat),
        "out_c2": conv_p(kg, in_channels // 2, n_feat, 3),
    }


# --------------------------------- forward pass ---------------------------------
def resblock_fwd(p, x, is_res=False):
    x1 = conv2d_nhwc(x, p["c1"]["w"], p["c1"]["b"], 3)
    x1 = batchnorm_gelu(x1, p["n1"]["g"], p["n1"]["b"])
    x2 = conv2d_nhwc(x1, p["c2"]["w"], p["c2"]["b"], 3)
    x2 = batchnorm_gelu(x2, p["n2"]["g"], p["n2"]["b"])
    if is_res:
        same_channels = (x.shape[-1] == x2.shape[-1])
        out = (x + x2) if same_channels else (x1 + x2)
        return (out / 1.414).astype(jnp.bfloat16)
    return x2


def embedfc_fwd(p, x):
    x = x.reshape(x.shape[0], -1)
    h = gelu(linear(x, p["l1"], out_dtype=jnp.float32))
    return linear(h, p["l2"], out_dtype=jnp.float32)


def unet_fwd(params, image, t, latent_flat, n_feat, up0_stride):
    """image: (B, in_channels, S, S) NCHW; t: (B,1); latent_flat: (B, ctx_dim)."""
    x = jnp.transpose(image, (0, 2, 3, 1)).astype(jnp.bfloat16)   # NCHW -> NHWC (once)

    x0 = resblock_fwd(params["init"], x, is_res=True)
    down1 = maxpool2d(resblock_fwd(params["down1"], x0), 2)
    down2 = maxpool2d(resblock_fwd(params["down2"], down1), 2)
    hidden = gelu(avgpool2d(down2, 4)).astype(jnp.bfloat16)

    cemb1 = embedfc_fwd(params["ce1"], latent_flat).reshape(-1, 1, 1, 2 * n_feat)
    temb1 = embedfc_fwd(params["te1"], t).reshape(-1, 1, 1, 2 * n_feat)
    cemb2 = embedfc_fwd(params["ce2"], latent_flat).reshape(-1, 1, 1, n_feat)
    temb2 = embedfc_fwd(params["te2"], t).reshape(-1, 1, 1, n_feat)

    up1 = conv_transpose_subpixel(hidden, params["up0"]["w"], params["up0"]["b"],
                                  up0_stride)
    up1 = groupnorm_relu(up1, 8, params["up0_gn"]["g"], params["up0_gn"]["b"])

    def unet_up(pp, xin, skip):
        xin = jnp.concatenate([xin, skip], axis=-1)
        h = conv_transpose_subpixel(xin, pp["ct"]["w"], pp["ct"]["b"], 2)
        h = resblock_fwd(pp["r1"], h)
        h = resblock_fwd(pp["r2"], h)
        return h

    up2 = unet_up(params["up1"],
                  (cemb1 * up1.astype(jnp.float32) + temb1).astype(jnp.bfloat16),
                  down2)
    up3 = unet_up(params["up2"],
                  (cemb2 * up2.astype(jnp.float32) + temb2).astype(jnp.bfloat16),
                  down1)

    o = conv2d_nhwc(jnp.concatenate([up3, x0], axis=-1),
                    params["out_c1"]["w"], params["out_c1"]["b"], 3)
    o = groupnorm_relu(o, 8, params["out_gn"]["g"], params["out_gn"]["b"])
    o = conv2d_nhwc(o, params["out_c2"]["w"], params["out_c2"]["b"], 3,
                    out_dtype=jnp.float32)
    return jnp.transpose(o, (0, 3, 1, 2))   # back to NCHW


# ------------------------------------ main ------------------------------------
if __name__ == "__main__":
    # TODO(synk): scaled config for a runnable synthetic test — the original
    # hard-codes in_channels=128, n_feat=256, image_size=128 and a 16*32*32
    # context dim; here in_channels=8, n_feat=32, spatial=32, ctx_dim=256 with
    # up0's kernel/stride kept at image_size//32 == 4 so the spatial chain
    # (maxpool2, maxpool2, avgpool4, x4, x2, x2) closes exactly as in the spec.
    B = 2
    IN_CH = 8
    N_FEAT = 32
    S = 32
    CTX_DIM = 256
    UP0_K = 4

    key = jax.random.PRNGKey(0)
    k_param, k_img, k_t, k_ctx = jax.random.split(key, 4)

    params = unet_params(k_param, IN_CH, N_FEAT, CTX_DIM, UP0_K)
    image = jax.random.normal(k_img, (B, IN_CH, S, S), jnp.float32)
    t = jax.random.uniform(k_t, (B, 1), jnp.float32)
    latent_flat = jax.random.normal(k_ctx, (B, CTX_DIM), jnp.float32)

    fwd = jax.jit(lambda p, im, tt, ctx: unet_fwd(p, im, tt, ctx, N_FEAT, UP0_K))
    out = fwd(params, image, t, latent_flat)
    jax.block_until_ready(out)

    assert out.shape == (B, IN_CH // 2, S, S), out.shape
    assert bool(jnp.all(jnp.isfinite(out)))
    print("KERNEL_OK")
</pallas_src>

<mosaic_0001>
module attributes {stable_mosaic.version = 11 : i64} {
  func.func @_mm_kernel(%arg0: i32, %arg1: i32, %arg2: i32, %arg3: memref<512x128xbf16, #tpu.memory_space<vmem>>, %arg4: memref<128x128xbf16, #tpu.memory_space<vmem>>, %arg5: memref<1x128xf32, #tpu.memory_space<vmem>>, %arg6: memref<512x128xbf16, #tpu.memory_space<vmem>>, %arg7: memref<512x128xf32, #tpu.memory_space<vmem>>) attributes {dimension_semantics = [#tpu.dimension_semantics<parallel>, #tpu.dimension_semantics<parallel>, #tpu.dimension_semantics<arbitrary>], iteration_bounds = array<i64: 4, 1, 1>, scalar_prefetch = 0 : i64, scratch_operands = 1 : i64, tpu.core_type = #tpu.core_type<tc>, window_params = [{transform_indices = @transform_0, window_bounds = array<i64: 512, 128>}, {transform_indices = @transform_1, window_bounds = array<i64: 128, 128>}, {transform_indices = @transform_2, window_bounds = array<i64: 1, 128>}, {transform_indices = @transform_3, window_bounds = array<i64: 512, 128>}]} {
    %c0_i32 = arith.constant 0 : i32
    %0 = arith.cmpi eq, %arg2, %c0_i32 : i32
    %1 = arith.extui %0 : i1 to i32
    %c0_i32_0 = arith.constant 0 : i32
    %2 = arith.cmpi ne, %1, %c0_i32_0 : i32
    scf.if %2 {
      %cst_10 = arith.constant 0.000000e+00 : f32
      %12 = vector.broadcast %cst_10 : f32 to vector<512x128xf32>
      %c0_11 = arith.constant 0 : index
      %c0_12 = arith.constant 0 : index
      %13 = vector.load %arg7[%c0_11, %c0_12] : memref<512x128xf32, #tpu.memory_space<vmem>>, vector<512x128xf32>
      tpu.vector_store %arg7[%c0_11, %c0_12], %12 {strides = array<i32>} : memref<512x128xf32, #tpu.memory_space<vmem>>, vector<512x128xf32>,
    } else {
    }
    %c0 = arith.constant 0 : index
    %c0_1 = arith.constant 0 : index
    %3 = vector.load %arg7[%c0, %c0_1] : memref<512x128xf32, #tpu.memory_space<vmem>>, vector<512x128xf32>
    %c0_2 = arith.constant 0 : index
    %c0_3 = arith.constant 0 : index
    %4 = vector.load %arg3[%c0_2, %c0_3] : memref<512x128xbf16, #tpu.memory_space<vmem>>, vector<512x128xbf16>
    %c0_4 = arith.constant 0 : index
    %c0_5 = arith.constant 0 : index
    %5 = vector.load %arg4[%c0_4, %c0_5] : memref<128x128xbf16, #tpu.memory_space<vmem>>, vector<128x128xbf16>
    %cst = arith.constant dense<0.000000e+00> : vector<512x128xf32>
    %6 = tpu.matmul %4, %5, %cst {dimension_numbers = #tpu.dot_dimension_numbers<[1], [0], [0], [1], [0, 0, 1, 1], [], []>} : vector<512x128xbf16>, vector<128x128xbf16>, vector<512x128xf32> -> vector<512x128xf32>
    %7 = arith.addf %3, %6 : vector<512x128xf32>
    %c0_6 = arith.constant 0 : index
    %c0_7 = arith.constant 0 : index
    %8 = vector.load %arg7[%c0_6, %c0_7] : memref<512x128xf32, #tpu.memory_space<vmem>>, vector<512x128xf32>
    tpu.vector_store %arg7[%c0_6, %c0_7], %7 {strides = array<i32>} : memref<512x128xf32, #tpu.memory_space<vmem>>, vector<512x128xf32>,
    %c0_i32_8 = arith.constant 0 : i32
    %9 = arith.cmpi eq, %arg2, %c0_i32_8 : i32
    %10 = arith.extui %9 : i1 to i32
    %c0_i32_9 = arith.constant 0 : i32
    %11 = arith.cmpi ne, %10, %c0_i32_9 : i32
    scf.if %11 {
      %c0_10 = arith.constant 0 : index
      %c0_11 = arith.constant 0 : index
      %12 = vector.load %arg7[%c0_10, %c0_11] : memref<512x128xf32, #tpu.memory_space<vmem>>, vector<512x128xf32>
      %c0_12 = arith.constant 0 : index
      %c0_13 = arith.constant 0 : index
      %13 = vector.load %arg5[%c0_12, %c0_13] : memref<1x128xf32, #tpu.memory_space<vmem>>, vector<1x128xf32>
      %14 = vector.broadcast %13 : vector<1x128xf32> to vector<512x128xf32>
      %15 = arith.addf %12, %14 : vector<512x128xf32>
      %16 = arith.truncf %15 : vector<512x128xf32> to vector<512x128xbf16>
      %c0_14 = arith.constant 0 : index
      %c0_15 = arith.constant 0 : index
      %17 = vector.load %arg6[%c0_14, %c0_15] : memref<512x128xbf16, #tpu.memory_space<vmem>>, vector<512x128xbf16>
      tpu.vector_store %arg6[%c0_14, %c0_15], %16 {strides = array<i32>} : memref<512x128xbf16, #tpu.memory_space<vmem>>, vector<512x128xbf16>,
    } else {
    }
    return
  }
  func.func @transform_0(%arg0: i32, %arg1: i32, %arg2: i32) -> (i32, i32) {
    %c0_i32 = arith.constant 0 : i32
    return %arg0, %arg2 : i32, i32
  }
  func.func @transform_1(%arg0: i32, %arg1: i32, %arg2: i32) -> (i32, i32) {
    %c0_i32 = arith.constant 0 : i32
    return %arg2, %arg1 : i32, i32
  }
  func.func @transform_2(%arg0: i32, %arg1: i32, %arg2: i32) -> (i32, i32) {
    %c0_i32 = arith.constant 0 : i32
    %c0_i32_0 = arith.constant 0 : i32
    return %c0_i32, %arg1 : i32, i32
  }
  func.func @transform_3(%arg0: i32, %arg1: i32, %arg2: i32) -> (i32, i32) {
    %c0_i32 = arith.constant 0 : i32
    return %arg0, %arg1 : i32, i32
  }
}

module attributes {stable_mosaic.version = 11 : i64} {
  func.func @_mm_kernel(%arg0: i32, %arg1: i32, %arg2: i32, %arg3: memref<512x384xbf16, #tpu.memory_space<vmem>>, %arg4: memref<384x128xbf16, #tpu.memory_space<vmem>>, %arg5: memref<1x128xf32, #tpu.memory_space<vmem>>, %arg6: memref<512x128xbf16, #tpu.memory_space<vmem>>, %arg7: memref<512x128xf32, #tpu.memory_space<vmem>>) attributes {dimension_semantics = [#tpu.dimension_semantics<parallel>, #tpu.dimension_semantics<parallel>, #tpu.dimension_semantics<arbitrary>], iteration_bounds = array<i64: 4, 1, 1>, scalar_prefetch = 0 : i64, scratch_operands = 1 : i64, tpu.core_type = #tpu.core_type<tc>, window_params = [{transform_indices = @transform_0, window_bounds = array<i64: 512, 384>}, {transform_indices = @transform_1, window_bounds = array<i64: 384, 128>}, {transform_indices = @transform_2, window_bounds = array<i64: 1, 128>}, {transform_indices = @transform_3, window_bounds = array<i64: 512, 128>}]} {
    %c0_i32 = arith.constant 0 : i32
    %0 = arith.cmpi eq, %arg2, %c0_i32 : i32
    %1 = arith.extui %0 : i1 to i32
    %c0_i32_0 = arith.constant 0 : i32
    %2 = arith.cmpi ne, %1, %c0_i32_0 : i32
    scf.if %2 {
      %cst_10 = arith.constant 0.000000e+00 : f32
      %12 = vector.broadcast %cst_10 : f32 to vector<512x128xf32>
      %c0_11 = arith.constant 0 : index
      %c0_12 = arith.constant 0 : index
      %13 = vector.load %arg7[%c0_11, %c0_12] : memref<512x128xf32, #tpu.memory_space<vmem>>, vector<512x128xf32>
      tpu.vector_store %arg7[%c0_11, %c0_12], %12 {strides = array<i32>} : memref<512x128xf32, #tpu.memory_space<vmem>>, vector<512x128xf32>,
    } else {
    }
    %c0 = arith.constant 0 : index
    %c0_1 = arith.constant 0 : index
    %3 = vector.load %arg7[%c0, %c0_1] : memref<512x128xf32, #tpu.memory_space<vmem>>, vector<512x128xf32>
    %c0_2 = arith.constant 0 : index
    %c0_3 = arith.constant 0 : index
    %4 = vector.load %arg3[%c0_2, %c0_3] : memref<512x384xbf16, #tpu.memory_space<vmem>>, vector<512x384xbf16>
    %c0_4 = arith.constant 0 : index
    %c0_5 = arith.constant 0 : index
    %5 = vector.load %arg4[%c0_4, %c0_5] : memref<384x128xbf16, #tpu.memory_space<vmem>>, vector<384x128xbf16>
    %cst = arith.constant dense<0.000000e+00> : vector<512x128xf32>
    %6 = tpu.matmul %4, %5, %cst {dimension_numbers = #tpu.dot_dimension_numbers<[1], [0], [0], [1], [0, 0, 1, 1], [], []>} : vector<512x384xbf16>, vector<384x128xbf16>, vector<512x128xf32> -> vector<512x128xf32>
    %7 = arith.addf %3, %6 : vector<512x128xf32>
    %c0_6 = arith.constant 0 : index
    %c0_7 = arith.constant 0 : index
    %8 = vector.load %arg7[%c0_6, %c0_7] : memref<512x128xf32, #tpu.memory_space<vmem>>, vector<512x128xf32>
    tpu.vector_store %arg7[%c0_6, %c0_7], %7 {strides = array<i32>} : memref<512x128xf32, #tpu.memory_space<vmem>>, vector<512x128xf32>,
    %c0_i32_8 = arith.constant 0 : i32
    %9 = arith.cmpi eq, %arg2, %c0_i32_8 : i32
    %10 = arith.extui %9 : i1 to i32
    %c0_i32_9 = arith.constant 0 : i32
    %11 = arith.cmpi ne, %10, %c0_i32_9 : i32
    scf.if %11 {
      %c0_10 = arith.constant 0 : index
      %c0_11 = arith.constant 0 : index
      %12 = vector.load %arg7[%c0_10, %c0_11] : memref<512x128xf32, #tpu.memory_space<vmem>>, vector<512x128xf32>
      %c0_12 = arith.constant 0 : index
      %c0_13 = arith.constant 0 : index
      %13 = vector.load %arg5[%c0_12, %c0_13] : memref<1x128xf32, #tpu.memory_space<vmem>>, vector<1x128xf32>
      %14 = vector.broadcast %13 : vector<1x128xf32> to vector<512x128xf32>
      %15 = arith.addf %12, %14 : vector<512x128xf32>
      %16 = arith.truncf %15 : vector<512x128xf32> to vector<512x128xbf16>
      %c0_14 = arith.constant 0 : index
      %c0_15 = arith.constant 0 : index
      %17 = vector.load %arg6[%c0_14, %c0_15] : memref<512x128xbf16, #tpu.memory_space<vmem>>, vector<512x128xbf16>
      tpu.vector_store %arg6[%c0_14, %c0_15], %16 {strides = array<i32>} : memref<512x128xbf16, #tpu.memory_space<vmem>>, vector<512x128xbf16>,
    } else {
    }
    return
  }
  func.func @transform_0(%arg0: i32, %arg1: i32, %arg2: i32) -> (i32, i32) {
    %c0_i32 = arith.constant 0 : i32
    return %arg0, %arg2 : i32, i32
  }
  func.func @transform_1(%arg0: i32, %arg1: i32, %arg2: i32) -> (i32, i32) {
    %c0_i32 = arith.constant 0 : i32
    return %arg2, %arg1 : i32, i32
  }
  func.func @transform_2(%arg0: i32, %arg1: i32, %arg2: i32) -> (i32, i32) {
    %c0_i32 = arith.constant 0 : i32
    %c0_i32_0 = arith.constant 0 : i32
    return %c0_i32, %arg1 : i32, i32
  }
  func.func @transform_3(%arg0: i32, %arg1: i32, %arg2: i32) -> (i32, i32) {
    %c0_i32 = arith.constant 0 : i32
    return %arg0, %arg1 : i32, i32
  }
}

module attributes {stable_mosaic.version = 11 : i64} {
  func.func @_mm_kernel(%arg0: i32, %arg1: i32, %arg2: i32, %arg3: memref<256x384xbf16, #tpu.memory_space<vmem>>, %arg4: memref<384x128xbf16, #tpu.memory_space<vmem>>, %arg5: memref<1x128xf32, #tpu.memory_space<vmem>>, %arg6: memref<256x128xbf16, #tpu.memory_space<vmem>>, %arg7: memref<256x128xf32, #tpu.memory_space<vmem>>) attributes {dimension_semantics = [#tpu.dimension_semantics<parallel>, #tpu.dimension_semantics<parallel>, #tpu.dimension_semantics<arbitrary>], iteration_bounds = array<i64: 2, 1, 1>, scalar_prefetch = 0 : i64, scratch_operands = 1 : i64, tpu.core_type = #tpu.core_type<tc>, window_params = [{transform_indices = @transform_0, window_bounds = array<i64: 256, 384>}, {transform_indices = @transform_1, window_bounds = array<i64: 384, 128>}, {transform_indices = @transform_2, window_bounds = array<i64: 1, 128>}, {transform_indices = @transform_3, window_bounds = array<i64: 256, 128>}]} {
    %c0_i32 = arith.constant 0 : i32
    %0 = arith.cmpi eq, %arg2, %c0_i32 : i32
    %1 = arith.extui %0 : i1 to i32
    %c0_i32_0 = arith.constant 0 : i32
    %2 = arith.cmpi ne, %1, %c0_i32_0 : i32
    scf.if %2 {
      %cst_10 = arith.constant 0.000000e+00 : f32
      %12 = vector.broadcast %cst_10 : f32 to vector<256x128xf32>
      %c0_11 = arith.constant 0 : index
      %c0_12 = arith.constant 0 : index
      %13 = vector.load %arg7[%c0_11, %c0_12] : memref<256x128xf32, #tpu.memory_space<vmem>>, vector<256x128xf32>
      tpu.vector_store %arg7[%c0_11, %c0_12], %12 {strides = array<i32>} : memref<256x128xf32, #tpu.memory_space<vmem>>, vector<256x128xf32>,
    } else {
    }
    %c0 = arith.constant 0 : index
    %c0_1 = arith.constant 0 : index
    %3 = vector.load %arg7[%c0, %c0_1] : memref<256x128xf32, #tpu.memory_space<vmem>>, vector<256x128xf32>
    %c0_2 = arith.constant 0 : index
    %c0_3 = arith.constant 0 : index
    %4 = vector.load %arg3[%c0_2, %c0_3] : memref<256x384xbf16, #tpu.memory_space<vmem>>, vector<256x384xbf16>
    %c0_4 = arith.constant 0 : index
    %c0_5 = arith.constant 0 : index
    %5 = vector.load %arg4[%c0_4, %c0_5] : memref<384x128xbf16, #tpu.memory_space<vmem>>, vector<384x128xbf16>
    %cst = arith.constant dense<0.000000e+00> : vector<256x128xf32>
    %6 = tpu.matmul %4, %5, %cst {dimension_numbers = #tpu.dot_dimension_numbers<[1], [0], [0], [1], [0, 0, 1, 1], [], []>} : vector<256x384xbf16>, vector<384x128xbf16>, vector<256x128xf32> -> vector<256x128xf32>
    %7 = arith.addf %3, %6 : vector<256x128xf32>
    %c0_6 = arith.constant 0 : index
    %c0_7 = arith.constant 0 : index
    %8 = vector.load %arg7[%c0_6, %c0_7] : memref<256x128xf32, #tpu.memory_space<vmem>>, vector<256x128xf32>
    tpu.vector_store %arg7[%c0_6, %c0_7], %7 {strides = array<i32>} : memref<256x128xf32, #tpu.memory_space<vmem>>, vector<256x128xf32>,
    %c0_i32_8 = arith.constant 0 : i32
    %9 = arith.cmpi eq, %arg2, %c0_i32_8 : i32
    %10 = arith.extui %9 : i1 to i32
    %c0_i32_9 = arith.constant 0 : i32
    %11 = arith.cmpi ne, %10, %c0_i32_9 : i32
    scf.if %11 {
      %c0_10 = arith.constant 0 : index
      %c0_11 = arith.constant 0 : index
      %12 = vector.load %arg7[%c0_10, %c0_11] : memref<256x128xf32, #tpu.memory_space<vmem>>, vector<256x128xf32>
      %c0_12 = arith.constant 0 : index
      %c0_13 = arith.constant 0 : index
      %13 = vector.load %arg5[%c0_12, %c0_13] : memref<1x128xf32, #tpu.memory_space<vmem>>, vector<1x128xf32>
      %14 = vector.broadcast %13 : vector<1x128xf32> to vector<256x128xf32>
      %15 = arith.addf %12, %14 : vector<256x128xf32>
      %16 = arith.truncf %15 : vector<256x128xf32> to vector<256x128xbf16>
      %c0_14 = arith.constant 0 : index
      %c0_15 = arith.constant 0 : index
      %17 = vector.load %arg6[%c0_14, %c0_15] : memref<256x128xbf16, #tpu.memory_space<vmem>>, vector<256x128xbf16>
      tpu.vector_store %arg6[%c0_14, %c0_15], %16 {strides = array<i32>} : memref<256x128xbf16, #tpu.memory_space<vmem>>, vector<256x128xbf16>,
    } else {
    }
    return
  }
  func.func @transform_0(%arg0: i32, %arg1: i32, %arg2: i32) -> (i32, i32) {
    %c0_i32 = arith.constant 0 : i32
    return %arg0, %arg2 : i32, i32
  }
  func.func @transform_1(%arg0: i32, %arg1: i32, %arg2: i32) -> (i32, i32) {
    %c0_i32 = arith.constant 0 : i32
    return %arg2, %arg1 : i32, i32
  }
  func.func @transform_2(%arg0: i32, %arg1: i32, %arg2: i32) -> (i32, i32) {
    %c0_i32 = arith.constant 0 : i32
    %c0_i32_0 = arith.constant 0 : i32
    return %c0_i32, %arg1 : i32, i32
  }
  func.func @transform_3(%arg0: i32, %arg1: i32, %arg2: i32) -> (i32, i32) {
    %c0_i32 = arith.constant 0 : i32
    return %arg0, %arg1 : i32, i32
  }
}

module attributes {stable_mosaic.version = 11 : i64} {
  func.func @_mm_kernel(%arg0: i32, %arg1: i32, %arg2: i32, %arg3: memref<256x128xbf16, #tpu.memory_space<vmem>>, %arg4: memref<128x128xbf16, #tpu.memory_space<vmem>>, %arg5: memref<1x128xf32, #tpu.memory_space<vmem>>, %arg6: memref<256x128xbf16, #tpu.memory_space<vmem>>, %arg7: memref<256x128xf32, #tpu.memory_space<vmem>>) attributes {dimension_semantics = [#tpu.dimension_semantics<parallel>, #tpu.dimension_semantics<parallel>, #tpu.dimension_semantics<arbitrary>], iteration_bounds = array<i64: 2, 1, 5>, scalar_prefetch = 0 : i64, scratch_operands = 1 : i64, tpu.core_type = #tpu.core_type<tc>, window_params = [{transform_indices = @transform_0, window_bounds = array<i64: 256, 128>}, {transform_indices = @transform_1, window_bounds = array<i64: 128, 128>}, {transform_indices = @transform_2, window_bounds = array<i64: 1, 128>}, {transform_indices = @transform_3, window_bounds = array<i64: 256, 128>}]} {
    %c0_i32 = arith.constant 0 : i32
    %0 = arith.cmpi eq, %arg2, %c0_i32 : i32
    %1 = arith.extui %0 : i1 to i32
    %c0_i32_0 = arith.constant 0 : i32
    %2 = arith.cmpi ne, %1, %c0_i32_0 : i32
    scf.if %2 {
      %cst_9 = arith.constant 0.000000e+00 : f32
      %12 = vector.broadcast %cst_9 : f32 to vector<256x128xf32>
      %c0_10 = arith.constant 0 : index
      %c0_11 = arith.constant 0 : index
      %13 = vector.load %arg7[%c0_10, %c0_11] : memref<256x128xf32, #tpu.memory_space<vmem>>, vector<256x128xf32>
      tpu.vector_store %arg7[%c0_10, %c0_11], %12 {strides = array<i32>} : memref<256x128xf32, #tpu.memory_space<vmem>>, vector<256x128xf32>,
    } else {
    }
    %c0 = arith.constant 0 : index
    %c0_1 = arith.constant 0 : index
    %3 = vector.load %arg7[%c0, %c0_1] : memref<256x128xf32, #tpu.memory_space<vmem>>, vector<256x128xf32>
    %c0_2 = arith.constant 0 : index
    %c0_3 = arith.constant 0 : index
    %4 = vector.load %arg3[%c0_2, %c0_3] : memref<256x128xbf16, #tpu.memory_space<vmem>>, vector<256x128xbf16>
    %c0_4 = arith.constant 0 : index
    %c0_5 = arith.constant 0 : index
    %5 = vector.load %arg4[%c0_4, %c0_5] : memref<128x128xbf16, #tpu.memory_space<vmem>>, vector<128x128xbf16>
    %cst = arith.constant dense<0.000000e+00> : vector<256x128xf32>
    %6 = tpu.matmul %4, %5, %cst {dimension_numbers = #tpu.dot_dimension_numbers<[1], [0], [0], [1], [0, 0, 1, 1], [], []>} : vector<256x128xbf16>, vector<128x128xbf16>, vector<256x128xf32> -> vector<256x128xf32>
    %7 = arith.addf %3, %6 : vector<256x128xf32>
    %c0_6 = arith.constant 0 : index
    %c0_7 = arith.constant 0 : index
    %8 = vector.load %arg7[%c0_6, %c0_7] : memref<256x128xf32, #tpu.memory_space<vmem>>, vector<256x128xf32>
    tpu.vector_store %arg7[%c0_6, %c0_7], %7 {strides = array<i32>} : memref<256x128xf32, #tpu.memory_space<vmem>>, vector<256x128xf32>,
    %c4_i32 = arith.constant 4 : i32
    %9 = arith.cmpi eq, %arg2, %c4_i32 : i32
    %10 = arith.extui %9 : i1 to i32
    %c0_i32_8 = arith.constant 0 : i32
    %11 = arith.cmpi ne, %10, %c0_i32_8 : i32
    scf.if %11 {
      %c0_9 = arith.constant 0 : index
      %c0_10 = arith.constant 0 : index
      %12 = vector.load %arg7[%c0_9, %c0_10] : memref<256x128xf32, #tpu.memory_space<vmem>>, vector<256x128xf32>
      %c0_11 = arith.constant 0 : index
      %c0_12 = arith.constant 0 : index
      %13 = vector.load %arg5[%c0_11, %c0_12] : memref<1x128xf32, #tpu.memory_space<vmem>>, vector<1x128xf32>
      %14 = vector.broadcast %13 : vector<1x128xf32> to vector<256x128xf32>
      %15 = arith.addf %12, %14 : vector<256x128xf32>
      %16 = arith.truncf %15 : vector<256x128xf32> to vector<256x128xbf16>
      %c0_13 = arith.constant 0 : index
      %c0_14 = arith.constant 0 : index
      %17 = vector.load %arg6[%c0_13, %c0_14] : memref<256x128xbf16, #tpu.memory_space<vmem>>, vector<256x128xbf16>
      tpu.vector_store %arg6[%c0_13, %c0_14], %16 {strides = array<i32>} : memref<256x128xbf16, #tpu.memory_space<vmem>>, vector<256x128xbf16>,
    } else {
    }
    return
  }
  func.func @transform_0(%arg0: i32, %arg1: i32, %arg2: i32) -> (i32, i32) {
    %c0_i32 = arith.constant 0 : i32
    return %arg0, %arg2 : i32, i32
  }
  func.func @transform_1(%arg0: i32, %arg1: i32, %arg2: i32) -> (i32, i32) {
    %c0_i32 = arith.constant 0 : i32
    return %arg2, %arg1 : i32, i32
  }
  func.func @transform_2(%arg0: i32, %arg1: i32, %arg2: i32) -> (i32, i32) {
    %c0_i32 = arith.constant 0 : i32
    %c0_i32_0 = arith.constant 0 : i32
    return %c0_i32, %arg1 : i32, i32
  }
  func.func @transform_3(%arg0: i32, %arg1: i32, %arg2: i32) -> (i32, i32) {
    %c0_i32 = arith.constant 0 : i32
    return %arg0, %arg1 : i32, i32
  }
}

module attributes {stable_mosaic.version = 11 : i64} {
  func.func @_mm_kernel(%arg0: i32, %arg1: i32, %arg2: i32, %arg3: memref<16x128xbf16, #tpu.memory_space<vmem>>, %arg4: memref<128x256xbf16, #tpu.memory_space<vmem>>, %arg5: memref<1x256xf32, #tpu.memory_space<vmem>>, %arg6: memref<16x256xbf16, #tpu.memory_space<vmem>>, %arg7: memref<16x256xf32, #tpu.memory_space<vmem>>) attributes {dimension_semantics = [#tpu.dimension_semantics<parallel>, #tpu.dimension_semantics<parallel>, #tpu.dimension_semantics<arbitrary>], iteration_bounds = array<i64: 1, 4, 1>, scalar_prefetch = 0 : i64, scratch_operands = 1 : i64, tpu.core_type = #tpu.core_type<tc>, window_params = [{transform_indices = @transform_0, window_bounds = array<i64: 16, 128>}, {transform_indices = @transform_1, window_bounds = array<i64: 128, 256>}, {transform_indices = @transform_2, window_bounds = array<i64: 1, 256>}, {transform_indices = @transform_3, window_bounds = array<i64: 16, 256>}]} {
    %c0_i32 = arith.constant 0 : i32
    %0 = arith.cmpi eq, %arg2, %c0_i32 : i32
    %1 = arith.extui %0 : i1 to i32
    %c0_i32_0 = arith.constant 0 : i32
    %2 = arith.cmpi ne, %1, %c0_i32_0 : i32
    scf.if %2 {
      %cst_10 = arith.constant 0.000000e+00 : f32
      %12 = vector.broadcast %cst_10 : f32 to vector<16x256xf32>
      %c0_11 = arith.constant 0 : index
      %c0_12 = arith.constant 0 : index
      %13 = vector.load %arg7[%c0_11, %c0_12] : memref<16x256xf32, #tpu.memory_space<vmem>>, vector<16x256xf32>
      tpu.vector_store %arg7[%c0_11, %c0_12], %12 {strides = array<i32>} : memref<16x256xf32, #tpu.memory_space<vmem>>, vector<16x256xf32>,
    } else {
    }
    %c0 = arith.constant 0 : index
    %c0_1 = arith.constant 0 : index
    %3 = vector.load %arg7[%c0, %c0_1] : memref<16x256xf32, #tpu.memory_space<vmem>>, vector<16x256xf32>
    %c0_2 = arith.constant 0 : index
    %c0_3 = arith.constant 0 : index
    %4 = vector.load %arg3[%c0_2, %c0_3] : memref<16x128xbf16, #tpu.memory_space<vmem>>, vector<16x128xbf16>
    %c0_4 = arith.constant 0 : index
    %c0_5 = arith.constant 0 : index
    %5 = vector.load %arg4[%c0_4, %c0_5] : memref<128x256xbf16, #tpu.memory_space<vmem>>, vector<128x256xbf16>
    %cst = arith.constant dense<0.000000e+00> : vector<16x256xf32>
    %6 = tpu.matmul %4, %5, %cst {dimension_numbers = #tpu.dot_dimension_numbers<[1], [0], [0], [1], [0, 0, 1, 1], [], []>} : vector<16x128xbf16>, vector<128x256xbf16>, vector<16x256xf32> -> vector<16x256xf32>
    %7 = arith.addf %3, %6 : vector<16x256xf32>
    %c0_6 = arith.constant 0 : index
    %c0_7 = arith.constant 0 : index
    %8 = vector.load %arg7[%c0_6, %c0_7] : memref<16x256xf32, #tpu.memory_space<vmem>>, vector<16x256xf32>
    tpu.vector_store %arg7[%c0_6, %c0_7], %7 {strides = array<i32>} : memref<16x256xf32, #tpu.memory_space<vmem>>, vector<16x256xf32>,
    %c0_i32_8 = arith.constant 0 : i32
    %9 = arith.cmpi eq, %arg2, %c0_i32_8 : i32
    %10 = arith.extui %9 : i1 to i32
    %c0_i32_9 = arith.constant 0 : i32
    %11 = arith.cmpi ne, %10, %c0_i32_9 : i32
    scf.if %11 {
      %c0_10 = arith.constant 0 : index
      %c0_11 = arith.constant 0 : index
      %12 = vector.load %arg7[%c0_10, %c0_11] : memref<16x256xf32, #tpu.memory_space<vmem>>, vector<16x256xf32>
      %c0_12 = arith.constant 0 : index
      %c0_13 = arith.constant 0 : index
      %13 = vector.load %arg5[%c0_12, %c0_13] : memref<1x256xf32, #tpu.memory_space<vmem>>, vector<1x256xf32>
      %14 = vector.broadcast %13 : vector<1x256xf32> to vector<16x256xf32>
      %15 = arith.addf %12, %14 : vector<16x256xf32>
      %16 = arith.truncf %15 : vector<16x256xf32> to vector<16x256xbf16>
      %c0_14 = arith.constant 0 : index
      %c0_15 = arith.constant 0 : index
      %17 = vector.load %arg6[%c0_14, %c0_15] : memref<16x256xbf16, #tpu.memory_space<vmem>>, vector<16x256xbf16>
      tpu.vector_store %arg6[%c0_14, %c0_15], %16 {strides = array<i32>} : memref<16x256xbf16, #tpu.memory_space<vmem>>, vector<16x256xbf16>,
    } else {
    }
    return
  }
  func.func @transform_0(%arg0: i32, %arg1: i32, %arg2: i32) -> (i32, i32) {
    %c0_i32 = arith.constant 0 : i32
    return %arg0, %arg2 : i32, i32
  }
  func.func @transform_1(%arg0: i32, %arg1: i32, %arg2: i32) -> (i32, i32) {
    %c0_i32 = arith.constant 0 : i32
    return %arg2, %arg1 : i32, i32
  }
  func.func @transform_2(%arg0: i32, %arg1: i32, %arg2: i32) -> (i32, i32) {
    %c0_i32 = arith.constant 0 : i32
    %c0_i32_0 = arith.constant 0 : i32
    return %c0_i32, %arg1 : i32, i32
  }
  func.func @transform_3(%arg0: i32, %arg1: i32, %arg2: i32) -> (i32, i32) {
    %c0_i32 = arith.constant 0 : i32
    return %arg0, %arg1 : i32, i32
  }
}

module attributes {stable_mosaic.version = 11 : i64} {
  func.func @_mm_kernel(%arg0: i32, %arg1: i32, %arg2: i32, %arg3: memref<16x256xbf16, #tpu.memory_space<vmem>>, %arg4: memref<256x128xbf16, #tpu.memory_space<vmem>>, %arg5: memref<1x128xf32, #tpu.memory_space<vmem>>, %arg6: memref<16x128xf32, #tpu.memory_space<vmem>>, %arg7: memref<16x128xf32, #tpu.memory_space<vmem>>) attributes {dimension_semantics = [#tpu.dimension_semantics<parallel>, #tpu.dimension_semantics<parallel>, #tpu.dimension_semantics<arbitrary>], iteration_bounds = array<i64: 1, 1, 1>, scalar_prefetch = 0 : i64, scratch_operands = 1 : i64, tpu.core_type = #tpu.core_type<tc>, window_params = [{transform_indices = @transform_0, window_bounds = array<i64: 16, 256>}, {transform_indices = @transform_1, window_bounds = array<i64: 256, 128>}, {transform_indices = @transform_2, window_bounds = array<i64: 1, 128>}, {transform_indices = @transform_3, window_bounds = array<i64: 16, 128>}]} {
    %c0_i32 = arith.constant 0 : i32
    %0 = arith.cmpi eq, %arg2, %c0_i32 : i32
    %1 = arith.extui %0 : i1 to i32
    %c0_i32_0 = arith.constant 0 : i32
    %2 = arith.cmpi ne, %1, %c0_i32_0 : i32
    scf.if %2 {
      %cst_10 = arith.constant 0.000000e+00 : f32
      %12 = vector.broadcast %cst_10 : f32 to vector<16x128xf32>
      %c0_11 = arith.constant 0 : index
      %c0_12 = arith.constant 0 : index
      %13 = vector.load %arg7[%c0_11, %c0_12] : memref<16x128xf32, #tpu.memory_space<vmem>>, vector<16x128xf32>
      tpu.vector_store %arg7[%c0_11, %c0_12], %12 {strides = array<i32>} : memref<16x128xf32, #tpu.memory_space<vmem>>, vector<16x128xf32>,
    } else {
    }
    %c0 = arith.constant 0 : index
    %c0_1 = arith.constant 0 : index
    %3 = vector.load %arg7[%c0, %c0_1] : memref<16x128xf32, #tpu.memory_space<vmem>>, vector<16x128xf32>
    %c0_2 = arith.constant 0 : index
    %c0_3 = arith.constant 0 : index
    %4 = vector.load %arg3[%c0_2, %c0_3] : memref<16x256xbf16, #tpu.memory_space<vmem>>, vector<16x256xbf16>
    %c0_4 = arith.constant 0 : index
    %c0_5 = arith.constant 0 : index
    %5 = vector.load %arg4[%c0_4, %c0_5] : memref<256x128xbf16, #tpu.memory_space<vmem>>, vector<256x128xbf16>
    %cst = arith.constant dense<0.000000e+00> : vector<16x128xf32>
    %6 = tpu.matmul %4, %5, %cst {dimension_numbers = #tpu.dot_dimension_numbers<[1], [0], [0], [1], [0, 0, 1, 1], [], []>} : vector<16x256xbf16>, vector<256x128xbf16>, vector<16x128xf32> -> vector<16x128xf32>
    %7 = arith.addf %3, %6 : vector<16x128xf32>
    %c0_6 = arith.constant 0 : index
    %c0_7 = arith.constant 0 : index
    %8 = vector.load %arg7[%c0_6, %c0_7] : memref<16x128xf32, #tpu.memory_space<vmem>>, vector<16x128xf32>
    tpu.vector_store %arg7[%c0_6, %c0_7], %7 {strides = array<i32>} : memref<16x128xf32, #tpu.memory_space<vmem>>, vector<16x128xf32>,
    %c0_i32_8 = arith.constant 0 : i32
    %9 = arith.cmpi eq, %arg2, %c0_i32_8 : i32
    %10 = arith.extui %9 : i1 to i32
    %c0_i32_9 = arith.constant 0 : i32
    %11 = arith.cmpi ne, %10, %c0_i32_9 : i32
    scf.if %11 {
      %c0_10 = arith.constant 0 : index
      %c0_11 = arith.constant 0 : index
      %12 = vector.load %arg7[%c0_10, %c0_11] : memref<16x128xf32, #tpu.memory_space<vmem>>, vector<16x128xf32>
      %c0_12 = arith.constant 0 : index
      %c0_13 = arith.constant 0 : index
      %13 = vector.load %arg5[%c0_12, %c0_13] : memref<1x128xf32, #tpu.memory_space<vmem>>, vector<1x128xf32>
      %14 = vector.broadcast %13 : vector<1x128xf32> to vector<16x128xf32>
      %15 = arith.addf %12, %14 : vector<16x128xf32>
      %c0_14 = arith.constant 0 : index
      %c0_15 = arith.constant 0 : index
      %16 = vector.load %arg6[%c0_14, %c0_15] : memref<16x128xf32, #tpu.memory_space<vmem>>, vector<16x128xf32>
      tpu.vector_store %arg6[%c0_14, %c0_15], %15 {strides = array<i32>} : memref<16x128xf32, #tpu.memory_space<vmem>>, vector<16x128xf32>,
    } else {
    }
    return
  }
  func.func @transform_0(%arg0: i32, %arg1: i32, %arg2: i32) -> (i32, i32) {
    %c0_i32 = arith.constant 0 : i32
    return %arg0, %arg2 : i32, i32
  }
  func.func @transform_1(%arg0: i32, %arg1: i32, %arg2: i32) -> (i32, i32) {
    %c0_i32 = arith.constant 0 : i32
    return %arg2, %arg1 : i32, i32
  }
  func.func @transform_2(%arg0: i32, %arg1: i32, %arg2: i32) -> (i32, i32) {
    %c0_i32 = arith.constant 0 : i32
    %c0_i32_0 = arith.constant 0 : i32
    return %c0_i32, %arg1 : i32, i32
  }
  func.func @transform_3(%arg0: i32, %arg1: i32, %arg2: i32) -> (i32, i32) {
    %c0_i32 = arith.constant 0 : i32
    return %arg0, %arg1 : i32, i32
  }
}

module attributes {stable_mosaic.version = 11 : i64} {
  func.func @_mm_kernel(%arg0: i32, %arg1: i32, %arg2: i32, %arg3: memref<16x128xbf16, #tpu.memory_space<vmem>>, %arg4: memref<128x128xbf16, #tpu.memory_space<vmem>>, %arg5: memref<1x128xf32, #tpu.memory_space<vmem>>, %arg6: memref<16x128xf32, #tpu.memory_space<vmem>>, %arg7: memref<16x128xf32, #tpu.memory_space<vmem>>) attributes {dimension_semantics = [#tpu.dimension_semantics<parallel>, #tpu.dimension_semantics<parallel>, #tpu.dimension_semantics<arbitrary>], iteration_bounds = array<i64: 1, 1, 1>, scalar_prefetch = 0 : i64, scratch_operands = 1 : i64, tpu.core_type = #tpu.core_type<tc>, window_params = [{transform_indices = @transform_0, window_bounds = array<i64: 16, 128>}, {transform_indices = @transform_1, window_bounds = array<i64: 128, 128>}, {transform_indices = @transform_2, window_bounds = array<i64: 1, 128>}, {transform_indices = @transform_3, window_bounds = array<i64: 16, 128>}]} {
    %c0_i32 = arith.constant 0 : i32
    %0 = arith.cmpi eq, %arg2, %c0_i32 : i32
    %1 = arith.extui %0 : i1 to i32
    %c0_i32_0 = arith.constant 0 : i32
    %2 = arith.cmpi ne, %1, %c0_i32_0 : i32
    scf.if %2 {
      %cst_10 = arith.constant 0.000000e+00 : f32
      %12 = vector.broadcast %cst_10 : f32 to vector<16x128xf32>
      %c0_11 = arith.constant 0 : index
      %c0_12 = arith.constant 0 : index
      %13 = vector.load %arg7[%c0_11, %c0_12] : memref<16x128xf32, #tpu.memory_space<vmem>>, vector<16x128xf32>
      tpu.vector_store %arg7[%c0_11, %c0_12], %12 {strides = array<i32>} : memref<16x128xf32, #tpu.memory_space<vmem>>, vector<16x128xf32>,
    } else {
    }
    %c0 = arith.constant 0 : index
    %c0_1 = arith.constant 0 : index
    %3 = vector.load %arg7[%c0, %c0_1] : memref<16x128xf32, #tpu.memory_space<vmem>>, vector<16x128xf32>
    %c0_2 = arith.constant 0 : index
    %c0_3 = arith.constant 0 : index
    %4 = vector.load %arg3[%c0_2, %c0_3] : memref<16x128xbf16, #tpu.memory_space<vmem>>, vector<16x128xbf16>
    %c0_4 = arith.constant 0 : index
    %c0_5 = arith.constant 0 : index
    %5 = vector.load %arg4[%c0_4, %c0_5] : memref<128x128xbf16, #tpu.memory_space<vmem>>, vector<128x128xbf16>
    %cst = arith.constant dense<0.000000e+00> : vector<16x128xf32>
    %6 = tpu.matmul %4, %5, %cst {dimension_numbers = #tpu.dot_dimension_numbers<[1], [0], [0], [1], [0, 0, 1, 1], [], []>} : vector<16x128xbf16>, vector<128x128xbf16>, vector<16x128xf32> -> vector<16x128xf32>
    %7 = arith.addf %3, %6 : vector<16x128xf32>
    %c0_6 = arith.constant 0 : index
    %c0_7 = arith.constant 0 : index
    %8 = vector.load %arg7[%c0_6, %c0_7] : memref<16x128xf32, #tpu.memory_space<vmem>>, vector<16x128xf32>
    tpu.vector_store %arg7[%c0_6, %c0_7], %7 {strides = array<i32>} : memref<16x128xf32, #tpu.memory_space<vmem>>, vector<16x128xf32>,
    %c0_i32_8 = arith.constant 0 : i32
    %9 = arith.cmpi eq, %arg2, %c0_i32_8 : i32
    %10 = arith.extui %9 : i1 to i32
    %c0_i32_9 = arith.constant 0 : i32
    %11 = arith.cmpi ne, %10, %c0_i32_9 : i32
    scf.if %11 {
      %c0_10 = arith.constant 0 : index
      %c0_11 = arith.constant 0 : index
      %12 = vector.load %arg7[%c0_10, %c0_11] : memref<16x128xf32, #tpu.memory_space<vmem>>, vector<16x128xf32>
      %c0_12 = arith.constant 0 : index
      %c0_13 = arith.constant 0 : index
      %13 = vector.load %arg5[%c0_12, %c0_13] : memref<1x128xf32, #tpu.memory_space<vmem>>, vector<1x128xf32>
      %14 = vector.broadcast %13 : vector<1x128xf32> to vector<16x128xf32>
      %15 = arith.addf %12, %14 : vector<16x128xf32>
      %c0_14 = arith.constant 0 : index
      %c0_15 = arith.constant 0 : index
      %16 = vector.load %arg6[%c0_14, %c0_15] : memref<16x128xf32, #tpu.memory_space<vmem>>, vector<16x128xf32>
      tpu.vector_store %arg6[%c0_14, %c0_15], %15 {strides = array<i32>} : memref<16x128xf32, #tpu.memory_space<vmem>>, vector<16x128xf32>,
    } else {
    }
    return
  }
  func.func @transform_0(%arg0: i32, %arg1: i32, %arg2: i32) -> (i32, i32) {
    %c0_i32 = arith.constant 0 : i32
    return %arg0, %arg2 : i32, i32
  }
  func.func @transform_1(%arg0: i32, %arg1: i32, %arg2: i32) -> (i32, i32) {
    %c0_i32 = arith.constant 0 : i32
    return %arg2, %arg1 : i32, i32
  }
  func.func @transform_2(%arg0: i32, %arg1: i32, %arg2: i32) -> (i32, i32) {
    %c0_i32 = arith.constant 0 : i32
    %c0_i32_0 = arith.constant 0 : i32
    return %c0_i32, %arg1 : i32, i32
  }
  func.func @transform_3(%arg0: i32, %arg1: i32, %arg2: i32) -> (i32, i32) {
    %c0_i32 = arith.constant 0 : i32
    return %arg0, %arg1 : i32, i32
  }
}

module attributes {stable_mosaic.version = 11 : i64} {
  func.func @_mm_kernel(%arg0: i32, %arg1: i32, %arg2: i32, %arg3: memref<64x128xbf16, #tpu.memory_space<vmem>>, %arg4: memref<128x128xbf16, #tpu.memory_space<vmem>>, %arg5: memref<1x128xf32, #tpu.memory_space<vmem>>, %arg6: memref<64x128xbf16, #tpu.memory_space<vmem>>, %arg7: memref<64x128xf32, #tpu.memory_space<vmem>>) attributes {dimension_semantics = [#tpu.dimension_semantics<parallel>, #tpu.dimension_semantics<parallel>, #tpu.dimension_semantics<arbitrary>], iteration_bounds = array<i64: 2, 1, 1>, scalar_prefetch = 0 : i64, scratch_operands = 1 : i64, tpu.core_type = #tpu.core_type<tc>, window_params = [{transform_indices = @transform_0, window_bounds = array<i64: 64, 128>}, {transform_indices = @transform_1, window_bounds = array<i64: 128, 128>}, {transform_indices = @transform_2, window_bounds = array<i64: 1, 128>}, {transform_indices = @transform_3, window_bounds = array<i64: 64, 128>}]} {
    %c0_i32 = arith.constant 0 : i32
    %0 = arith.cmpi eq, %arg2, %c0_i32 : i32
    %1 = arith.extui %0 : i1 to i32
    %c0_i32_0 = arith.constant 0 : i32
    %2 = arith.cmpi ne, %1, %c0_i32_0 : i32
    scf.if %2 {
      %cst_10 = arith.constant 0.000000e+00 : f32
      %12 = vector.broadcast %cst_10 : f32 to vector<64x128xf32>
      %c0_11 = arith.constant 0 : index
      %c0_12 = arith.constant 0 : index
      %13 = vector.load %arg7[%c0_11, %c0_12] : memref<64x128xf32, #tpu.memory_space<vmem>>, vector<64x128xf32>
      tpu.vector_store %arg7[%c0_11, %c0_12], %12 {strides = array<i32>} : memref<64x128xf32, #tpu.memory_space<vmem>>, vector<64x128xf32>,
    } else {
    }
    %c0 = arith.constant 0 : index
    %c0_1 = arith.constant 0 : index
    %3 = vector.load %arg7[%c0, %c0_1] : memref<64x128xf32, #tpu.memory_space<vmem>>, vector<64x128xf32>
    %c0_2 = arith.constant 0 : index
    %c0_3 = arith.constant 0 : index
    %4 = vector.load %arg3[%c0_2, %c0_3] : memref<64x128xbf16, #tpu.memory_space<vmem>>, vector<64x128xbf16>
    %c0_4 = arith.constant 0 : index
    %c0_5 = arith.constant 0 : index
    %5 = vector.load %arg4[%c0_4, %c0_5] : memref<128x128xbf16, #tpu.memory_space<vmem>>, vector<128x128xbf16>
    %cst = arith.constant dense<0.000000e+00> : vector<64x128xf32>
    %6 = tpu.matmul %4, %5, %cst {dimension_numbers = #tpu.dot_dimension_numbers<[1], [0], [0], [1], [0, 0, 1, 1], [], []>} : vector<64x128xbf16>, vector<128x128xbf16>, vector<64x128xf32> -> vector<64x128xf32>
    %7 = arith.addf %3, %6 : vector<64x128xf32>
    %c0_6 = arith.constant 0 : index
    %c0_7 = arith.constant 0 : index
    %8 = vector.load %arg7[%c0_6, %c0_7] : memref<64x128xf32, #tpu.memory_space<vmem>>, vector<64x128xf32>
    tpu.vector_store %arg7[%c0_6, %c0_7], %7 {strides = array<i32>} : memref<64x128xf32, #tpu.memory_space<vmem>>, vector<64x128xf32>,
    %c0_i32_8 = arith.constant 0 : i32
    %9 = arith.cmpi eq, %arg2, %c0_i32_8 : i32
    %10 = arith.extui %9 : i1 to i32
    %c0_i32_9 = arith.constant 0 : i32
    %11 = arith.cmpi ne, %10, %c0_i32_9 : i32
    scf.if %11 {
      %c0_10 = arith.constant 0 : index
      %c0_11 = arith.constant 0 : index
      %12 = vector.load %arg7[%c0_10, %c0_11] : memref<64x128xf32, #tpu.memory_space<vmem>>, vector<64x128xf32>
      %c0_12 = arith.constant 0 : index
      %c0_13 = arith.constant 0 : index
      %13 = vector.load %arg5[%c0_12, %c0_13] : memref<1x128xf32, #tpu.memory_space<vmem>>, vector<1x128xf32>
      %14 = vector.broadcast %13 : vector<1x128xf32> to vector<64x128xf32>
      %15 = arith.addf %12, %14 : vector<64x128xf32>
      %16 = arith.truncf %15 : vector<64x128xf32> to vector<64x128xbf16>
      %c0_14 = arith.constant 0 : index
      %c0_15 = arith.constant 0 : index
      %17 = vector.load %arg6[%c0_14, %c0_15] : memref<64x128xbf16, #tpu.memory_space<vmem>>, vector<64x128xbf16>
      tpu.vector_store %arg6[%c0_14, %c0_15], %16 {strides = array<i32>} : memref<64x128xbf16, #tpu.memory_space<vmem>>, vector<64x128xbf16>,
    } else {
    }
    return
  }
  func.func @transform_0(%arg0: i32, %arg1: i32, %arg2: i32) -> (i32, i32) {
    %c0_i32 = arith.constant 0 : i32
    return %arg0, %arg2 : i32, i32
  }
  func.func @transform_1(%arg0: i32, %arg1: i32, %arg2: i32) -> (i32, i32) {
    %c0_i32 = arith.constant 0 : i32
    return %arg2, %arg1 : i32, i32
  }
  func.func @transform_2(%arg0: i32, %arg1: i32, %arg2: i32) -> (i32, i32) {
    %c0_i32 = arith.constant 0 : i32
    %c0_i32_0 = arith.constant 0 : i32
    return %c0_i32, %arg1 : i32, i32
  }
  func.func @transform_3(%arg0: i32, %arg1: i32, %arg2: i32) -> (i32, i32) {
    %c0_i32 = arith.constant 0 : i32
    return %arg0, %arg1 : i32, i32
  }
}

module attributes {stable_mosaic.version = 11 : i64} {
  func.func @_mm_kernel(%arg0: i32, %arg1: i32, %arg2: i32, %arg3: memref<256x128xbf16, #tpu.memory_space<vmem>>, %arg4: memref<128x128xbf16, #tpu.memory_space<vmem>>, %arg5: memref<1x128xf32, #tpu.memory_space<vmem>>, %arg6: memref<256x128xbf16, #tpu.memory_space<vmem>>, %arg7: memref<256x128xf32, #tpu.memory_space<vmem>>) attributes {dimension_semantics = [#tpu.dimension_semantics<parallel>, #tpu.dimension_semantics<parallel>, #tpu.dimension_semantics<arbitrary>], iteration_bounds = array<i64: 2, 1, 1>, scalar_prefetch = 0 : i64, scratch_operands = 1 : i64, tpu.core_type = #tpu.core_type<tc>, window_params = [{transform_indices = @transform_0, window_bounds = array<i64: 256, 128>}, {transform_indices = @transform_1, window_bounds = array<i64: 128, 128>}, {transform_indices = @transform_2, window_bounds = array<i64: 1, 128>}, {transform_indices = @transform_3, window_bounds = array<i64: 256, 128>}]} {
    %c0_i32 = arith.constant 0 : i32
    %0 = arith.cmpi eq, %arg2, %c0_i32 : i32
    %1 = arith.extui %0 : i1 to i32
    %c0_i32_0 = arith.constant 0 : i32
    %2 = arith.cmpi ne, %1, %c0_i32_0 : i32
    scf.if %2 {
      %cst_10 = arith.constant 0.000000e+00 : f32
      %12 = vector.broadcast %cst_10 : f32 to vector<256x128xf32>
      %c0_11 = arith.constant 0 : index
      %c0_12 = arith.constant 0 : index
      %13 = vector.load %arg7[%c0_11, %c0_12] : memref<256x128xf32, #tpu.memory_space<vmem>>, vector<256x128xf32>
      tpu.vector_store %arg7[%c0_11, %c0_12], %12 {strides = array<i32>} : memref<256x128xf32, #tpu.memory_space<vmem>>, vector<256x128xf32>,
    } else {
    }
    %c0 = arith.constant 0 : index
    %c0_1 = arith.constant 0 : index
    %3 = vector.load %arg7[%c0, %c0_1] : memref<256x128xf32, #tpu.memory_space<vmem>>, vector<256x128xf32>
    %c0_2 = arith.constant 0 : index
    %c0_3 = arith.constant 0 : index
    %4 = vector.load %arg3[%c0_2, %c0_3] : memref<256x128xbf16, #tpu.memory_space<vmem>>, vector<256x128xbf16>
    %c0_4 = arith.constant 0 : index
    %c0_5 = arith.constant 0 : index
    %5 = vector.load %arg4[%c0_4, %c0_5] : memref<128x128xbf16, #tpu.memory_space<vmem>>, vector<128x128xbf16>
    %cst = arith.constant dense<0.000000e+00> : vector<256x128xf32>
    %6 = tpu.matmul %4, %5, %cst {dimension_numbers = #tpu.dot_dimension_numbers<[1], [0], [0], [1], [0, 0, 1, 1], [], []>} : vector<256x128xbf16>, vector<128x128xbf16>, vector<256x128xf32> -> vector<256x128xf32>
    %7 = arith.addf %3, %6 : vector<256x128xf32>
    %c0_6 = arith.constant 0 : index
    %c0_7 = arith.constant 0 : index
    %8 = vector.load %arg7[%c0_6, %c0_7] : memref<256x128xf32, #tpu.memory_space<vmem>>, vector<256x128xf32>
    tpu.vector_store %arg7[%c0_6, %c0_7], %7 {strides = array<i32>} : memref<256x128xf32, #tpu.memory_space<vmem>>, vector<256x128xf32>,
    %c0_i32_8 = arith.constant 0 : i32
    %9 = arith.cmpi eq, %arg2, %c0_i32_8 : i32
    %10 = arith.extui %9 : i1 to i32
    %c0_i32_9 = arith.constant 0 : i32
    %11 = arith.cmpi ne, %10, %c0_i32_9 : i32
    scf.if %11 {
      %c0_10 = arith.constant 0 : index
      %c0_11 = arith.constant 0 : index
      %12 = vector.load %arg7[%c0_10, %c0_11] : memref<256x128xf32, #tpu.memory_space<vmem>>, vector<256x128xf32>
      %c0_12 = arith.constant 0 : index
      %c0_13 = arith.constant 0 : index
      %13 = vector.load %arg5[%c0_12, %c0_13] : memref<1x128xf32, #tpu.memory_space<vmem>>, vector<1x128xf32>
      %14 = vector.broadcast %13 : vector<1x128xf32> to vector<256x128xf32>
      %15 = arith.addf %12, %14 : vector<256x128xf32>
      %16 = arith.truncf %15 : vector<256x128xf32> to vector<256x128xbf16>
      %c0_14 = arith.constant 0 : index
      %c0_15 = arith.constant 0 : index
      %17 = vector.load %arg6[%c0_14, %c0_15] : memref<256x128xbf16, #tpu.memory_space<vmem>>, vector<256x128xbf16>
      tpu.vector_store %arg6[%c0_14, %c0_15], %16 {strides = array<i32>} : memref<256x128xbf16, #tpu.memory_space<vmem>>, vector<256x128xbf16>,
    } else {
    }
    return
  }
  func.func @transform_0(%arg0: i32, %arg1: i32, %arg2: i32) -> (i32, i32) {
    %c0_i32 = arith.constant 0 : i32
    return %arg0, %arg2 : i32, i32
  }
  func.func @transform_1(%arg0: i32, %arg1: i32, %arg2: i32) -> (i32, i32) {
    %c0_i32 = arith.constant 0 : i32
    return %arg2, %arg1 : i32, i32
  }
  func.func @transform_2(%arg0: i32, %arg1: i32, %arg2: i32) -> (i32, i32) {
    %c0_i32 = arith.constant 0 : i32
    %c0_i32_0 = arith.constant 0 : i32
    return %c0_i32, %arg1 : i32, i32
  }
  func.func @transform_3(%arg0: i32, %arg1: i32, %arg2: i32) -> (i32, i32) {
    %c0_i32 = arith.constant 0 : i32
    return %arg0, %arg1 : i32, i32
  }
}

module attributes {stable_mosaic.version = 11 : i64} {
  func.func @_mm_kernel(%arg0: i32, %arg1: i32, %arg2: i32, %arg3: memref<512x128xbf16, #tpu.memory_space<vmem>>, %arg4: memref<128x128xbf16, #tpu.memory_space<vmem>>, %arg5: memref<1x128xf32, #tpu.memory_space<vmem>>, %arg6: memref<512x128xbf16, #tpu.memory_space<vmem>>, %arg7: memref<512x128xf32, #tpu.memory_space<vmem>>) attributes {dimension_semantics = [#tpu.dimension_semantics<parallel>, #tpu.dimension_semantics<parallel>, #tpu.dimension_semantics<arbitrary>], iteration_bounds = array<i64: 4, 1, 5>, scalar_prefetch = 0 : i64, scratch_operands = 1 : i64, tpu.core_type = #tpu.core_type<tc>, window_params = [{transform_indices = @transform_0, window_bounds = array<i64: 512, 128>}, {transform_indices = @transform_1, window_bounds = array<i64: 128, 128>}, {transform_indices = @transform_2, window_bounds = array<i64: 1, 128>}, {transform_indices = @transform_3, window_bounds = array<i64: 512, 128>}]} {
    %c0_i32 = arith.constant 0 : i32
    %0 = arith.cmpi eq, %arg2, %c0_i32 : i32
    %1 = arith.extui %0 : i1 to i32
    %c0_i32_0 = arith.constant 0 : i32
    %2 = arith.cmpi ne, %1, %c0_i32_0 : i32
    scf.if %2 {
      %cst_9 = arith.constant 0.000000e+00 : f32
      %12 = vector.broadcast %cst_9 : f32 to vector<512x128xf32>
      %c0_10 = arith.constant 0 : index
      %c0_11 = arith.constant 0 : index
      %13 = vector.load %arg7[%c0_10, %c0_11] : memref<512x128xf32, #tpu.memory_space<vmem>>, vector<512x128xf32>
      tpu.vector_store %arg7[%c0_10, %c0_11], %12 {strides = array<i32>} : memref<512x128xf32, #tpu.memory_space<vmem>>, vector<512x128xf32>,
    } else {
    }
    %c0 = arith.constant 0 : index
    %c0_1 = arith.constant 0 : index
    %3 = vector.load %arg7[%c0, %c0_1] : memref<512x128xf32, #tpu.memory_space<vmem>>, vector<512x128xf32>
    %c0_2 = arith.constant 0 : index
    %c0_3 = arith.constant 0 : index
    %4 = vector.load %arg3[%c0_2, %c0_3] : memref<512x128xbf16, #tpu.memory_space<vmem>>, vector<512x128xbf16>
    %c0_4 = arith.constant 0 : index
    %c0_5 = arith.constant 0 : index
    %5 = vector.load %arg4[%c0_4, %c0_5] : memref<128x128xbf16, #tpu.memory_space<vmem>>, vector<128x128xbf16>
    %cst = arith.constant dense<0.000000e+00> : vector<512x128xf32>
    %6 = tpu.matmul %4, %5, %cst {dimension_numbers = #tpu.dot_dimension_numbers<[1], [0], [0], [1], [0, 0, 1, 1], [], []>} : vector<512x128xbf16>, vector<128x128xbf16>, vector<512x128xf32> -> vector<512x128xf32>
    %7 = arith.addf %3, %6 : vector<512x128xf32>
    %c0_6 = arith.constant 0 : index
    %c0_7 = arith.constant 0 : index
    %8 = vector.load %arg7[%c0_6, %c0_7] : memref<512x128xf32, #tpu.memory_space<vmem>>, vector<512x128xf32>
    tpu.vector_store %arg7[%c0_6, %c0_7], %7 {strides = array<i32>} : memref<512x128xf32, #tpu.memory_space<vmem>>, vector<512x128xf32>,
    %c4_i32 = arith.constant 4 : i32
    %9 = arith.cmpi eq, %arg2, %c4_i32 : i32
    %10 = arith.extui %9 : i1 to i32
    %c0_i32_8 = arith.constant 0 : i32
    %11 = arith.cmpi ne, %10, %c0_i32_8 : i32
    scf.if %11 {
      %c0_9 = arith.constant 0 : index
      %c0_10 = arith.constant 0 : index
      %12 = vector.load %arg7[%c0_9, %c0_10] : memref<512x128xf32, #tpu.memory_space<vmem>>, vector<512x128xf32>
      %c0_11 = arith.constant 0 : index
      %c0_12 = arith.constant 0 : index
      %13 = vector.load %arg5[%c0_11, %c0_12] : memref<1x128xf32, #tpu.memory_space<vmem>>, vector<1x128xf32>
      %14 = vector.broadcast %13 : vector<1x128xf32> to vector<512x128xf32>
      %15 = arith.addf %12, %14 : vector<512x128xf32>
      %16 = arith.truncf %15 : vector<512x128xf32> to vector<512x128xbf16>
      %c0_13 = arith.constant 0 : index
      %c0_14 = arith.constant 0 : index
      %17 = vector.load %arg6[%c0_13, %c0_14] : memref<512x128xbf16, #tpu.memory_space<vmem>>, vector<512x128xbf16>
      tpu.vector_store %arg6[%c0_13, %c0_14], %16 {strides = array<i32>} : memref<512x128xbf16, #tpu.memory_space<vmem>>, vector<512x128xbf16>,
    } else {
    }
    return
  }
  func.func @transform_0(%arg0: i32, %arg1: i32, %arg2: i32) -> (i32, i32) {
    %c0_i32 = arith.constant 0 : i32
    return %arg0, %arg2 : i32, i32
  }
  func.func @transform_1(%arg0: i32, %arg1: i32, %arg2: i32) -> (i32, i32) {
    %c0_i32 = arith.constant 0 : i32
    return %arg2, %arg1 : i32, i32
  }
  func.func @transform_2(%arg0: i32, %arg1: i32, %arg2: i32) -> (i32, i32) {
    %c0_i32 = arith.constant 0 : i32
    %c0_i32_0 = arith.constant 0 : i32
    return %c0_i32, %arg1 : i32, i32
  }
  func.func @transform_3(%arg0: i32, %arg1: i32, %arg2: i32) -> (i32, i32) {
    %c0_i32 = arith.constant 0 : i32
    return %arg0, %arg1 : i32, i32
  }
}

module attributes {stable_mosaic.version = 11 : i64} {
  func.func @_mm_kernel(%arg0: i32, %arg1: i32, %arg2: i32, %arg3: memref<512x384xbf16, #tpu.memory_space<vmem>>, %arg4: memref<384x128xbf16, #tpu.memory_space<vmem>>, %arg5: memref<1x128xf32, #tpu.memory_space<vmem>>, %arg6: memref<512x128xf32, #tpu.memory_space<vmem>>, %arg7: memref<512x128xf32, #tpu.memory_space<vmem>>) attributes {dimension_semantics = [#tpu.dimension_semantics<parallel>, #tpu.dimension_semantics<parallel>, #tpu.dimension_semantics<arbitrary>], iteration_bounds = array<i64: 4, 1, 1>, scalar_prefetch = 0 : i64, scratch_operands = 1 : i64, tpu.core_type = #tpu.core_type<tc>, window_params = [{transform_indices = @transform_0, window_bounds = array<i64: 512, 384>}, {transform_indices = @transform_1, window_bounds = array<i64: 384, 128>}, {transform_indices = @transform_2, window_bounds = array<i64: 1, 128>}, {transform_indices = @transform_3, window_bounds = array<i64: 512, 128>}]} {
    %c0_i32 = arith.constant 0 : i32
    %0 = arith.cmpi eq, %arg2, %c0_i32 : i32
    %1 = arith.extui %0 : i1 to i32
    %c0_i32_0 = arith.constant 0 : i32
    %2 = arith.cmpi ne, %1, %c0_i32_0 : i32
    scf.if %2 {
      %cst_10 = arith.constant 0.000000e+00 : f32
      %12 = vector.broadcast %cst_10 : f32 to vector<512x128xf32>
      %c0_11 = arith.constant 0 : index
      %c0_12 = arith.constant 0 : index
      %13 = vector.load %arg7[%c0_11, %c0_12] : memref<512x128xf32, #tpu.memory_space<vmem>>, vector<512x128xf32>
      tpu.vector_store %arg7[%c0_11, %c0_12], %12 {strides = array<i32>} : memref<512x128xf32, #tpu.memory_space<vmem>>, vector<512x128xf32>,
    } else {
    }
    %c0 = arith.constant 0 : index
    %c0_1 = arith.constant 0 : index
    %3 = vector.load %arg7[%c0, %c0_1] : memref<512x128xf32, #tpu.memory_space<vmem>>, vector<512x128xf32>
    %c0_2 = arith.constant 0 : index
    %c0_3 = arith.constant 0 : index
    %4 = vector.load %arg3[%c0_2, %c0_3] : memref<512x384xbf16, #tpu.memory_space<vmem>>, vector<512x384xbf16>
    %c0_4 = arith.constant 0 : index
    %c0_5 = arith.constant 0 : index
    %5 = vector.load %arg4[%c0_4, %c0_5] : memref<384x128xbf16, #tpu.memory_space<vmem>>, vector<384x128xbf16>
    %cst = arith.constant dense<0.000000e+00> : vector<512x128xf32>
    %6 = tpu.matmul %4, %5, %cst {dimension_numbers = #tpu.dot_dimension_numbers<[1], [0], [0], [1], [0, 0, 1, 1], [], []>} : vector<512x384xbf16>, vector<384x128xbf16>, vector<512x128xf32> -> vector<512x128xf32>
    %7 = arith.addf %3, %6 : vector<512x128xf32>
    %c0_6 = arith.constant 0 : index
    %c0_7 = arith.constant 0 : index
    %8 = vector.load %arg7[%c0_6, %c0_7] : memref<512x128xf32, #tpu.memory_space<vmem>>, vector<512x128xf32>
    tpu.vector_store %arg7[%c0_6, %c0_7], %7 {strides = array<i32>} : memref<512x128xf32, #tpu.memory_space<vmem>>, vector<512x128xf32>,
    %c0_i32_8 = arith.constant 0 : i32
    %9 = arith.cmpi eq, %arg2, %c0_i32_8 : i32
    %10 = arith.extui %9 : i1 to i32
    %c0_i32_9 = arith.constant 0 : i32
    %11 = arith.cmpi ne, %10, %c0_i32_9 : i32
    scf.if %11 {
      %c0_10 = arith.constant 0 : index
      %c0_11 = arith.constant 0 : index
      %12 = vector.load %arg7[%c0_10, %c0_11] : memref<512x128xf32, #tpu.memory_space<vmem>>, vector<512x128xf32>
      %c0_12 = arith.constant 0 : index
      %c0_13 = arith.constant 0 : index
      %13 = vector.load %arg5[%c0_12, %c0_13] : memref<1x128xf32, #tpu.memory_space<vmem>>, vector<1x128xf32>
      %14 = vector.broadcast %13 : vector<1x128xf32> to vector<512x128xf32>
      %15 = arith.addf %12, %14 : vector<512x128xf32>
      %c0_14 = arith.constant 0 : index
      %c0_15 = arith.constant 0 : index
      %16 = vector.load %arg6[%c0_14, %c0_15] : memref<512x128xf32, #tpu.memory_space<vmem>>, vector<512x128xf32>
      tpu.vector_store %arg6[%c0_14, %c0_15], %15 {strides = array<i32>} : memref<512x128xf32, #tpu.memory_space<vmem>>, vector<512x128xf32>,
    } else {
    }
    return
  }
  func.func @transform_0(%arg0: i32, %arg1: i32, %arg2: i32) -> (i32, i32) {
    %c0_i32 = arith.constant 0 : i32
    return %arg0, %arg2 : i32, i32
  }
  func.func @transform_1(%arg0: i32, %arg1: i32, %arg2: i32) -> (i32, i32) {
    %c0_i32 = arith.constant 0 : i32
    return %arg2, %arg1 : i32, i32
  }
  func.func @transform_2(%arg0: i32, %arg1: i32, %arg2: i32) -> (i32, i32) {
    %c0_i32 = arith.constant 0 : i32
    %c0_i32_0 = arith.constant 0 : i32
    return %c0_i32, %arg1 : i32, i32
  }
  func.func @transform_3(%arg0: i32, %arg1: i32, %arg2: i32) -> (i32, i32) {
    %c0_i32 = arith.constant 0 : i32
    return %arg0, %arg1 : i32, i32
  }
}

</mosaic_0001>

<bundles_post_ra>
// kernel: _lambda_.27
= control target key start
LH: loop header
LB: loop body
LE: loop exit
PB: predicated region body
PF: predicated region fallthrough
CT: control target
= control target key end

     0   :  { %s2315_s12 = smov 0   ;;  %s2317_s13 = smov 0   ;;  %s2516_s0 = inlined_call_operand.vmem [shape: bf16[2048,128], index: 0, kind: input, shape index: {}]   ;;  %s2517_s1 = inlined_call_operand.vmem [shape: bf16[128,128], index: 1, kind: input, shape index: {}]   ;;  %s2518_s2 = inlined_call_operand.vmem [shape: f32[1,128], index: 2, kind: input, shape index: {}]   ;;  %s2519_s3 = inlined_call_operand.vmem [shape: bf16[2048,128], index: 3, kind: output, shape index: {}]  }
   0x1   :  { %s2319_s14 = smov 0  }
   0x2 LB: > { %s32_s15 = sadd.s32 1, %s2289_s13  ;;  %p1704_p0 = scmp.ge.s32.totalorder %s2293_s14, 1  ;;  %s2293_s14 = sphi %s2319_s14, %s13_s14   ;;  %s2289_s13 = sphi %s2317_s13, %s2521_s13   ;;  %s2285_s12 = sphi %s2315_s12, %s2520_s12  }
   0x3   : > { %p34_p1 = scmp.ge.s32.totalorder %s32_s15, 4  ;;  %p188_p2 = scmp.lt.s32.totalorder %s2293_s14, 5 }
   0x5   : > { %s2523_s15 = smov (%p34_p1, %s32_s15), 0  ;;  %p189_p3 = pnand %p1704_p0, %p188_p2 }
   0x6   : > { %v2231_v0 = vld [vmem:[%s2517_s1] sm:$0xff] (!%p189_p3)   ;;  %s1705_s18 = sshll.u32 (!%p189_p3), %s2285_s12, 6  ;;  %v2232_v1 = vld [vmem:[%s2517_s1 + $0x8] sm:$0xff] (!%p189_p3)   ;;  %v2233_v2 = vld [vmem:[%s2517_s1 + $0x10] sm:$0xff] (!%p189_p3)  }
   0x7   : > { %192 = sbr.rel (%p189_p3) target bundleno = 315 (0x13b), region = 32  ;;  %p230_p4 = scmp.lt.s32.totalorder (!%p189_p3), %s1705_s18, 255  ;;  %2111 = vmatprep.subr.bf16.mxu0 (!%p189_p3), %v2231_v0  ;;  %2191 = vmatprep.subr.bf16.mxu1 (!%p189_p3), %v2231_v0  ;;  %v2234_v3 = vld [vmem:[%s2517_s1 + $0x18] sm:$0xff] (!%p189_p3)   ;;  %v2235_v6 = vld [vmem:[%s2517_s1 + $0x20] sm:$0xff] (!%p189_p3)   ;;  %v2236_v7 = vld [vmem:[%s2517_s1 + $0x28] sm:$0xff] (!%p189_p3)  }
   0x8   : > { %2112 = vmatpush3.bf16.msra.mxu0 (!%p189_p3), %v2231_v0  ;;  %2199 = vmatpush3.bf16.msra.mxu1 (!%p189_p3), %v2231_v0  ;;  %v2237_v8 = vld [vmem:[%s2517_s1 + $0x30] sm:$0xff] (!%p189_p3)   ;;  %v2238_v9 = vld [vmem:[%s2517_s1 + $0x38] sm:$0xff] (!%p189_p3)   ;;  %v2402_v41 = vld [vmem:[%s2518_s2] ss:$0 sm:$0xff] (!%p189_p3) }
   0x9   : > { %2113 = vmatprep.subr.bf16.mxu0 (!%p189_p3), %v2232_v1  ;;  %2192 = vmatprep.subr.bf16.mxu1 (!%p189_p3), %v2232_v1 }
   0xc   : > { %2114 = vmatpush3.bf16.msra.mxu0 (!%p189_p3), %v2232_v1  ;;  %2200 = vmatpush3.bf16.msra.mxu1 (!%p189_p3), %v2232_v1 }
   0xd   : > { %2115 = vmatprep.subr.bf16.mxu0 (!%p189_p3), %v2233_v2  ;;  %2193 = vmatprep.subr.bf16.mxu1 (!%p189_p3), %v2233_v2 }
   0xe   : > { %s2525_s18 = smov (!%p230_p4, %s1705_s18), 255 }
   0xf   : > { %s1706_s23 = sshll.u32 %s2525_s18, 2 }
  0x10   : > { %s2350_s26 = scalar_lea.vmem %s2516_s0, %s1706_s23  ;;  %2116 = vmatpush3.bf16.msra.mxu0 %v2233_v2  ;;  %2201 = vmatpush3.bf16.msra.mxu1 %v2233_v2  ;;  %s2415_s17 = scalar_lea.vmem %s2519_s3, %s1706_s23 }
  0x11   : > { %v2239_v4 = vld [vmem:[%s2350_s26] sm:$0xff]   ;;  %2117 = vmatprep.subr.bf16.mxu0 %v2234_v3  ;;  %2194 = vmatprep.subr.bf16.mxu1 %v2234_v3  ;;  %v2241_v10 = vld [vmem:[%s2350_s26 + $0x8] sm:$0xff]   ;;  %v2243_v12 = vld [vmem:[%s2350_s26 + $0x10] sm:$0xff]  }
  0x12   : > { %v2240_v5 = vld [vmem:[%s2350_s26 + $0x80] sm:$0xff]   ;;  %2127 = vmatprep.mubr.bf16.mxu0 %v2239_v4  ;;  %v2242_v11 = vld [vmem:[%s2350_s26 + $0x88] sm:$0xff]   ;;  %v2244_v13 = vld [vmem:[%s2350_s26 + $0x90] sm:$0xff]  }
  0x13   : > { %2159 = vmatprep.mubr.bf16.mxu1 %v2240_v5  ;;  %v2245_v14 = vld [vmem:[%s2350_s26 + $0x18] sm:$0xff]   ;;  %v2247_v16 = vld [vmem:[%s2350_s26 + $0x20] sm:$0xff]   ;;  %v2249_v18 = vld [vmem:[%s2350_s26 + $0x28] sm:$0xff]  }
  0x14   : > { %2118 = vmatpush3.bf16.msra.mxu0 %v2234_v3  ;;  %2202 = vmatpush3.bf16.msra.mxu1 %v2234_v3  ;;  %v2246_v15 = vld [vmem:[%s2350_s26 + $0x98] sm:$0xff]   ;;  %v2248_v17 = vld [vmem:[%s2350_s26 + $0xa0] sm:$0xff]   ;;  %v2250_v19 = vld [vmem:[%s2350_s26 + $0xa8] sm:$0xff]  }
  0x15   : > { %2119 = vmatprep.subr.bf16.mxu0 %v2235_v6  ;;  %2195 = vmatprep.subr.bf16.mxu1 %v2235_v6  ;;  %v2251_v20 = vld [vmem:[%s2350_s26 + $0x30] sm:$0xff]   ;;  %v2253_v22 = vld [vmem:[%s2350_s26 + $0x38] sm:$0xff]   ;;  %v2255_v24 = vld [vmem:[%s2350_s26 + $0x40] sm:$0xff]  }
  0x16   : > { %v2252_v21 = vld [vmem:[%s2350_s26 + $0xb0] sm:$0xff]   ;;  %v2254_v23 = vld [vmem:[%s2350_s26 + $0xb8] sm:$0xff]   ;;  %v2256_v25 = vld [vmem:[%s2350_s26 + $0xc0] sm:$0xff]  }
  0x17   : > { %v2257_v26 = vld [vmem:[%s2350_s26 + $0x48] sm:$0xff]   ;;  %v2259_v28 = vld [vmem:[%s2350_s26 + $0x50] sm:$0xff]   ;;  %v2261_v30 = vld [vmem:[%s2350_s26 + $0x58] sm:$0xff]  }
  0x18   : > { %2120 = vmatpush3.bf16.msra.mxu0 %v2235_v6  ;;  %2203 = vmatpush3.bf16.msra.mxu1 %v2235_v6  ;;  %v2258_v27 = vld [vmem:[%s2350_s26 + $0xc8] sm:$0xff]   ;;  %v2260_v29 = vld [vmem:[%s2350_s26 + $0xd0] sm:$0xff]   ;;  %v2262_v31 = vld [vmem:[%s2350_s26 + $0xd8] sm:$0xff]  }
  0x19   : > { %2121 = vmatprep.subr.bf16.mxu0 %v2236_v7  ;;  %2196 = vmatprep.subr.bf16.mxu1 %v2236_v7  ;;  %v2263_v32 = vld [vmem:[%s2350_s26 + $0x60] sm:$0xff]   ;;  %v2265_v34 = vld [vmem:[%s2350_s26 + $0x68] sm:$0xff]   ;;  %v2267_v36 = vld [vmem:[%s2350_s26 + $0x70] sm:$0xff]  }
  0x1a   : > { %v2264_v33 = vld [vmem:[%s2350_s26 + $0xe0] sm:$0xff]   ;;  %v2266_v35 = vld [vmem:[%s2350_s26 + $0xe8] sm:$0xff]   ;;  %v2268_v37 = vld [vmem:[%s2350_s26 + $0xf0] sm:$0xff]  }
  0x1b   : > { %v2269_v38 = vld [vmem:[%s2350_s26 + $0x78] sm:$0xff]  }
  0x1c   : > { %2122 = vmatpush3.bf16.msra.mxu0 %v2236_v7  ;;  %2204 = vmatpush3.bf16.msra.mxu1 %v2236_v7  ;;  %v2270_v39 = vld [vmem:[%s2350_s26 + $0xf8] sm:$0xff]  }
  0x1d   : > { %2123 = vmatprep.subr.bf16.mxu0 %v2237_v8  ;;  %2197 = vmatprep.subr.bf16.mxu1 %v2237_v8 }
  0x20   : > { %2124 = vmatpush3.bf16.msra.mxu0 %v2237_v8  ;;  %2205 = vmatpush3.bf16.msra.mxu1 %v2237_v8 }
  0x21   : > { %2125 = vmatprep.subr.bf16.mxu0 %v2238_v9  ;;  %2198 = vmatprep.subr.bf16.mxu1 %v2238_v9 }
  0x24   : > { %2126 = vmatpush3.bf16.msra.mxu0 %v2238_v9  ;;  %2206 = vmatpush3.bf16.msra.mxu1 %v2238_v9 }
  0x27   : > { %2128 = vmatmul.mubr.bf16.vlgmr.msra.gmra.mrb[0].mxu0 %v2241_v10  ;;  %2160 = vmatmul.mubr.bf16.vlgmr.msra.gmra.mrb[0].mxu1 %v2242_v11 }
  0x28   : > { %2131 = vmatprep.mubr.bf16.mxu0 %v2243_v12  ;;  %2163 = vmatprep.mubr.bf16.mxu1 %v2244_v13 }
  0x2f   : > { %2132 = vmatmul.mubr.bf16.gmra.mrb[4].mxu0 %v2245_v14  ;;  %2164 = vmatmul.mubr.bf16.gmra.mrb[4].mxu1 %v2246_v15 }
  0x30   : > { %2135 = vmatprep.mubr.bf16.mxu0 %v2247_v16  ;;  %2167 = vmatprep.mubr.bf16.mxu1 %v2248_v17 }
  0x37   : > { %2136 = vmatmul.mubr.bf16.gmra.mrb[8].mxu0 %v2249_v18  ;;  %2168 = vmatmul.mubr.bf16.gmra.mrb[8].mxu1 %v2250_v19 }
  0x38   : > { %2139 = vmatprep.mubr.bf16.mxu0 %v2251_v20  ;;  %2171 = vmatprep.mubr.bf16.mxu1 %v2252_v21 }
  0x3f   : > { %2140 = vmatmul.mubr.bf16.gmra.mrb[12].mxu0 %v2253_v22  ;;  %2172 = vmatmul.mubr.bf16.gmra.mrb[12].mxu1 %v2254_v23 }
  0x40   : > { %2143 = vmatprep.mubr.bf16.mxu0 %v2255_v24  ;;  %2175 = vmatprep.mubr.bf16.mxu1 %v2256_v25 }
  0x47   : > { %2144 = vmatmul.mubr.bf16.gmra.mrb[16].mxu0 %v2257_v26  ;;  %2176 = vmatmul.mubr.bf16.gmra.mrb[16].mxu1 %v2258_v27 }
  0x48   : > { %2147 = vmatprep.mubr.bf16.mxu0 %v2259_v28  ;;  %2179 = vmatprep.mubr.bf16.mxu1 %v2260_v29 }
  0x4f   : > { %2148 = vmatmul.mubr.bf16.gmra.mrb[20].mxu0 %v2261_v30  ;;  %2180 = vmatmul.mubr.bf16.gmra.mrb[20].mxu1 %v2262_v31 }
  0x50   : > { %2151 = vmatprep.mubr.bf16.mxu0 %v2263_v32  ;;  %2183 = vmatprep.mubr.bf16.mxu1 %v2264_v33 }
  0x57   : > { %2152 = vmatmul.mubr.bf16.gmra.mrb[24].mxu0 %v2265_v34  ;;  %2184 = vmatmul.mubr.bf16.gmra.mrb[24].mxu1 %v2266_v35 }
  0x58   : > { %2155 = vmatprep.mubr.bf16.mxu0 %v2267_v36  ;;  %2187 = vmatprep.mubr.bf16.mxu1 %v2268_v37 }
  0x5f   : > { %2156 = vmatmul.mubr.bf16.gmra.mrb[28].mxu0 %v2269_v38  ;;  %2188 = vmatmul.mubr.bf16.gmra.mrb[28].mxu1 %v2270_v39 }
  0xfa   : > { %v2129_v40 = vpop.f32.mrb[0].mxu0  ;;  %v2161_v42 = vpop.f32.mrb[0].mxu1 }
  0xfb   : > { %v746_v43 = vpop.f32.mrb[1].mxu0  ;;  %v874_v44 = vpop.f32.mrb[1].mxu1  ;;  %v1205_v47 = vadd.f32 %v2129_v40, %v2402_v41  ;;  %v1237_v48 = vadd.f32 %v2161_v42, %v2402_v41 }
  0xfc   : > { %v2130_v45 = vpop.f32.mrb[2].mxu0  ;;  %v2162_v46 = vpop.f32.mrb[2].mxu1  ;;  %v1203_v53 = vadd.f32 %v2402_v41, %v746_v43  ;;  %v1235_v54 = vadd.f32 %v2402_v41, %v874_v44 }
  0xfd   : > { %v1206_v49 = vadd.f32 %v2130_v45, %v2402_v41  ;;  %v1238_v50 = vadd.f32 %v2162_v46, %v2402_v41  ;;  %v749_v51 = vpop.f32.mrb[3].mxu0  ;;  %v877_v52 = vpop.f32.mrb[3].mxu1 }
  0xfe   : > { %v1204_v55 = vadd.f32 %v2402_v41, %v749_v51  ;;  %v1236_v56 = vadd.f32 %v2402_v41, %v877_v52 }
  0xff   : > { %v1888_v57 = vpack.c.bf16 %v1206_v49, %v1205_v47  ;;  %v1968_v58 = vpack.c.bf16 %v1238_v50, %v1237_v48 }
 0x100   : > { %v1883_v59 = vpack.c.bf16 %v1204_v55, %v1203_v53  ;;  %v1963_v60 = vpack.c.bf16 %v1236_v56, %v1235_v54 }
 0x101   : > { %2040 = vst [vmem:[%s2415_s17 + $0x8] sm:$0xff] %v1888_v57   ;;  %2056 = vst [vmem:[%s2415_s17 + $0x88] sm:$0xff] %v1968_v58  }
 0x102   : > { %1884 = vst [vmem:[%s2415_s17] sm:$0xff] %v1883_v59   ;;  %2055 = vst [vmem:[%s2415_s17 + $0x80] sm:$0xff] %v1963_v60   ;;  %v2133_v61 = vpop.f32.mrb[4].mxu0  ;;  %v2165_v62 = vpop.f32.mrb[4].mxu1 }
 0x103   : > { %v762_v63 = vpop.f32.mrb[5].mxu0  ;;  %v890_v0 = vpop.f32.mrb[5].mxu1  ;;  %v1209_v3 = vadd.f32 %v2133_v61, %v2402_v41  ;;  %v1241_v4 = vadd.f32 %v2165_v62, %v2402_v41 }
 0x104   : > { %v2134_v1 = vpop.f32.mrb[6].mxu0  ;;  %v2166_v2 = vpop.f32.mrb[6].mxu1  ;;  %v1207_v9 = vadd.f32 %v2402_v41, %v762_v63  ;;  %v1239_v10 = vadd.f32 %v2402_v41, %v890_v0 }
 0x105   : > { %v1210_v5 = vadd.f32 %v2134_v1, %v2402_v41  ;;  %v1242_v6 = vadd.f32 %v2166_v2, %v2402_v41  ;;  %v765_v7 = vpop.f32.mrb[7].mxu0  ;;  %v893_v8 = vpop.f32.mrb[7].mxu1 }
 0x106   : > { %v1208_v11 = vadd.f32 %v2402_v41, %v765_v7  ;;  %v1240_v12 = vadd.f32 %v2402_v41, %v893_v8 }
 0x107   : > { %v1898_v13 = vpack.c.bf16 %v1210_v5, %v1209_v3  ;;  %v1978_v14 = vpack.c.bf16 %v1242_v6, %v1241_v4 }
 0x108   : > { %v1893_v15 = vpack.c.bf16 %v1208_v11, %v1207_v9  ;;  %v1973_v16 = vpack.c.bf16 %v1240_v12, %v1239_v10 }
 0x109   : > { %2042 = vst [vmem:[%s2415_s17 + $0x18] sm:$0xff] %v1898_v13   ;;  %2058 = vst [vmem:[%s2415_s17 + $0x98] sm:$0xff] %v1978_v14  }
 0x10a   : > { %2041 = vst [vmem:[%s2415_s17 + $0x10] sm:$0xff] %v1893_v15   ;;  %2057 = vst [vmem:[%s2415_s17 + $0x90] sm:$0xff] %v1973_v16   ;;  %v2137_v17 = vpop.f32.mrb[8].mxu0  ;;  %v2169_v18 = vpop.f32.mrb[8].mxu1 }
 0x10b   : > { %v778_v19 = vpop.f32.mrb[9].mxu0  ;;  %v906_v20 = vpop.f32.mrb[9].mxu1  ;;  %v1213_v23 = vadd.f32 %v2137_v17, %v2402_v41  ;;  %v1245_v24 = vadd.f32 %v2169_v18, %v2402_v41 }
 0x10c   : > { %v2138_v21 = vpop.f32.mrb[10].mxu0  ;;  %v2170_v22 = vpop.f32.mrb[10].mxu1  ;;  %v1211_v29 = vadd.f32 %v2402_v41, %v778_v19  ;;  %v1243_v30 = vadd.f32 %v2402_v41, %v906_v20 }
 0x10d   : > { %v1214_v25 = vadd.f32 %v2138_v21, %v2402_v41  ;;  %v1246_v26 = vadd.f32 %v2170_v22, %v2402_v41  ;;  %v781_v27 = vpop.f32.mrb[11].mxu0  ;;  %v909_v28 = vpop.f32.mrb[11].mxu1 }
 0x10e   : > { %v1212_v31 = vadd.f32 %v2402_v41, %v781_v27  ;;  %v1244_v32 = vadd.f32 %v2402_v41, %v909_v28 }
 0x10f   : > { %v1908_v33 = vpack.c.bf16 %v1214_v25, %v1213_v23  ;;  %v1988_v34 = vpack.c.bf16 %v1246_v26, %v1245_v24 }
 0x110   : > { %v1903_v35 = vpack.c.bf16 %v1212_v31, %v1211_v29  ;;  %v1983_v36 = vpack.c.bf16 %v1244_v32, %v1243_v30 }
 0x111   : > { %2044 = vst [vmem:[%s2415_s17 + $0x28] sm:$0xff] %v1908_v33   ;;  %2060 = vst [vmem:[%s2415_s17 + $0xa8] sm:$0xff] %v1988_v34  }
 0x112   : > { %2043 = vst [vmem:[%s2415_s17 + $0x20] sm:$0xff] %v1903_v35   ;;  %2059 = vst [vmem:[%s2415_s17 + $0xa0] sm:$0xff] %v1983_v36   ;;  %v2141_v37 = vpop.f32.mrb[12].mxu0  ;;  %v2173_v38 = vpop.f32.mrb[12].mxu1 }
 0x113   : > { %v794_v39 = vpop.f32.mrb[13].mxu0  ;;  %v922_v40 = vpop.f32.mrb[13].mxu1  ;;  %v1217_v44 = vadd.f32 %v2141_v37, %v2402_v41  ;;  %v1249_v45 = vadd.f32 %v2173_v38, %v2402_v41 }
 0x114   : > { %v2142_v42 = vpop.f32.mrb[14].mxu0  ;;  %v2174_v43 = vpop.f32.mrb[14].mxu1  ;;  %v1215_v50 = vadd.f32 %v2402_v41, %v794_v39  ;;  %v1247_v51 = vadd.f32 %v2402_v41, %v922_v40 }
 0x115   : > { %v1218_v46 = vadd.f32 %v2142_v42, %v2402_v41  ;;  %v1250_v47 = vadd.f32 %v2174_v43, %v2402_v41  ;;  %v797_v48 = vpop.f32.mrb[15].mxu0  ;;  %v925_v49 = vpop.f32.mrb[15].mxu1 }
 0x116   : > { %v1216_v52 = vadd.f32 %v2402_v41, %v797_v48  ;;  %v1248_v53 = vadd.f32 %v2402_v41, %v925_v49 }
 0x117   : > { %v1918_v54 = vpack.c.bf16 %v1218_v46, %v1217_v44  ;;  %v1998_v55 = vpack.c.bf16 %v1250_v47, %v1249_v45 }
 0x118   : > { %v1913_v56 = vpack.c.bf16 %v1216_v52, %v1215_v50  ;;  %v1993_v57 = vpack.c.bf16 %v1248_v53, %v1247_v51 }
 0x119   : > { %2046 = vst [vmem:[%s2415_s17 + $0x38] sm:$0xff] %v1918_v54   ;;  %2062 = vst [vmem:[%s2415_s17 + $0xb8] sm:$0xff] %v1998_v55  }
 0x11a   : > { %2045 = vst [vmem:[%s2415_s17 + $0x30] sm:$0xff] %v1913_v56   ;;  %2061 = vst [vmem:[%s2415_s17 + $0xb0] sm:$0xff] %v1993_v57   ;;  %v2145_v58 = vpop.f32.mrb[16].mxu0  ;;  %v2177_v59 = vpop.f32.mrb[16].mxu1 }
 0x11b   : > { %v810_v60 = vpop.f32.mrb[17].mxu0  ;;  %v938_v61 = vpop.f32.mrb[17].mxu1  ;;  %v1221_v0 = vadd.f32 %v2145_v58, %v2402_v41  ;;  %v1253_v1 = vadd.f32 %v2177_v59, %v2402_v41 }
 0x11c   : > { %v2146_v62 = vpop.f32.mrb[18].mxu0  ;;  %v2178_v63 = vpop.f32.mrb[18].mxu1  ;;  %v1219_v6 = vadd.f32 %v2402_v41, %v810_v60  ;;  %v1251_v7 = vadd.f32 %v2402_v41, %v938_v61 }
 0x11d   : > { %v1222_v2 = vadd.f32 %v2146_v62, %v2402_v41  ;;  %v1254_v3 = vadd.f32 %v2178_v63, %v2402_v41  ;;  %v813_v4 = vpop.f32.mrb[19].mxu0  ;;  %v941_v5 = vpop.f32.mrb[19].mxu1 }
 0x11e   : > { %v1220_v8 = vadd.f32 %v2402_v41, %v813_v4  ;;  %v1252_v9 = vadd.f32 %v2402_v41, %v941_v5 }
 0x11f   : > { %v1928_v10 = vpack.c.bf16 %v1222_v2, %v1221_v0  ;;  %v2008_v11 = vpack.c.bf16 %v1254_v3, %v1253_v1 }
 0x120   : > { %v1923_v12 = vpack.c.bf16 %v1220_v8, %v1219_v6  ;;  %v2003_v13 = vpack.c.bf16 %v1252_v9, %v1251_v7 }
 0x121   : > { %2048 = vst [vmem:[%s2415_s17 + $0x48] sm:$0xff] %v1928_v10   ;;  %2064 = vst [vmem:[%s2415_s17 + $0xc8] sm:$0xff] %v2008_v11  }
 0x122   : > { %2047 = vst [vmem:[%s2415_s17 + $0x40] sm:$0xff] %v1923_v12   ;;  %2063 = vst [vmem:[%s2415_s17 + $0xc0] sm:$0xff] %v2003_v13   ;;  %v2149_v14 = vpop.f32.mrb[20].mxu0  ;;  %v2181_v15 = vpop.f32.mrb[20].mxu1 }
 0x123   : > { %v826_v16 = vpop.f32.mrb[21].mxu0  ;;  %v954_v17 = vpop.f32.mrb[21].mxu1  ;;  %v1225_v20 = vadd.f32 %v2149_v14, %v2402_v41  ;;  %v1257_v21 = vadd.f32 %v2181_v15, %v2402_v41 }
 0x124   : > { %v2150_v18 = vpop.f32.mrb[22].mxu0  ;;  %v2182_v19 = vpop.f32.mrb[22].mxu1  ;;  %v1223_v26 = vadd.f32 %v2402_v41, %v826_v16  ;;  %v1255_v27 = vadd.f32 %v2402_v41, %v954_v17 }
 0x125   : > { %v1226_v22 = vadd.f32 %v2150_v18, %v2402_v41  ;;  %v1258_v23 = vadd.f32 %v2182_v19, %v2402_v41  ;;  %v829_v24 = vpop.f32.mrb[23].mxu0  ;;  %v957_v25 = vpop.f32.mrb[23].mxu1 }
 0x126   : > { %v1224_v28 = vadd.f32 %v2402_v41, %v829_v24  ;;  %v1256_v29 = vadd.f32 %v2402_v41, %v957_v25 }
 0x127   : > { %v1938_v30 = vpack.c.bf16 %v1226_v22, %v1225_v20  ;;  %v2018_v31 = vpack.c.bf16 %v1258_v23, %v1257_v21 }
 0x128   : > { %v1933_v32 = vpack.c.bf16 %v1224_v28, %v1223_v26  ;;  %v2013_v33 = vpack.c.bf16 %v1256_v29, %v1255_v27 }
 0x129   : > { %2050 = vst [vmem:[%s2415_s17 + $0x58] sm:$0xff] %v1938_v30   ;;  %2066 = vst [vmem:[%s2415_s17 + $0xd8] sm:$0xff] %v2018_v31  }
 0x12a   : > { %2049 = vst [vmem:[%s2415_s17 + $0x50] sm:$0xff] %v1933_v32   ;;  %2065 = vst [vmem:[%s2415_s17 + $0xd0] sm:$0xff] %v2013_v33   ;;  %v2153_v34 = vpop.f32.mrb[24].mxu0  ;;  %v2185_v35 = vpop.f32.mrb[24].mxu1 }
 0x12b   : > { %v842_v36 = vpop.f32.mrb[25].mxu0  ;;  %v970_v37 = vpop.f32.mrb[25].mxu1  ;;  %v1229_v40 = vadd.f32 %v2153_v34, %v2402_v41  ;;  %v1261_v42 = vadd.f32 %v2185_v35, %v2402_v41 }
 0x12c   : > { %v2154_v38 = vpop.f32.mrb[26].mxu0  ;;  %v2186_v39 = vpop.f32.mrb[26].mxu1  ;;  %v1227_v47 = vadd.f32 %v2402_v41, %v842_v36  ;;  %v1259_v48 = vadd.f32 %v2402_v41, %v970_v37 }
 0x12d   : > { %v1230_v43 = vadd.f32 %v2154_v38, %v2402_v41  ;;  %v1262_v44 = vadd.f32 %v2186_v39, %v2402_v41  ;;  %v845_v45 = vpop.f32.mrb[27].mxu0  ;;  %v973_v46 = vpop.f32.mrb[27].mxu1 }
 0x12e   : > { %v1228_v49 = vadd.f32 %v2402_v41, %v845_v45  ;;  %v1260_v50 = vadd.f32 %v2402_v41, %v973_v46 }
 0x12f   : > { %v1948_v51 = vpack.c.bf16 %v1230_v43, %v1229_v40  ;;  %v2028_v52 = vpack.c.bf16 %v1262_v44, %v1261_v42 }
 0x130   : > { %v1943_v53 = vpack.c.bf16 %v1228_v49, %v1227_v47  ;;  %v2023_v54 = vpack.c.bf16 %v1260_v50, %v1259_v48 }
 0x131   : > { %2052 = vst [vmem:[%s2415_s17 + $0x68] sm:$0xff] %v1948_v51   ;;  %2068 = vst [vmem:[%s2415_s17 + $0xe8] sm:$0xff] %v2028_v52  }
 0x132   : > { %2051 = vst [vmem:[%s2415_s17 + $0x60] sm:$0xff] %v1943_v53   ;;  %2067 = vst [vmem:[%s2415_s17 + $0xe0] sm:$0xff] %v2023_v54   ;;  %v2157_v55 = vpop.f32.mrb[28].mxu0  ;;  %v2189_v56 = vpop.f32.mrb[28].mxu1 }
 0x133   : > { %v858_v57 = vpop.f32.mrb[29].mxu0  ;;  %v986_v58 = vpop.f32.mrb[29].mxu1  ;;  %v1233_v61 = vadd.f32 %v2157_v55, %v2402_v41  ;;  %v1265_v62 = vadd.f32 %v2189_v56, %v2402_v41 }
 0x134   : > { %v2158_v59 = vpop.f32.mrb[30].mxu0  ;;  %v2190_v60 = vpop.f32.mrb[30].mxu1  ;;  %v1231_v3 = vadd.f32 %v2402_v41, %v858_v57  ;;  %v1263_v4 = vadd.f32 %v2402_v41, %v986_v58 }
 0x135   : > { %v1234_v63 = vadd.f32 %v2158_v59, %v2402_v41  ;;  %v1266_v0 = vadd.f32 %v2190_v60, %v2402_v41  ;;  %v861_v1 = vpop.f32.mrb[31].mxu0  ;;  %v989_v2 = vpop.f32.mrb[31].mxu1 }
 0x136   : > { %v1232_v5 = vadd.f32 %v2402_v41, %v861_v1  ;;  %v1264_v6 = vadd.f32 %v2402_v41, %v989_v2 }
 0x137   : > { %v1958_v7 = vpack.c.bf16 %v1234_v63, %v1233_v61  ;;  %v2038_v8 = vpack.c.bf16 %v1266_v0, %v1265_v62 }
 0x138   : > { %v1953_v9 = vpack.c.bf16 %v1232_v5, %v1231_v3  ;;  %v2033_v10 = vpack.c.bf16 %v1264_v6, %v1263_v4 }
 0x139   : > { %2054 = vst [vmem:[%s2415_s17 + $0x78] sm:$0xff] %v1958_v7   ;;  %2070 = vst [vmem:[%s2415_s17 + $0xf8] sm:$0xff] %v2038_v8  }
 0x13a   : > { %2053 = vst [vmem:[%s2415_s17 + $0x70] sm:$0xff] %v1953_v9   ;;  %2069 = vst [vmem:[%s2415_s17 + $0xf0] sm:$0xff] %v2033_v10  }
 0x13b PF: > { %s13_s14 = sadd.s32 1, %s2293_s14   ;;  %s2520_s12 = smov %s2289_s13 }
 0x13c   : > { %p10_p5 = scmp.ge.s32.totalorder %s13_s14, 6   ;;  %s2521_s13 = smov %s2523_s15 }
 0x13e   :  { %12 = sbr.rel (!%p10_p5) target bundleno = 2 (0x2), region = 76 }

// kernel: _lambda_.28
= control target key start
LH: loop header
LB: loop body
LE: loop exit
PB: predicated region body
PF: predicated region fallthrough
CT: control target
= control target key end

     0   :  { %s3338_s12 = smov 0   ;;  %s3340_s13 = smov 0   ;;  %s3797_s0 = inlined_call_operand.vmem [shape: bf16[2048,384], index: 0, kind: input, shape index: {}]   ;;  %s3798_s1 = inlined_call_operand.vmem [shape: bf16[384,128], index: 1, kind: input, shape index: {}]   ;;  %s3799_s2 = inlined_call_operand.vmem [shape: f32[1,128], index: 2, kind: input, shape index: {}]   ;;  %s3800_s3 = inlined_call_operand.vmem [shape: bf16[2048,128], index: 3, kind: output, shape index: {}]  }
   0x1   :  { %s3342_s14 = smov 0  }
   0x2 LB: > { %s32_s15 = sadd.s32 1, %s3311_s13  ;;  %p2516_p0 = scmp.ge.s32.totalorder %s3315_s14, 1  ;;  %s3315_s14 = sphi %s3342_s14, %s13_s14   ;;  %s3311_s13 = sphi %s3340_s13, %s3802_s13   ;;  %s3307_s12 = sphi %s3338_s12, %s3801_s12  }
   0x3   : > { %p34_p1 = scmp.ge.s32.totalorder %s32_s15, 4  ;;  %p191_p2 = scmp.lt.s32.totalorder %s3315_s14, 5 }
   0x5   : > { %s3804_s15 = smov (%p34_p1, %s32_s15), 0  ;;  %p192_p3 = pnand %p2516_p0, %p191_p2 }
   0x6   : > { %v3141_v0 = vld [vmem:[%s3798_s1] sm:$0xff] (!%p192_p3)   ;;  %v3317_v1 = vmov (!%p192_p3), 0   ;;  %s2517_s18 = sshll.u32 (!%p192_p3), %s3307_s12, 6  ;;  %v3142_v2 = vld [vmem:[%s3798_s1 + $0x8] sm:$0xff] (!%p192_p3)   ;;  %v3143_v3 = vld [vmem:[%s3798_s1 + $0x10] sm:$0xff] (!%p192_p3)  }
   0x7   : > { %195 = sbr.rel (%p192_p3) target bundleno = 477 (0x1dd), region = 32  ;;  %1232 = vmatprep.subr.bf16.mxu0 (!%p192_p3), %v3317_v1  ;;  %3083 = vmatprep.subr.bf16.mxu1 (!%p192_p3), %v3317_v1  ;;  %p236_p4 = scmp.lt.s32.totalorder (!%p192_p3), %s2517_s18, 255  ;;  %v3144_v4 = vld [vmem:[%s3798_s1 + $0x18] sm:$0xff] (!%p192_p3)   ;;  %v3145_v5 = vld [vmem:[%s3798_s1 + $0x20] sm:$0xff] (!%p192_p3)   ;;  %v3146_v7 = vld [vmem:[%s3798_s1 + $0x28] sm:$0xff] (!%p192_p3)  }
   0x8   : > { %1233 = vmatpush1.bf16.msra.mxu0 (!%p192_p3), %v3141_v0  ;;  %3099 = vmatpush1.bf16.msra.mxu1 (!%p192_p3), %v3141_v0  ;;  %v3147_v9 = vld [vmem:[%s3798_s1 + $0x30] sm:$0xff] (!%p192_p3)   ;;  %v3148_v10 = vld [vmem:[%s3798_s1 + $0x38] sm:$0xff] (!%p192_p3)   ;;  %v3149_v11 = vld [vmem:[%s3798_s1 + $0x40] sm:$0xff] (!%p192_p3)  }
   0x9   : > { %1234 = vmatprep.subr.bf16.mxu0 (!%p192_p3), %v3317_v1  ;;  %3084 = vmatprep.subr.bf16.mxu1 (!%p192_p3), %v3317_v1  ;;  %v3150_v12 = vld [vmem:[%s3798_s1 + $0x48] sm:$0xff] (!%p192_p3)   ;;  %v3151_v13 = vld [vmem:[%s3798_s1 + $0x50] sm:$0xff] (!%p192_p3)   ;;  %v3152_v14 = vld [vmem:[%s3798_s1 + $0x58] sm:$0xff] (!%p192_p3)  }
   0xa   : > { %v3153_v15 = vld [vmem:[%s3798_s1 + $0x60] sm:$0xff] (!%p192_p3)   ;;  %v3154_v16 = vld [vmem:[%s3798_s1 + $0x68] sm:$0xff] (!%p192_p3)   ;;  %v3155_v17 = vld [vmem:[%s3798_s1 + $0x70] sm:$0xff] (!%p192_p3)  }
   0xb   : > { %v3156_v18 = vld [vmem:[%s3798_s1 + $0x78] sm:$0xff] (!%p192_p3)   ;;  %v3163_v19 = vld [vmem:[%s3798_s1 + $0x80] sm:$0xff] (!%p192_p3)   ;;  %v3170_v24 = vld [vmem:[%s3798_s1 + $0x88] sm:$0xff] (!%p192_p3)  }
   0xc   : > { %1235 = vmatpush1.bf16.msra.mxu0 (!%p192_p3), %v3142_v2  ;;  %3100 = vmatpush1.bf16.msra.mxu1 (!%p192_p3), %v3142_v2  ;;  %v3177_v25 = vld [vmem:[%s3798_s1 + $0x90] sm:$0xff] (!%p192_p3)   ;;  %v3184_v30 = vld [vmem:[%s3798_s1 + $0x98] sm:$0xff] (!%p192_p3)   ;;  %v3191_v32 = vld [vmem:[%s3798_s1 + $0xa0] sm:$0xff] (!%p192_p3)  }
   0xd   : > { %1236 = vmatprep.subr.bf16.mxu0 (!%p192_p3), %v3317_v1  ;;  %3085 = vmatprep.subr.bf16.mxu1 (!%p192_p3), %v3317_v1  ;;  %v3198_v36 = vld [vmem:[%s3798_s1 + $0xa8] sm:$0xff] (!%p192_p3)   ;;  %v3205_v41 = vld [vmem:[%s3798_s1 + $0xb0] sm:$0xff] (!%p192_p3)   ;;  %v3212_v42 = vld [vmem:[%s3798_s1 + $0xb8] sm:$0xff] (!%p192_p3)  }
   0xe   : > { %s3806_s18 = smov (!%p236_p4, %s2517_s18), 255 }
   0xf   : > { %s3115_s25 = smul.u32 12, %s3806_s18 }
  0x10   : > { %1237 = vmatpush1.bf16.msra.mxu0 %v3143_v3  ;;  %3101 = vmatpush1.bf16.msra.mxu1 %v3143_v3 }
  0x11   : > { %1238 = vmatprep.subr.bf16.mxu0 %v3317_v1  ;;  %3086 = vmatprep.subr.bf16.mxu1 %v3317_v1  ;;  %s3385_s30 = scalar_lea.vmem %s3797_s0, %s3115_s25  ;;  %s2520_s25 = sshll.u32 %s3806_s18, 2 }
  0x12   : > { %v3159_v6 = vld [vmem:[%s3385_s30 + $0x4] ss:$12 sps:$4 sm:$0xff]   ;;  %v3157_v20 = vld [vmem:[%s3385_s30] ss:$12 sps:$4 sm:$0xff]   ;;  %v3164_v22 = vld [vmem:[%s3385_s30 + $0x1c] ss:$12 sps:$4 sm:$0xff]   ;;  %s3642_s28 = scalar_lea.vmem %s3800_s3, %s2520_s25 }
  0x13   : > { %v3162_v8 = vld [vmem:[%s3385_s30 + $0x244] ss:$12 sps:$4 sm:$0xff]   ;;  %1264 = vmatprep.mubr.bf16.mxu0 %v3159_v6  ;;  %v3160_v21 = vld [vmem:[%s3385_s30 + $0x240] ss:$12 sps:$4 sm:$0xff]   ;;  %v3166_v23 = vld [vmem:[%s3385_s30 + $0x25c] ss:$12 sps:$4 sm:$0xff]  }
  0x14   : > { %1239 = vmatpush1.bf16.msra.mxu0 %v3144_v4  ;;  %3102 = vmatpush1.bf16.msra.mxu1 %v3144_v4  ;;  %v3168_v26 = vld [vmem:[%s3385_s30 + $0x18] ss:$12 sps:$4 sm:$0xff]   ;;  %v3171_v28 = vld [vmem:[%s3385_s30 + $0x34] ss:$12 sps:$4 sm:$0xff]   ;;  %v3175_v31 = vld [vmem:[%s3385_s30 + $0x30] ss:$12 sps:$4 sm:$0xff]  }
  0x15   : > { %1240 = vmatprep.subr.bf16.mxu0 %v3317_v1  ;;  %3087 = vmatprep.subr.bf16.mxu1 %v3317_v1  ;;  %v3169_v27 = vld [vmem:[%s3385_s30 + $0x258] ss:$12 sps:$4 sm:$0xff]   ;;  %v3173_v29 = vld [vmem:[%s3385_s30 + $0x274] ss:$12 sps:$4 sm:$0xff]   ;;  %v3176_v33 = vld [vmem:[%s3385_s30 + $0x270] ss:$12 sps:$4 sm:$0xff]  }
  0x16   : > { %1456 = vmatprep.mubr.bf16.mxu1 %v3162_v8  ;;  %v3178_v34 = vld [vmem:[%s3385_s30 + $0x4c] ss:$12 sps:$4 sm:$0xff]   ;;  %v3182_v37 = vld [vmem:[%s3385_s30 + $0x48] ss:$12 sps:$4 sm:$0xff]   ;;  %v3185_v39 = vld [vmem:[%s3385_s30 + $0x64] ss:$12 sps:$4 sm:$0xff]  }
  0x17   : > { %v3180_v35 = vld [vmem:[%s3385_s30 + $0x28c] ss:$12 sps:$4 sm:$0xff]   ;;  %v3183_v38 = vld [vmem:[%s3385_s30 + $0x288] ss:$12 sps:$4 sm:$0xff]   ;;  %v3187_v40 = vld [vmem:[%s3385_s30 + $0x2a4] ss:$12 sps:$4 sm:$0xff]  }
  0x18   : > { %1241 = vmatpush1.bf16.msra.mxu0 %v3145_v5  ;;  %3103 = vmatpush1.bf16.msra.mxu1 %v3145_v5  ;;  %v3189_v43 = vld [vmem:[%s3385_s30 + $0x60] ss:$12 sps:$4 sm:$0xff]   ;;  %v3192_v45 = vld [vmem:[%s3385_s30 + $0x7c] ss:$12 sps:$4 sm:$0xff]   ;;  %v3196_v47 = vld [vmem:[%s3385_s30 + $0x78] ss:$12 sps:$4 sm:$0xff]  }
  0x19   : > { %1242 = vmatprep.subr.bf16.mxu0 %v3317_v1  ;;  %3088 = vmatprep.subr.bf16.mxu1 %v3317_v1  ;;  %v3190_v44 = vld [vmem:[%s3385_s30 + $0x2a0] ss:$12 sps:$4 sm:$0xff]   ;;  %v3194_v46 = vld [vmem:[%s3385_s30 + $0x2bc] ss:$12 sps:$4 sm:$0xff]   ;;  %v3197_v48 = vld [vmem:[%s3385_s30 + $0x2b8] ss:$12 sps:$4 sm:$0xff]  }
  0x1a   : > { %v3199_v49 = vld [vmem:[%s3385_s30 + $0x94] ss:$12 sps:$4 sm:$0xff]   ;;  %v3203_v51 = vld [vmem:[%s3385_s30 + $0x90] ss:$12 sps:$4 sm:$0xff]   ;;  %v3206_v53 = vld [vmem:[%s3385_s30 + $0xac] ss:$12 sps:$4 sm:$0xff]  }
  0x1b   : > { %v3201_v50 = vld [vmem:[%s3385_s30 + $0x2d4] ss:$12 sps:$4 sm:$0xff]   ;;  %v3204_v52 = vld [vmem:[%s3385_s30 + $0x2d0] ss:$12 sps:$4 sm:$0xff]   ;;  %v3208_v54 = vld [vmem:[%s3385_s30 + $0x2ec] ss:$12 sps:$4 sm:$0xff]  }
  0x1c   : > { %1243 = vmatpush1.bf16.msra.mxu0 %v3146_v7  ;;  %3104 = vmatpush1.bf16.msra.mxu1 %v3146_v7  ;;  %v3210_v55 = vld [vmem:[%s3385_s30 + $0xa8] ss:$12 sps:$4 sm:$0xff]   ;;  %v3213_v57 = vld [vmem:[%s3385_s30 + $0xc4] ss:$12 sps:$4 sm:$0xff]   ;;  %v3216_v59 = vld [vmem:[%s3385_s30 + $0xc0] ss:$12 sps:$4 sm:$0xff]  }
  0x1d   : > { %1244 = vmatprep.subr.bf16.mxu0 %v3317_v1  ;;  %3089 = vmatprep.subr.bf16.mxu1 %v3317_v1  ;;  %v3211_v56 = vld [vmem:[%s3385_s30 + $0x2e8] ss:$12 sps:$4 sm:$0xff]   ;;  %v3217_v60 = vld [vmem:[%s3385_s30 + $0x20] ss:$12 sps:$4 sm:$0xff]   ;;  %v3220_v62 = vld [vmem:[%s3385_s30 + $0x38] ss:$12 sps:$4 sm:$0xff]  }
  0x1e   : > { %v3215_v58 = vld [vmem:[%s3385_s30 + $0x8] ss:$12 sps:$4 sm:$0xff]   ;;  %v3221_v63 = vld [vmem:[%s3385_s30 + $0xd8] ss:$12 sps:$4 sm:$0xff]   ;;  %v3222_v0 = vld [vmem:[%s3385_s30 + $0x50] ss:$12 sps:$4 sm:$0xff]  }
  0x1f   : > { %v3218_v61 = vld [vmem:[%s3385_s30 + $0xdc] ss:$12 sps:$4 sm:$0xff]   ;;  %v3227_v4 = vld [vmem:[%s3385_s30 + $0x80] ss:$12 sps:$4 sm:$0xff]   ;;  %v3230_v6 = vld [vmem:[%s3385_s30 + $0x98] ss:$12 sps:$4 sm:$0xff]  }
  0x20   : > { %1245 = vmatpush1.bf16.msra.mxu0 %v3147_v9  ;;  %3105 = vmatpush1.bf16.msra.mxu1 %v3147_v9  ;;  %v3225_v2 = vld [vmem:[%s3385_s30 + $0x68] ss:$12 sps:$4 sm:$0xff]   ;;  %v3226_v3 = vld [vmem:[%s3385_s30 + $0xf0] ss:$12 sps:$4 sm:$0xff]   ;;  %v3228_v5 = vld [vmem:[%s3385_s30 + $0x10c] ss:$12 sps:$4 sm:$0xff]  }
  0x21   : > { %1246 = vmatprep.subr.bf16.mxu0 %v3317_v1  ;;  %3090 = vmatprep.subr.bf16.mxu1 %v3317_v1  ;;  %v3231_v7 = vld [vmem:[%s3385_s30 + $0x108] ss:$12 sps:$4 sm:$0xff]   ;;  %v3232_v8 = vld [vmem:[%s3385_s30 + $0xb0] ss:$12 sps:$4 sm:$0xff]  }
  0x22   : > { %v3233_v9 = vld [vmem:[%s3385_s30 + $0x124] ss:$12 sps:$4 sm:$0xff]  }
  0x24   : > { %1247 = vmatpush1.bf16.msra.mxu0 %v3148_v10  ;;  %3106 = vmatpush1.bf16.msra.mxu1 %v3148_v10  ;;  %v3235_v10 = vld [vmem:[%s3385_s30 + $0xc8] ss:$12 sps:$4 sm:$0xff]  }
  0x25   : > { %1248 = vmatprep.subr.bf16.mxu0 %v3317_v1  ;;  %3091 = vmatprep.subr.bf16.mxu1 %v3317_v1 }
  0x28   : > { %1249 = vmatpush1.bf16.msra.mxu0 %v3149_v11  ;;  %3107 = vmatpush1.bf16.msra.mxu1 %v3149_v11  ;;  %v3236_v11 = vld [vmem:[%s3385_s30 + $0x120] ss:$12 sps:$4 sm:$0xff]  }
  0x29   : > { %1250 = vmatprep.subr.bf16.mxu0 %v3317_v1  ;;  %3092 = vmatprep.subr.bf16.mxu1 %v3317_v1 }
  0x2c   : > { %1251 = vmatpush1.bf16.msra.mxu0 %v3150_v12  ;;  %3108 = vmatpush1.bf16.msra.mxu1 %v3150_v12  ;;  %v3237_v12 = vld [vmem:[%s3385_s30 + $0xe0] ss:$12 sps:$4 sm:$0xff]  }
  0x2d   : > { %1252 = vmatprep.subr.bf16.mxu0 %v3317_v1  ;;  %3093 = vmatprep.subr.bf16.mxu1 %v3317_v1 }
  0x30   : > { %1253 = vmatpush1.bf16.msra.mxu0 %v3151_v13  ;;  %3109 = vmatpush1.bf16.msra.mxu1 %v3151_v13  ;;  %v3238_v13 = vld [vmem:[%s3385_s30 + $0x13c] ss:$12 sps:$4 sm:$0xff]  }
  0x31   : > { %1254 = vmatprep.subr.bf16.mxu0 %v3317_v1  ;;  %3094 = vmatprep.subr.bf16.mxu1 %v3317_v1 }
  0x34   : > { %1255 = vmatpush1.bf16.msra.mxu0 %v3152_v14  ;;  %3110 = vmatpush1.bf16.msra.mxu1 %v3152_v14  ;;  %v3240_v14 = vld [vmem:[%s3385_s30 + $0xf8] ss:$12 sps:$4 sm:$0xff]  }
  0x35   : > { %1256 = vmatprep.subr.bf16.mxu0 %v3317_v1  ;;  %3095 = vmatprep.subr.bf16.mxu1 %v3317_v1 }
  0x38   : > { %1257 = vmatpush1.bf16.msra.mxu0 %v3153_v15  ;;  %3111 = vmatpush1.bf16.msra.mxu1 %v3153_v15  ;;  %v3241_v15 = vld [vmem:[%s3385_s30 + $0x138] ss:$12 sps:$4 sm:$0xff]  }
  0x39   : > { %1258 = vmatprep.subr.bf16.mxu0 %v3317_v1  ;;  %3096 = vmatprep.subr.bf16.mxu1 %v3317_v1 }
  0x3c   : > { %1259 = vmatpush1.bf16.msra.mxu0 %v3154_v16  ;;  %3112 = vmatpush1.bf16.msra.mxu1 %v3154_v16  ;;  %v3242_v16 = vld [vmem:[%s3385_s30 + $0x110] ss:$12 sps:$4 sm:$0xff]  }
  0x3d   : > { %1260 = vmatprep.subr.bf16.mxu0 %v3317_v1  ;;  %3097 = vmatprep.subr.bf16.mxu1 %v3317_v1 }
  0x40   : > { %1261 = vmatpush1.bf16.msra.mxu0 %v3155_v17  ;;  %3113 = vmatpush1.bf16.msra.mxu1 %v3155_v17  ;;  %v3243_v17 = vld [vmem:[%s3385_s30 + $0x154] ss:$12 sps:$4 sm:$0xff]  }
  0x41   : > { %1262 = vmatprep.subr.bf16.mxu0 %v3317_v1  ;;  %3098 = vmatprep.subr.bf16.mxu1 %v3317_v1  ;;  %v3223_v1 = vld [vmem:[%s3385_s30 + $0xf4] ss:$12 sps:$4 sm:$0xff]  }
  0x44   : > { %1263 = vmatpush1.bf16.msra.mxu0 %v3156_v18  ;;  %3114 = vmatpush1.bf16.msra.mxu1 %v3156_v18  ;;  %v3245_v18 = vld [vmem:[%s3385_s30 + $0x128] ss:$12 sps:$4 sm:$0xff]  }
  0x45   : > { %3003 = vmatprep.subr.bf16.mxu1 %v3163_v19 }
  0x47   : > { %1265 = vmatmul.mubr.bf16.vlgmr.msra.gmra.mrb[0].mxu0 %v3157_v20  ;;  %1457 = vmatmul.mubr.bf16.vlgmr.msra.gmra.mrb[0].mxu1 %v3160_v21  ;;  %v3247_v20 = vld [vmem:[%s3385_s30 + $0x140] ss:$12 sps:$4 sm:$0xff]  }
  0x48   : > { %3004 = vmatpush3.bf16.msra.mxu1 %v3163_v19  ;;  %1272 = vmatprep.mubr.bf16.mxu0 %v3164_v22  ;;  %v3246_v19 = vld [vmem:[%s3385_s30 + $0x150] ss:$12 sps:$4 sm:$0xff]   ;;  %v3248_v21 = vld [vmem:[%s3385_s30 + $0x16c] ss:$12 sps:$4 sm:$0xff]  }
  0x49   : > { %1464 = vmatprep.mubr.bf16.mxu1 %v3166_v23  ;;  %3005 = vmatprep.subr.bf16.mxu1 %v3170_v24  ;;  %v3250_v22 = vld [vmem:[%s3385_s30 + $0x158] ss:$12 sps:$4 sm:$0xff]   ;;  %v3251_v23 = vld [vmem:[%s3385_s30 + $0x168] ss:$12 sps:$4 sm:$0xff]  }
  0x4c   : > { %3006 = vmatpush3.bf16.msra.mxu1 %v3170_v24  ;;  %v3252_v24 = vld [vmem:[%s3385_s30 + $0x170] ss:$12 sps:$4 sm:$0xff]  }
  0x4d   : > { %3007 = vmatprep.subr.bf16.mxu1 %v3177_v25 }
  0x4f   : > { %1273 = vmatmul.mubr.bf16.gmra.mrb[4].mxu0 %v3168_v26  ;;  %1465 = vmatmul.mubr.bf16.gmra.mrb[4].mxu1 %v3169_v27  ;;  %v3255_v26 = vld [vmem:[%s3385_s30 + $0x188] ss:$12 sps:$4 sm:$0xff]   ;;  %v3256_v27 = vld [vmem:[%s3385_s30 + $0x180] ss:$12 sps:$4 sm:$0xff]  }
  0x50   : > { %1280 = vmatprep.mubr.bf16.mxu0 %v3171_v28  ;;  %1472 = vmatprep.mubr.bf16.mxu1 %v3173_v29  ;;  %v3257_v28 = vld [vmem:[%s3385_s30 + $0x1a0] ss:$12 sps:$4 sm:$0xff]   ;;  %v3258_v29 = vld [vmem:[%s3385_s30 + $0x19c] ss:$12 sps:$4 sm:$0xff]  }
  0x51   : > { %3008 = vmatpush3.bf16.msra.mxu1 %v3177_v25  ;;  %v3253_v25 = vld [vmem:[%s3385_s30 + $0x184] ss:$12 sps:$4 sm:$0xff]  }
  0x52   : > { %3009 = vmatprep.subr.bf16.mxu1 %v3184_v30 }
  0x55   : > { %3010 = vmatpush3.bf16.msra.mxu1 %v3184_v30  ;;  %v3260_v30 = vld [vmem:[%s3385_s30 + $0x1b8] ss:$12 sps:$4 sm:$0xff]  }
  0x56   : > { %3011 = vmatprep.subr.bf16.mxu1 %v3191_v32 }
  0x57   : > { %1281 = vmatmul.mubr.bf16.gmra.mrb[8].mxu0 %v3175_v31  ;;  %1473 = vmatmul.mubr.bf16.gmra.mrb[8].mxu1 %v3176_v33  ;;  %v3261_v31 = vld [vmem:[%s3385_s30 + $0x198] ss:$12 sps:$4 sm:$0xff]   ;;  %v3263_v33 = vld [vmem:[%s3385_s30 + $0x1b4] ss:$12 sps:$4 sm:$0xff]  }
  0x58   : > { %1288 = vmatprep.mubr.bf16.mxu0 %v3178_v34  ;;  %1480 = vmatprep.mubr.bf16.mxu1 %v3180_v35  ;;  %v3265_v34 = vld [vmem:[%s3385_s30 + $0x1e8] ss:$12 sps:$4 sm:$0xff]   ;;  %v3266_v35 = vld [vmem:[%s3385_s30 + $0x1b0] ss:$12 sps:$4 sm:$0xff]  }
  0x59   : > { %3012 = vmatpush3.bf16.msra.mxu1 %v3191_v32  ;;  %v3262_v32 = vld [vmem:[%s3385_s30 + $0x1d0] ss:$12 sps:$4 sm:$0xff]  }
  0x5a   : > { %3013 = vmatprep.subr.bf16.mxu1 %v3198_v36 }
  0x5d   : > { %3014 = vmatpush3.bf16.msra.mxu1 %v3198_v36  ;;  %v3267_v36 = vld [vmem:[%s3385_s30 + $0x200] ss:$12 sps:$4 sm:$0xff]  }
  0x5e   : > { %3015 = vmatprep.subr.bf16.mxu1 %v3205_v41 }
  0x5f   : > { %1289 = vmatmul.mubr.bf16.gmra.mrb[12].mxu0 %v3182_v37  ;;  %1481 = vmatmul.mubr.bf16.gmra.mrb[12].mxu1 %v3183_v38  ;;  %v3268_v37 = vld [vmem:[%s3385_s30 + $0x1cc] ss:$12 sps:$4 sm:$0xff]  }
  0x60   : > { %1296 = vmatprep.mubr.bf16.mxu0 %v3185_v39  ;;  %1488 = vmatprep.mubr.bf16.mxu1 %v3187_v40  ;;  %v3270_v38 = vld [vmem:[%s3385_s30 + $0x218] ss:$12 sps:$4 sm:$0xff]   ;;  %v3271_v39 = vld [vmem:[%s3385_s30 + $0x1c8] ss:$12 sps:$4 sm:$0xff]   ;;  %v3272_v40 = vld [vmem:[%s3385_s30 + $0x230] ss:$12 sps:$4 sm:$0xff]  }
  0x61   : > { %3016 = vmatpush3.bf16.msra.mxu1 %v3205_v41  ;;  %v3273_v41 = vld [vmem:[%s3385_s30 + $0x1e4] ss:$12 sps:$4 sm:$0xff]  }
  0x62   : > { %3017 = vmatprep.subr.bf16.mxu1 %v3212_v42 }
  0x65   : > { %3018 = vmatpush3.bf16.msra.mxu1 %v3212_v42  ;;  %v3275_v42 = vld [vmem:[%s3385_s30 + $0x248] ss:$12 sps:$4 sm:$0xff]  }
  0x67   : > { %1297 = vmatmul.mubr.bf16.gmra.mrb[16].mxu0 %v3189_v43  ;;  %1489 = vmatmul.mubr.bf16.gmra.mrb[16].mxu1 %v3190_v44  ;;  %v3276_v43 = vld [vmem:[%s3385_s30 + $0x1e0] ss:$12 sps:$4 sm:$0xff]  }
  0x68   : > { %1304 = vmatprep.mubr.bf16.mxu0 %v3192_v45  ;;  %1496 = vmatprep.mubr.bf16.mxu1 %v3194_v46  ;;  %v3277_v44 = vld [vmem:[%s3385_s30 + $0x260] ss:$12 sps:$4 sm:$0xff]   ;;  %v3278_v45 = vld [vmem:[%s3385_s30 + $0x1fc] ss:$12 sps:$4 sm:$0xff]   ;;  %v3280_v46 = vld [vmem:[%s3385_s30 + $0x278] ss:$12 sps:$4 sm:$0xff]  }
  0x6f   : > { %1305 = vmatmul.mubr.bf16.gmra.mrb[20].mxu0 %v3196_v47  ;;  %1497 = vmatmul.mubr.bf16.gmra.mrb[20].mxu1 %v3197_v48  ;;  %v3281_v47 = vld [vmem:[%s3385_s30 + $0x1f8] ss:$12 sps:$4 sm:$0xff]   ;;  %v3282_v48 = vld [vmem:[%s3385_s30 + $0x290] ss:$12 sps:$4 sm:$0xff]  }
  0x70   : > { %1312 = vmatprep.mubr.bf16.mxu0 %v3199_v49  ;;  %1504 = vmatprep.mubr.bf16.mxu1 %v3201_v50  ;;  %v3283_v49 = vld [vmem:[%s3385_s30 + $0x214] ss:$12 sps:$4 sm:$0xff]  }
  0x71   : > { %v3285_v50 = vld [vmem:[%s3385_s30 + $0x2a8] ss:$12 sps:$4 sm:$0xff]  }
  0x77   : > { %1313 = vmatmul.mubr.bf16.gmra.mrb[24].mxu0 %v3203_v51  ;;  %1505 = vmatmul.mubr.bf16.gmra.mrb[24].mxu1 %v3204_v52  ;;  %v3286_v51 = vld [vmem:[%s3385_s30 + $0x210] ss:$12 sps:$4 sm:$0xff]   ;;  %v3287_v52 = vld [vmem:[%s3385_s30 + $0x2c0] ss:$12 sps:$4 sm:$0xff]  }
  0x78   : > { %1320 = vmatprep.mubr.bf16.mxu0 %v3206_v53  ;;  %1512 = vmatprep.mubr.bf16.mxu1 %v3208_v54  ;;  %v3288_v53 = vld [vmem:[%s3385_s30 + $0x22c] ss:$12 sps:$4 sm:$0xff]  }
  0x79   : > { %v3290_v54 = vld [vmem:[%s3385_s30 + $0x2d8] ss:$12 sps:$4 sm:$0xff]  }
  0x7f   : > { %1321 = vmatmul.mubr.bf16.gmra.mrb[28].mxu0 %v3210_v55  ;;  %1513 = vmatmul.mubr.bf16.gmra.mrb[28].mxu1 %v3211_v56  ;;  %v3291_v55 = vld [vmem:[%s3385_s30 + $0x228] ss:$12 sps:$4 sm:$0xff]   ;;  %v3292_v56 = vld [vmem:[%s3385_s30 + $0x2f0] ss:$12 sps:$4 sm:$0xff]  }
  0x80   : > { %1328 = vmatprep.mubr.bf16.mxu0 %v3213_v57  ;;  %3019 = vmatprep.mubr.bf16.mxu1 %v3215_v58 }
  0x87   : > { %1329 = vmatmul.mubr.bf16.gmra.mrb[32].mxu0 %v3216_v59  ;;  %3020 = vmatmul.mubr.bf16.vlgmr.msra.gmra.mrb[32].mxu1 %v3217_v60 }
  0x88   : > { %1336 = vmatprep.mubr.bf16.mxu0 %v3218_v61  ;;  %3023 = vmatprep.mubr.bf16.mxu1 %v3220_v62 }
  0x8f   : > { %1337 = vmatmul.mubr.bf16.gmra.mrb[36].mxu0 %v3221_v63  ;;  %3024 = vmatmul.mubr.bf16.gmra.mrb[36].mxu1 %v3222_v0 }
  0x90   : > { %1344 = vmatprep.mubr.bf16.mxu0 %v3223_v1  ;;  %3027 = vmatprep.mubr.bf16.mxu1 %v3225_v2 }
  0x97   : > { %1345 = vmatmul.mubr.bf16.gmra.mrb[40].mxu0 %v3226_v3  ;;  %3028 = vmatmul.mubr.bf16.gmra.mrb[40].mxu1 %v3227_v4 }
  0x98   : > { %1352 = vmatprep.mubr.bf16.mxu0 %v3228_v5  ;;  %3031 = vmatprep.mubr.bf16.mxu1 %v3230_v6 }
  0x9f   : > { %1353 = vmatmul.mubr.bf16.gmra.mrb[44].mxu0 %v3231_v7  ;;  %3032 = vmatmul.mubr.bf16.gmra.mrb[44].mxu1 %v3232_v8 }
  0xa0   : > { %1360 = vmatprep.mubr.bf16.mxu0 %v3233_v9  ;;  %3035 = vmatprep.mubr.bf16.mxu1 %v3235_v10 }
  0xa7   : > { %1361 = vmatmul.mubr.bf16.gmra.mrb[48].mxu0 %v3236_v11  ;;  %3036 = vmatmul.mubr.bf16.gmra.mrb[48].mxu1 %v3237_v12 }
  0xa8   : > { %1368 = vmatprep.mubr.bf16.mxu0 %v3238_v13  ;;  %3039 = vmatprep.mubr.bf16.mxu1 %v3240_v14 }
  0xaf   : > { %1369 = vmatmul.mubr.bf16.gmra.mrb[52].mxu0 %v3241_v15  ;;  %3040 = vmatmul.mubr.bf16.gmra.mrb[52].mxu1 %v3242_v16 }
  0xb0   : > { %1376 = vmatprep.mubr.bf16.mxu0 %v3243_v17  ;;  %3043 = vmatprep.mubr.bf16.mxu1 %v3245_v18 }
  0xb7   : > { %1377 = vmatmul.mubr.bf16.gmra.mrb[56].mxu0 %v3246_v19  ;;  %3044 = vmatmul.mubr.bf16.gmra.mrb[56].mxu1 %v3247_v20 }
  0xb8   : > { %1384 = vmatprep.mubr.bf16.mxu0 %v3248_v21  ;;  %3047 = vmatprep.mubr.bf16.mxu1 %v3250_v22 }
  0xbf   : > { %1385 = vmatmul.mubr.bf16.gmra.mrb[60].mxu0 %v3251_v23  ;;  %3048 = vmatmul.mubr.bf16.gmra.mrb[60].mxu1 %v3252_v24 }
  0xc0   : > { %1392 = vmatprep.mubr.bf16.mxu0 %v3253_v25  ;;  %3051 = vmatprep.mubr.bf16.mxu1 %v3255_v26 }
  0xc7   : > { %1393 = vmatmul.mubr.bf16.gmra.mrb[64].mxu0 %v3256_v27  ;;  %3052 = vmatmul.mubr.bf16.gmra.mrb[64].mxu1 %v3257_v28 }
  0xc8   : > { %1400 = vmatprep.mubr.bf16.mxu0 %v3258_v29  ;;  %3055 = vmatprep.mubr.bf16.mxu1 %v3260_v30 }
  0xcf   : > { %1401 = vmatmul.mubr.bf16.gmra.mrb[68].mxu0 %v3261_v31  ;;  %3056 = vmatmul.mubr.bf16.gmra.mrb[68].mxu1 %v3262_v32 }
  0xd0   : > { %1408 = vmatprep.mubr.bf16.mxu0 %v3263_v33  ;;  %3059 = vmatprep.mubr.bf16.mxu1 %v3265_v34 }
  0xd7   : > { %1409 = vmatmul.mubr.bf16.gmra.mrb[72].mxu0 %v3266_v35  ;;  %3060 = vmatmul.mubr.bf16.gmra.mrb[72].mxu1 %v3267_v36 }
  0xd8   : > { %1416 = vmatprep.mubr.bf16.mxu0 %v3268_v37  ;;  %3063 = vmatprep.mubr.bf16.mxu1 %v3270_v38 }
  0xdf   : > { %1417 = vmatmul.mubr.bf16.gmra.mrb[76].mxu0 %v3271_v39  ;;  %3064 = vmatmul.mubr.bf16.gmra.mrb[76].mxu1 %v3272_v40 }
  0xe0   : > { %1424 = vmatprep.mubr.bf16.mxu0 %v3273_v41  ;;  %3067 = vmatprep.mubr.bf16.mxu1 %v3275_v42 }
  0xe7   : > { %1425 = vmatmul.mubr.bf16.gmra.mrb[80].mxu0 %v3276_v43  ;;  %3068 = vmatmul.mubr.bf16.gmra.mrb[80].mxu1 %v3277_v44 }
  0xe8   : > { %1432 = vmatprep.mubr.bf16.mxu0 %v3278_v45  ;;  %3071 = vmatprep.mubr.bf16.mxu1 %v3280_v46 }
  0xef   : > { %1433 = vmatmul.mubr.bf16.gmra.mrb[84].mxu0 %v3281_v47  ;;  %3072 = vmatmul.mubr.bf16.gmra.mrb[84].mxu1 %v3282_v48 }
  0xf0   : > { %1440 = vmatprep.mubr.bf16.mxu0 %v3283_v49  ;;  %3075 = vmatprep.mubr.bf16.mxu1 %v3285_v50 }
  0xf7   : > { %1441 = vmatmul.mubr.bf16.gmra.mrb[88].mxu0 %v3286_v51  ;;  %3076 = vmatmul.mubr.bf16.gmra.mrb[88].mxu1 %v3287_v52 }
  0xf8   : > { %1448 = vmatprep.mubr.bf16.mxu0 %v3288_v53  ;;  %3079 = vmatprep.mubr.bf16.mxu1 %v3290_v54 }
  0xff   : > { %1449 = vmatmul.mubr.bf16.gmra.mrb[92].mxu0 %v3291_v55  ;;  %3080 = vmatmul.mubr.bf16.gmra.mrb[92].mxu1 %v3292_v56 }
 0x11a   : > { %v3564_v57 = vpop.f32.mrb[0].mxu0  ;;  %v3566_v58 = vpop.f32.mrb[0].mxu1 }
 0x11b   : > { %v1268_v59 = vpop.f32.mrb[1].mxu0  ;;  %v1460_v60 = vpop.f32.mrb[1].mxu1 }
 0x11c   : > { %v3568_v61 = vpop.f32.mrb[2].mxu0  ;;  %v3570_v62 = vpop.f32.mrb[2].mxu1 }
 0x11d   : > { %v1271_v63 = vpop.f32.mrb[3].mxu0  ;;  %v1463_v0 = vpop.f32.mrb[3].mxu1 }
 0x122   : > { %v1274_v1 = vpop.f32.mrb[4].mxu0  ;;  %v3572_v2 = vpop.f32.mrb[4].mxu1 }
 0x123   : > { %v1276_v3 = vpop.f32.mrb[5].mxu0  ;;  %v1468_v4 = vpop.f32.mrb[5].mxu1 }
 0x124   : > { %v1277_v5 = vpop.f32.mrb[6].mxu0  ;;  %v3574_v6 = vpop.f32.mrb[6].mxu1  ;;  %v3629_v4 = vld [vmem:[%s3799_s2] ss:$0 sm:$0xff] }
 0x125   : > { %v1279_v7 = vpop.f32.mrb[7].mxu0  ;;  %v1471_v8 = vpop.f32.mrb[7].mxu1 }
 0x12a   : > { %v3576_v9 = vpop.f32.mrb[8].mxu0  ;;  %v3578_v10 = vpop.f32.mrb[8].mxu1 }
 0x12b   : > { %v1284_v11 = vpop.f32.mrb[9].mxu0  ;;  %v1476_v12 = vpop.f32.mrb[9].mxu1 }
 0x12c   : > { %v3580_v13 = vpop.f32.mrb[10].mxu0  ;;  %v3582_v14 = vpop.f32.mrb[10].mxu1 }
 0x12d   : > { %v1287_v15 = vpop.f32.mrb[11].mxu0  ;;  %v1479_v16 = vpop.f32.mrb[11].mxu1 }
 0x132   : > { %v3584_v17 = vpop.f32.mrb[12].mxu0  ;;  %v3586_v18 = vpop.f32.mrb[12].mxu1 }
 0x133   : > { %v1292_v19 = vpop.f32.mrb[13].mxu0  ;;  %v1484_v20 = vpop.f32.mrb[13].mxu1 }
 0x134   : > { %v3588_v21 = vpop.f32.mrb[14].mxu0  ;;  %v3590_v22 = vpop.f32.mrb[14].mxu1 }
 0x135   : > { %v1295_v23 = vpop.f32.mrb[15].mxu0  ;;  %v1487_v24 = vpop.f32.mrb[15].mxu1 }
 0x13a   : > { %v3592_v25 = vpop.f32.mrb[16].mxu0  ;;  %v3594_v26 = vpop.f32.mrb[16].mxu1 }
 0x13b   : > { %v1300_v27 = vpop.f32.mrb[17].mxu0  ;;  %v1492_v28 = vpop.f32.mrb[17].mxu1 }
 0x13c   : > { %v3596_v29 = vpop.f32.mrb[18].mxu0  ;;  %v3598_v30 = vpop.f32.mrb[18].mxu1 }
 0x13d   : > { %v1303_v31 = vpop.f32.mrb[19].mxu0  ;;  %v1495_v32 = vpop.f32.mrb[19].mxu1 }
 0x142   : > { %v3600_v33 = vpop.f32.mrb[20].mxu0  ;;  %v3602_v34 = vpop.f32.mrb[20].mxu1 }
 0x143   : > { %v1308_v35 = vpop.f32.mrb[21].mxu0  ;;  %v1500_v36 = vpop.f32.mrb[21].mxu1 }
 0x144   : > { %v3604_v37 = vpop.f32.mrb[22].mxu0  ;;  %v3606_v38 = vpop.f32.mrb[22].mxu1 }
 0x145   : > { %v1311_v39 = vpop.f32.mrb[23].mxu0  ;;  %v1503_v40 = vpop.f32.mrb[23].mxu1 }
 0x14a   : > { %v3608_v41 = vpop.f32.mrb[24].mxu0  ;;  %v3610_v42 = vpop.f32.mrb[24].mxu1 }
 0x14b   : > { %v1316_v43 = vpop.f32.mrb[25].mxu0  ;;  %v1508_v44 = vpop.f32.mrb[25].mxu1 }
 0x14c   : > { %v3612_v45 = vpop.f32.mrb[26].mxu0  ;;  %v3614_v46 = vpop.f32.mrb[26].mxu1 }
 0x14d   : > { %v1319_v47 = vpop.f32.mrb[27].mxu0  ;;  %v1511_v48 = vpop.f32.mrb[27].mxu1 }
 0x152   : > { %v3616_v49 = vpop.f32.mrb[28].mxu0  ;;  %v3618_v50 = vpop.f32.mrb[28].mxu1 }
 0x153   : > { %v1324_v51 = vpop.f32.mrb[29].mxu0  ;;  %v1516_v52 = vpop.f32.mrb[29].mxu1 }
 0x154   : > { %v3620_v53 = vpop.f32.mrb[30].mxu0  ;;  %v3622_v54 = vpop.f32.mrb[30].mxu1 }
 0x155   : > { %v1327_v55 = vpop.f32.mrb[31].mxu0  ;;  %v1519_v56 = vpop.f32.mrb[31].mxu1 }
 0x15a   : > { %v3624_v59 = vpop.f32.mrb[32].mxu0  ;;  %v3021_v60 = vpop.f32.mrb[32].mxu1 }
 0x15b   : > { %v1564_v63 = vadd.f32 %v3021_v60, %v1274_v1  ;;  %v1332_v0 = vpop.f32.mrb[33].mxu0  ;;  %v1555_v3 = vpop.f32.mrb[33].mxu1 }
 0x15c   : > { %v1556_v7 = vadd.f32 %v1555_v3, %v3564_v57  ;;  %v3632_v8 = vpop.f32.mrb[34].mxu0  ;;  %v3022_v11 = vpop.f32.mrb[34].mxu1 }
 0x15d   : > { %v1567_v12 = vadd.f32 %v3022_v11, %v1277_v5  ;;  %v1335_v15 = vpop.f32.mrb[35].mxu0  ;;  %v1558_v16 = vpop.f32.mrb[35].mxu1  ;;  %v2014_v1 = vadd.f32 %v3629_v4, %v1564_v63 }
 0x15e   : > { %v1559_v19 = vadd.f32 %v1558_v16, %v3568_v61  ;;  %v2012_v23 = vadd.f32 %v3629_v4, %v1556_v7 }
 0x15f   : > { %v2015_v20 = vadd.f32 %v3629_v4, %v1567_v12 }
 0x160   : > { %v2013_v57 = vadd.f32 %v3629_v4, %v1559_v19 }
 0x161   : > { %v2780_v5 = vpack.c.bf16 %v2015_v20, %v2014_v1 }
 0x162   : > { %v2775_v24 = vpack.c.bf16 %v2013_v57, %v2012_v23  ;;  %v3645_v27 = vpop.f32.mrb[36].mxu0  ;;  %v3025_v61 = vpop.f32.mrb[36].mxu1 }
 0x163   : > { %2932 = vst [vmem:[%s3642_s28 + $0x8] sm:$0xff] %v2780_v5   ;;  %v1580_v28 = vadd.f32 %v3025_v61, %v3584_v17  ;;  %v1340_v31 = vpop.f32.mrb[37].mxu0  ;;  %v1571_v32 = vpop.f32.mrb[37].mxu1 }
 0x164   : > { %2776 = vst [vmem:[%s3642_s28] sm:$0xff] %v2775_v24   ;;  %v1572_v35 = vadd.f32 %v1571_v32, %v3576_v9  ;;  %v1341_v36 = vpop.f32.mrb[38].mxu0  ;;  %v3026_v39 = vpop.f32.mrb[38].mxu1 }
 0x165   : > { %v1583_v40 = vadd.f32 %v3026_v39, %v3588_v21  ;;  %v1343_v43 = vpop.f32.mrb[39].mxu0  ;;  %v1574_v44 = vpop.f32.mrb[39].mxu1  ;;  %v2018_v48 = vadd.f32 %v3629_v4, %v1580_v28 }
 0x166   : > { %v1575_v47 = vadd.f32 %v1574_v44, %v3580_v13  ;;  %v2016_v17 = vadd.f32 %v3629_v4, %v1572_v35 }
 0x167   : > { %v2019_v51 = vadd.f32 %v3629_v4, %v1583_v40 }
 0x168   : > { %v2017_v52 = vadd.f32 %v3629_v4, %v1575_v47 }
 0x169   : > { %v2790_v55 = vpack.c.bf16 %v2019_v51, %v2018_v48 }
 0x16a   : > { %v2785_v56 = vpack.c.bf16 %v2017_v52, %v2016_v17  ;;  %v3657_v9 = vpop.f32.mrb[40].mxu0  ;;  %v3029_v60 = vpop.f32.mrb[40].mxu1 }
 0x16b   : > { %2934 = vst [vmem:[%s3642_s28 + $0x18] sm:$0xff] %v2790_v55   ;;  %v1596_v21 = vadd.f32 %v3029_v60, %v3600_v33  ;;  %v1348_v63 = vpop.f32.mrb[41].mxu0  ;;  %v1587_v0 = vpop.f32.mrb[41].mxu1 }
 0x16c   : > { %2933 = vst [vmem:[%s3642_s28 + $0x10] sm:$0xff] %v2785_v56   ;;  %v1588_v13 = vadd.f32 %v1587_v0, %v3592_v25  ;;  %v3663_v3 = vpop.f32.mrb[42].mxu0  ;;  %v3030_v7 = vpop.f32.mrb[42].mxu1 }
 0x16d   : > { %v1599_v11 = vadd.f32 %v3030_v7, %v3604_v37  ;;  %v1351_v12 = vpop.f32.mrb[43].mxu0  ;;  %v1590_v15 = vpop.f32.mrb[43].mxu1  ;;  %v2022_v19 = vadd.f32 %v3629_v4, %v1596_v21 }
 0x16e   : > { %v1591_v16 = vadd.f32 %v1590_v15, %v3596_v29  ;;  %v2020_v1 = vadd.f32 %v3629_v4, %v1588_v13 }
 0x16f   : > { %v2023_v33 = vadd.f32 %v3629_v4, %v1599_v11 }
 0x170   : > { %v2021_v20 = vadd.f32 %v3629_v4, %v1591_v16 }
 0x171   : > { %v2800_v23 = vpack.c.bf16 %v2023_v33, %v2022_v19 }
 0x172   : > { %v2795_v25 = vpack.c.bf16 %v2021_v20, %v2020_v1  ;;  %v1354_v57 = vpop.f32.mrb[44].mxu0  ;;  %v3033_v5 = vpop.f32.mrb[44].mxu1 }
 0x173   : > { %2936 = vst [vmem:[%s3642_s28 + $0x28] sm:$0xff] %v2800_v23   ;;  %v1612_v37 = vadd.f32 %v3033_v5, %v3616_v49  ;;  %v1356_v24 = vpop.f32.mrb[45].mxu0  ;;  %v1603_v61 = vpop.f32.mrb[45].mxu1 }
 0x174   : > { %2935 = vst [vmem:[%s3642_s28 + $0x20] sm:$0xff] %v2795_v25   ;;  %v1604_v29 = vadd.f32 %v1603_v61, %v3608_v41  ;;  %v1357_v28 = vpop.f32.mrb[46].mxu0  ;;  %v3034_v31 = vpop.f32.mrb[46].mxu1 }
 0x175   : > { %v1615_v32 = vadd.f32 %v3034_v31, %v3620_v53  ;;  %v1359_v35 = vpop.f32.mrb[47].mxu0  ;;  %v1606_v39 = vpop.f32.mrb[47].mxu1  ;;  %v2026_v43 = vadd.f32 %v3629_v4, %v1612_v37 }
 0x176   : > { %v1607_v40 = vadd.f32 %v1606_v39, %v3612_v45  ;;  %v2024_v49 = vadd.f32 %v3629_v4, %v1604_v29 }
 0x177   : > { %v2027_v44 = vadd.f32 %v3629_v4, %v1615_v32 }
 0x178   : > { %v2025_v47 = vadd.f32 %v3629_v4, %v1607_v40 }
 0x179   : > { %v2810_v48 = vpack.c.bf16 %v2027_v44, %v2026_v43 }
 0x17a   : > { %v2805_v51 = vpack.c.bf16 %v2025_v47, %v2024_v49  ;;  %v1362_v41 = vpop.f32.mrb[48].mxu0  ;;  %v3037_v17 = vpop.f32.mrb[48].mxu1 }
 0x17b   : > { %2938 = vst [vmem:[%s3642_s28 + $0x38] sm:$0xff] %v2810_v48   ;;  %v1628_v53 = vadd.f32 %v3037_v17, %v3645_v27  ;;  %v1364_v52 = vpop.f32.mrb[49].mxu0  ;;  %v1619_v55 = vpop.f32.mrb[49].mxu1 }
 0x17c   : > { %2937 = vst [vmem:[%s3642_s28 + $0x30] sm:$0xff] %v2805_v51   ;;  %v1620_v45 = vadd.f32 %v1619_v55, %v3624_v59  ;;  %v1365_v56 = vpop.f32.mrb[50].mxu0  ;;  %v3038_v60 = vpop.f32.mrb[50].mxu1 }
 0x17d   : > { %v1631_v21 = vadd.f32 %v3038_v60, %v1341_v36  ;;  %v1367_v63 = vpop.f32.mrb[51].mxu0  ;;  %v1622_v0 = vpop.f32.mrb[51].mxu1  ;;  %v2030_v7 = vadd.f32 %v3629_v4, %v1628_v53 }
 0x17e   : > { %v1623_v13 = vadd.f32 %v1622_v0, %v3632_v8  ;;  %v2028_v27 = vadd.f32 %v3629_v4, %v1620_v45 }
 0x17f   : > { %v2031_v11 = vadd.f32 %v3629_v4, %v1631_v21 }
 0x180   : > { %v2029_v12 = vadd.f32 %v3629_v4, %v1623_v13 }
 0x181   : > { %v2820_v15 = vpack.c.bf16 %v2031_v11, %v2030_v7 }
 0x182   : > { %v2815_v16 = vpack.c.bf16 %v2029_v12, %v2028_v27  ;;  %v1370_v19 = vpop.f32.mrb[52].mxu0  ;;  %v3041_v59 = vpop.f32.mrb[52].mxu1 }
 0x183   : > { %2940 = vst [vmem:[%s3642_s28 + $0x48] sm:$0xff] %v2820_v15   ;;  %v1644_v33 = vadd.f32 %v3041_v59, %v1354_v57  ;;  %v1372_v36 = vpop.f32.mrb[53].mxu0  ;;  %v1635_v1 = vpop.f32.mrb[53].mxu1 }
 0x184   : > { %2939 = vst [vmem:[%s3642_s28 + $0x40] sm:$0xff] %v2815_v16   ;;  %v1636_v8 = vadd.f32 %v1635_v1, %v3657_v9  ;;  %v1373_v20 = vpop.f32.mrb[54].mxu0  ;;  %v3042_v23 = vpop.f32.mrb[54].mxu1 }
 0x185   : > { %v1647_v25 = vadd.f32 %v3042_v23, %v1357_v28  ;;  %v1375_v5 = vpop.f32.mrb[55].mxu0  ;;  %v1638_v37 = vpop.f32.mrb[55].mxu1  ;;  %v2034_v61 = vadd.f32 %v3629_v4, %v1644_v33 }
 0x186   : > { %v1639_v24 = vadd.f32 %v1638_v37, %v3663_v3  ;;  %v2032_v57 = vadd.f32 %v3629_v4, %v1636_v8 }
 0x187   : > { %v2035_v29 = vadd.f32 %v3629_v4, %v1647_v25 }
 0x188   : > { %v2033_v31 = vadd.f32 %v3629_v4, %v1639_v24 }
 0x189   : > { %v2830_v32 = vpack.c.bf16 %v2035_v29, %v2034_v61 }
 0x18a   : > { %v2825_v35 = vpack.c.bf16 %v2033_v31, %v2032_v57  ;;  %v1378_v39 = vpop.f32.mrb[56].mxu0  ;;  %v3045_v9 = vpop.f32.mrb[56].mxu1 }
 0x18b   : > { %2942 = vst [vmem:[%s3642_s28 + $0x58] sm:$0xff] %v2830_v32   ;;  %v1660_v40 = vadd.f32 %v3045_v9, %v1370_v19  ;;  %v1380_v28 = vpop.f32.mrb[57].mxu0  ;;  %v1651_v43 = vpop.f32.mrb[57].mxu1 }
 0x18c   : > { %2941 = vst [vmem:[%s3642_s28 + $0x50] sm:$0xff] %v2825_v35   ;;  %v1652_v44 = vadd.f32 %v1651_v43, %v1362_v41  ;;  %v1381_v3 = vpop.f32.mrb[58].mxu0  ;;  %v3046_v49 = vpop.f32.mrb[58].mxu1 }
 0x18d   : > { %v1663_v47 = vadd.f32 %v3046_v49, %v1373_v20  ;;  %v1383_v48 = vpop.f32.mrb[59].mxu0  ;;  %v1654_v51 = vpop.f32.mrb[59].mxu1  ;;  %v2038_v53 = vadd.f32 %v3629_v4, %v1660_v40 }
 0x18e   : > { %v1655_v17 = vadd.f32 %v1654_v51, %v1365_v56  ;;  %v2036_v55 = vadd.f32 %v3629_v4, %v1652_v44 }
 0x18f   : > { %v2039_v52 = vadd.f32 %v3629_v4, %v1663_v47 }
 0x190   : > { %v2037_v45 = vadd.f32 %v3629_v4, %v1655_v17 }
 0x191   : > { %v2840_v60 = vpack.c.bf16 %v2039_v52, %v2038_v53 }
 0x192   : > { %v2835_v21 = vpack.c.bf16 %v2037_v45, %v2036_v55  ;;  %v1386_v63 = vpop.f32.mrb[60].mxu0  ;;  %v3049_v0 = vpop.f32.mrb[60].mxu1 }
 0x193   : > { %2944 = vst [vmem:[%s3642_s28 + $0x68] sm:$0xff] %v2840_v60   ;;  %v1676_v41 = vadd.f32 %v3049_v0, %v1386_v63  ;;  %v1388_v13 = vpop.f32.mrb[61].mxu0  ;;  %v1667_v7 = vpop.f32.mrb[61].mxu1 }
 0x194   : > { %2943 = vst [vmem:[%s3642_s28 + $0x60] sm:$0xff] %v2835_v21   ;;  %v1668_v11 = vadd.f32 %v1667_v7, %v1378_v39  ;;  %v1389_v56 = vpop.f32.mrb[62].mxu0  ;;  %v3050_v27 = vpop.f32.mrb[62].mxu1 }
 0x195   : > { %v1679_v12 = vadd.f32 %v3050_v27, %v1389_v56  ;;  %v1391_v15 = vpop.f32.mrb[63].mxu0  ;;  %v1670_v16 = vpop.f32.mrb[63].mxu1  ;;  %v2042_v59 = vadd.f32 %v3629_v4, %v1676_v41 }
 0x196   : > { %v1671_v19 = vadd.f32 %v1670_v16, %v1381_v3  ;;  %v2040_v36 = vadd.f32 %v3629_v4, %v1668_v11 }
 0x197   : > { %v2043_v33 = vadd.f32 %v3629_v4, %v1679_v12 }
 0x198   : > { %v2041_v1 = vadd.f32 %v3629_v4, %v1671_v19 }
 0x199   : > { %v2850_v8 = vpack.c.bf16 %v2043_v33, %v2042_v59 }
 0x19a   : > { %v2845_v20 = vpack.c.bf16 %v2041_v1, %v2040_v36  ;;  %v1394_v23 = vpop.f32.mrb[64].mxu0  ;;  %v3053_v25 = vpop.f32.mrb[64].mxu1 }
 0x19b   : > { %2946 = vst [vmem:[%s3642_s28 + $0x78] sm:$0xff] %v2850_v8   ;;  %v1396_v5 = vpop.f32.mrb[65].mxu0  ;;  %v1683_v37 = vpop.f32.mrb[65].mxu1 }
 0x19c   : > { %2945 = vst [vmem:[%s3642_s28 + $0x70] sm:$0xff] %v2845_v20   ;;  %v1684_v24 = vadd.f32 %v1683_v37, %v1394_v23  ;;  %v1397_v61 = vpop.f32.mrb[66].mxu0  ;;  %v3054_v29 = vpop.f32.mrb[66].mxu1 }
 0x19d   : > { %v1399_v57 = vpop.f32.mrb[67].mxu0  ;;  %v1686_v31 = vpop.f32.mrb[67].mxu1 }
 0x19e   : > { %v1687_v32 = vadd.f32 %v1686_v31, %v1397_v61  ;;  %v2044_v35 = vadd.f32 %v3629_v4, %v1684_v24 }
 0x1a0   : > { %v2045_v39 = vadd.f32 %v3629_v4, %v1687_v32 }
 0x1a2   : > { %v2855_v9 = vpack.c.bf16 %v2045_v39, %v2044_v35  ;;  %v1402_v40 = vpop.f32.mrb[68].mxu0  ;;  %v3057_v28 = vpop.f32.mrb[68].mxu1 }
 0x1a3   : > { %v1692_v43 = vadd.f32 %v3053_v25, %v1402_v40  ;;  %v1404_v44 = vpop.f32.mrb[69].mxu0  ;;  %v1699_v3 = vpop.f32.mrb[69].mxu1 }
 0x1a4   : > { %2947 = vst [vmem:[%s3642_s28 + $0x80] sm:$0xff] %v2855_v9   ;;  %v1405_v49 = vpop.f32.mrb[70].mxu0  ;;  %v3058_v47 = vpop.f32.mrb[70].mxu1 }
 0x1a5   : > { %v1695_v48 = vadd.f32 %v3054_v29, %v1405_v49  ;;  %v1407_v51 = vpop.f32.mrb[71].mxu0  ;;  %v1702_v17 = vpop.f32.mrb[71].mxu1  ;;  %v2046_v53 = vadd.f32 %v3629_v4, %v1692_v43 }
 0x1a7   : > { %v2047_v52 = vadd.f32 %v3629_v4, %v1695_v48 }
 0x1a9   : > { %v2860_v55 = vpack.c.bf16 %v2047_v52, %v2046_v53 }
 0x1aa   : > { %v1410_v45 = vpop.f32.mrb[72].mxu0  ;;  %v3061_v60 = vpop.f32.mrb[72].mxu1 }
 0x1ab   : > { %2948 = vst [vmem:[%s3642_s28 + $0x88] sm:$0xff] %v2860_v55   ;;  %v1700_v21 = vadd.f32 %v1699_v3, %v1410_v45  ;;  %v1412_v63 = vpop.f32.mrb[73].mxu0  ;;  %v1715_v0 = vpop.f32.mrb[73].mxu1 }
 0x1ac   : > { %v1413_v41 = vpop.f32.mrb[74].mxu0  ;;  %v3062_v13 = vpop.f32.mrb[74].mxu1 }
 0x1ad   : > { %v1703_v7 = vadd.f32 %v1702_v17, %v1413_v41  ;;  %v1415_v11 = vpop.f32.mrb[75].mxu0  ;;  %v1718_v56 = vpop.f32.mrb[75].mxu1  ;;  %v2048_v27 = vadd.f32 %v3629_v4, %v1700_v21 }
 0x1af   : > { %v2049_v12 = vadd.f32 %v3629_v4, %v1703_v7 }
 0x1b1   : > { %v2865_v15 = vpack.c.bf16 %v2049_v12, %v2048_v27 }
 0x1b2   : > { %v1418_v16 = vpop.f32.mrb[76].mxu0  ;;  %v3720_v19 = vpop.f32.mrb[76].mxu1 }
 0x1b3   : > { %2949 = vst [vmem:[%s3642_s28 + $0x90] sm:$0xff] %v2865_v15   ;;  %v1708_v59 = vadd.f32 %v3057_v28, %v1418_v16  ;;  %v1420_v33 = vpop.f32.mrb[77].mxu0  ;;  %v3723_v36 = vpop.f32.mrb[77].mxu1 }
 0x1b4   : > { %v1421_v1 = vpop.f32.mrb[78].mxu0  ;;  %v3725_v8 = vpop.f32.mrb[78].mxu1 }
 0x1b5   : > { %v1711_v20 = vadd.f32 %v3058_v47, %v1421_v1  ;;  %v1423_v23 = vpop.f32.mrb[79].mxu0  ;;  %v3727_v25 = vpop.f32.mrb[79].mxu1  ;;  %v2050_v5 = vadd.f32 %v3629_v4, %v1708_v59 }
 0x1b7   : > { %v2051_v37 = vadd.f32 %v3629_v4, %v1711_v20 }
 0x1b9   : > { %v2870_v24 = vpack.c.bf16 %v2051_v37, %v2050_v5 }
 0x1ba   : > { %v1426_v61 = vpop.f32.mrb[80].mxu0  ;;  %v3069_v29 = vpop.f32.mrb[80].mxu1 }
 0x1bb   : > { %2950 = vst [vmem:[%s3642_s28 + $0x98] sm:$0xff] %v2870_v24   ;;  %v1716_v57 = vadd.f32 %v1715_v0, %v1426_v61  ;;  %v1756_v31 = vadd.f32 %v3069_v29, %v3572_v2  ;;  %v1428_v32 = vpop.f32.mrb[81].mxu0  ;;  %v1747_v35 = vpop.f32.mrb[81].mxu1 }
 0x1bc   : > { %v1748_v39 = vadd.f32 %v1747_v35, %v3566_v58  ;;  %v1429_v9 = vpop.f32.mrb[82].mxu0  ;;  %v3070_v40 = vpop.f32.mrb[82].mxu1 }
 0x1bd   : > { %v1719_v28 = vadd.f32 %v1718_v56, %v1429_v9  ;;  %v1759_v43 = vadd.f32 %v3070_v40, %v3574_v6  ;;  %v1431_v44 = vpop.f32.mrb[83].mxu0  ;;  %v1750_v3 = vpop.f32.mrb[83].mxu1  ;;  %v2052_v47 = vadd.f32 %v3629_v4, %v1716_v57  ;;  %v2062_v48 = vadd.f32 %v3629_v4, %v1756_v31 }
 0x1be   : > { %v1751_v49 = vadd.f32 %v1750_v3, %v3570_v62  ;;  %v2060_v51 = vadd.f32 %v3629_v4, %v1748_v39 }
 0x1bf   : > { %v2053_v2 = vadd.f32 %v3629_v4, %v1719_v28  ;;  %v2063_v58 = vadd.f32 %v3629_v4, %v1759_v43 }
 0x1c0   : > { %v2061_v17 = vadd.f32 %v3629_v4, %v1751_v49 }
 0x1c1   : > { %v2875_v53 = vpack.c.bf16 %v2053_v2, %v2052_v47  ;;  %v2900_v6 = vpack.c.bf16 %v2063_v58, %v2062_v48 }
 0x1c2   : > { %v2895_v52 = vpack.c.bf16 %v2061_v17, %v2060_v51  ;;  %v1434_v55 = vpop.f32.mrb[84].mxu0  ;;  %v3073_v45 = vpop.f32.mrb[84].mxu1 }
 0x1c3   : > { %2951 = vst [vmem:[%s3642_s28 + $0xa0] sm:$0xff] %v2875_v53   ;;  %2956 = vst [vmem:[%s3642_s28 + $0xc8] sm:$0xff] %v2900_v6   ;;  %v1724_v62 = vadd.f32 %v3061_v60, %v1434_v55  ;;  %v1772_v21 = vadd.f32 %v3073_v45, %v3586_v18  ;;  %v1436_v63 = vpop.f32.mrb[85].mxu0  ;;  %v1763_v0 = vpop.f32.mrb[85].mxu1 }
 0x1c4   : > { %2955 = vst [vmem:[%s3642_s28 + $0xc0] sm:$0xff] %v2895_v52   ;;  %v1764_v41 = vadd.f32 %v1763_v0, %v3578_v10  ;;  %v1437_v7 = vpop.f32.mrb[86].mxu0  ;;  %v3074_v11 = vpop.f32.mrb[86].mxu1 }
 0x1c5   : > { %v1727_v56 = vadd.f32 %v3062_v13, %v1437_v7  ;;  %v1775_v27 = vadd.f32 %v3074_v11, %v3590_v22  ;;  %v1439_v12 = vpop.f32.mrb[87].mxu0  ;;  %v1766_v15 = vpop.f32.mrb[87].mxu1  ;;  %v2054_v60 = vadd.f32 %v3629_v4, %v1724_v62  ;;  %v2066_v18 = vadd.f32 %v3629_v4, %v1772_v21 }
 0x1c6   : > { %v1767_v16 = vadd.f32 %v1766_v15, %v3582_v14  ;;  %v2064_v33 = vadd.f32 %v3629_v4, %v1764_v41 }
 0x1c7   : > { %v2055_v59 = vadd.f32 %v3629_v4, %v1727_v56  ;;  %v2067_v10 = vadd.f32 %v3629_v4, %v1775_v27 }
 0x1c8   : > { %v2065_v13 = vadd.f32 %v3629_v4, %v1767_v16 }
 0x1c9   : > { %v2880_v1 = vpack.c.bf16 %v2055_v59, %v2054_v60  ;;  %v2910_v22 = vpack.c.bf16 %v2067_v10, %v2066_v18 }
 0x1ca   : > { %v2905_v20 = vpack.c.bf16 %v2065_v13, %v2064_v33  ;;  %v1442_v23 = vpop.f32.mrb[88].mxu0  ;;  %v3077_v5 = vpop.f32.mrb[88].mxu1 }
 0x1cb   : > { %2952 = vst [vmem:[%s3642_s28 + $0xa8] sm:$0xff] %v2880_v1   ;;  %2958 = vst [vmem:[%s3642_s28 + $0xd8] sm:$0xff] %v2910_v22   ;;  %v1732_v14 = vadd.f32 %v3723_v36, %v1442_v23  ;;  %v1788_v37 = vadd.f32 %v3077_v5, %v3602_v34  ;;  %v1444_v24 = vpop.f32.mrb[89].mxu0  ;;  %v1779_v61 = vpop.f32.mrb[89].mxu1 }
 0x1cc   : > { %2957 = vst [vmem:[%s3642_s28 + $0xd0] sm:$0xff] %v2905_v20   ;;  %v1780_v29 = vadd.f32 %v1779_v61, %v3594_v26  ;;  %v1445_v57 = vpop.f32.mrb[90].mxu0  ;;  %v3078_v31 = vpop.f32.mrb[90].mxu1 }
 0x1cd   : > { %v1735_v32 = vadd.f32 %v3727_v25, %v1445_v57  ;;  %v1791_v35 = vadd.f32 %v3078_v31, %v3606_v38  ;;  %v1447_v39 = vpop.f32.mrb[91].mxu0  ;;  %v1782_v9 = vpop.f32.mrb[91].mxu1  ;;  %v2056_v36 = vadd.f32 %v3629_v4, %v1732_v14  ;;  %v2070_v34 = vadd.f32 %v3629_v4, %v1788_v37 }
 0x1ce   : > { %v1783_v40 = vadd.f32 %v1782_v9, %v3598_v30  ;;  %v2068_v43 = vadd.f32 %v3629_v4, %v1780_v29 }
 0x1cf   : > { %v2057_v28 = vadd.f32 %v3629_v4, %v1735_v32  ;;  %v2071_v26 = vadd.f32 %v3629_v4, %v1791_v35 }
 0x1d0   : > { %v2069_v25 = vadd.f32 %v3629_v4, %v1783_v40 }
 0x1d1   : > { %v2885_v44 = vpack.c.bf16 %v2057_v28, %v2056_v36  ;;  %v2920_v38 = vpack.c.bf16 %v2071_v26, %v2070_v34 }
 0x1d2   : > { %v2915_v3 = vpack.c.bf16 %v2069_v25, %v2068_v43  ;;  %v1450_v49 = vpop.f32.mrb[92].mxu0  ;;  %v3081_v47 = vpop.f32.mrb[92].mxu1 }
 0x1d3   : > { %2953 = vst [vmem:[%s3642_s28 + $0xb0] sm:$0xff] %v2885_v44   ;;  %2960 = vst [vmem:[%s3642_s28 + $0xe8] sm:$0xff] %v2920_v38   ;;  %v1740_v30 = vadd.f32 %v3720_v19, %v1450_v49  ;;  %v1804_v48 = vadd.f32 %v3081_v47, %v3618_v50  ;;  %v1452_v2 = vpop.f32.mrb[93].mxu0  ;;  %v1795_v58 = vpop.f32.mrb[93].mxu1 }
 0x1d4   : > { %2959 = vst [vmem:[%s3642_s28 + $0xe0] sm:$0xff] %v2915_v3   ;;  %v1796_v51 = vadd.f32 %v1795_v58, %v3610_v42  ;;  %v1453_v17 = vpop.f32.mrb[94].mxu0  ;;  %v3082_v53 = vpop.f32.mrb[94].mxu1 }
 0x1d5   : > { %v1743_v6 = vadd.f32 %v3725_v8, %v1453_v17  ;;  %v1807_v52 = vadd.f32 %v3082_v53, %v3622_v54  ;;  %v1455_v55 = vpop.f32.mrb[95].mxu0  ;;  %v1798_v45 = vpop.f32.mrb[95].mxu1  ;;  %v2058_v50 = vadd.f32 %v3629_v4, %v1740_v30  ;;  %v2074_v62 = vadd.f32 %v3629_v4, %v1804_v48 }
 0x1d6   : > { %v1799_v19 = vadd.f32 %v1798_v45, %v3614_v46  ;;  %v2072_v63 = vadd.f32 %v3629_v4, %v1796_v51 }
 0x1d7   : > { %v2059_v21 = vadd.f32 %v3629_v4, %v1743_v6  ;;  %v2075_v42 = vadd.f32 %v3629_v4, %v1807_v52 }
 0x1d8   : > { %v2073_v0 = vadd.f32 %v3629_v4, %v1799_v19 }
 0x1d9   : > { %v2890_v8 = vpack.c.bf16 %v2059_v21, %v2058_v50  ;;  %v2930_v41 = vpack.c.bf16 %v2075_v42, %v2074_v62 }
 0x1da   : > { %v2925_v7 = vpack.c.bf16 %v2073_v0, %v2072_v63 }
 0x1db   : > { %2954 = vst [vmem:[%s3642_s28 + $0xb8] sm:$0xff] %v2890_v8   ;;  %2962 = vst [vmem:[%s3642_s28 + $0xf8] sm:$0xff] %v2930_v41  }
 0x1dc   : > { %2961 = vst [vmem:[%s3642_s28 + $0xf0] sm:$0xff] %v2925_v7  }
 0x1dd PF: > { %s13_s14 = sadd.s32 1, %s3315_s14   ;;  %s3801_s12 = smov %s3311_s13 }
 0x1de   : > { %p10_p5 = scmp.ge.s32.totalorder %s13_s14, 6   ;;  %s3802_s13 = smov %s3804_s15 }
 0x1e0   :  { %12 = sbr.rel (!%p10_p5) target bundleno = 2 (0x2), region = 76 }

// kernel: _lambda_.31
= control target key start
LH: loop header
LB: loop body
LE: loop exit
PB: predicated region body
PF: predicated region fallthrough
CT: control target
= control target key end

     0   :  { %s2184_s12 = smov 0   ;;  %s2186_s13 = smov 0   ;;  %s2422_s0 = inlined_call_operand.vmem [shape: bf16[512,384], index: 0, kind: input, shape index: {}]   ;;  %s2423_s1 = inlined_call_operand.vmem [shape: bf16[384,128], index: 1, kind: input, shape index: {}]   ;;  %s2424_s2 = inlined_call_operand.vmem [shape: f32[1,128], index: 2, kind: input, shape index: {}]   ;;  %s2425_s3 = inlined_call_operand.vmem [shape: bf16[512,128], index: 3, kind: output, shape index: {}]  }
   0x1   :  { %s2188_s14 = smov 0  }
   0x2 LB: > { %s32_s15 = sadd.s32 1, %s2158_s13  ;;  %p1588_p0 = scmp.ge.s32.totalorder %s2162_s14, 1  ;;  %s2162_s14 = sphi %s2188_s14, %s13_s14   ;;  %s2158_s13 = sphi %s2186_s13, %s2427_s13   ;;  %s2154_s12 = sphi %s2184_s12, %s2426_s12  }
   0x3   : > { %p34_p1 = scmp.ge.s32.totalorder %s32_s15, 2  ;;  %p191_p2 = scmp.lt.s32.totalorder %s2162_s14, 3 }
   0x5   : > { %s2429_s15 = smov (%p34_p1, %s32_s15), 0  ;;  %p192_p3 = pnand %p1588_p0, %p191_p2 }
   0x6   : > { %v2052_v0 = vld [vmem:[%s2423_s1 + $0x40] sm:$0xff] (!%p192_p3)   ;;  %s1589_s18 = sshll.u32 (!%p192_p3), %s2154_s12, 5  ;;  %v2054_v2 = vld [vmem:[%s2423_s1 + $0x48] sm:$0xff] (!%p192_p3)   ;;  %v2056_v4 = vld [vmem:[%s2423_s1 + $0x50] sm:$0xff] (!%p192_p3)  }
   0x7   : > { %195 = sbr.rel (%p192_p3) target bundleno = 351 (0x15f), region = 32  ;;  %v2053_v1 = vld [vmem:[%s2423_s1] sm:$0xff] (!%p192_p3)   ;;  %1827 = vmatprep.subr.bf16.mxu0 (!%p192_p3), %v2052_v0  ;;  %2011 = vmatprep.subr.bf16.mxu1 (!%p192_p3), %v2052_v0  ;;  %p236_p4 = scmp.lt.s32.totalorder (!%p192_p3), %s1589_s18, 63  ;;  %v2055_v3 = vld [vmem:[%s2423_s1 + $0x8] sm:$0xff] (!%p192_p3)   ;;  %v2057_v5 = vld [vmem:[%s2423_s1 + $0x10] sm:$0xff] (!%p192_p3)  }
   0x8   : > { %1828 = vmatpush3.bf16.msra.mxu0 (!%p192_p3), %v2053_v1  ;;  %2019 = vmatpush3.bf16.msra.mxu1 (!%p192_p3), %v2053_v1  ;;  %v2058_v6 = vld [vmem:[%s2423_s1 + $0x58] sm:$0xff] (!%p192_p3)   ;;  %v2060_v8 = vld [vmem:[%s2423_s1 + $0x60] sm:$0xff] (!%p192_p3)   ;;  %v2062_v10 = vld [vmem:[%s2423_s1 + $0x68] sm:$0xff] (!%p192_p3)  }
   0x9   : > { %1829 = vmatprep.subr.bf16.mxu0 (!%p192_p3), %v2054_v2  ;;  %2012 = vmatprep.subr.bf16.mxu1 (!%p192_p3), %v2054_v2  ;;  %v2059_v7 = vld [vmem:[%s2423_s1 + $0x18] sm:$0xff] (!%p192_p3)   ;;  %v2061_v9 = vld [vmem:[%s2423_s1 + $0x20] sm:$0xff] (!%p192_p3)   ;;  %v2063_v13 = vld [vmem:[%s2423_s1 + $0x28] sm:$0xff] (!%p192_p3)  }
   0xa   : > { %v2064_v14 = vld [vmem:[%s2423_s1 + $0x70] sm:$0xff] (!%p192_p3)   ;;  %v2066_v16 = vld [vmem:[%s2423_s1 + $0x78] sm:$0xff] (!%p192_p3)   ;;  %v2074_v18 = vld [vmem:[%s2423_s1 + $0x80] sm:$0xff] (!%p192_p3)  }
   0xb   : > { %v2065_v15 = vld [vmem:[%s2423_s1 + $0x30] sm:$0xff] (!%p192_p3)   ;;  %v2067_v17 = vld [vmem:[%s2423_s1 + $0x38] sm:$0xff] (!%p192_p3)   ;;  %v2075_v22 = vld [vmem:[%s2423_s1 + $0x88] sm:$0xff] (!%p192_p3)  }
   0xc   : > { %1830 = vmatpush3.bf16.msra.mxu0 (!%p192_p3), %v2055_v3  ;;  %2020 = vmatpush3.bf16.msra.mxu1 (!%p192_p3), %v2055_v3  ;;  %v2082_v25 = vld [vmem:[%s2423_s1 + $0x90] sm:$0xff] (!%p192_p3)   ;;  %v2083_v27 = vld [vmem:[%s2423_s1 + $0x98] sm:$0xff] (!%p192_p3)   ;;  %v2090_v30 = vld [vmem:[%s2423_s1 + $0xa0] sm:$0xff] (!%p192_p3)  }
   0xd   : > { %1831 = vmatprep.subr.bf16.mxu0 (!%p192_p3), %v2056_v4  ;;  %2013 = vmatprep.subr.bf16.mxu1 (!%p192_p3), %v2056_v4  ;;  %v2091_v33 = vld [vmem:[%s2423_s1 + $0xa8] sm:$0xff] (!%p192_p3)   ;;  %v2098_v36 = vld [vmem:[%s2423_s1 + $0xb0] sm:$0xff] (!%p192_p3)   ;;  %v2099_v40 = vld [vmem:[%s2423_s1 + $0xb8] sm:$0xff] (!%p192_p3)  }
   0xe   : > { %s2431_s18 = smov (!%p236_p4, %s1589_s18), 63 }
   0xf   : > { %s2027_s4 = smul.u32 12, %s2431_s18  ;;  %s1592_s25 = sshll.u32 %s2431_s18, 2 }
  0x10   : > { %1832 = vmatpush3.bf16.msra.mxu0 %v2057_v5  ;;  %2021 = vmatpush3.bf16.msra.mxu1 %v2057_v5  ;;  %s2358_s28 = scalar_lea.vmem %s2425_s3, %s1592_s25 }
  0x11   : > { %1833 = vmatprep.subr.bf16.mxu0 %v2058_v6  ;;  %2014 = vmatprep.subr.bf16.mxu1 %v2058_v6  ;;  %s2235_s11 = scalar_lea.vmem %s2422_s0, %s2027_s4 }
  0x12   : > { %v2070_v11 = vld [vmem:[%s2235_s11 + $0x4] ss:$12 sps:$4 sm:$0xff]   ;;  %v2068_v19 = vld [vmem:[%s2235_s11] ss:$12 sps:$4 sm:$0xff]   ;;  %v2076_v21 = vld [vmem:[%s2235_s11 + $0x1c] ss:$12 sps:$4 sm:$0xff]  }
  0x13   : > { %v2073_v12 = vld [vmem:[%s2235_s11 + $0x124] ss:$12 sps:$4 sm:$0xff]   ;;  %880 = vmatprep.mubr.bf16.mxu0 %v2070_v11  ;;  %v2071_v20 = vld [vmem:[%s2235_s11 + $0x120] ss:$12 sps:$4 sm:$0xff]   ;;  %v2078_v23 = vld [vmem:[%s2235_s11 + $0x13c] ss:$12 sps:$4 sm:$0xff]  }
  0x14   : > { %1834 = vmatpush3.bf16.msra.mxu0 %v2059_v7  ;;  %2022 = vmatpush3.bf16.msra.mxu1 %v2059_v7  ;;  %v2080_v24 = vld [vmem:[%s2235_s11 + $0x18] ss:$12 sps:$4 sm:$0xff]   ;;  %v2084_v28 = vld [vmem:[%s2235_s11 + $0x34] ss:$12 sps:$4 sm:$0xff]   ;;  %v2088_v31 = vld [vmem:[%s2235_s11 + $0x30] ss:$12 sps:$4 sm:$0xff]  }
  0x15   : > { %1835 = vmatprep.subr.bf16.mxu0 %v2060_v8  ;;  %2015 = vmatprep.subr.bf16.mxu1 %v2060_v8  ;;  %v2081_v26 = vld [vmem:[%s2235_s11 + $0x138] ss:$12 sps:$4 sm:$0xff]   ;;  %v2086_v29 = vld [vmem:[%s2235_s11 + $0x154] ss:$12 sps:$4 sm:$0xff]   ;;  %v2089_v32 = vld [vmem:[%s2235_s11 + $0x150] ss:$12 sps:$4 sm:$0xff]  }
  0x16   : > { %976 = vmatprep.mubr.bf16.mxu1 %v2073_v12  ;;  %v2092_v34 = vld [vmem:[%s2235_s11 + $0x4c] ss:$12 sps:$4 sm:$0xff]   ;;  %v2096_v37 = vld [vmem:[%s2235_s11 + $0x48] ss:$12 sps:$4 sm:$0xff]   ;;  %v2100_v39 = vld [vmem:[%s2235_s11 + $0x64] ss:$12 sps:$4 sm:$0xff]  }
  0x17   : > { %v2094_v35 = vld [vmem:[%s2235_s11 + $0x16c] ss:$12 sps:$4 sm:$0xff]   ;;  %v2097_v38 = vld [vmem:[%s2235_s11 + $0x168] ss:$12 sps:$4 sm:$0xff]   ;;  %v2109_v47 = vld [vmem:[%s2235_s11 + $0x50] ss:$12 sps:$4 sm:$0xff]  }
  0x18   : > { %1836 = vmatpush3.bf16.msra.mxu0 %v2061_v9  ;;  %2023 = vmatpush3.bf16.msra.mxu1 %v2061_v9  ;;  %v2102_v41 = vld [vmem:[%s2235_s11 + $0x8] ss:$12 sps:$4 sm:$0xff]   ;;  %v2103_v42 = vld [vmem:[%s2235_s11 + $0x60] ss:$12 sps:$4 sm:$0xff]   ;;  %v2107_v45 = vld [vmem:[%s2235_s11 + $0x38] ss:$12 sps:$4 sm:$0xff]  }
  0x19   : > { %1837 = vmatprep.subr.bf16.mxu0 %v2062_v10  ;;  %2016 = vmatprep.subr.bf16.mxu1 %v2062_v10  ;;  %v2104_v43 = vld [vmem:[%s2235_s11 + $0x20] ss:$12 sps:$4 sm:$0xff]   ;;  %v2105_v44 = vld [vmem:[%s2235_s11 + $0x7c] ss:$12 sps:$4 sm:$0xff]   ;;  %v2108_v46 = vld [vmem:[%s2235_s11 + $0x78] ss:$12 sps:$4 sm:$0xff]  }
  0x1a   : > { %v2110_v48 = vld [vmem:[%s2235_s11 + $0x94] ss:$12 sps:$4 sm:$0xff]   ;;  %v2113_v50 = vld [vmem:[%s2235_s11 + $0x90] ss:$12 sps:$4 sm:$0xff]   ;;  %v2115_v52 = vld [vmem:[%s2235_s11 + $0xac] ss:$12 sps:$4 sm:$0xff]  }
  0x1b   : > { %v2112_v49 = vld [vmem:[%s2235_s11 + $0x68] ss:$12 sps:$4 sm:$0xff]   ;;  %v2114_v51 = vld [vmem:[%s2235_s11 + $0x80] ss:$12 sps:$4 sm:$0xff]   ;;  %v2117_v53 = vld [vmem:[%s2235_s11 + $0x98] ss:$12 sps:$4 sm:$0xff]  }
  0x1c   : > { %1838 = vmatpush3.bf16.msra.mxu0 %v2063_v13  ;;  %2024 = vmatpush3.bf16.msra.mxu1 %v2063_v13  ;;  %v2118_v54 = vld [vmem:[%s2235_s11 + $0xa8] ss:$12 sps:$4 sm:$0xff]   ;;  %v2119_v55 = vld [vmem:[%s2235_s11 + $0xb0] ss:$12 sps:$4 sm:$0xff]   ;;  %v2123_v58 = vld [vmem:[%s2235_s11 + $0xc0] ss:$12 sps:$4 sm:$0xff]  }
  0x1d   : > { %1839 = vmatprep.subr.bf16.mxu0 %v2064_v14  ;;  %2017 = vmatprep.subr.bf16.mxu1 %v2064_v14  ;;  %v2120_v56 = vld [vmem:[%s2235_s11 + $0xc4] ss:$12 sps:$4 sm:$0xff]   ;;  %v2122_v57 = vld [vmem:[%s2235_s11 + $0xc8] ss:$12 sps:$4 sm:$0xff]   ;;  %v2124_v59 = vld [vmem:[%s2235_s11 + $0xe0] ss:$12 sps:$4 sm:$0xff]  }
  0x1e   : > { %v2125_v60 = vld [vmem:[%s2235_s11 + $0xdc] ss:$12 sps:$4 sm:$0xff]   ;;  %v2127_v61 = vld [vmem:[%s2235_s11 + $0xf8] ss:$12 sps:$4 sm:$0xff]   ;;  %v2130_v0 = vld [vmem:[%s2235_s11 + $0xf4] ss:$12 sps:$4 sm:$0xff]  }
  0x1f   : > { %v2128_v62 = vld [vmem:[%s2235_s11 + $0xd8] ss:$12 sps:$4 sm:$0xff]   ;;  %v2129_v63 = vld [vmem:[%s2235_s11 + $0x110] ss:$12 sps:$4 sm:$0xff]   ;;  %v2132_v1 = vld [vmem:[%s2235_s11 + $0x128] ss:$12 sps:$4 sm:$0xff]  }
  0x20   : > { %1840 = vmatpush3.bf16.msra.mxu0 %v2065_v15  ;;  %2025 = vmatpush3.bf16.msra.mxu1 %v2065_v15  ;;  %v2133_v2 = vld [vmem:[%s2235_s11 + $0xf0] ss:$12 sps:$4 sm:$0xff]   ;;  %v2134_v3 = vld [vmem:[%s2235_s11 + $0x140] ss:$12 sps:$4 sm:$0xff]   ;;  %v2137_v5 = vld [vmem:[%s2235_s11 + $0x158] ss:$12 sps:$4 sm:$0xff]  }
  0x21   : > { %1841 = vmatprep.subr.bf16.mxu0 %v2066_v16  ;;  %2018 = vmatprep.subr.bf16.mxu1 %v2066_v16  ;;  %v2135_v4 = vld [vmem:[%s2235_s11 + $0x10c] ss:$12 sps:$4 sm:$0xff]   ;;  %v2138_v6 = vld [vmem:[%s2235_s11 + $0x108] ss:$12 sps:$4 sm:$0xff]   ;;  %v2139_v7 = vld [vmem:[%s2235_s11 + $0x170] ss:$12 sps:$4 sm:$0xff]  }
  0x24   : > { %1842 = vmatpush3.bf16.msra.mxu0 %v2067_v17  ;;  %2026 = vmatpush3.bf16.msra.mxu1 %v2067_v17 }
  0x25   : > { %1963 = vmatprep.subr.bf16.mxu1 %v2074_v18 }
  0x27   : > { %881 = vmatmul.mubr.bf16.vlgmr.msra.gmra.mrb[0].mxu0 %v2068_v19  ;;  %977 = vmatmul.mubr.bf16.vlgmr.msra.gmra.mrb[0].mxu1 %v2071_v20 }
  0x28   : > { %1964 = vmatpush3.bf16.msra.mxu1 %v2074_v18  ;;  %888 = vmatprep.mubr.bf16.mxu0 %v2076_v21 }
  0x29   : > { %1965 = vmatprep.subr.bf16.mxu1 %v2075_v22  ;;  %984 = vmatprep.mubr.bf16.mxu1 %v2078_v23 }
  0x2c   : > { %1966 = vmatpush3.bf16.msra.mxu1 %v2075_v22 }
  0x2d   : > { %1967 = vmatprep.subr.bf16.mxu1 %v2082_v25 }
  0x2f   : > { %889 = vmatmul.mubr.bf16.gmra.mrb[4].mxu0 %v2080_v24  ;;  %985 = vmatmul.mubr.bf16.gmra.mrb[4].mxu1 %v2081_v26 }
  0x30   : > { %1968 = vmatpush3.bf16.msra.mxu1 %v2082_v25  ;;  %896 = vmatprep.mubr.bf16.mxu0 %v2084_v28 }
  0x31   : > { %1969 = vmatprep.subr.bf16.mxu1 %v2083_v27  ;;  %992 = vmatprep.mubr.bf16.mxu1 %v2086_v29 }
  0x34   : > { %1970 = vmatpush3.bf16.msra.mxu1 %v2083_v27 }
  0x35   : > { %1971 = vmatprep.subr.bf16.mxu1 %v2090_v30 }
  0x37   : > { %897 = vmatmul.mubr.bf16.gmra.mrb[8].mxu0 %v2088_v31  ;;  %993 = vmatmul.mubr.bf16.gmra.mrb[8].mxu1 %v2089_v32 }
  0x38   : > { %1972 = vmatpush3.bf16.msra.mxu1 %v2090_v30  ;;  %904 = vmatprep.mubr.bf16.mxu0 %v2092_v34 }
  0x39   : > { %1973 = vmatprep.subr.bf16.mxu1 %v2091_v33  ;;  %1000 = vmatprep.mubr.bf16.mxu1 %v2094_v35 }
  0x3c   : > { %1974 = vmatpush3.bf16.msra.mxu1 %v2091_v33 }
  0x3d   : > { %1975 = vmatprep.subr.bf16.mxu1 %v2098_v36 }
  0x3f   : > { %905 = vmatmul.mubr.bf16.gmra.mrb[12].mxu0 %v2096_v37  ;;  %1001 = vmatmul.mubr.bf16.gmra.mrb[12].mxu1 %v2097_v38 }
  0x40   : > { %1976 = vmatpush3.bf16.msra.mxu1 %v2098_v36  ;;  %912 = vmatprep.mubr.bf16.mxu0 %v2100_v39 }
  0x41   : > { %1977 = vmatprep.subr.bf16.mxu1 %v2099_v40  ;;  %1979 = vmatprep.mubr.bf16.mxu1 %v2102_v41 }
  0x44   : > { %1978 = vmatpush3.bf16.msra.mxu1 %v2099_v40 }
  0x47   : > { %913 = vmatmul.mubr.bf16.gmra.mrb[16].mxu0 %v2103_v42  ;;  %1980 = vmatmul.mubr.bf16.vlgmr.msra.gmra.mrb[16].mxu1 %v2104_v43 }
  0x48   : > { %920 = vmatprep.mubr.bf16.mxu0 %v2105_v44  ;;  %1983 = vmatprep.mubr.bf16.mxu1 %v2107_v45 }
  0x4f   : > { %921 = vmatmul.mubr.bf16.gmra.mrb[20].mxu0 %v2108_v46  ;;  %1984 = vmatmul.mubr.bf16.gmra.mrb[20].mxu1 %v2109_v47 }
  0x50   : > { %928 = vmatprep.mubr.bf16.mxu0 %v2110_v48  ;;  %1987 = vmatprep.mubr.bf16.mxu1 %v2112_v49 }
  0x57   : > { %929 = vmatmul.mubr.bf16.gmra.mrb[24].mxu0 %v2113_v50  ;;  %1988 = vmatmul.mubr.bf16.gmra.mrb[24].mxu1 %v2114_v51 }
  0x58   : > { %936 = vmatprep.mubr.bf16.mxu0 %v2115_v52  ;;  %1991 = vmatprep.mubr.bf16.mxu1 %v2117_v53 }
  0x5f   : > { %937 = vmatmul.mubr.bf16.gmra.mrb[28].mxu0 %v2118_v54  ;;  %1992 = vmatmul.mubr.bf16.gmra.mrb[28].mxu1 %v2119_v55 }
  0x60   : > { %944 = vmatprep.mubr.bf16.mxu0 %v2120_v56  ;;  %1995 = vmatprep.mubr.bf16.mxu1 %v2122_v57 }
  0x67   : > { %945 = vmatmul.mubr.bf16.gmra.mrb[32].mxu0 %v2123_v58  ;;  %1996 = vmatmul.mubr.bf16.gmra.mrb[32].mxu1 %v2124_v59 }
  0x68   : > { %952 = vmatprep.mubr.bf16.mxu0 %v2125_v60  ;;  %1999 = vmatprep.mubr.bf16.mxu1 %v2127_v61  ;;  %v2349_v61 = vld [vmem:[%s2424_s2] ss:$0 sm:$0xff] }
  0x6f   : > { %953 = vmatmul.mubr.bf16.gmra.mrb[36].mxu0 %v2128_v62  ;;  %2000 = vmatmul.mubr.bf16.gmra.mrb[36].mxu1 %v2129_v63 }
  0x70   : > { %960 = vmatprep.mubr.bf16.mxu0 %v2130_v0  ;;  %2003 = vmatprep.mubr.bf16.mxu1 %v2132_v1 }
  0x77   : > { %961 = vmatmul.mubr.bf16.gmra.mrb[40].mxu0 %v2133_v2  ;;  %2004 = vmatmul.mubr.bf16.gmra.mrb[40].mxu1 %v2134_v3 }
  0x78   : > { %968 = vmatprep.mubr.bf16.mxu0 %v2135_v4  ;;  %2007 = vmatprep.mubr.bf16.mxu1 %v2137_v5 }
  0x7f   : > { %969 = vmatmul.mubr.bf16.gmra.mrb[44].mxu0 %v2138_v6  ;;  %2008 = vmatmul.mubr.bf16.gmra.mrb[44].mxu1 %v2139_v7 }
  0xfa   : > { %v1843_v8 = vpop.f32.mrb[0].mxu0  ;;  %v1915_v9 = vpop.f32.mrb[0].mxu1 }
  0xfb   : > { %v1844_v10 = vpop.f32.mrb[1].mxu0  ;;  %v1916_v11 = vpop.f32.mrb[1].mxu1 }
  0xfc   : > { %v1845_v12 = vadd.f32 %v1844_v10, %v1843_v8  ;;  %v2330_v13 = vadd.f32 %v1916_v11, %v1915_v9  ;;  %v1846_v14 = vpop.f32.mrb[2].mxu0  ;;  %v1918_v15 = vpop.f32.mrb[2].mxu1 }
  0xfd   : > { %v1847_v16 = vpop.f32.mrb[3].mxu0  ;;  %v1919_v17 = vpop.f32.mrb[3].mxu1 }
  0xfe   : > { %v1848_v18 = vadd.f32 %v1847_v16, %v1846_v14  ;;  %v2332_v19 = vadd.f32 %v1919_v17, %v1918_v15 }
 0x102   : > { %v1849_v20 = vpop.f32.mrb[4].mxu0  ;;  %v1921_v21 = vpop.f32.mrb[4].mxu1 }
 0x103   : > { %v1850_v22 = vpop.f32.mrb[5].mxu0  ;;  %v1922_v23 = vpop.f32.mrb[5].mxu1 }
 0x104   : > { %v1851_v24 = vadd.f32 %v1850_v22, %v1849_v20  ;;  %v2334_v25 = vadd.f32 %v1922_v23, %v1921_v21  ;;  %v1852_v26 = vpop.f32.mrb[6].mxu0  ;;  %v1924_v27 = vpop.f32.mrb[6].mxu1 }
 0x105   : > { %v1853_v28 = vpop.f32.mrb[7].mxu0  ;;  %v1925_v29 = vpop.f32.mrb[7].mxu1 }
 0x106   : > { %v1854_v30 = vadd.f32 %v1853_v28, %v1852_v26  ;;  %v2336_v31 = vadd.f32 %v1925_v29, %v1924_v27 }
 0x10a   : > { %v1855_v32 = vpop.f32.mrb[8].mxu0  ;;  %v1927_v33 = vpop.f32.mrb[8].mxu1 }
 0x10b   : > { %v1856_v34 = vpop.f32.mrb[9].mxu0  ;;  %v1928_v35 = vpop.f32.mrb[9].mxu1 }
 0x10c   : > { %v1857_v36 = vadd.f32 %v1856_v34, %v1855_v32  ;;  %v2338_v37 = vadd.f32 %v1928_v35, %v1927_v33  ;;  %v1858_v38 = vpop.f32.mrb[10].mxu0  ;;  %v1930_v39 = vpop.f32.mrb[10].mxu1 }
 0x10d   : > { %v1859_v40 = vpop.f32.mrb[11].mxu0  ;;  %v1931_v41 = vpop.f32.mrb[11].mxu1 }
 0x10e   : > { %v1860_v42 = vadd.f32 %v1859_v40, %v1858_v38  ;;  %v2340_v43 = vadd.f32 %v1931_v41, %v1930_v39 }
 0x112   : > { %v1861_v44 = vpop.f32.mrb[12].mxu0  ;;  %v1933_v45 = vpop.f32.mrb[12].mxu1 }
 0x113   : > { %v1862_v46 = vpop.f32.mrb[13].mxu0  ;;  %v1934_v47 = vpop.f32.mrb[13].mxu1 }
 0x114   : > { %v1863_v48 = vadd.f32 %v1862_v46, %v1861_v44  ;;  %v2342_v49 = vadd.f32 %v1934_v47, %v1933_v45  ;;  %v1864_v50 = vpop.f32.mrb[14].mxu0  ;;  %v1936_v51 = vpop.f32.mrb[14].mxu1 }
 0x115   : > { %v1865_v52 = vpop.f32.mrb[15].mxu0  ;;  %v1937_v53 = vpop.f32.mrb[15].mxu1 }
 0x116   : > { %v1866_v54 = vadd.f32 %v1865_v52, %v1864_v50  ;;  %v2344_v55 = vadd.f32 %v1937_v53, %v1936_v51 }
 0x11a   : > { %v1867_v56 = vpop.f32.mrb[16].mxu0  ;;  %v1981_v57 = vpop.f32.mrb[16].mxu1 }
 0x11b   : > { %v1052_v58 = vadd.f32 %v1981_v57, %v1851_v24  ;;  %v1868_v59 = vpop.f32.mrb[17].mxu0  ;;  %v1043_v60 = vpop.f32.mrb[17].mxu1 }
 0x11c   : > { %v1869_v62 = vadd.f32 %v1868_v59, %v1867_v56  ;;  %v1044_v63 = vadd.f32 %v1845_v12, %v1043_v60  ;;  %v1870_v0 = vpop.f32.mrb[18].mxu0  ;;  %v1982_v1 = vpop.f32.mrb[18].mxu1 }
 0x11d   : > { %v1055_v2 = vadd.f32 %v1982_v1, %v1854_v30  ;;  %v1871_v3 = vpop.f32.mrb[19].mxu0  ;;  %v1046_v4 = vpop.f32.mrb[19].mxu1  ;;  %v1278_v7 = vadd.f32 %v2349_v61, %v1052_v58 }
 0x11e   : > { %v1872_v5 = vadd.f32 %v1871_v3, %v1870_v0  ;;  %v1047_v6 = vadd.f32 %v1848_v18, %v1046_v4  ;;  %v1276_v9 = vadd.f32 %v2349_v61, %v1044_v63 }
 0x11f   : > { %v1279_v8 = vadd.f32 %v2349_v61, %v1055_v2 }
 0x120   : > { %v1277_v10 = vadd.f32 %v2349_v61, %v1047_v6 }
 0x121   : > { %v1740_v11 = vpack.c.bf16 %v1279_v8, %v1278_v7 }
 0x122   : > { %v1735_v12 = vpack.c.bf16 %v1277_v10, %v1276_v9  ;;  %v1873_v14 = vpop.f32.mrb[20].mxu0  ;;  %v1985_v15 = vpop.f32.mrb[20].mxu1 }
 0x123   : > { %1812 = vst [vmem:[%s2358_s28 + $0x8] sm:$0xff] %v1740_v11   ;;  %v1068_v16 = vadd.f32 %v1985_v15, %v1863_v48  ;;  %v1874_v17 = vpop.f32.mrb[21].mxu0  ;;  %v1059_v18 = vpop.f32.mrb[21].mxu1 }
 0x124   : > { %1736 = vst [vmem:[%s2358_s28] sm:$0xff] %v1735_v12   ;;  %v1875_v20 = vadd.f32 %v1874_v17, %v1873_v14  ;;  %v1060_v21 = vadd.f32 %v1857_v36, %v1059_v18  ;;  %v1876_v22 = vpop.f32.mrb[22].mxu0  ;;  %v1986_v23 = vpop.f32.mrb[22].mxu1 }
 0x125   : > { %v1071_v24 = vadd.f32 %v1986_v23, %v1866_v54  ;;  %v1877_v26 = vpop.f32.mrb[23].mxu0  ;;  %v1062_v27 = vpop.f32.mrb[23].mxu1  ;;  %v1282_v30 = vadd.f32 %v2349_v61, %v1068_v16 }
 0x126   : > { %v1878_v28 = vadd.f32 %v1877_v26, %v1876_v22  ;;  %v1063_v29 = vadd.f32 %v1860_v42, %v1062_v27  ;;  %v1280_v33 = vadd.f32 %v2349_v61, %v1060_v21 }
 0x127   : > { %v1283_v32 = vadd.f32 %v2349_v61, %v1071_v24 }
 0x128   : > { %v1281_v34 = vadd.f32 %v2349_v61, %v1063_v29 }
 0x129   : > { %v1750_v35 = vpack.c.bf16 %v1283_v32, %v1282_v30 }
 0x12a   : > { %v1745_v38 = vpack.c.bf16 %v1281_v34, %v1280_v33  ;;  %v1879_v36 = vpop.f32.mrb[24].mxu0  ;;  %v1989_v39 = vpop.f32.mrb[24].mxu1 }
 0x12b   : > { %1814 = vst [vmem:[%s2358_s28 + $0x18] sm:$0xff] %v1750_v35   ;;  %v1084_v40 = vadd.f32 %v1989_v39, %v1875_v20  ;;  %v1880_v41 = vpop.f32.mrb[25].mxu0  ;;  %v1075_v44 = vpop.f32.mrb[25].mxu1 }
 0x12c   : > { %1813 = vst [vmem:[%s2358_s28 + $0x10] sm:$0xff] %v1745_v38   ;;  %v1881_v45 = vadd.f32 %v1880_v41, %v1879_v36  ;;  %v1076_v46 = vadd.f32 %v1869_v62, %v1075_v44  ;;  %v1882_v42 = vpop.f32.mrb[26].mxu0  ;;  %v1990_v47 = vpop.f32.mrb[26].mxu1 }
 0x12d   : > { %v1087_v48 = vadd.f32 %v1990_v47, %v1878_v28  ;;  %v1883_v50 = vpop.f32.mrb[27].mxu0  ;;  %v1078_v51 = vpop.f32.mrb[27].mxu1  ;;  %v1286_v54 = vadd.f32 %v2349_v61, %v1084_v40 }
 0x12e   : > { %v1884_v52 = vadd.f32 %v1883_v50, %v1882_v42  ;;  %v1079_v53 = vadd.f32 %v1872_v5, %v1078_v51  ;;  %v1284_v57 = vadd.f32 %v2349_v61, %v1076_v46 }
 0x12f   : > { %v1287_v56 = vadd.f32 %v2349_v61, %v1087_v48 }
 0x130   : > { %v1285_v58 = vadd.f32 %v2349_v61, %v1079_v53 }
 0x131   : > { %v1760_v59 = vpack.c.bf16 %v1287_v56, %v1286_v54 }
 0x132   : > { %v1755_v60 = vpack.c.bf16 %v1285_v58, %v1284_v57  ;;  %v1885_v62 = vpop.f32.mrb[28].mxu0  ;;  %v1993_v63 = vpop.f32.mrb[28].mxu1 }
 0x133   : > { %1816 = vst [vmem:[%s2358_s28 + $0x28] sm:$0xff] %v1760_v59   ;;  %v1886_v0 = vpop.f32.mrb[29].mxu0  ;;  %v1091_v1 = vpop.f32.mrb[29].mxu1 }
 0x134   : > { %1815 = vst [vmem:[%s2358_s28 + $0x20] sm:$0xff] %v1755_v60   ;;  %v1887_v2 = vadd.f32 %v1886_v0, %v1885_v62  ;;  %v1092_v3 = vadd.f32 %v1881_v45, %v1091_v1  ;;  %v1888_v4 = vpop.f32.mrb[30].mxu0  ;;  %v1994_v5 = vpop.f32.mrb[30].mxu1 }
 0x135   : > { %v1889_v6 = vpop.f32.mrb[31].mxu0  ;;  %v1094_v7 = vpop.f32.mrb[31].mxu1 }
 0x136   : > { %v1100_v8 = vadd.f32 %v1993_v63, %v1887_v2  ;;  %v1890_v9 = vadd.f32 %v1889_v6, %v1888_v4  ;;  %v1095_v10 = vadd.f32 %v1884_v52, %v1094_v7  ;;  %v1288_v11 = vadd.f32 %v2349_v61, %v1092_v3 }
 0x138   : > { %v1103_v12 = vadd.f32 %v1994_v5, %v1890_v9  ;;  %v1289_v14 = vadd.f32 %v2349_v61, %v1095_v10  ;;  %v1290_v15 = vadd.f32 %v2349_v61, %v1100_v8 }
 0x13a   : > { %v1291_v16 = vadd.f32 %v2349_v61, %v1103_v12  ;;  %v1765_v17 = vpack.c.bf16 %v1289_v14, %v1288_v11  ;;  %v1891_v18 = vpop.f32.mrb[32].mxu0  ;;  %v1997_v20 = vpop.f32.mrb[32].mxu1 }
 0x13b   : > { %v1892_v21 = vpop.f32.mrb[33].mxu0  ;;  %v1107_v22 = vpop.f32.mrb[33].mxu1 }
 0x13c   : > { %v1770_v23 = vpack.c.bf16 %v1291_v16, %v1290_v15  ;;  %1817 = vst [vmem:[%s2358_s28 + $0x30] sm:$0xff] %v1765_v17   ;;  %v1893_v24 = vadd.f32 %v1892_v21, %v1891_v18  ;;  %v1894_v26 = vpop.f32.mrb[34].mxu0  ;;  %v1998_v27 = vpop.f32.mrb[34].mxu1 }
 0x13d   : > { %v1895_v28 = vpop.f32.mrb[35].mxu0  ;;  %v1110_v29 = vpop.f32.mrb[35].mxu1 }
 0x13e   : > { %1818 = vst [vmem:[%s2358_s28 + $0x38] sm:$0xff] %v1770_v23   ;;  %v1108_v30 = vadd.f32 %v1893_v24, %v1107_v22  ;;  %v1896_v32 = vadd.f32 %v1895_v28, %v1894_v26 }
 0x140   : > { %v1111_v33 = vadd.f32 %v1896_v32, %v1110_v29  ;;  %v1292_v34 = vadd.f32 %v2349_v61, %v1108_v30 }
 0x142   : > { %v1293_v35 = vadd.f32 %v2349_v61, %v1111_v33  ;;  %v1897_v38 = vpop.f32.mrb[36].mxu0  ;;  %v2001_v36 = vpop.f32.mrb[36].mxu1 }
 0x143   : > { %v1898_v39 = vpop.f32.mrb[37].mxu0  ;;  %v1123_v40 = vpop.f32.mrb[37].mxu1 }
 0x144   : > { %v1775_v41 = vpack.c.bf16 %v1293_v35, %v1292_v34  ;;  %v1899_v44 = vadd.f32 %v1898_v39, %v1897_v38  ;;  %v1900_v45 = vpop.f32.mrb[38].mxu0  ;;  %v2002_v46 = vpop.f32.mrb[38].mxu1 }
 0x145   : > { %v1901_v42 = vpop.f32.mrb[39].mxu0  ;;  %v1126_v47 = vpop.f32.mrb[39].mxu1 }
 0x146   : > { %1819 = vst [vmem:[%s2358_s28 + $0x40] sm:$0xff] %v1775_v41   ;;  %v1116_v48 = vadd.f32 %v1997_v20, %v1899_v44  ;;  %v1902_v50 = vadd.f32 %v1901_v42, %v1900_v45 }
 0x148   : > { %v1119_v51 = vadd.f32 %v1998_v27, %v1902_v50  ;;  %v1294_v52 = vadd.f32 %v2349_v61, %v1116_v48 }
 0x14a   : > { %v1295_v53 = vadd.f32 %v2349_v61, %v1119_v51  ;;  %v1903_v54 = vpop.f32.mrb[40].mxu0  ;;  %v2005_v56 = vpop.f32.mrb[40].mxu1 }
 0x14b   : > { %v1148_v57 = vadd.f32 %v2005_v56, %v2334_v25  ;;  %v1904_v58 = vpop.f32.mrb[41].mxu0  ;;  %v1139_v59 = vpop.f32.mrb[41].mxu1 }
 0x14c   : > { %v1780_v60 = vpack.c.bf16 %v1295_v53, %v1294_v52  ;;  %v1905_v62 = vadd.f32 %v1904_v58, %v1903_v54  ;;  %v1140_v63 = vadd.f32 %v2330_v13, %v1139_v59  ;;  %v1906_v0 = vpop.f32.mrb[42].mxu0  ;;  %v2006_v1 = vpop.f32.mrb[42].mxu1 }
 0x14d   : > { %v1151_v2 = vadd.f32 %v2006_v1, %v2336_v31  ;;  %v1907_v3 = vpop.f32.mrb[43].mxu0  ;;  %v1142_v4 = vpop.f32.mrb[43].mxu1  ;;  %v1302_v25 = vadd.f32 %v2349_v61, %v1148_v57 }
 0x14e   : > { %1820 = vst [vmem:[%s2358_s28 + $0x48] sm:$0xff] %v1780_v60   ;;  %v1124_v5 = vadd.f32 %v1905_v62, %v1123_v40  ;;  %v1908_v6 = vadd.f32 %v1907_v3, %v1906_v0  ;;  %v1143_v7 = vadd.f32 %v2332_v19, %v1142_v4  ;;  %v1300_v9 = vadd.f32 %v2349_v61, %v1140_v63 }
 0x14f   : > { %v1303_v8 = vadd.f32 %v2349_v61, %v1151_v2 }
 0x150   : > { %v1127_v13 = vadd.f32 %v1908_v6, %v1126_v47  ;;  %v1301_v10 = vadd.f32 %v2349_v61, %v1143_v7  ;;  %v1296_v31 = vadd.f32 %v2349_v61, %v1124_v5 }
 0x151   : > { %v1800_v11 = vpack.c.bf16 %v1303_v8, %v1302_v25 }
 0x152   : > { %v1297_v12 = vadd.f32 %v2349_v61, %v1127_v13  ;;  %v1795_v14 = vpack.c.bf16 %v1301_v10, %v1300_v9  ;;  %v1909_v15 = vpop.f32.mrb[44].mxu0  ;;  %v2009_v16 = vpop.f32.mrb[44].mxu1 }
 0x153   : > { %1824 = vst [vmem:[%s2358_s28 + $0x68] sm:$0xff] %v1800_v11   ;;  %v1164_v19 = vadd.f32 %v2009_v16, %v2342_v49  ;;  %v1910_v17 = vpop.f32.mrb[45].mxu0  ;;  %v1155_v18 = vpop.f32.mrb[45].mxu1 }
 0x154   : > { %v1785_v20 = vpack.c.bf16 %v1297_v12, %v1296_v31  ;;  %1823 = vst [vmem:[%s2358_s28 + $0x60] sm:$0xff] %v1795_v14   ;;  %v1911_v21 = vadd.f32 %v1910_v17, %v1909_v15  ;;  %v1156_v22 = vadd.f32 %v2338_v37, %v1155_v18  ;;  %v1912_v23 = vpop.f32.mrb[46].mxu0  ;;  %v2010_v24 = vpop.f32.mrb[46].mxu1 }
 0x155   : > { %v1167_v26 = vadd.f32 %v2010_v24, %v2344_v55  ;;  %v1913_v27 = vpop.f32.mrb[47].mxu0  ;;  %v1158_v28 = vpop.f32.mrb[47].mxu1  ;;  %v1306_v32 = vadd.f32 %v2349_v61, %v1164_v19 }
 0x156   : > { %1821 = vst [vmem:[%s2358_s28 + $0x50] sm:$0xff] %v1785_v20   ;;  %v1132_v29 = vadd.f32 %v2001_v36, %v1911_v21  ;;  %v1914_v30 = vadd.f32 %v1913_v27, %v1912_v23  ;;  %v1159_v49 = vadd.f32 %v2340_v43, %v1158_v28  ;;  %v1304_v37 = vadd.f32 %v2349_v61, %v1156_v22 }
 0x157   : > { %v1307_v33 = vadd.f32 %v2349_v61, %v1167_v26 }
 0x158   : > { %v1135_v34 = vadd.f32 %v2002_v46, %v1914_v30  ;;  %v1305_v35 = vadd.f32 %v2349_v61, %v1159_v49  ;;  %v1298_v38 = vadd.f32 %v2349_v61, %v1132_v29 }
 0x159   : > { %v1810_v55 = vpack.c.bf16 %v1307_v33, %v1306_v32 }
 0x15a   : > { %v1299_v39 = vadd.f32 %v2349_v61, %v1135_v34  ;;  %v1805_v40 = vpack.c.bf16 %v1305_v35, %v1304_v37 }
 0x15b   : > { %1826 = vst [vmem:[%s2358_s28 + $0x78] sm:$0xff] %v1810_v55  }
 0x15c   : > { %v1790_v36 = vpack.c.bf16 %v1299_v39, %v1298_v38  ;;  %1825 = vst [vmem:[%s2358_s28 + $0x70] sm:$0xff] %v1805_v40  }
 0x15e   : > { %1822 = vst [vmem:[%s2358_s28 + $0x58] sm:$0xff] %v1790_v36  }
 0x15f PF: > { %s13_s14 = sadd.s32 1, %s2162_s14   ;;  %s2426_s12 = smov %s2158_s13 }
 0x160   : > { %p10_p5 = scmp.ge.s32.totalorder %s13_s14, 4   ;;  %s2427_s13 = smov %s2429_s15 }
 0x162   :  { %12 = sbr.rel (!%p10_p5) target bundleno = 2 (0x2), region = 76 }

// kernel: _lambda_.32
= control target key start
LH: loop header
LB: loop body
LE: loop exit
PB: predicated region body
PF: predicated region fallthrough
CT: control target
= control target key end

     0   :  { %s1704_s12 = smov 0   ;;  %s1706_s13 = smov 0   ;;  %s1949_s0 = inlined_call_operand.vmem [shape: bf16[512,640], index: 0, kind: input, shape index: {}]   ;;  %s1950_s1 = inlined_call_operand.vmem [shape: bf16[640,128], index: 1, kind: input, shape index: {}]   ;;  %s1951_s2 = inlined_call_operand.vmem [shape: f32[1,128], index: 2, kind: input, shape index: {}]   ;;  %s1952_s3 = inlined_call_operand.vmem [shape: bf16[512,128], index: 3, kind: output, shape index: {}]  }
   0x1   :  { %s1708_s14 = smov 0   ;;  %s1710_s15 = smov 0  }
   0x2   :  { %s1712_s16 = smov 0   ;;  %s1714_s17 = smov 0  }
   0x3   :  { %s1716_s18 = smov 0  }
   0x4 LB: > { %s25_s19 = sadd.s32 1, %s1673_s16  ;;  %s32_s20 = sadd.s32 1, %s1677_s17  ;;  %s1681_s18 = sphi %s1716_s18, %s13_s18   ;;  %s1677_s17 = sphi %s1714_s17, %s1958_s17   ;;  %s1673_s16 = sphi %s1712_s16, %s1957_s16   ;;  %s1669_s15 = sphi %s1710_s15, %s1956_s15   ;;  %s1665_s14 = sphi %s1708_s14, %s1955_s14   ;;  %s1661_s13 = sphi %s1706_s13, %s1954_s13   ;;  %s1657_s12 = sphi %s1704_s12, %s1953_s12  }
   0x5   : > { %p26_p0 = scmp.ge.s32.totalorder %s25_s19, 5  ;;  %p48_p1 = scmp.ne.s32.totalorder %s1661_s13, %s1657_s12 }
   0x6   : > { %p49_p2 = scmp.eq.s32.totalorder %s1681_s18, 0  ;;  %s41_s24 = sadd.s32 1, %s1661_s13 }
   0x7   : > { %s1960_s19 = smov (%p26_p0, %s25_s19), 0  ;;  %s1962_s20 = smov (!%p26_p0, %s32_s20), %s1677_s17 }
   0x8   : > { %p50_p3 = por %p49_p2, %p48_p1  ;;  %p34_p4 = scmp.ge.s32.totalorder %s1962_s20, 2 }
   0x9   : > { %s37_s21 = ssub.s32 %s1673_s16, %s1960_s19  ;;  %p1258_p6 = scmp.ge.s32.totalorder %s1681_s18, 10 }
   0xa   : > { %s1964_s20 = smov (%p34_p4, %s1962_s20), 0 }
   0xb   : > { %s36_s22 = ssub.s32 %s1677_s17, %s1964_s20  ;;  %162 = sbr.rel (%p1258_p6) target bundleno = 46 (0x2e), region = 20 }
   0xc   : > { %s38_s23 = sor.u32 %s37_s21, %s36_s22 }
   0xd   : > { %p39_p5 = scmp.eq.s32.totalorder %s38_s23, 0 }
   0xf   : > { %s1755_s25 = scalar_select %p39_p5, %s1661_s13, %s41_s24  }
  0x12   : > { %165 = sbr.rel (!%p50_p3) target bundleno = 46 (0x2e), region = 24  ;;  %s167_s26 = sand.u32 (%p50_p3), 1, %s1661_s13  }
  0x13   : > { %s1545_s27 = smul.u32 (%p50_p3), 160, %s1677_s17  ;;  %s1259_s28 = sshll.u32 (%p50_p3), %s167_s26, 7 }
  0x14   : > { %s1769_s7 = scalar_lea.vmem (%p50_p3), [#allocation3], %s1259_s28 }
  0x15   : > { %s172_s29 = sadd.s32 (%p50_p3), %s1673_s16, %s1545_s27 }
  0x16   : > { %s1262_s30 = sshll.u32 (%p50_p3), %s172_s29, 2 }
  0x17   : > { %s1764_s6 = scalar_lea.vmem (%p50_p3), %s1949_s0, %s1262_s30 }
  0x18   : > { %v190_v0 = vld [vmem:[%s1764_s6] sm:$0xf] (%p50_p3)  ;;  %v192_v1 = vld [vmem:[%s1764_s6 + $0x14] sm:$0xf] (%p50_p3)  ;;  %v194_v2 = vld [vmem:[%s1764_s6 + $0x28] sm:$0xf] (%p50_p3) }
  0x19   : > { %191 = vst [vmem:[%s1769_s7] sm:$0xf] %v190_v0  ;;  %193 = vst [vmem:[%s1769_s7 + $0x4] sm:$0xf] %v192_v1  ;;  %v196_v3 = vld [vmem:[%s1764_s6 + $0x3c] sm:$0xf] }
  0x1a   : > { %195 = vst [vmem:[%s1769_s7 + $0x8] sm:$0xf] %v194_v2  ;;  %v198_v4 = vld [vmem:[%s1764_s6 + $0x50] sm:$0xf]  ;;  %v200_v5 = vld [vmem:[%s1764_s6 + $0x64] sm:$0xf] }
  0x1b   : > { %197 = vst [vmem:[%s1769_s7 + $0xc] sm:$0xf] %v196_v3  ;;  %199 = vst [vmem:[%s1769_s7 + $0x10] sm:$0xf] %v198_v4  ;;  %v202_v6 = vld [vmem:[%s1764_s6 + $0x78] sm:$0xf] }
  0x1c   : > { %201 = vst [vmem:[%s1769_s7 + $0x14] sm:$0xf] %v200_v5  ;;  %v204_v7 = vld [vmem:[%s1764_s6 + $0x8c] sm:$0xf]  ;;  %v206_v8 = vld [vmem:[%s1764_s6 + $0xa0] sm:$0xf] }
  0x1d   : > { %203 = vst [vmem:[%s1769_s7 + $0x18] sm:$0xf] %v202_v6  ;;  %205 = vst [vmem:[%s1769_s7 + $0x1c] sm:$0xf] %v204_v7  ;;  %v208_v9 = vld [vmem:[%s1764_s6 + $0xb4] sm:$0xf] }
  0x1e   : > { %207 = vst [vmem:[%s1769_s7 + $0x20] sm:$0xf] %v206_v8  ;;  %v210_v10 = vld [vmem:[%s1764_s6 + $0xc8] sm:$0xf]  ;;  %v212_v11 = vld [vmem:[%s1764_s6 + $0xdc] sm:$0xf] }
  0x1f   : > { %209 = vst [vmem:[%s1769_s7 + $0x24] sm:$0xf] %v208_v9  ;;  %211 = vst [vmem:[%s1769_s7 + $0x28] sm:$0xf] %v210_v10  ;;  %v214_v12 = vld [vmem:[%s1764_s6 + $0xf0] sm:$0xf] }
  0x20   : > { %213 = vst [vmem:[%s1769_s7 + $0x2c] sm:$0xf] %v212_v11  ;;  %v216_v13 = vld [vmem:[%s1764_s6 + $0x104] sm:$0xf]  ;;  %v218_v14 = vld [vmem:[%s1764_s6 + $0x118] sm:$0xf] }
  0x21   : > { %215 = vst [vmem:[%s1769_s7 + $0x30] sm:$0xf] %v214_v12  ;;  %217 = vst [vmem:[%s1769_s7 + $0x34] sm:$0xf] %v216_v13  ;;  %v220_v15 = vld [vmem:[%s1764_s6 + $0x12c] sm:$0xf] }
  0x22   : > { %219 = vst [vmem:[%s1769_s7 + $0x38] sm:$0xf] %v218_v14  ;;  %v222_v16 = vld [vmem:[%s1764_s6 + $0x140] sm:$0xf]  ;;  %v224_v17 = vld [vmem:[%s1764_s6 + $0x154] sm:$0xf] }
  0x23   : > { %221 = vst [vmem:[%s1769_s7 + $0x3c] sm:$0xf] %v220_v15  ;;  %223 = vst [vmem:[%s1769_s7 + $0x40] sm:$0xf] %v222_v16  ;;  %v226_v18 = vld [vmem:[%s1764_s6 + $0x168] sm:$0xf] }
  0x24   : > { %225 = vst [vmem:[%s1769_s7 + $0x44] sm:$0xf] %v224_v17  ;;  %v228_v19 = vld [vmem:[%s1764_s6 + $0x17c] sm:$0xf]  ;;  %v230_v20 = vld [vmem:[%s1764_s6 + $0x190] sm:$0xf] }
  0x25   : > { %227 = vst [vmem:[%s1769_s7 + $0x48] sm:$0xf] %v226_v18  ;;  %229 = vst [vmem:[%s1769_s7 + $0x4c] sm:$0xf] %v228_v19  ;;  %v232_v21 = vld [vmem:[%s1764_s6 + $0x1a4] sm:$0xf] }
  0x26   : > { %231 = vst [vmem:[%s1769_s7 + $0x50] sm:$0xf] %v230_v20  ;;  %v234_v22 = vld [vmem:[%s1764_s6 + $0x1b8] sm:$0xf]  ;;  %v236_v23 = vld [vmem:[%s1764_s6 + $0x1cc] sm:$0xf] }
  0x27   : > { %233 = vst [vmem:[%s1769_s7 + $0x54] sm:$0xf] %v232_v21  ;;  %235 = vst [vmem:[%s1769_s7 + $0x58] sm:$0xf] %v234_v22  ;;  %v238_v24 = vld [vmem:[%s1764_s6 + $0x1e0] sm:$0xf] }
  0x28   : > { %237 = vst [vmem:[%s1769_s7 + $0x5c] sm:$0xf] %v236_v23  ;;  %v240_v25 = vld [vmem:[%s1764_s6 + $0x1f4] sm:$0xf]  ;;  %v242_v26 = vld [vmem:[%s1764_s6 + $0x208] sm:$0xf] }
  0x29   : > { %239 = vst [vmem:[%s1769_s7 + $0x60] sm:$0xf] %v238_v24  ;;  %241 = vst [vmem:[%s1769_s7 + $0x64] sm:$0xf] %v240_v25  ;;  %v244_v27 = vld [vmem:[%s1764_s6 + $0x21c] sm:$0xf] }
  0x2a   : > { %243 = vst [vmem:[%s1769_s7 + $0x68] sm:$0xf] %v242_v26  ;;  %v246_v28 = vld [vmem:[%s1764_s6 + $0x230] sm:$0xf]  ;;  %v248_v29 = vld [vmem:[%s1764_s6 + $0x244] sm:$0xf] }
  0x2b   : > { %245 = vst [vmem:[%s1769_s7 + $0x6c] sm:$0xf] %v244_v27  ;;  %247 = vst [vmem:[%s1769_s7 + $0x70] sm:$0xf] %v246_v28  ;;  %v250_v30 = vld [vmem:[%s1764_s6 + $0x258] sm:$0xf] }
  0x2c   : > { %249 = vst [vmem:[%s1769_s7 + $0x74] sm:$0xf] %v248_v29  ;;  %v252_v31 = vld [vmem:[%s1764_s6 + $0x26c] sm:$0xf]  ;;  %251 = vst [vmem:[%s1769_s7 + $0x78] sm:$0xf] %v250_v30 }
  0x2d   : > { %253 = vst [vmem:[%s1769_s7 + $0x7c] sm:$0xf] %v252_v31 }
  0x2e PF: > { %p1263_p7 = scmp.ge.s32.totalorder %s1681_s18, 1  ;;  %p351_p8 = scmp.lt.s32.totalorder %s1681_s18, 11 }
  0x30   : > { %p352_p9 = pnand %p1263_p7, %p351_p8 }
  0x31   : > { %s358_s8 = sand.u32 (!%p352_p9), 1, %s1657_s12   ;;  %s1265_s9 = sshll.u32 (!%p352_p9), %s1665_s14, 4 }
  0x32   : > { %355 = sbr.rel (%p352_p9) target bundleno = 363 (0x16b), region = 69  ;;  %s1264_s10 = sshll.u32 (!%p352_p9), %s358_s8, 7 }
  0x33   : > { %p397_p10 = scmp.lt.s32.totalorder (!%p352_p9), %s1265_s9, 79  ;;  %s1267_s11 = sshll.u32 (!%p352_p9), %s1669_s15, 5 }
  0x34   : > { %p409_p11 = scmp.lt.s32.totalorder (!%p352_p9), %s1267_s11, 63  ;;  %s1847_s12 = scalar_lea.vmem (!%p352_p9), [#allocation3], %s1264_s10 }
  0x35   : > { %p1269_p12 = scmp.ne.s32.totalorder (!%p352_p9), %s1665_s14, 0 }
  0x39   : > { %s1966_s9 = smov (!%p397_p10, %s1265_s9), 79  ;;  %s1968_s11 = smov (!%p409_p11, %s1267_s11), 63 }
  0x3a   : > { %s1266_s21 = sshll.u32 %s1966_s9, 2  ;;  %s1268_s26 = sshll.u32 %s1968_s11, 2  ;;  %v1683_v32 = vmov (!%p1269_p12), 0.0  }
  0x3b   : > { %s1840_s24 = scalar_lea.vmem %s1950_s1, %s1266_s21  ;;  %s1845_s29 = scalar_lea.vmem %s1952_s3, %s1268_s26  ;;  %422 = vst [vmem:[#allocation2] sm:$0xff] (!%p1269_p12), %v1683_v32  ;;  %423 = vst [vmem:[#allocation2 + $0x8] sm:$0xff] (!%p1269_p12), %v1683_v32 }
  0x3c   : > { %421 = sbr.rel (%p1269_p12) target bundleno = 75 (0x4b), region = 77  ;;  %424 = vst [vmem:[#allocation2 + $0x10] sm:$0xff] (!%p1269_p12), %v1683_v32  ;;  %425 = vst [vmem:[#allocation2 + $0x18] sm:$0xff] (!%p1269_p12), %v1683_v32 }
  0x3d   : > { %426 = vst [vmem:[#allocation2 + $0x20] sm:$0xff] (!%p1269_p12), %v1683_v32  ;;  %427 = vst [vmem:[#allocation2 + $0x28] sm:$0xff] (!%p1269_p12), %v1683_v32 }
  0x3e   : > { %428 = vst [vmem:[#allocation2 + $0x30] sm:$0xff] (!%p1269_p12), %v1683_v32  ;;  %429 = vst [vmem:[#allocation2 + $0x38] sm:$0xff] (!%p1269_p12), %v1683_v32 }
  0x3f   : > { %430 = vst [vmem:[#allocation2 + $0x40] sm:$0xff] (!%p1269_p12), %v1683_v32  ;;  %431 = vst [vmem:[#allocation2 + $0x48] sm:$0xff] (!%p1269_p12), %v1683_v32 }
  0x40   : > { %432 = vst [vmem:[#allocation2 + $0x50] sm:$0xff] (!%p1269_p12), %v1683_v32  ;;  %433 = vst [vmem:[#allocation2 + $0x58] sm:$0xff] (!%p1269_p12), %v1683_v32 }
  0x41   : > { %434 = vst [vmem:[#allocation2 + $0x60] sm:$0xff] (!%p1269_p12), %v1683_v32  ;;  %435 = vst [vmem:[#allocation2 + $0x68] sm:$0xff] (!%p1269_p12), %v1683_v32 }
  0x42   : > { %436 = vst [vmem:[#allocation2 + $0x70] sm:$0xff] (!%p1269_p12), %v1683_v32  ;;  %437 = vst [vmem:[#allocation2 + $0x78] sm:$0xff] (!%p1269_p12), %v1683_v32 }
  0x43   : > { %438 = vst [vmem:[#allocation2 + $0x80] sm:$0xff] %v1683_v32  ;;  %439 = vst [vmem:[#allocation2 + $0x88] sm:$0xff] %v1683_v32 }
  0x44   : > { %440 = vst [vmem:[#allocation2 + $0x90] sm:$0xff] %v1683_v32  ;;  %441 = vst [vmem:[#allocation2 + $0x98] sm:$0xff] %v1683_v32 }
  0x45   : > { %442 = vst [vmem:[#allocation2 + $0xa0] sm:$0xff] %v1683_v32  ;;  %443 = vst [vmem:[#allocation2 + $0xa8] sm:$0xff] %v1683_v32 }
  0x46   : > { %444 = vst [vmem:[#allocation2 + $0xb0] sm:$0xff] %v1683_v32  ;;  %445 = vst [vmem:[#allocation2 + $0xb8] sm:$0xff] %v1683_v32 }
  0x47   : > { %446 = vst [vmem:[#allocation2 + $0xc0] sm:$0xff] %v1683_v32  ;;  %447 = vst [vmem:[#allocation2 + $0xc8] sm:$0xff] %v1683_v32 }
  0x48   : > { %448 = vst [vmem:[#allocation2 + $0xd0] sm:$0xff] %v1683_v32  ;;  %449 = vst [vmem:[#allocation2 + $0xd8] sm:$0xff] %v1683_v32 }
  0x49   : > { %450 = vst [vmem:[#allocation2 + $0xe0] sm:$0xff] %v1683_v32  ;;  %451 = vst [vmem:[#allocation2 + $0xe8] sm:$0xff] %v1683_v32 }
  0x4a   : > { %452 = vst [vmem:[#allocation2 + $0xf0] sm:$0xff] %v1683_v32  ;;  %453 = vst [vmem:[#allocation2 + $0xf8] sm:$0xff] %v1683_v32 }
  0x4b PF: > { %v1603_v33 = vld [vmem:[%s1840_s24] sm:$0xff]   ;;  %v1604_v34 = vld [vmem:[%s1840_s24 + $0x8] sm:$0xff]   ;;  %v1605_v35 = vld [vmem:[%s1840_s24 + $0x10] sm:$0xff]   ;;  %p1294_p13 = scmp.ne.s32.totalorder %s1665_s14, 4 }
  0x4c   : > { %1481 = vmatprep.subr.bf16.mxu0 %v1603_v33  ;;  %1529 = vmatprep.subr.bf16.mxu1 %v1603_v33  ;;  %v1606_v36 = vld [vmem:[%s1840_s24 + $0x18] sm:$0xff]   ;;  %v1611_v37 = vld [vmem:[%s1847_s12] sm:$0xff]   ;;  %v1608_v40 = vld [vmem:[%s1840_s24 + $0x28] sm:$0xff]  }
  0x4d   : > { %1482 = vmatpush3.bf16.msra.mxu0 %v1603_v33  ;;  %1537 = vmatpush3.bf16.msra.mxu1 %v1603_v33  ;;  %v1612_v38 = vld [vmem:[%s1847_s12 + $0x40] sm:$0xff]   ;;  %v1609_v41 = vld [vmem:[%s1840_s24 + $0x30] sm:$0xff]   ;;  %v1610_v42 = vld [vmem:[%s1840_s24 + $0x38] sm:$0xff]  }
  0x4e   : > { %1483 = vmatprep.subr.bf16.mxu0 %v1604_v34  ;;  %1530 = vmatprep.subr.bf16.mxu1 %v1604_v34  ;;  %v1607_v39 = vld [vmem:[%s1840_s24 + $0x20] sm:$0xff]   ;;  %v1613_v43 = vld [vmem:[%s1847_s12 + $0x8] sm:$0xff]   ;;  %v1615_v45 = vld [vmem:[%s1847_s12 + $0x10] sm:$0xff]  }
  0x4f   : > { %1497 = vmatprep.mubr.bf16.mxu0 %v1611_v37  ;;  %1513 = vmatprep.mubr.bf16.mxu1 %v1612_v38  ;;  %v1614_v44 = vld [vmem:[%s1847_s12 + $0x48] sm:$0xff]   ;;  %v1616_v46 = vld [vmem:[%s1847_s12 + $0x50] sm:$0xff]   ;;  %v1617_v47 = vld [vmem:[%s1847_s12 + $0x18] sm:$0xff]  }
  0x50   : > { %v1618_v48 = vld [vmem:[%s1847_s12 + $0x58] sm:$0xff]   ;;  %v1619_v49 = vld [vmem:[%s1847_s12 + $0x20] sm:$0xff]   ;;  %v1621_v51 = vld [vmem:[%s1847_s12 + $0x28] sm:$0xff]  }
  0x51   : > { %1484 = vmatpush3.bf16.msra.mxu0 %v1604_v34  ;;  %1538 = vmatpush3.bf16.msra.mxu1 %v1604_v34  ;;  %v1620_v50 = vld [vmem:[%s1847_s12 + $0x60] sm:$0xff]   ;;  %v1622_v52 = vld [vmem:[%s1847_s12 + $0x68] sm:$0xff]   ;;  %v1623_v53 = vld [vmem:[%s1847_s12 + $0x30] sm:$0xff]  }
  0x52   : > { %1485 = vmatprep.subr.bf16.mxu0 %v1605_v35  ;;  %1531 = vmatprep.subr.bf16.mxu1 %v1605_v35  ;;  %v1624_v54 = vld [vmem:[%s1847_s12 + $0x70] sm:$0xff]   ;;  %v1625_v55 = vld [vmem:[%s1847_s12 + $0x38] sm:$0xff]   ;;  %v454_v59 = vld [vmem:[#allocation2] sm:$0xff] }
  0x53   : > { %v1626_v56 = vld [vmem:[%s1847_s12 + $0x78] sm:$0xff]   ;;  %v456_v57 = vld [vmem:[#allocation2 + $0x10] sm:$0xff]  ;;  %v470_v60 = vld [vmem:[#allocation2 + $0x80] sm:$0xff] }
  0x54   : > { %v472_v58 = vld [vmem:[#allocation2 + $0x90] sm:$0xff]  ;;  %v457_v63 = vld [vmem:[#allocation2 + $0x18] sm:$0xff]  ;;  %v455_v5 = vld [vmem:[#allocation2 + $0x8] sm:$0xff] }
  0x55   : > { %1486 = vmatpush3.bf16.msra.mxu0 %v1605_v35  ;;  %1539 = vmatpush3.bf16.msra.mxu1 %v1605_v35  ;;  %v473_v0 = vld [vmem:[#allocation2 + $0x98] sm:$0xff]  ;;  %v471_v6 = vld [vmem:[#allocation2 + $0x88] sm:$0xff]  ;;  %v460_v17 = vld [vmem:[#allocation2 + $0x30] sm:$0xff] }
  0x56   : > { %1487 = vmatprep.subr.bf16.mxu0 %v1606_v36  ;;  %1532 = vmatprep.subr.bf16.mxu1 %v1606_v36  ;;  %v476_v18 = vld [vmem:[#allocation2 + $0xb0] sm:$0xff]  ;;  %v458_v19 = vld [vmem:[#allocation2 + $0x20] sm:$0xff]  ;;  %v461_v23 = vld [vmem:[#allocation2 + $0x38] sm:$0xff] }
  0x57   : > { %v474_v20 = vld [vmem:[#allocation2 + $0xa0] sm:$0xff]  ;;  %v477_v24 = vld [vmem:[#allocation2 + $0xb8] sm:$0xff]  ;;  %v459_v29 = vld [vmem:[#allocation2 + $0x28] sm:$0xff] }
  0x58   : > { %v475_v30 = vld [vmem:[#allocation2 + $0xa8] sm:$0xff] }
  0x59   : > { %1488 = vmatpush3.bf16.msra.mxu0 %v1606_v36  ;;  %1540 = vmatpush3.bf16.msra.mxu1 %v1606_v36 }
  0x5a   : > { %1489 = vmatprep.subr.bf16.mxu0 %v1607_v39  ;;  %1533 = vmatprep.subr.bf16.mxu1 %v1607_v39 }
  0x5d   : > { %1490 = vmatpush3.bf16.msra.mxu0 %v1607_v39  ;;  %1541 = vmatpush3.bf16.msra.mxu1 %v1607_v39 }
  0x5e   : > { %1491 = vmatprep.subr.bf16.mxu0 %v1608_v40  ;;  %1534 = vmatprep.subr.bf16.mxu1 %v1608_v40 }
  0x61   : > { %1492 = vmatpush3.bf16.msra.mxu0 %v1608_v40  ;;  %1542 = vmatpush3.bf16.msra.mxu1 %v1608_v40 }
  0x62   : > { %1493 = vmatprep.subr.bf16.mxu0 %v1609_v41  ;;  %1535 = vmatprep.subr.bf16.mxu1 %v1609_v41 }
  0x65   : > { %1494 = vmatpush3.bf16.msra.mxu0 %v1609_v41  ;;  %1543 = vmatpush3.bf16.msra.mxu1 %v1609_v41  ;;  %v464_v41 = vld [vmem:[#allocation2 + $0x50] sm:$0xff] }
  0x66   : > { %1495 = vmatprep.subr.bf16.mxu0 %v1610_v42  ;;  %1536 = vmatprep.subr.bf16.mxu1 %v1610_v42 }
  0x69   : > { %1496 = vmatpush3.bf16.msra.mxu0 %v1610_v42  ;;  %1544 = vmatpush3.bf16.msra.mxu1 %v1610_v42  ;;  %v480_v42 = vld [vmem:[#allocation2 + $0xd0] sm:$0xff] }
  0x6c   : > { %1498 = vmatmul.mubr.bf16.vlgmr.msra.gmra.mrb[0].mxu0 %v1613_v43  ;;  %1514 = vmatmul.mubr.bf16.vlgmr.msra.gmra.mrb[0].mxu1 %v1614_v44  ;;  %v462_v43 = vld [vmem:[#allocation2 + $0x40] sm:$0xff] }
  0x6d   : > { %1501 = vmatprep.mubr.bf16.mxu0 %v1615_v45  ;;  %1517 = vmatprep.mubr.bf16.mxu1 %v1616_v46  ;;  %v478_v44 = vld [vmem:[#allocation2 + $0xc0] sm:$0xff] }
  0x74   : > { %1502 = vmatmul.mubr.bf16.gmra.mrb[4].mxu0 %v1617_v47  ;;  %1518 = vmatmul.mubr.bf16.gmra.mrb[4].mxu1 %v1618_v48  ;;  %v465_v47 = vld [vmem:[#allocation2 + $0x58] sm:$0xff] }
  0x75   : > { %1505 = vmatprep.mubr.bf16.mxu0 %v1619_v49  ;;  %1521 = vmatprep.mubr.bf16.mxu1 %v1620_v50  ;;  %v481_v48 = vld [vmem:[#allocation2 + $0xd8] sm:$0xff] }
  0x7c   : > { %1506 = vmatmul.mubr.bf16.gmra.mrb[8].mxu0 %v1621_v51  ;;  %1522 = vmatmul.mubr.bf16.gmra.mrb[8].mxu1 %v1622_v52 }
  0x7d   : > { %1509 = vmatprep.mubr.bf16.mxu0 %v1623_v53  ;;  %1525 = vmatprep.mubr.bf16.mxu1 %v1624_v54  ;;  %v463_v53 = vld [vmem:[#allocation2 + $0x48] sm:$0xff] }
  0x7e   : > { %v479_v54 = vld [vmem:[#allocation2 + $0xc8] sm:$0xff] }
  0x84   : > { %1510 = vmatmul.mubr.bf16.gmra.mrb[12].mxu0 %v1625_v55  ;;  %1526 = vmatmul.mubr.bf16.gmra.mrb[12].mxu1 %v1626_v56 }
 0x13f   : > { %v1499_v61 = vpop.f32.mrb[0].mxu0  ;;  %v1515_v62 = vpop.f32.mrb[0].mxu1 }
 0x140   : > { %v841_v1 = vadd.f32 %v1499_v61, %v456_v57  ;;  %v857_v2 = vadd.f32 %v1515_v62, %v472_v58  ;;  %v712_v3 = vpop.f32.mrb[1].mxu0  ;;  %v776_v4 = vpop.f32.mrb[1].mxu1 }
 0x141   : > { %v839_v7 = vadd.f32 %v712_v3, %v454_v59  ;;  %v855_v8 = vadd.f32 %v776_v4, %v470_v60  ;;  %v1500_v9 = vpop.f32.mrb[2].mxu0  ;;  %v1516_v10 = vpop.f32.mrb[2].mxu1  ;;  %v466_v3 = vld [vmem:[#allocation2 + $0x60] sm:$0xff] }
 0x142   : > { %873 = vst [vmem:[#allocation2 + $0x10] sm:$0xff] %v841_v1  ;;  %889 = vst [vmem:[#allocation2 + $0x90] sm:$0xff] %v857_v2  ;;  %v842_v11 = vadd.f32 %v1500_v9, %v457_v63  ;;  %v858_v12 = vadd.f32 %v1516_v10, %v473_v0  ;;  %v715_v13 = vpop.f32.mrb[3].mxu0  ;;  %v779_v14 = vpop.f32.mrb[3].mxu1  ;;  %v468_v1 = vld [vmem:[#allocation2 + $0x70] sm:$0xff]  ;;  %v482_v4 = vld [vmem:[#allocation2 + $0xe0] sm:$0xff] }
 0x143   : > { %871 = vst [vmem:[#allocation2] sm:$0xff] %v839_v7  ;;  %887 = vst [vmem:[#allocation2 + $0x80] sm:$0xff] %v855_v8  ;;  %v840_v15 = vadd.f32 %v715_v13, %v455_v5  ;;  %v856_v16 = vadd.f32 %v779_v14, %v471_v6  ;;  %v484_v2 = vld [vmem:[#allocation2 + $0xf0] sm:$0xff]  ;;  %v469_v7 = vld [vmem:[#allocation2 + $0x78] sm:$0xff] }
 0x144   : > { %874 = vst [vmem:[#allocation2 + $0x18] sm:$0xff] %v842_v11  ;;  %890 = vst [vmem:[#allocation2 + $0x98] sm:$0xff] %v858_v12  ;;  %v485_v8 = vld [vmem:[#allocation2 + $0xf8] sm:$0xff]  ;;  %v467_v13 = vld [vmem:[#allocation2 + $0x68] sm:$0xff] }
 0x145   : > { %872 = vst [vmem:[#allocation2 + $0x8] sm:$0xff] %v840_v15  ;;  %888 = vst [vmem:[#allocation2 + $0x88] sm:$0xff] %v856_v16  ;;  %v483_v14 = vld [vmem:[#allocation2 + $0xe8] sm:$0xff] }
 0x147   : > { %v1503_v21 = vpop.f32.mrb[4].mxu0  ;;  %v1519_v22 = vpop.f32.mrb[4].mxu1 }
 0x148   : > { %v845_v25 = vadd.f32 %v1503_v21, %v460_v17  ;;  %v861_v26 = vadd.f32 %v1519_v22, %v476_v18  ;;  %v728_v27 = vpop.f32.mrb[5].mxu0  ;;  %v792_v28 = vpop.f32.mrb[5].mxu1 }
 0x149   : > { %v843_v31 = vadd.f32 %v728_v27, %v458_v19  ;;  %v859_v32 = vadd.f32 %v792_v28, %v474_v20  ;;  %v1504_v33 = vpop.f32.mrb[6].mxu0  ;;  %v1520_v34 = vpop.f32.mrb[6].mxu1  ;;  %v1878_v27 = vld [vmem:[%s1951_s2] ss:$0 sm:$0xff] (!%p1294_p13) }
 0x14a   : > { %877 = vst [vmem:[#allocation2 + $0x30] sm:$0xff] %v845_v25  ;;  %893 = vst [vmem:[#allocation2 + $0xb0] sm:$0xff] %v861_v26  ;;  %v846_v35 = vadd.f32 %v1504_v33, %v461_v23  ;;  %v862_v36 = vadd.f32 %v1520_v34, %v477_v24  ;;  %v731_v37 = vpop.f32.mrb[7].mxu0  ;;  %v795_v38 = vpop.f32.mrb[7].mxu1  ;;  %v907_v25 = vld [vmem:[#allocation2] sm:$0xff] (!%p1294_p13) }
 0x14b   : > { %875 = vst [vmem:[#allocation2 + $0x20] sm:$0xff] %v843_v31  ;;  %891 = vst [vmem:[#allocation2 + $0xa0] sm:$0xff] %v859_v32  ;;  %v844_v39 = vadd.f32 %v731_v37, %v459_v29  ;;  %v860_v40 = vadd.f32 %v795_v38, %v475_v30  ;;  %v946_v28 = vadd.f32 (!%p1294_p13), %v1878_v27, %v907_v25  ;;  %v909_v30 = vld [vmem:[#allocation2 + $0x10] sm:$0xff] (!%p1294_p13)  ;;  %v910_v31 = vld [vmem:[#allocation2 + $0x18] sm:$0xff] (!%p1294_p13) }
 0x14c   : > { %878 = vst [vmem:[#allocation2 + $0x38] sm:$0xff] %v846_v35  ;;  %894 = vst [vmem:[#allocation2 + $0xb8] sm:$0xff] %v862_v36  ;;  %v908_v26 = vld [vmem:[#allocation2 + $0x8] sm:$0xff] (!%p1294_p13)  ;;  %v948_v33 = vadd.f32 (!%p1294_p13), %v1878_v27, %v909_v30  ;;  %v949_v34 = vadd.f32 (!%p1294_p13), %v1878_v27, %v910_v31 }
 0x14d   : > { %876 = vst [vmem:[#allocation2 + $0x28] sm:$0xff] %v844_v39  ;;  %892 = vst [vmem:[#allocation2 + $0xa8] sm:$0xff] %v860_v40  ;;  %v947_v29 = vadd.f32 (!%p1294_p13), %v1878_v27, %v908_v26 }
 0x14f   : > { %v1507_v45 = vpop.f32.mrb[8].mxu0  ;;  %v1523_v46 = vpop.f32.mrb[8].mxu1  ;;  %v1365_v39 = vpack.c.bf16 (!%p1294_p13), %v947_v29, %v946_v28 }
 0x150   : > { %v849_v49 = vadd.f32 %v1507_v45, %v464_v41  ;;  %v865_v50 = vadd.f32 %v1523_v46, %v480_v42  ;;  %v744_v51 = vpop.f32.mrb[9].mxu0  ;;  %v808_v52 = vpop.f32.mrb[9].mxu1  ;;  %v1370_v46 = vpack.c.bf16 (!%p1294_p13), %v949_v34, %v948_v33 }
 0x151   : > { %v847_v55 = vadd.f32 %v744_v51, %v462_v43  ;;  %v863_v56 = vadd.f32 %v808_v52, %v478_v44  ;;  %v1508_v57 = vpop.f32.mrb[10].mxu0  ;;  %v1524_v58 = vpop.f32.mrb[10].mxu1  ;;  %v913_v37 = vld [vmem:[#allocation2 + $0x30] sm:$0xff] (!%p1294_p13)  ;;  %1366 = vst [vmem:[%s1845_s29] sm:$0xff] (!%p1294_p13), %v1365_v39  }
 0x152   : > { %881 = vst [vmem:[#allocation2 + $0x50] sm:$0xff] %v849_v49  ;;  %897 = vst [vmem:[#allocation2 + $0xd0] sm:$0xff] %v865_v50  ;;  %v850_v59 = vadd.f32 %v1508_v57, %v465_v47  ;;  %v866_v60 = vadd.f32 %v1524_v58, %v481_v48  ;;  %v747_v61 = vpop.f32.mrb[11].mxu0  ;;  %v811_v62 = vpop.f32.mrb[11].mxu1  ;;  %v911_v32 = vld [vmem:[#allocation2 + $0x20] sm:$0xff] (!%p1294_p13)  ;;  %v952_v41 = vadd.f32 (!%p1294_p13), %v1878_v27, %v913_v37 }
 0x153   : > { %879 = vst [vmem:[#allocation2 + $0x40] sm:$0xff] %v847_v55  ;;  %895 = vst [vmem:[#allocation2 + $0xc0] sm:$0xff] %v863_v56  ;;  %v848_v63 = vadd.f32 %v747_v61, %v463_v53  ;;  %v864_v0 = vadd.f32 %v811_v62, %v479_v54  ;;  %v950_v36 = vadd.f32 (!%p1294_p13), %v1878_v27, %v911_v32  ;;  %v914_v38 = vld [vmem:[#allocation2 + $0x38] sm:$0xff] (!%p1294_p13) }
 0x154   : > { %882 = vst [vmem:[#allocation2 + $0x58] sm:$0xff] %v850_v59  ;;  %898 = vst [vmem:[#allocation2 + $0xd8] sm:$0xff] %v866_v60  ;;  %v912_v35 = vld [vmem:[#allocation2 + $0x28] sm:$0xff] (!%p1294_p13)  ;;  %v953_v42 = vadd.f32 (!%p1294_p13), %v1878_v27, %v914_v38  ;;  %v923_v59 = vld [vmem:[#allocation2 + $0x80] sm:$0xff] (!%p1294_p13) }
 0x155   : > { %880 = vst [vmem:[#allocation2 + $0x48] sm:$0xff] %v848_v63  ;;  %896 = vst [vmem:[#allocation2 + $0xc8] sm:$0xff] %v864_v0  ;;  %v951_v40 = vadd.f32 (!%p1294_p13), %v1878_v27, %v912_v35  ;;  %v924_v0 = vld [vmem:[#allocation2 + $0x88] sm:$0xff] (!%p1294_p13) }
 0x156   : > { %v1380_v54 = vpack.c.bf16 (!%p1294_p13), %v953_v42, %v952_v41  ;;  %1442 = vst [vmem:[%s1845_s29 + $0x8] sm:$0xff] (!%p1294_p13), %v1370_v46  }
 0x157   : > { %v1511_v5 = vpop.f32.mrb[12].mxu0  ;;  %v1527_v6 = vpop.f32.mrb[12].mxu1  ;;  %906 = sbr.rel (%p1294_p13) target bundleno = 363 (0x16b), region = 81  ;;  %v1375_v53 = vpack.c.bf16 (!%p1294_p13), %v951_v40, %v950_v36 }
 0x158   : > { %v853_v9 = vadd.f32 %v1511_v5, %v468_v1  ;;  %v869_v10 = vadd.f32 %v1527_v6, %v484_v2  ;;  %v760_v11 = vpop.f32.mrb[13].mxu0  ;;  %v824_v12 = vpop.f32.mrb[13].mxu1  ;;  %v925_v1 = vld [vmem:[#allocation2 + $0x90] sm:$0xff] (!%p1294_p13)  ;;  %v926_v2 = vld [vmem:[#allocation2 + $0x98] sm:$0xff] (!%p1294_p13)  ;;  %1444 = vst [vmem:[%s1845_s29 + $0x18] sm:$0xff] (!%p1294_p13), %v1380_v54   ;;  %v963_v5 = vadd.f32 (!%p1294_p13), %v1878_v27, %v924_v0 }
 0x159   : > { %v851_v15 = vadd.f32 %v760_v11, %v466_v3  ;;  %v867_v16 = vadd.f32 %v824_v12, %v482_v4  ;;  %v1512_v17 = vpop.f32.mrb[14].mxu0  ;;  %v1528_v18 = vpop.f32.mrb[14].mxu1  ;;  %v917_v45 = vld [vmem:[#allocation2 + $0x50] sm:$0xff] (!%p1294_p13)  ;;  %1443 = vst [vmem:[%s1845_s29 + $0x10] sm:$0xff] (!%p1294_p13), %v1375_v53   ;;  %v962_v4 = vadd.f32 (!%p1294_p13), %v1878_v27, %v923_v59  ;;  %v964_v6 = vadd.f32 (!%p1294_p13), %v1878_v27, %v925_v1 }
 0x15a   : > { %885 = vst [vmem:[#allocation2 + $0x70] sm:$0xff] %v853_v9  ;;  %901 = vst [vmem:[#allocation2 + $0xf0] sm:$0xff] %v869_v10  ;;  %v854_v19 = vadd.f32 %v1512_v17, %v469_v7  ;;  %v870_v20 = vadd.f32 %v1528_v18, %v485_v8  ;;  %v763_v21 = vpop.f32.mrb[15].mxu0  ;;  %v827_v22 = vpop.f32.mrb[15].mxu1  ;;  %v915_v43 = vld [vmem:[#allocation2 + $0x40] sm:$0xff] (!%p1294_p13)  ;;  %v956_v50 = vadd.f32 (!%p1294_p13), %v1878_v27, %v917_v45  ;;  %v928_v8 = vld [vmem:[#allocation2 + $0xa8] sm:$0xff] (!%p1294_p13) }
 0x15b   : > { %883 = vst [vmem:[#allocation2 + $0x60] sm:$0xff] %v851_v15  ;;  %899 = vst [vmem:[#allocation2 + $0xe0] sm:$0xff] %v867_v16  ;;  %v852_v23 = vadd.f32 %v763_v21, %v467_v13  ;;  %v868_v24 = vadd.f32 %v827_v22, %v483_v14  ;;  %v954_v47 = vadd.f32 (!%p1294_p13), %v1878_v27, %v915_v43  ;;  %v918_v49 = vld [vmem:[#allocation2 + $0x58] sm:$0xff] (!%p1294_p13)  ;;  %v927_v7 = vld [vmem:[#allocation2 + $0xa0] sm:$0xff] (!%p1294_p13) }
 0x15c   : > { %886 = vst [vmem:[#allocation2 + $0x78] sm:$0xff] %v854_v19  ;;  %902 = vst [vmem:[#allocation2 + $0xf8] sm:$0xff] %v870_v20  ;;  %v916_v44 = vld [vmem:[#allocation2 + $0x48] sm:$0xff] (!%p1294_p13)  ;;  %v957_v55 = vadd.f32 (!%p1294_p13), %v1878_v27, %v918_v49  ;;  %v929_v9 = vld [vmem:[#allocation2 + $0xb0] sm:$0xff] (!%p1294_p13)  ;;  %v965_v12 = vadd.f32 (!%p1294_p13), %v1878_v27, %v926_v2  ;;  %v966_v13 = vadd.f32 (!%p1294_p13), %v1878_v27, %v927_v7 }
 0x15d   : > { %884 = vst [vmem:[#allocation2 + $0x68] sm:$0xff] %v852_v23  ;;  %900 = vst [vmem:[#allocation2 + $0xe8] sm:$0xff] %v868_v24  ;;  %v955_v48 = vadd.f32 (!%p1294_p13), %v1878_v27, %v916_v44  ;;  %v930_v14 = vld [vmem:[#allocation2 + $0xb8] sm:$0xff] (!%p1294_p13)  ;;  %v931_v15 = vld [vmem:[#allocation2 + $0xc0] sm:$0xff] (!%p1294_p13)  ;;  %v1405_v17 = vpack.c.bf16 (!%p1294_p13), %v963_v5, %v962_v4  ;;  %v967_v18 = vadd.f32 (!%p1294_p13), %v1878_v27, %v928_v8 }
 0x15e   : > { %v1390_v3 = vpack.c.bf16 %v957_v55, %v956_v50  ;;  %v932_v16 = vld [vmem:[#allocation2 + $0xc8] sm:$0xff]  ;;  %v968_v19 = vadd.f32 %v1878_v27, %v929_v9  ;;  %v969_v20 = vadd.f32 %v1878_v27, %v930_v14  ;;  %v933_v21 = vld [vmem:[#allocation2 + $0xd0] sm:$0xff]  ;;  %v934_v22 = vld [vmem:[#allocation2 + $0xd8] sm:$0xff]  ;;  %v1410_v24 = vpack.c.bf16 %v965_v12, %v964_v6 }
 0x15f   : > { %v1385_v60 = vpack.c.bf16 %v955_v48, %v954_v47  ;;  %v970_v25 = vadd.f32 %v1878_v27, %v931_v15  ;;  %v971_v26 = vadd.f32 %v1878_v27, %v932_v16  ;;  %v972_v28 = vadd.f32 %v1878_v27, %v933_v21  ;;  %1449 = vst [vmem:[%s1845_s29 + $0x40] sm:$0xff] %v1405_v17  }
 0x160   : > { %1446 = vst [vmem:[%s1845_s29 + $0x28] sm:$0xff] %v1390_v3   ;;  %v1415_v32 = vpack.c.bf16 %v967_v18, %v966_v13  ;;  %v1420_v33 = vpack.c.bf16 %v969_v20, %v968_v19  ;;  %v973_v34 = vadd.f32 %v1878_v27, %v934_v22  ;;  %1450 = vst [vmem:[%s1845_s29 + $0x48] sm:$0xff] %v1410_v24  }
 0x161   : > { %v921_v57 = vld [vmem:[#allocation2 + $0x70] sm:$0xff]  ;;  %1445 = vst [vmem:[%s1845_s29 + $0x20] sm:$0xff] %v1385_v60   ;;  %v1425_v36 = vpack.c.bf16 %v971_v26, %v970_v25 }
 0x162   : > { %v919_v51 = vld [vmem:[#allocation2 + $0x60] sm:$0xff]  ;;  %v960_v62 = vadd.f32 %v1878_v27, %v921_v57  ;;  %v937_v30 = vld [vmem:[#allocation2 + $0xf0] sm:$0xff]  ;;  %1451 = vst [vmem:[%s1845_s29 + $0x50] sm:$0xff] %v1415_v32   ;;  %1452 = vst [vmem:[%s1845_s29 + $0x58] sm:$0xff] %v1420_v33   ;;  %v1430_v40 = vpack.c.bf16 %v973_v34, %v972_v28 }
 0x163   : > { %v958_v56 = vadd.f32 %v1878_v27, %v919_v51  ;;  %v922_v58 = vld [vmem:[#allocation2 + $0x78] sm:$0xff]  ;;  %v935_v23 = vld [vmem:[#allocation2 + $0xe0] sm:$0xff]  ;;  %v976_v38 = vadd.f32 %v1878_v27, %v937_v30  ;;  %1453 = vst [vmem:[%s1845_s29 + $0x60] sm:$0xff] %v1425_v36  }
 0x164   : > { %v920_v52 = vld [vmem:[#allocation2 + $0x68] sm:$0xff]  ;;  %v961_v63 = vadd.f32 %v1878_v27, %v922_v58  ;;  %v938_v31 = vld [vmem:[#allocation2 + $0xf8] sm:$0xff]  ;;  %v974_v35 = vadd.f32 %v1878_v27, %v935_v23  ;;  %1454 = vst [vmem:[%s1845_s29 + $0x68] sm:$0xff] %v1430_v40  }
 0x165   : > { %v959_v61 = vadd.f32 %v1878_v27, %v920_v52  ;;  %v936_v29 = vld [vmem:[#allocation2 + $0xe8] sm:$0xff]  ;;  %v977_v39 = vadd.f32 %v1878_v27, %v938_v31 }
 0x166   : > { %v1400_v11 = vpack.c.bf16 %v961_v63, %v960_v62  ;;  %v975_v37 = vadd.f32 %v1878_v27, %v936_v29 }
 0x167   : > { %v1395_v10 = vpack.c.bf16 %v959_v61, %v958_v56  ;;  %v1440_v42 = vpack.c.bf16 %v977_v39, %v976_v38 }
 0x168   : > { %1448 = vst [vmem:[%s1845_s29 + $0x38] sm:$0xff] %v1400_v11   ;;  %v1435_v41 = vpack.c.bf16 %v975_v37, %v974_v35 }
 0x169   : > { %1447 = vst [vmem:[%s1845_s29 + $0x30] sm:$0xff] %v1395_v10   ;;  %1456 = vst [vmem:[%s1845_s29 + $0x78] sm:$0xff] %v1440_v42  }
 0x16a   : > { %1455 = vst [vmem:[%s1845_s29 + $0x70] sm:$0xff] %v1435_v41  }
 0x16b PF: > { %s13_s18 = sadd.s32 1, %s1681_s18   ;;  %s1953_s12 = smov %s1661_s13 }
 0x16c   : > { %p10_p0 = scmp.ge.s32.totalorder %s13_s18, 12   ;;  %s1954_s13 = smov %s1755_s25 }
 0x16d   : > { %s1955_s14 = smov %s1673_s16  ;;  %s1956_s15 = smov %s1677_s17 }
 0x16e   : > { %s1957_s16 = smov %s1960_s19  ;;  %s1958_s17 = smov %s1964_s20 }
 0x16f   :  { %12 = sbr.rel (!%p10_p0) target bundleno = 4 (0x4), region = 122 }

// kernel: _lambda_.41
= control target key start
LH: loop header
LB: loop body
LE: loop exit
PB: predicated region body
PF: predicated region fallthrough
CT: control target
= control target key end

     0   :  { %s864_s12 = smov 0   ;;  %s866_s13 = smov 0   ;;  %s965_s0 = inlined_call_operand.vmem [shape: bf16[16,128], index: 0, kind: input, shape index: {}]   ;;  %s966_s1 = inlined_call_operand.vmem [shape: bf16[128,1024], index: 1, kind: input, shape index: {}]   ;;  %s967_s2 = inlined_call_operand.vmem [shape: f32[1,1024], index: 2, kind: input, shape index: {}]   ;;  %s968_s3 = inlined_call_operand.vmem [shape: bf16[16,1024], index: 3, kind: output, shape index: {}]  }
   0x1   :  { %s868_s14 = smov 0   ;;  %s870_s15 = smov 0  }
   0x2   :  { %s872_s16 = smov 0  }
   0x3 LB: > { %s28_s17 = sadd.s32 1, %s837_s15  ;;  %s697_s18 = sadd.s32 4294967295, %s841_s16   ;;  %s841_s16 = sphi %s872_s16, %s13_s16   ;;  %s837_s15 = sphi %s870_s15, %s973_s15   ;;  %s833_s14 = sphi %s868_s14, %s972_s14   ;;  %s829_s13 = sphi %s866_s13, %s971_s13   ;;  %s825_s12 = sphi %s864_s12, %s970_s12  }
   0x4   : > { %p30_p0 = scmp.ge.s32.totalorder %s28_s17, 4  ;;  %p76_p1 = scmp.ne.s32.totalorder %s829_s13, %s825_s12 }
   0x5   : > { %p77_p2 = scmp.eq.s32.totalorder %s841_s16, 0  ;;  %p134_p4 = scmp.eq.s32.totalorder %s697_s18, 3 }
   0x6   : > { %s975_s17 = smov (%p30_p0, %s28_s17), 0  ;;  %s69_s20 = sadd.s32 1, %s829_s13 }
   0x7   : > { %p78_p3 = por %p77_p2, %p76_p1  ;;  %s65_s19 = ssub.s32 %s837_s15, %s975_s17 }
   0x8   : > { %p67_p5 = scmp.eq.s32.totalorder %s65_s19, 0  ;;  %p899_p6 = por %p134_p4, %p76_p1 }
   0x9   : > { %p701_p7 = scmp.ge.s32.totalorder %s841_s16, 4 }
   0xa   : > { %s904_s22 = scalar_select %p67_p5, %s829_s13, %s69_s20  }
   0xb   : > { %168 = sbr.rel (%p701_p7) target bundleno = 38 (0x26), region = 20 }
  0x12   : > { %171 = sbr.rel (!%p78_p3) target bundleno = 38 (0x26), region = 24  ;;  %s173_s23 = sand.u32 (%p78_p3), 1, %s829_s13  }
  0x13   : > { %s733_s24 = sshll.u32 (%p78_p3), %s837_s15, 3  ;;  %s702_s25 = sshll.u32 (%p78_p3), %s173_s23, 7 }
  0x14   : > { %s912_s28 = scalar_lea.vmem (%p78_p3), %s966_s1, %s733_s24  ;;  %s175_s29 = scalar_lea.vmem (%p78_p3), [#allocation3], %s702_s25 }
  0x15   : > { %v239_v0 = vld [vmem:[%s912_s28] sm:$0xff] (%p78_p3) }
  0x16   : > { %v241_v1 = vld [vmem:[%s912_s28 + $0x20] sm:$0xff] (%p78_p3)  ;;  %240 = vst [vmem:[%s175_s29] sm:$0xff] (%p78_p3), %v239_v0 }
  0x17   : > { %v243_v2 = vld [vmem:[%s912_s28 + $0x40] sm:$0xff] (%p78_p3)  ;;  %242 = vst [vmem:[%s175_s29 + $0x8] sm:$0xff] (%p78_p3), %v241_v1 }
  0x18   : > { %244 = vst [vmem:[%s175_s29 + $0x10] sm:$0xff] (%p78_p3), %v243_v2  ;;  %v245_v3 = vld [vmem:[%s912_s28 + $0x60] sm:$0xff] (%p78_p3) }
  0x19   : > { %v247_v4 = vld [vmem:[%s912_s28 + $0x80] sm:$0xff]  ;;  %246 = vst [vmem:[%s175_s29 + $0x18] sm:$0xff] %v245_v3 }
  0x1a   : > { %v249_v5 = vld [vmem:[%s912_s28 + $0xa0] sm:$0xff]  ;;  %248 = vst [vmem:[%s175_s29 + $0x20] sm:$0xff] %v247_v4 }
  0x1b   : > { %250 = vst [vmem:[%s175_s29 + $0x28] sm:$0xff] %v249_v5  ;;  %v251_v6 = vld [vmem:[%s912_s28 + $0xc0] sm:$0xff] }
  0x1c   : > { %v253_v7 = vld [vmem:[%s912_s28 + $0xe0] sm:$0xff]  ;;  %252 = vst [vmem:[%s175_s29 + $0x30] sm:$0xff] %v251_v6 }
  0x1d   : > { %v255_v8 = vld [vmem:[%s912_s28 + $0x100] sm:$0xff]  ;;  %254 = vst [vmem:[%s175_s29 + $0x38] sm:$0xff] %v253_v7 }
  0x1e   : > { %256 = vst [vmem:[%s175_s29 + $0x40] sm:$0xff] %v255_v8  ;;  %v257_v9 = vld [vmem:[%s912_s28 + $0x120] sm:$0xff] }
  0x1f   : > { %v259_v10 = vld [vmem:[%s912_s28 + $0x140] sm:$0xff]  ;;  %258 = vst [vmem:[%s175_s29 + $0x48] sm:$0xff] %v257_v9 }
  0x20   : > { %v261_v11 = vld [vmem:[%s912_s28 + $0x160] sm:$0xff]  ;;  %260 = vst [vmem:[%s175_s29 + $0x50] sm:$0xff] %v259_v10 }
  0x21   : > { %262 = vst [vmem:[%s175_s29 + $0x58] sm:$0xff] %v261_v11  ;;  %v263_v12 = vld [vmem:[%s912_s28 + $0x180] sm:$0xff] }
  0x22   : > { %v265_v13 = vld [vmem:[%s912_s28 + $0x1a0] sm:$0xff]  ;;  %264 = vst [vmem:[%s175_s29 + $0x60] sm:$0xff] %v263_v12 }
  0x23   : > { %v267_v14 = vld [vmem:[%s912_s28 + $0x1c0] sm:$0xff]  ;;  %266 = vst [vmem:[%s175_s29 + $0x68] sm:$0xff] %v265_v13 }
  0x24   : > { %268 = vst [vmem:[%s175_s29 + $0x70] sm:$0xff] %v267_v14  ;;  %v269_v15 = vld [vmem:[%s912_s28 + $0x1e0] sm:$0xff] }
  0x25   : > { %270 = vst [vmem:[%s175_s29 + $0x78] sm:$0xff] %v269_v15 }
  0x26 PF: > { %p705_p8 = scmp.ge.s32.totalorder %s841_s16, 1  ;;  %p283_p9 = scmp.lt.s32.totalorder %s841_s16, 5 }
  0x28   : > { %p284_p10 = pnand %p705_p8, %p283_p9 }
  0x29   : > { %s290_s30 = sand.u32 (!%p284_p10), 1, %s825_s12   ;;  %v843_v16 = vmov (!%p284_p10), 0   ;;  %v802_v33 = vld [vmem:[%s965_s0] sm:$0xff] (!%p284_p10)   ;;  %s708_s8 = sshll.u32 (!%p284_p10), %s833_s14, 1  ;;  %v519_v34 = vlaneseq (!%p284_p10) }
  0x2a   : > { %287 = sbr.rel (%p284_p10) target bundleno = 305 (0x131), region = 66  ;;  %s706_s4 = sshll.u32 (!%p284_p10), %s290_s30, 7  ;;  %491 = vmatprep.mubr.bf16.mxu0 (!%p284_p10), %v843_v16 }
  0x2b   : > { %s292_s5 = scalar_lea.vmem (!%p284_p10), [#allocation3], %s706_s4  ;;  %p336_p11 = scmp.lt.s32.totalorder (!%p284_p10), %s708_s8, 7  ;;  %v520_v35 = vshrl.u32 (!%p284_p10), %v519_v34, 7 }
  0x2c   : > { %v778_v17 = vld [vmem:[%s292_s5 + $0x4] ss:$8 sps:$4 sm:$0xff] (!%p284_p10)   ;;  %v780_v18 = vld [vmem:[%s292_s5] ss:$8 sps:$4 sm:$0xff] (!%p284_p10)   ;;  %v781_v19 = vld [vmem:[%s292_s5 + $0x14] ss:$8 sps:$4 sm:$0xff] (!%p284_p10)  }
  0x2d   : > { %459 = vmatprep.subr.bf16.mxu0 (!%p284_p10), %v778_v17  ;;  %v783_v20 = vld [vmem:[%s292_s5 + $0x10] ss:$8 sps:$4 sm:$0xff] (!%p284_p10)   ;;  %v784_v21 = vld [vmem:[%s292_s5 + $0x24] ss:$8 sps:$4 sm:$0xff] (!%p284_p10)   ;;  %v786_v22 = vld [vmem:[%s292_s5 + $0x20] ss:$8 sps:$4 sm:$0xff] (!%p284_p10)  }
  0x2e   : > { %460 = vmatpush1.bf16.msra.mxu0 (!%p284_p10), %v780_v18  ;;  %v787_v23 = vld [vmem:[%s292_s5 + $0x34] ss:$8 sps:$4 sm:$0xff] (!%p284_p10)   ;;  %v789_v24 = vld [vmem:[%s292_s5 + $0x30] ss:$8 sps:$4 sm:$0xff] (!%p284_p10)   ;;  %v790_v25 = vld [vmem:[%s292_s5 + $0x44] ss:$8 sps:$4 sm:$0xff] (!%p284_p10)  }
  0x2f   : > { %461 = vmatprep.subr.bf16.mxu0 (!%p284_p10), %v781_v19  ;;  %v792_v26 = vld [vmem:[%s292_s5 + $0x40] ss:$8 sps:$4 sm:$0xff] (!%p284_p10)   ;;  %v793_v27 = vld [vmem:[%s292_s5 + $0x54] ss:$8 sps:$4 sm:$0xff] (!%p284_p10)   ;;  %v795_v28 = vld [vmem:[%s292_s5 + $0x50] ss:$8 sps:$4 sm:$0xff] (!%p284_p10)  }
  0x30   : > { %v796_v29 = vld [vmem:[%s292_s5 + $0x64] ss:$8 sps:$4 sm:$0xff] (!%p284_p10)   ;;  %v798_v30 = vld [vmem:[%s292_s5 + $0x60] ss:$8 sps:$4 sm:$0xff] (!%p284_p10)   ;;  %v799_v31 = vld [vmem:[%s292_s5 + $0x74] ss:$8 sps:$4 sm:$0xff] (!%p284_p10)  }
  0x31   : > { %v801_v32 = vld [vmem:[%s292_s5 + $0x70] ss:$8 sps:$4 sm:$0xff]   ;;  %s977_s8 = smov (!%p336_p11, %s708_s8), 7  ;;  %v521_v36 = vsub.s32 0, %v520_v35  ;;  %v525_v38 = vsub.s32 1, %v520_v35  ;;  %s707_s18 = sshll.u32 %s290_s30, 4 }
  0x32   : > { %462 = vmatpush1.bf16.msra.mxu0 %v783_v20  ;;  %s338_s11 = scalar_lea.vmem %s967_s2, %s977_s8  ;;  %s323_s19 = scalar_lea.vmem [#allocation4], %s707_s18 }
  0x33   : > { %463 = vmatprep.subr.bf16.mxu0 %v784_v21  ;;  %v517_v37 = vld [vmem:[%s338_s11] sm:$0x3]  ;;  %s736_s20 = sshll.u32 (%p899_p6), %s833_s14, 3 }
  0x34   : > { %v522_v39 = vrot.slane %v517_v37, %v521_v36  ;;  %v526_v40 = vrot.slane %v517_v37, %v525_v38  ;;  %s559_s24 = scalar_lea.vmem (%p899_p6), %s968_s3, %s736_s20 }
  0x36   : > { %464 = vmatpush1.bf16.msra.mxu0 %v786_v22 }
  0x37   : > { %465 = vmatprep.subr.bf16.mxu0 %v787_v23 }
  0x3a   : > { %466 = vmatpush1.bf16.msra.mxu0 %v789_v24 }
  0x3b   : > { %467 = vmatprep.subr.bf16.mxu0 %v790_v25 }
  0x3e   : > { %468 = vmatpush1.bf16.msra.mxu0 %v792_v26 }
  0x3f   : > { %469 = vmatprep.subr.bf16.mxu0 %v793_v27 }
  0x42   : > { %470 = vmatpush1.bf16.msra.mxu0 %v795_v28 }
  0x43   : > { %471 = vmatprep.subr.bf16.mxu0 %v796_v29 }
  0x46   : > { %472 = vmatpush1.bf16.msra.mxu0 %v798_v30 }
  0x47   : > { %473 = vmatprep.subr.bf16.mxu0 %v799_v31 }
  0x4a   : > { %474 = vmatpush1.bf16.msra.mxu0 %v801_v32 }
  0x4d   : > { %492 = vmatmul.mubr.bf16.vlgmr.msra.gmra.mrb[0].mxu0 %v802_v33 }
 0x120   : > { %v493_v41 = vpop.f32.mrb[0].mxu0 }
 0x121   : > { %v529_v42 = vadd.f32 %v522_v39, %v493_v41  ;;  %v495_v43 = vpop.f32.mrb[1].mxu0 }
 0x122   : > { %v530_v44 = vadd.f32 %v526_v40, %v495_v43  ;;  %v497_v45 = vpop.f32.mrb[2].mxu0  ;;  %553 = sbr.rel (!%p899_p6) target bundleno = 305 (0x131), region = 82 }
 0x123   : > { %v531_v46 = vadd.f32 %v522_v39, %v497_v45  ;;  %v499_v47 = vpop.f32.mrb[3].mxu0 }
 0x124   : > { %v734_v48 = vpack.c.bf16 %v530_v44, %v529_v42  ;;  %v532_v49 = vadd.f32 %v526_v40, %v499_v47 }
 0x126   : > { %545 = vst [vmem:[%s323_s19] sm:$0xff] %v734_v48  ;;  %v735_v50 = vpack.c.bf16 %v532_v49, %v531_v46 }
 0x128   : > { %546 = vst [vmem:[%s323_s19 + $0x8] sm:$0xff] %v735_v50 }
 0x12d   : > { %v589_v51 = vld [vmem:[%s323_s19] sm:$0xff] }
 0x12e   : > { %590 = vst [vmem:[%s559_s24] sm:$0xff] %v589_v51 }
 0x12f   : > { %v591_v52 = vld [vmem:[%s323_s19 + $0x8] sm:$0xff] }
 0x130   : > { %592 = vst [vmem:[%s559_s24 + $0x20] sm:$0xff] %v591_v52 }
 0x131 PF: > { %s13_s16 = sadd.s32 1, %s841_s16   ;;  %s970_s12 = smov %s829_s13 }
 0x132   : > { %p10_p12 = scmp.ge.s32.totalorder %s13_s16, 6   ;;  %s971_s13 = smov %s904_s22 }
 0x133   : > { %s972_s14 = smov %s837_s15  ;;  %s973_s15 = smov %s975_s17 }
 0x134   :  { %12 = sbr.rel (!%p10_p12) target bundleno = 3 (0x3), region = 157 }

// kernel: _lambda_.33
= control target key start
LH: loop header
LB: loop body
LE: loop exit
PB: predicated region body
PF: predicated region fallthrough
CT: control target
= control target key end

     0   :  { %s371_s1 = inlined_call_operand.vmem [shape: bf16[256,128], index: 1, kind: input, shape index: {}]   ;;  %s372_s0 = inlined_call_operand.vmem [shape: bf16[16,256], index: 0, kind: input, shape index: {}]   ;;  %s373_s2 = inlined_call_operand.vmem [shape: f32[1,128], index: 2, kind: input, shape index: {}]   ;;  %s374_s3 = inlined_call_operand.vmem [shape: f32[16,128], index: 3, kind: output, shape index: {}]  }
   0x1   :  { %v269_v0 = vld [vmem:[%s371_s1 + $0x40] sm:$0xff]   ;;  %v271_v2 = vld [vmem:[%s371_s1 + $0x48] sm:$0xff]   ;;  %v273_v4 = vld [vmem:[%s371_s1 + $0x50] sm:$0xff]  }
   0x2   :  { %v270_v1 = vld [vmem:[%s371_s1] sm:$0xff]   ;;  %247 = vmatprep.subr.bf16.mxu0 %v269_v0  ;;  %v272_v3 = vld [vmem:[%s371_s1 + $0x8] sm:$0xff]   ;;  %v274_v5 = vld [vmem:[%s371_s1 + $0x10] sm:$0xff]  }
   0x3   :  { %248 = vmatpush3.bf16.msra.mxu0 %v270_v1  ;;  %v275_v6 = vld [vmem:[%s371_s1 + $0x58] sm:$0xff]   ;;  %v277_v8 = vld [vmem:[%s371_s1 + $0x60] sm:$0xff]   ;;  %v279_v10 = vld [vmem:[%s371_s1 + $0x68] sm:$0xff]  }
   0x4   :  { %249 = vmatprep.subr.bf16.mxu0 %v271_v2  ;;  %v276_v7 = vld [vmem:[%s371_s1 + $0x18] sm:$0xff]   ;;  %v278_v9 = vld [vmem:[%s371_s1 + $0x20] sm:$0xff]   ;;  %v280_v12 = vld [vmem:[%s371_s1 + $0x28] sm:$0xff]  }
   0x5   :  { %v287_v11 = vld [vmem:[%s372_s0 + $0x4] ss:$8 sps:$4 sm:$0xff]   ;;  %v281_v13 = vld [vmem:[%s371_s1 + $0x70] sm:$0xff]   ;;  %v283_v15 = vld [vmem:[%s371_s1 + $0x78] sm:$0xff]  }
   0x6   :  { %195 = vmatprep.mubr.bf16.mxu0 %v287_v11  ;;  %v282_v14 = vld [vmem:[%s371_s1 + $0x30] sm:$0xff]   ;;  %v284_v16 = vld [vmem:[%s371_s1 + $0x38] sm:$0xff]   ;;  %v285_v17 = vld [vmem:[%s372_s0] ss:$8 sps:$4 sm:$0xff]  }
   0x7   :  { %250 = vmatpush3.bf16.msra.mxu0 %v272_v3  ;;  %v246_v20 = vld [vmem:[%s373_s2] ss:$0 sm:$0xff] }
   0x8   :  { %251 = vmatprep.subr.bf16.mxu0 %v273_v4 }
   0xb   :  { %252 = vmatpush3.bf16.msra.mxu0 %v274_v5 }
   0xc   :  { %253 = vmatprep.subr.bf16.mxu0 %v275_v6 }
   0xf   :  { %254 = vmatpush3.bf16.msra.mxu0 %v276_v7 }
  0x10   :  { %255 = vmatprep.subr.bf16.mxu0 %v277_v8 }
  0x13   :  { %256 = vmatpush3.bf16.msra.mxu0 %v278_v9 }
  0x14   :  { %257 = vmatprep.subr.bf16.mxu0 %v279_v10 }
  0x17   :  { %258 = vmatpush3.bf16.msra.mxu0 %v280_v12 }
  0x18   :  { %259 = vmatprep.subr.bf16.mxu0 %v281_v13 }
  0x1b   :  { %260 = vmatpush3.bf16.msra.mxu0 %v282_v14 }
  0x1c   :  { %261 = vmatprep.subr.bf16.mxu0 %v283_v15 }
  0x1f   :  { %262 = vmatpush3.bf16.msra.mxu0 %v284_v16 }
  0x22   :  { %196 = vmatmul.mubr.bf16.vlgmr.msra.gmra.mrb[0].mxu0 %v285_v17 }
  0xf5   :  { %v263_v18 = vpop.f32.mrb[0].mxu0 }
  0xf6   :  { %v264_v19 = vpop.f32.mrb[1].mxu0 }
  0xf7   :  { %v265_v21 = vadd.f32 %v264_v19, %v263_v18  ;;  %v266_v22 = vpop.f32.mrb[2].mxu0 }
  0xf8   :  { %v267_v23 = vpop.f32.mrb[3].mxu0 }
  0xf9   :  { %v220_v24 = vadd.f32 %v265_v21, %v246_v20  ;;  %v268_v25 = vadd.f32 %v267_v23, %v266_v22 }
  0xfb   :  { %222 = vst [vmem:[%s374_s3] sm:$0xff] %v220_v24  ;;  %v221_v26 = vadd.f32 %v268_v25, %v246_v20 }
  0xfd   :  { %223 = vst [vmem:[%s374_s3 + $0x8] sm:$0xff] %v221_v26 }

// kernel: _lambda_.34
= control target key start
LH: loop header
LB: loop body
LE: loop exit
PB: predicated region body
PF: predicated region fallthrough
CT: control target
= control target key end

     0   :  { %v210_v0 = vmov 0.0   ;;  %vm211_vm0 = vmmov 0   ;;  %s268_s1 = inlined_call_operand.vmem [shape: bf16[128,128], index: 1, kind: input, shape index: {}]   ;;  %s269_s0 = inlined_call_operand.vmem [shape: bf16[16,128], index: 0, kind: input, shape index: {}]   ;;  %s270_s2 = inlined_call_operand.vmem [shape: f32[1,128], index: 2, kind: input, shape index: {}]   ;;  %s271_s3 = inlined_call_operand.vmem [shape: f32[16,128], index: 3, kind: output, shape index: {}]  }
   0x1   :  { %179 = vmatprep.subr.bf16.mxu0 %v210_v0  ;;  %v201_v1 = vld [vmem:[%s268_s1] sm:$0xff]   ;;  %195 = vmatprep.mubr.msk.bf16.mxu0 %vm211_vm0, %v210_v0  ;;  %v202_v2 = vld [vmem:[%s268_s1 + $0x8] sm:$0xff]   ;;  %v203_v3 = vld [vmem:[%s268_s1 + $0x10] sm:$0xff]  }
   0x2   :  { %180 = vmatpush3.bf16.msra.mxu0 %v201_v1  ;;  %v204_v4 = vld [vmem:[%s268_s1 + $0x18] sm:$0xff]   ;;  %v205_v5 = vld [vmem:[%s268_s1 + $0x20] sm:$0xff]   ;;  %v206_v6 = vld [vmem:[%s268_s1 + $0x28] sm:$0xff]  }
   0x3   :  { %181 = vmatprep.subr.bf16.mxu0 %v210_v0  ;;  %v207_v7 = vld [vmem:[%s268_s1 + $0x30] sm:$0xff]   ;;  %v208_v8 = vld [vmem:[%s268_s1 + $0x38] sm:$0xff]   ;;  %v209_v9 = vld [vmem:[%s269_s0] sm:$0xff]  }
   0x4   :  { %v169_v10 = vld [vmem:[%s270_s2] ss:$0 sm:$0xff] }
   0x6   :  { %182 = vmatpush3.bf16.msra.mxu0 %v202_v2 }
   0x7   :  { %183 = vmatprep.subr.bf16.mxu0 %v210_v0 }
   0xa   :  { %184 = vmatpush3.bf16.msra.mxu0 %v203_v3 }
   0xb   :  { %185 = vmatprep.subr.bf16.mxu0 %v210_v0 }
   0xe   :  { %186 = vmatpush3.bf16.msra.mxu0 %v204_v4 }
   0xf   :  { %187 = vmatprep.subr.bf16.mxu0 %v210_v0 }
  0x12   :  { %188 = vmatpush3.bf16.msra.mxu0 %v205_v5 }
  0x13   :  { %189 = vmatprep.subr.bf16.mxu0 %v210_v0 }
  0x16   :  { %190 = vmatpush3.bf16.msra.mxu0 %v206_v6 }
  0x17   :  { %191 = vmatprep.subr.bf16.mxu0 %v210_v0 }
  0x1a   :  { %192 = vmatpush3.bf16.msra.mxu0 %v207_v7 }
  0x1b   :  { %193 = vmatprep.subr.bf16.mxu0 %v210_v0 }
  0x1e   :  { %194 = vmatpush3.bf16.msra.mxu0 %v208_v8 }
  0x21   :  { %196 = vmatmul.mubr.bf16.vlgmr.msra.gmra.mrb[0].mxu0 %v209_v9 }
  0xf4   :  { %v129_v11 = vpop.f32.mrb[0].mxu0 }
  0xf5   :  { %v152_v12 = vadd.f32 %v169_v10, %v129_v11  ;;  %v197_v13 = vpop.f32.mrb[1].mxu0 }
  0xf6   :  { %v132_v14 = vpop.f32.mrb[2].mxu0 }
  0xf7   :  { %154 = vst [vmem:[%s271_s3] sm:$0xff] %v152_v12  ;;  %v153_v15 = vadd.f32 %v169_v10, %v132_v14  ;;  %v198_v16 = vpop.f32.mrb[3].mxu0 }
  0xf9   :  { %155 = vst [vmem:[%s271_s3 + $0x8] sm:$0xff] %v153_v15 }

// kernel: _lambda_.42
= control target key start
LH: loop header
LB: loop body
LE: loop exit
PB: predicated region body
PF: predicated region fallthrough
CT: control target
= control target key end

     0   :  { %s831_s12 = smov 0   ;;  %s833_s13 = smov 0   ;;  %s904_s0 = inlined_call_operand.vmem [shape: bf16[128,128], index: 0, kind: input, shape index: {}]   ;;  %s905_s1 = inlined_call_operand.vmem [shape: bf16[128,128], index: 1, kind: input, shape index: {}]   ;;  %s906_s2 = inlined_call_operand.vmem [shape: f32[1,128], index: 2, kind: input, shape index: {}]   ;;  %s907_s3 = inlined_call_operand.vmem [shape: bf16[128,128], index: 3, kind: output, shape index: {}]  }
   0x1   :  { %s835_s14 = smov 0  }
   0x2 LB: > { %s32_s15 = sadd.s32 1, %s805_s13  ;;  %p640_p0 = scmp.ge.s32.totalorder %s809_s14, 1  ;;  %s809_s14 = sphi %s835_s14, %s13_s14   ;;  %s805_s13 = sphi %s833_s13, %s909_s13   ;;  %s801_s12 = sphi %s831_s12, %s908_s12  }
   0x3   : > { %p34_p1 = scmp.ge.s32.totalorder %s32_s15, 2  ;;  %p188_p2 = scmp.lt.s32.totalorder %s809_s14, 3 }
   0x5   : > { %s911_s15 = smov (%p34_p1, %s32_s15), 0  ;;  %p189_p3 = pnand %p640_p0, %p188_p2 }
   0x6   : > { %v775_v0 = vld [vmem:[%s905_s1] sm:$0xff] (!%p189_p3)   ;;  %s641_s18 = sshll.u32 (!%p189_p3), %s801_s12, 3  ;;  %v776_v1 = vld [vmem:[%s905_s1 + $0x8] sm:$0xff] (!%p189_p3)   ;;  %v777_v2 = vld [vmem:[%s905_s1 + $0x10] sm:$0xff] (!%p189_p3)  }
   0x7   : > { %192 = sbr.rel (%p189_p3) target bundleno = 259 (0x103), region = 32  ;;  %p230_p4 = scmp.lt.s32.totalorder (!%p189_p3), %s641_s18, 15  ;;  %711 = vmatprep.subr.bf16.mxu0 (!%p189_p3), %v775_v0  ;;  %735 = vmatprep.subr.bf16.mxu1 (!%p189_p3), %v775_v0  ;;  %v778_v3 = vld [vmem:[%s905_s1 + $0x18] sm:$0xff] (!%p189_p3)   ;;  %v779_v6 = vld [vmem:[%s905_s1 + $0x20] sm:$0xff] (!%p189_p3)   ;;  %v780_v7 = vld [vmem:[%s905_s1 + $0x28] sm:$0xff] (!%p189_p3)  }
   0x8   : > { %712 = vmatpush3.bf16.msra.mxu0 (!%p189_p3), %v775_v0  ;;  %743 = vmatpush3.bf16.msra.mxu1 (!%p189_p3), %v775_v0  ;;  %v781_v8 = vld [vmem:[%s905_s1 + $0x30] sm:$0xff] (!%p189_p3)   ;;  %v782_v9 = vld [vmem:[%s905_s1 + $0x38] sm:$0xff] (!%p189_p3)   ;;  %v657_v13 = vld [vmem:[%s906_s2] ss:$0 sm:$0xff] (!%p189_p3) }
   0x9   : > { %713 = vmatprep.subr.bf16.mxu0 (!%p189_p3), %v776_v1  ;;  %736 = vmatprep.subr.bf16.mxu1 (!%p189_p3), %v776_v1 }
   0xc   : > { %714 = vmatpush3.bf16.msra.mxu0 (!%p189_p3), %v776_v1  ;;  %744 = vmatpush3.bf16.msra.mxu1 (!%p189_p3), %v776_v1 }
   0xd   : > { %715 = vmatprep.subr.bf16.mxu0 (!%p189_p3), %v777_v2  ;;  %737 = vmatprep.subr.bf16.mxu1 (!%p189_p3), %v777_v2 }
   0xe   : > { %s913_s18 = smov (!%p230_p4, %s641_s18), 15 }
   0xf   : > { %s642_s23 = sshll.u32 %s913_s18, 2 }
  0x10   : > { %s866_s26 = scalar_lea.vmem %s904_s0, %s642_s23  ;;  %716 = vmatpush3.bf16.msra.mxu0 %v777_v2  ;;  %745 = vmatpush3.bf16.msra.mxu1 %v777_v2  ;;  %s257_s17 = scalar_lea.vmem %s907_s3, %s642_s23 }
  0x11   : > { %v783_v4 = vld [vmem:[%s866_s26] sm:$0xff]   ;;  %v784_v5 = vld [vmem:[%s866_s26 + $0x10] sm:$0xff]   ;;  %717 = vmatprep.subr.bf16.mxu0 %v778_v3  ;;  %738 = vmatprep.subr.bf16.mxu1 %v778_v3  ;;  %v785_v10 = vld [vmem:[%s866_s26 + $0x8] sm:$0xff]  }
  0x12   : > { %727 = vmatprep.mubr.bf16.mxu0 %v783_v4  ;;  %731 = vmatprep.mubr.bf16.mxu1 %v784_v5  ;;  %v786_v11 = vld [vmem:[%s866_s26 + $0x18] sm:$0xff]  }
  0x14   : > { %718 = vmatpush3.bf16.msra.mxu0 %v778_v3  ;;  %746 = vmatpush3.bf16.msra.mxu1 %v778_v3 }
  0x15   : > { %719 = vmatprep.subr.bf16.mxu0 %v779_v6  ;;  %739 = vmatprep.subr.bf16.mxu1 %v779_v6 }
  0x18   : > { %720 = vmatpush3.bf16.msra.mxu0 %v779_v6  ;;  %747 = vmatpush3.bf16.msra.mxu1 %v779_v6 }
  0x19   : > { %721 = vmatprep.subr.bf16.mxu0 %v780_v7  ;;  %740 = vmatprep.subr.bf16.mxu1 %v780_v7 }
  0x1c   : > { %722 = vmatpush3.bf16.msra.mxu0 %v780_v7  ;;  %748 = vmatpush3.bf16.msra.mxu1 %v780_v7 }
  0x1d   : > { %723 = vmatprep.subr.bf16.mxu0 %v781_v8  ;;  %741 = vmatprep.subr.bf16.mxu1 %v781_v8 }
  0x20   : > { %724 = vmatpush3.bf16.msra.mxu0 %v781_v8  ;;  %749 = vmatpush3.bf16.msra.mxu1 %v781_v8 }
  0x21   : > { %725 = vmatprep.subr.bf16.mxu0 %v782_v9  ;;  %742 = vmatprep.subr.bf16.mxu1 %v782_v9 }
  0x24   : > { %726 = vmatpush3.bf16.msra.mxu0 %v782_v9  ;;  %750 = vmatpush3.bf16.msra.mxu1 %v782_v9 }
  0x27   : > { %728 = vmatmul.mubr.bf16.vlgmr.msra.gmra.mrb[0].mxu0 %v785_v10  ;;  %732 = vmatmul.mubr.bf16.vlgmr.msra.gmra.mrb[0].mxu1 %v786_v11 }
  0xfa   : > { %v729_v12 = vpop.f32.mrb[0].mxu0  ;;  %v733_v14 = vpop.f32.mrb[0].mxu1 }
  0xfb   : > { %v410_v15 = vpop.f32.mrb[1].mxu0  ;;  %v426_v16 = vpop.f32.mrb[1].mxu1  ;;  %v477_v19 = vadd.f32 %v729_v12, %v657_v13  ;;  %v481_v20 = vadd.f32 %v733_v14, %v657_v13 }
  0xfc   : > { %v730_v17 = vpop.f32.mrb[2].mxu0  ;;  %v734_v18 = vpop.f32.mrb[2].mxu1  ;;  %v475_v25 = vadd.f32 %v657_v13, %v410_v15  ;;  %v479_v26 = vadd.f32 %v657_v13, %v426_v16 }
  0xfd   : > { %v478_v21 = vadd.f32 %v730_v17, %v657_v13  ;;  %v482_v22 = vadd.f32 %v734_v18, %v657_v13  ;;  %v413_v23 = vpop.f32.mrb[3].mxu0  ;;  %v429_v24 = vpop.f32.mrb[3].mxu1 }
  0xfe   : > { %v476_v27 = vadd.f32 %v657_v13, %v413_v23  ;;  %v480_v28 = vadd.f32 %v657_v13, %v429_v24 }
  0xff   : > { %v684_v29 = vpack.c.bf16 %v478_v21, %v477_v19  ;;  %v694_v30 = vpack.c.bf16 %v482_v22, %v481_v20 }
 0x100   : > { %v679_v31 = vpack.c.bf16 %v476_v27, %v475_v25  ;;  %v689_v32 = vpack.c.bf16 %v480_v28, %v479_v26 }
 0x101   : > { %696 = vst [vmem:[%s257_s17 + $0x8] sm:$0xff] %v684_v29   ;;  %698 = vst [vmem:[%s257_s17 + $0x18] sm:$0xff] %v694_v30  }
 0x102   : > { %680 = vst [vmem:[%s257_s17] sm:$0xff] %v679_v31   ;;  %697 = vst [vmem:[%s257_s17 + $0x10] sm:$0xff] %v689_v32  }
 0x103 PF: > { %s13_s14 = sadd.s32 1, %s809_s14   ;;  %s908_s12 = smov %s805_s13 }
 0x104   : > { %p10_p5 = scmp.ge.s32.totalorder %s13_s14, 4   ;;  %s909_s13 = smov %s911_s15 }
 0x106   :  { %12 = sbr.rel (!%p10_p5) target bundleno = 2 (0x2), region = 76 }

// kernel: _lambda_.47
= control target key start
LH: loop header
LB: loop body
LE: loop exit
PB: predicated region body
PF: predicated region fallthrough
CT: control target
= control target key end

     0   :  { %s1467_s12 = smov 0   ;;  %s1469_s13 = smov 0   ;;  %s1604_s0 = inlined_call_operand.vmem [shape: bf16[512,128], index: 0, kind: input, shape index: {}]   ;;  %s1605_s1 = inlined_call_operand.vmem [shape: bf16[128,128], index: 1, kind: input, shape index: {}]   ;;  %s1606_s2 = inlined_call_operand.vmem [shape: f32[1,128], index: 2, kind: input, shape index: {}]   ;;  %s1607_s3 = inlined_call_operand.vmem [shape: bf16[512,128], index: 3, kind: output, shape index: {}]  }
   0x1   :  { %s1471_s14 = smov 0  }
   0x2 LB: > { %s32_s15 = sadd.s32 1, %s1441_s13  ;;  %p1096_p0 = scmp.ge.s32.totalorder %s1445_s14, 1  ;;  %s1445_s14 = sphi %s1471_s14, %s13_s14   ;;  %s1441_s13 = sphi %s1469_s13, %s1609_s13   ;;  %s1437_s12 = sphi %s1467_s12, %s1608_s12  }
   0x3   : > { %p34_p1 = scmp.ge.s32.totalorder %s32_s15, 2  ;;  %p188_p2 = scmp.lt.s32.totalorder %s1445_s14, 3 }
   0x5   : > { %s1611_s15 = smov (%p34_p1, %s32_s15), 0  ;;  %p189_p3 = pnand %p1096_p0, %p188_p2 }
   0x6   : > { %v1399_v0 = vld [vmem:[%s1605_s1] sm:$0xff] (!%p189_p3)   ;;  %s1097_s18 = sshll.u32 (!%p189_p3), %s1437_s12, 5  ;;  %v1400_v1 = vld [vmem:[%s1605_s1 + $0x8] sm:$0xff] (!%p189_p3)   ;;  %v1401_v2 = vld [vmem:[%s1605_s1 + $0x10] sm:$0xff] (!%p189_p3)  }
   0x7   : > { %192 = sbr.rel (%p189_p3) target bundleno = 283 (0x11b), region = 32  ;;  %p230_p4 = scmp.lt.s32.totalorder (!%p189_p3), %s1097_s18, 63  ;;  %1311 = vmatprep.subr.bf16.mxu0 (!%p189_p3), %v1399_v0  ;;  %1359 = vmatprep.subr.bf16.mxu1 (!%p189_p3), %v1399_v0  ;;  %v1402_v3 = vld [vmem:[%s1605_s1 + $0x18] sm:$0xff] (!%p189_p3)   ;;  %v1403_v6 = vld [vmem:[%s1605_s1 + $0x20] sm:$0xff] (!%p189_p3)   ;;  %v1404_v7 = vld [vmem:[%s1605_s1 + $0x28] sm:$0xff] (!%p189_p3)  }
   0x8   : > { %1312 = vmatpush3.bf16.msra.mxu0 (!%p189_p3), %v1399_v0  ;;  %1367 = vmatpush3.bf16.msra.mxu1 (!%p189_p3), %v1399_v0  ;;  %v1405_v8 = vld [vmem:[%s1605_s1 + $0x30] sm:$0xff] (!%p189_p3)   ;;  %v1406_v9 = vld [vmem:[%s1605_s1 + $0x38] sm:$0xff] (!%p189_p3)   ;;  %v1538_v25 = vld [vmem:[%s1606_s2] ss:$0 sm:$0xff] (!%p189_p3) }
   0x9   : > { %1313 = vmatprep.subr.bf16.mxu0 (!%p189_p3), %v1400_v1  ;;  %1360 = vmatprep.subr.bf16.mxu1 (!%p189_p3), %v1400_v1 }
   0xc   : > { %1314 = vmatpush3.bf16.msra.mxu0 (!%p189_p3), %v1400_v1  ;;  %1368 = vmatpush3.bf16.msra.mxu1 (!%p189_p3), %v1400_v1 }
   0xd   : > { %1315 = vmatprep.subr.bf16.mxu0 (!%p189_p3), %v1401_v2  ;;  %1361 = vmatprep.subr.bf16.mxu1 (!%p189_p3), %v1401_v2 }
   0xe   : > { %s1613_s18 = smov (!%p230_p4, %s1097_s18), 63 }
   0xf   : > { %s1098_s23 = sshll.u32 %s1613_s18, 2 }
  0x10   : > { %s1502_s26 = scalar_lea.vmem %s1604_s0, %s1098_s23  ;;  %1316 = vmatpush3.bf16.msra.mxu0 %v1401_v2  ;;  %1369 = vmatpush3.bf16.msra.mxu1 %v1401_v2  ;;  %s1551_s17 = scalar_lea.vmem %s1607_s3, %s1098_s23 }
  0x11   : > { %v1407_v4 = vld [vmem:[%s1502_s26] sm:$0xff]   ;;  %1317 = vmatprep.subr.bf16.mxu0 %v1402_v3  ;;  %1362 = vmatprep.subr.bf16.mxu1 %v1402_v3  ;;  %v1409_v10 = vld [vmem:[%s1502_s26 + $0x8] sm:$0xff]   ;;  %v1411_v12 = vld [vmem:[%s1502_s26 + $0x10] sm:$0xff]  }
  0x12   : > { %v1408_v5 = vld [vmem:[%s1502_s26 + $0x40] sm:$0xff]   ;;  %1327 = vmatprep.mubr.bf16.mxu0 %v1407_v4  ;;  %v1410_v11 = vld [vmem:[%s1502_s26 + $0x48] sm:$0xff]   ;;  %v1412_v13 = vld [vmem:[%s1502_s26 + $0x50] sm:$0xff]  }
  0x13   : > { %1343 = vmatprep.mubr.bf16.mxu1 %v1408_v5  ;;  %v1413_v14 = vld [vmem:[%s1502_s26 + $0x18] sm:$0xff]   ;;  %v1415_v16 = vld [vmem:[%s1502_s26 + $0x20] sm:$0xff]   ;;  %v1417_v18 = vld [vmem:[%s1502_s26 + $0x28] sm:$0xff]  }
  0x14   : > { %1318 = vmatpush3.bf16.msra.mxu0 %v1402_v3  ;;  %1370 = vmatpush3.bf16.msra.mxu1 %v1402_v3  ;;  %v1414_v15 = vld [vmem:[%s1502_s26 + $0x58] sm:$0xff]   ;;  %v1416_v17 = vld [vmem:[%s1502_s26 + $0x60] sm:$0xff]   ;;  %v1418_v19 = vld [vmem:[%s1502_s26 + $0x68] sm:$0xff]  }
  0x15   : > { %1319 = vmatprep.subr.bf16.mxu0 %v1403_v6  ;;  %1363 = vmatprep.subr.bf16.mxu1 %v1403_v6  ;;  %v1419_v20 = vld [vmem:[%s1502_s26 + $0x30] sm:$0xff]   ;;  %v1421_v22 = vld [vmem:[%s1502_s26 + $0x38] sm:$0xff]  }
  0x16   : > { %v1420_v21 = vld [vmem:[%s1502_s26 + $0x70] sm:$0xff]   ;;  %v1422_v23 = vld [vmem:[%s1502_s26 + $0x78] sm:$0xff]  }
  0x18   : > { %1320 = vmatpush3.bf16.msra.mxu0 %v1403_v6  ;;  %1371 = vmatpush3.bf16.msra.mxu1 %v1403_v6 }
  0x19   : > { %1321 = vmatprep.subr.bf16.mxu0 %v1404_v7  ;;  %1364 = vmatprep.subr.bf16.mxu1 %v1404_v7 }
  0x1c   : > { %1322 = vmatpush3.bf16.msra.mxu0 %v1404_v7  ;;  %1372 = vmatpush3.bf16.msra.mxu1 %v1404_v7 }
  0x1d   : > { %1323 = vmatprep.subr.bf16.mxu0 %v1405_v8  ;;  %1365 = vmatprep.subr.bf16.mxu1 %v1405_v8 }
  0x20   : > { %1324 = vmatpush3.bf16.msra.mxu0 %v1405_v8  ;;  %1373 = vmatpush3.bf16.msra.mxu1 %v1405_v8 }
  0x21   : > { %1325 = vmatprep.subr.bf16.mxu0 %v1406_v9  ;;  %1366 = vmatprep.subr.bf16.mxu1 %v1406_v9 }
  0x24   : > { %1326 = vmatpush3.bf16.msra.mxu0 %v1406_v9  ;;  %1374 = vmatpush3.bf16.msra.mxu1 %v1406_v9 }
  0x27   : > { %1328 = vmatmul.mubr.bf16.vlgmr.msra.gmra.mrb[0].mxu0 %v1409_v10  ;;  %1344 = vmatmul.mubr.bf16.vlgmr.msra.gmra.mrb[0].mxu1 %v1410_v11 }
  0x28   : > { %1331 = vmatprep.mubr.bf16.mxu0 %v1411_v12  ;;  %1347 = vmatprep.mubr.bf16.mxu1 %v1412_v13 }
  0x2f   : > { %1332 = vmatmul.mubr.bf16.gmra.mrb[4].mxu0 %v1413_v14  ;;  %1348 = vmatmul.mubr.bf16.gmra.mrb[4].mxu1 %v1414_v15 }
  0x30   : > { %1335 = vmatprep.mubr.bf16.mxu0 %v1415_v16  ;;  %1351 = vmatprep.mubr.bf16.mxu1 %v1416_v17 }
  0x37   : > { %1336 = vmatmul.mubr.bf16.gmra.mrb[8].mxu0 %v1417_v18  ;;  %1352 = vmatmul.mubr.bf16.gmra.mrb[8].mxu1 %v1418_v19 }
  0x38   : > { %1339 = vmatprep.mubr.bf16.mxu0 %v1419_v20  ;;  %1355 = vmatprep.mubr.bf16.mxu1 %v1420_v21 }
  0x3f   : > { %1340 = vmatmul.mubr.bf16.gmra.mrb[12].mxu0 %v1421_v22  ;;  %1356 = vmatmul.mubr.bf16.gmra.mrb[12].mxu1 %v1422_v23 }
  0xfa   : > { %v1329_v24 = vpop.f32.mrb[0].mxu0  ;;  %v1345_v26 = vpop.f32.mrb[0].mxu1 }
  0xfb   : > { %v554_v27 = vpop.f32.mrb[1].mxu0  ;;  %v618_v28 = vpop.f32.mrb[1].mxu1  ;;  %v789_v31 = vadd.f32 %v1329_v24, %v1538_v25  ;;  %v805_v32 = vadd.f32 %v1345_v26, %v1538_v25 }
  0xfc   : > { %v1330_v29 = vpop.f32.mrb[2].mxu0  ;;  %v1346_v30 = vpop.f32.mrb[2].mxu1  ;;  %v787_v37 = vadd.f32 %v1538_v25, %v554_v27  ;;  %v803_v38 = vadd.f32 %v1538_v25, %v618_v28 }
  0xfd   : > { %v790_v33 = vadd.f32 %v1330_v29, %v1538_v25  ;;  %v806_v34 = vadd.f32 %v1346_v30, %v1538_v25  ;;  %v557_v35 = vpop.f32.mrb[3].mxu0  ;;  %v621_v36 = vpop.f32.mrb[3].mxu1 }
  0xfe   : > { %v788_v39 = vadd.f32 %v1538_v25, %v557_v35  ;;  %v804_v40 = vadd.f32 %v1538_v25, %v621_v36 }
  0xff   : > { %v1200_v41 = vpack.c.bf16 %v790_v33, %v789_v31  ;;  %v1240_v42 = vpack.c.bf16 %v806_v34, %v805_v32 }
 0x100   : > { %v1195_v43 = vpack.c.bf16 %v788_v39, %v787_v37  ;;  %v1235_v44 = vpack.c.bf16 %v804_v40, %v803_v38 }
 0x101   : > { %1272 = vst [vmem:[%s1551_s17 + $0x8] sm:$0xff] %v1200_v41   ;;  %1280 = vst [vmem:[%s1551_s17 + $0x48] sm:$0xff] %v1240_v42  }
 0x102   : > { %1196 = vst [vmem:[%s1551_s17] sm:$0xff] %v1195_v43   ;;  %1279 = vst [vmem:[%s1551_s17 + $0x40] sm:$0xff] %v1235_v44   ;;  %v1333_v45 = vpop.f32.mrb[4].mxu0  ;;  %v1349_v46 = vpop.f32.mrb[4].mxu1 }
 0x103   : > { %v570_v47 = vpop.f32.mrb[5].mxu0  ;;  %v634_v48 = vpop.f32.mrb[5].mxu1  ;;  %v793_v51 = vadd.f32 %v1333_v45, %v1538_v25  ;;  %v809_v52 = vadd.f32 %v1349_v46, %v1538_v25 }
 0x104   : > { %v1334_v49 = vpop.f32.mrb[6].mxu0  ;;  %v1350_v50 = vpop.f32.mrb[6].mxu1  ;;  %v791_v57 = vadd.f32 %v1538_v25, %v570_v47  ;;  %v807_v58 = vadd.f32 %v1538_v25, %v634_v48 }
 0x105   : > { %v794_v53 = vadd.f32 %v1334_v49, %v1538_v25  ;;  %v810_v54 = vadd.f32 %v1350_v50, %v1538_v25  ;;  %v573_v55 = vpop.f32.mrb[7].mxu0  ;;  %v637_v56 = vpop.f32.mrb[7].mxu1 }
 0x106   : > { %v792_v59 = vadd.f32 %v1538_v25, %v573_v55  ;;  %v808_v60 = vadd.f32 %v1538_v25, %v637_v56 }
 0x107   : > { %v1210_v61 = vpack.c.bf16 %v794_v53, %v793_v51  ;;  %v1250_v62 = vpack.c.bf16 %v810_v54, %v809_v52 }
 0x108   : > { %v1205_v63 = vpack.c.bf16 %v792_v59, %v791_v57  ;;  %v1245_v0 = vpack.c.bf16 %v808_v60, %v807_v58 }
 0x109   : > { %1274 = vst [vmem:[%s1551_s17 + $0x18] sm:$0xff] %v1210_v61   ;;  %1282 = vst [vmem:[%s1551_s17 + $0x58] sm:$0xff] %v1250_v62  }
 0x10a   : > { %1273 = vst [vmem:[%s1551_s17 + $0x10] sm:$0xff] %v1205_v63   ;;  %1281 = vst [vmem:[%s1551_s17 + $0x50] sm:$0xff] %v1245_v0   ;;  %v1337_v1 = vpop.f32.mrb[8].mxu0  ;;  %v1353_v2 = vpop.f32.mrb[8].mxu1 }
 0x10b   : > { %v586_v3 = vpop.f32.mrb[9].mxu0  ;;  %v650_v4 = vpop.f32.mrb[9].mxu1  ;;  %v797_v7 = vadd.f32 %v1337_v1, %v1538_v25  ;;  %v813_v8 = vadd.f32 %v1353_v2, %v1538_v25 }
 0x10c   : > { %v1338_v5 = vpop.f32.mrb[10].mxu0  ;;  %v1354_v6 = vpop.f32.mrb[10].mxu1  ;;  %v795_v13 = vadd.f32 %v1538_v25, %v586_v3  ;;  %v811_v14 = vadd.f32 %v1538_v25, %v650_v4 }
 0x10d   : > { %v798_v9 = vadd.f32 %v1338_v5, %v1538_v25  ;;  %v814_v10 = vadd.f32 %v1354_v6, %v1538_v25  ;;  %v589_v11 = vpop.f32.mrb[11].mxu0  ;;  %v653_v12 = vpop.f32.mrb[11].mxu1 }
 0x10e   : > { %v796_v15 = vadd.f32 %v1538_v25, %v589_v11  ;;  %v812_v16 = vadd.f32 %v1538_v25, %v653_v12 }
 0x10f   : > { %v1220_v17 = vpack.c.bf16 %v798_v9, %v797_v7  ;;  %v1260_v18 = vpack.c.bf16 %v814_v10, %v813_v8 }
 0x110   : > { %v1215_v19 = vpack.c.bf16 %v796_v15, %v795_v13  ;;  %v1255_v20 = vpack.c.bf16 %v812_v16, %v811_v14 }
 0x111   : > { %1276 = vst [vmem:[%s1551_s17 + $0x28] sm:$0xff] %v1220_v17   ;;  %1284 = vst [vmem:[%s1551_s17 + $0x68] sm:$0xff] %v1260_v18  }
 0x112   : > { %1275 = vst [vmem:[%s1551_s17 + $0x20] sm:$0xff] %v1215_v19   ;;  %1283 = vst [vmem:[%s1551_s17 + $0x60] sm:$0xff] %v1255_v20   ;;  %v1341_v21 = vpop.f32.mrb[12].mxu0  ;;  %v1357_v22 = vpop.f32.mrb[12].mxu1 }
 0x113   : > { %v602_v23 = vpop.f32.mrb[13].mxu0  ;;  %v666_v24 = vpop.f32.mrb[13].mxu1  ;;  %v801_v28 = vadd.f32 %v1341_v21, %v1538_v25  ;;  %v817_v29 = vadd.f32 %v1357_v22, %v1538_v25 }
 0x114   : > { %v1342_v26 = vpop.f32.mrb[14].mxu0  ;;  %v1358_v27 = vpop.f32.mrb[14].mxu1  ;;  %v799_v34 = vadd.f32 %v1538_v25, %v602_v23  ;;  %v815_v35 = vadd.f32 %v1538_v25, %v666_v24 }
 0x115   : > { %v802_v30 = vadd.f32 %v1342_v26, %v1538_v25  ;;  %v818_v31 = vadd.f32 %v1358_v27, %v1538_v25  ;;  %v605_v32 = vpop.f32.mrb[15].mxu0  ;;  %v669_v33 = vpop.f32.mrb[15].mxu1 }
 0x116   : > { %v800_v36 = vadd.f32 %v1538_v25, %v605_v32  ;;  %v816_v37 = vadd.f32 %v1538_v25, %v669_v33 }
 0x117   : > { %v1230_v38 = vpack.c.bf16 %v802_v30, %v801_v28  ;;  %v1270_v39 = vpack.c.bf16 %v818_v31, %v817_v29 }
 0x118   : > { %v1225_v40 = vpack.c.bf16 %v800_v36, %v799_v34  ;;  %v1265_v41 = vpack.c.bf16 %v816_v37, %v815_v35 }
 0x119   : > { %1278 = vst [vmem:[%s1551_s17 + $0x38] sm:$0xff] %v1230_v38   ;;  %1286 = vst [vmem:[%s1551_s17 + $0x78] sm:$0xff] %v1270_v39  }
 0x11a   : > { %1277 = vst [vmem:[%s1551_s17 + $0x30] sm:$0xff] %v1225_v40   ;;  %1285 = vst [vmem:[%s1551_s17 + $0x70] sm:$0xff] %v1265_v41  }
 0x11b PF: > { %s13_s14 = sadd.s32 1, %s1445_s14   ;;  %s1608_s12 = smov %s1441_s13 }
 0x11c   : > { %p10_p5 = scmp.ge.s32.totalorder %s13_s14, 4   ;;  %s1609_s13 = smov %s1611_s15 }
 0x11e   :  { %12 = sbr.rel (!%p10_p5) target bundleno = 2 (0x2), region = 76 }

// kernel: _lambda_.52
= control target key start
LH: loop header
LB: loop body
LE: loop exit
PB: predicated region body
PF: predicated region fallthrough
CT: control target
= control target key end

     0   :  { %s2680_s12 = smov 0   ;;  %s2682_s13 = smov 0   ;;  %s3117_s0 = inlined_call_operand.vmem [shape: bf16[2048,640], index: 0, kind: input, shape index: {}]   ;;  %s3118_s1 = inlined_call_operand.vmem [shape: bf16[640,128], index: 1, kind: input, shape index: {}]   ;;  %s3119_s2 = inlined_call_operand.vmem [shape: f32[1,128], index: 2, kind: input, shape index: {}]   ;;  %s3120_s3 = inlined_call_operand.vmem [shape: bf16[2048,128], index: 3, kind: output, shape index: {}]  }
   0x1   :  { %s2684_s14 = smov 0   ;;  %s2686_s15 = smov 0  }
   0x2   :  { %s2688_s16 = smov 0   ;;  %s2690_s17 = smov 0  }
   0x3   :  { %s2692_s18 = smov 0  }
   0x4 LB: > { %s25_s19 = sadd.s32 1, %s2649_s16  ;;  %s32_s20 = sadd.s32 1, %s2653_s17  ;;  %s2657_s18 = sphi %s2692_s18, %s13_s18   ;;  %s2653_s17 = sphi %s2690_s17, %s3126_s17   ;;  %s2649_s16 = sphi %s2688_s16, %s3125_s16   ;;  %s2645_s15 = sphi %s2686_s15, %s3124_s15   ;;  %s2641_s14 = sphi %s2684_s14, %s3123_s14   ;;  %s2637_s13 = sphi %s2682_s13, %s3122_s13   ;;  %s2633_s12 = sphi %s2680_s12, %s3121_s12  }
   0x5   : > { %p26_p0 = scmp.ge.s32.totalorder %s25_s19, 5  ;;  %p48_p1 = scmp.ne.s32.totalorder %s2637_s13, %s2633_s12 }
   0x6   : > { %p49_p2 = scmp.eq.s32.totalorder %s2657_s18, 0  ;;  %s41_s24 = sadd.s32 1, %s2637_s13 }
   0x7   : > { %s3128_s19 = smov (%p26_p0, %s25_s19), 0  ;;  %s3130_s20 = smov (!%p26_p0, %s32_s20), %s2653_s17 }
   0x8   : > { %p50_p3 = por %p49_p2, %p48_p1  ;;  %p34_p4 = scmp.ge.s32.totalorder %s3130_s20, 4 }
   0x9   : > { %s37_s21 = ssub.s32 %s2649_s16, %s3128_s19  ;;  %p1994_p6 = scmp.ge.s32.totalorder %s2657_s18, 20 }
   0xa   : > { %s3132_s20 = smov (%p34_p4, %s3130_s20), 0 }
   0xb   : > { %s36_s22 = ssub.s32 %s2653_s17, %s3132_s20  ;;  %162 = sbr.rel (%p1994_p6) target bundleno = 67 (0x43), region = 20 }
   0xc   : > { %s38_s23 = sor.u32 %s37_s21, %s36_s22 }
   0xd   : > { %p39_p5 = scmp.eq.s32.totalorder %s38_s23, 0 }
   0xf   : > { %s2731_s25 = scalar_select %p39_p5, %s2637_s13, %s41_s24  }
  0x12   : > { %165 = sbr.rel (!%p50_p3) target bundleno = 67 (0x43), region = 24  ;;  %s167_s26 = sand.u32 (%p50_p3), 1, %s2637_s13  }
  0x13   : > { %s2505_s27 = smul.u32 (%p50_p3), 320, %s2653_s17  ;;  %s1995_s28 = sshll.u32 (%p50_p3), %s167_s26, 8 }
  0x14   : > { %s2745_s7 = scalar_lea.vmem (%p50_p3), [#allocation3], %s1995_s28 }
  0x15   : > { %s172_s29 = sadd.s32 (%p50_p3), %s2649_s16, %s2505_s27 }
  0x16   : > { %s1998_s30 = sshll.u32 (%p50_p3), %s172_s29, 2 }
  0x17   : > { %s2740_s6 = scalar_lea.vmem (%p50_p3), %s3117_s0, %s1998_s30 }
  0x18   : > { %v190_v0 = vld [vmem:[%s2740_s6] sm:$0xf] (%p50_p3)  ;;  %v192_v1 = vld [vmem:[%s2740_s6 + $0x14] sm:$0xf] (%p50_p3)  ;;  %v194_v2 = vld [vmem:[%s2740_s6 + $0x28] sm:$0xf] (%p50_p3) }
  0x19   : > { %191 = vst [vmem:[%s2745_s7] sm:$0xf] %v190_v0  ;;  %193 = vst [vmem:[%s2745_s7 + $0x4] sm:$0xf] %v192_v1  ;;  %v196_v3 = vld [vmem:[%s2740_s6 + $0x3c] sm:$0xf] }
  0x1a   : > { %195 = vst [vmem:[%s2745_s7 + $0x8] sm:$0xf] %v194_v2  ;;  %v198_v4 = vld [vmem:[%s2740_s6 + $0x50] sm:$0xf]  ;;  %v200_v5 = vld [vmem:[%s2740_s6 + $0x64] sm:$0xf] }
  0x1b   : > { %197 = vst [vmem:[%s2745_s7 + $0xc] sm:$0xf] %v196_v3  ;;  %199 = vst [vmem:[%s2745_s7 + $0x10] sm:$0xf] %v198_v4  ;;  %v202_v6 = vld [vmem:[%s2740_s6 + $0x78] sm:$0xf] }
  0x1c   : > { %201 = vst [vmem:[%s2745_s7 + $0x14] sm:$0xf] %v200_v5  ;;  %v204_v7 = vld [vmem:[%s2740_s6 + $0x8c] sm:$0xf]  ;;  %v206_v8 = vld [vmem:[%s2740_s6 + $0xa0] sm:$0xf] }
  0x1d   : > { %203 = vst [vmem:[%s2745_s7 + $0x18] sm:$0xf] %v202_v6  ;;  %205 = vst [vmem:[%s2745_s7 + $0x1c] sm:$0xf] %v204_v7  ;;  %v208_v9 = vld [vmem:[%s2740_s6 + $0xb4] sm:$0xf] }
  0x1e   : > { %207 = vst [vmem:[%s2745_s7 + $0x20] sm:$0xf] %v206_v8  ;;  %v210_v10 = vld [vmem:[%s2740_s6 + $0xc8] sm:$0xf]  ;;  %v212_v11 = vld [vmem:[%s2740_s6 + $0xdc] sm:$0xf] }
  0x1f   : > { %209 = vst [vmem:[%s2745_s7 + $0x24] sm:$0xf] %v208_v9  ;;  %211 = vst [vmem:[%s2745_s7 + $0x28] sm:$0xf] %v210_v10  ;;  %v214_v12 = vld [vmem:[%s2740_s6 + $0xf0] sm:$0xf] }
  0x20   : > { %213 = vst [vmem:[%s2745_s7 + $0x2c] sm:$0xf] %v212_v11  ;;  %v216_v13 = vld [vmem:[%s2740_s6 + $0x104] sm:$0xf]  ;;  %v218_v14 = vld [vmem:[%s2740_s6 + $0x118] sm:$0xf] }
  0x21   : > { %215 = vst [vmem:[%s2745_s7 + $0x30] sm:$0xf] %v214_v12  ;;  %217 = vst [vmem:[%s2745_s7 + $0x34] sm:$0xf] %v216_v13  ;;  %v220_v15 = vld [vmem:[%s2740_s6 + $0x12c] sm:$0xf] }
  0x22   : > { %219 = vst [vmem:[%s2745_s7 + $0x38] sm:$0xf] %v218_v14  ;;  %v222_v16 = vld [vmem:[%s2740_s6 + $0x140] sm:$0xf]  ;;  %v224_v17 = vld [vmem:[%s2740_s6 + $0x154] sm:$0xf] }
  0x23   : > { %221 = vst [vmem:[%s2745_s7 + $0x3c] sm:$0xf] %v220_v15  ;;  %223 = vst [vmem:[%s2745_s7 + $0x40] sm:$0xf] %v222_v16  ;;  %v226_v18 = vld [vmem:[%s2740_s6 + $0x168] sm:$0xf] }
  0x24   : > { %225 = vst [vmem:[%s2745_s7 + $0x44] sm:$0xf] %v224_v17  ;;  %v228_v19 = vld [vmem:[%s2740_s6 + $0x17c] sm:$0xf]  ;;  %v230_v20 = vld [vmem:[%s2740_s6 + $0x190] sm:$0xf] }
  0x25   : > { %227 = vst [vmem:[%s2745_s7 + $0x48] sm:$0xf] %v226_v18  ;;  %229 = vst [vmem:[%s2745_s7 + $0x4c] sm:$0xf] %v228_v19  ;;  %v232_v21 = vld [vmem:[%s2740_s6 + $0x1a4] sm:$0xf] }
  0x26   : > { %231 = vst [vmem:[%s2745_s7 + $0x50] sm:$0xf] %v230_v20  ;;  %v234_v22 = vld [vmem:[%s2740_s6 + $0x1b8] sm:$0xf]  ;;  %v236_v23 = vld [vmem:[%s2740_s6 + $0x1cc] sm:$0xf] }
  0x27   : > { %233 = vst [vmem:[%s2745_s7 + $0x54] sm:$0xf] %v232_v21  ;;  %235 = vst [vmem:[%s2745_s7 + $0x58] sm:$0xf] %v234_v22  ;;  %v238_v24 = vld [vmem:[%s2740_s6 + $0x1e0] sm:$0xf] }
  0x28   : > { %237 = vst [vmem:[%s2745_s7 + $0x5c] sm:$0xf] %v236_v23  ;;  %v240_v25 = vld [vmem:[%s2740_s6 + $0x1f4] sm:$0xf]  ;;  %v242_v26 = vld [vmem:[%s2740_s6 + $0x208] sm:$0xf] }
  0x29   : > { %239 = vst [vmem:[%s2745_s7 + $0x60] sm:$0xf] %v238_v24  ;;  %241 = vst [vmem:[%s2745_s7 + $0x64] sm:$0xf] %v240_v25  ;;  %v244_v27 = vld [vmem:[%s2740_s6 + $0x21c] sm:$0xf] }
  0x2a   : > { %243 = vst [vmem:[%s2745_s7 + $0x68] sm:$0xf] %v242_v26  ;;  %v246_v28 = vld [vmem:[%s2740_s6 + $0x230] sm:$0xf]  ;;  %v248_v29 = vld [vmem:[%s2740_s6 + $0x244] sm:$0xf] }
  0x2b   : > { %245 = vst [vmem:[%s2745_s7 + $0x6c] sm:$0xf] %v244_v27  ;;  %247 = vst [vmem:[%s2745_s7 + $0x70] sm:$0xf] %v246_v28  ;;  %v250_v30 = vld [vmem:[%s2740_s6 + $0x258] sm:$0xf] }
  0x2c   : > { %249 = vst [vmem:[%s2745_s7 + $0x74] sm:$0xf] %v248_v29  ;;  %v252_v31 = vld [vmem:[%s2740_s6 + $0x26c] sm:$0xf]  ;;  %v254_v32 = vld [vmem:[%s2740_s6 + $0x280] sm:$0xf] }
  0x2d   : > { %251 = vst [vmem:[%s2745_s7 + $0x78] sm:$0xf] %v250_v30  ;;  %253 = vst [vmem:[%s2745_s7 + $0x7c] sm:$0xf] %v252_v31  ;;  %v256_v33 = vld [vmem:[%s2740_s6 + $0x294] sm:$0xf] }
  0x2e   : > { %255 = vst [vmem:[%s2745_s7 + $0x80] sm:$0xf] %v254_v32  ;;  %v258_v34 = vld [vmem:[%s2740_s6 + $0x2a8] sm:$0xf]  ;;  %v260_v35 = vld [vmem:[%s2740_s6 + $0x2bc] sm:$0xf] }
  0x2f   : > { %257 = vst [vmem:[%s2745_s7 + $0x84] sm:$0xf] %v256_v33  ;;  %259 = vst [vmem:[%s2745_s7 + $0x88] sm:$0xf] %v258_v34  ;;  %v262_v36 = vld [vmem:[%s2740_s6 + $0x2d0] sm:$0xf] }
  0x30   : > { %261 = vst [vmem:[%s2745_s7 + $0x8c] sm:$0xf] %v260_v35  ;;  %v264_v37 = vld [vmem:[%s2740_s6 + $0x2e4] sm:$0xf]  ;;  %v266_v38 = vld [vmem:[%s2740_s6 + $0x2f8] sm:$0xf] }
  0x31   : > { %263 = vst [vmem:[%s2745_s7 + $0x90] sm:$0xf] %v262_v36  ;;  %265 = vst [vmem:[%s2745_s7 + $0x94] sm:$0xf] %v264_v37  ;;  %v268_v39 = vld [vmem:[%s2740_s6 + $0x30c] sm:$0xf] }
  0x32   : > { %267 = vst [vmem:[%s2745_s7 + $0x98] sm:$0xf] %v266_v38  ;;  %v270_v40 = vld [vmem:[%s2740_s6 + $0x320] sm:$0xf]  ;;  %v272_v41 = vld [vmem:[%s2740_s6 + $0x334] sm:$0xf] }
  0x33   : > { %269 = vst [vmem:[%s2745_s7 + $0x9c] sm:$0xf] %v268_v39  ;;  %271 = vst [vmem:[%s2745_s7 + $0xa0] sm:$0xf] %v270_v40  ;;  %v274_v42 = vld [vmem:[%s2740_s6 + $0x348] sm:$0xf] }
  0x34   : > { %273 = vst [vmem:[%s2745_s7 + $0xa4] sm:$0xf] %v272_v41  ;;  %v276_v43 = vld [vmem:[%s2740_s6 + $0x35c] sm:$0xf]  ;;  %v278_v44 = vld [vmem:[%s2740_s6 + $0x370] sm:$0xf] }
  0x35   : > { %275 = vst [vmem:[%s2745_s7 + $0xa8] sm:$0xf] %v274_v42  ;;  %277 = vst [vmem:[%s2745_s7 + $0xac] sm:$0xf] %v276_v43  ;;  %v280_v45 = vld [vmem:[%s2740_s6 + $0x384] sm:$0xf] }
  0x36   : > { %279 = vst [vmem:[%s2745_s7 + $0xb0] sm:$0xf] %v278_v44  ;;  %v282_v46 = vld [vmem:[%s2740_s6 + $0x398] sm:$0xf]  ;;  %v284_v47 = vld [vmem:[%s2740_s6 + $0x3ac] sm:$0xf] }
  0x37   : > { %281 = vst [vmem:[%s2745_s7 + $0xb4] sm:$0xf] %v280_v45  ;;  %283 = vst [vmem:[%s2745_s7 + $0xb8] sm:$0xf] %v282_v46  ;;  %v286_v48 = vld [vmem:[%s2740_s6 + $0x3c0] sm:$0xf] }
  0x38   : > { %285 = vst [vmem:[%s2745_s7 + $0xbc] sm:$0xf] %v284_v47  ;;  %v288_v49 = vld [vmem:[%s2740_s6 + $0x3d4] sm:$0xf]  ;;  %v290_v50 = vld [vmem:[%s2740_s6 + $0x3e8] sm:$0xf] }
  0x39   : > { %287 = vst [vmem:[%s2745_s7 + $0xc0] sm:$0xf] %v286_v48  ;;  %289 = vst [vmem:[%s2745_s7 + $0xc4] sm:$0xf] %v288_v49  ;;  %v292_v51 = vld [vmem:[%s2740_s6 + $0x3fc] sm:$0xf] }
  0x3a   : > { %291 = vst [vmem:[%s2745_s7 + $0xc8] sm:$0xf] %v290_v50  ;;  %v294_v52 = vld [vmem:[%s2740_s6 + $0x410] sm:$0xf]  ;;  %v296_v53 = vld [vmem:[%s2740_s6 + $0x424] sm:$0xf] }
  0x3b   : > { %293 = vst [vmem:[%s2745_s7 + $0xcc] sm:$0xf] %v292_v51  ;;  %295 = vst [vmem:[%s2745_s7 + $0xd0] sm:$0xf] %v294_v52  ;;  %v298_v54 = vld [vmem:[%s2740_s6 + $0x438] sm:$0xf] }
  0x3c   : > { %297 = vst [vmem:[%s2745_s7 + $0xd4] sm:$0xf] %v296_v53  ;;  %v300_v55 = vld [vmem:[%s2740_s6 + $0x44c] sm:$0xf]  ;;  %v302_v56 = vld [vmem:[%s2740_s6 + $0x460] sm:$0xf] }
  0x3d   : > { %299 = vst [vmem:[%s2745_s7 + $0xd8] sm:$0xf] %v298_v54  ;;  %301 = vst [vmem:[%s2745_s7 + $0xdc] sm:$0xf] %v300_v55  ;;  %v304_v57 = vld [vmem:[%s2740_s6 + $0x474] sm:$0xf] }
  0x3e   : > { %303 = vst [vmem:[%s2745_s7 + $0xe0] sm:$0xf] %v302_v56  ;;  %v306_v58 = vld [vmem:[%s2740_s6 + $0x488] sm:$0xf]  ;;  %v308_v59 = vld [vmem:[%s2740_s6 + $0x49c] sm:$0xf] }
  0x3f   : > { %305 = vst [vmem:[%s2745_s7 + $0xe4] sm:$0xf] %v304_v57  ;;  %307 = vst [vmem:[%s2745_s7 + $0xe8] sm:$0xf] %v306_v58  ;;  %v310_v60 = vld [vmem:[%s2740_s6 + $0x4b0] sm:$0xf] }
  0x40   : > { %309 = vst [vmem:[%s2745_s7 + $0xec] sm:$0xf] %v308_v59  ;;  %v312_v61 = vld [vmem:[%s2740_s6 + $0x4c4] sm:$0xf]  ;;  %v314_v62 = vld [vmem:[%s2740_s6 + $0x4d8] sm:$0xf] }
  0x41   : > { %311 = vst [vmem:[%s2745_s7 + $0xf0] sm:$0xf] %v310_v60  ;;  %313 = vst [vmem:[%s2745_s7 + $0xf4] sm:$0xf] %v312_v61  ;;  %v316_v63 = vld [vmem:[%s2740_s6 + $0x4ec] sm:$0xf] }
  0x42   : > { %315 = vst [vmem:[%s2745_s7 + $0xf8] sm:$0xf] %v314_v62  ;;  %317 = vst [vmem:[%s2745_s7 + $0xfc] sm:$0xf] %v316_v63 }
  0x43 PF: > { %p1999_p7 = scmp.ge.s32.totalorder %s2657_s18, 1  ;;  %p479_p8 = scmp.lt.s32.totalorder %s2657_s18, 21 }
  0x45   : > { %p480_p9 = pnand %p1999_p7, %p479_p8 }
  0x46   : > { %s486_s8 = sand.u32 (!%p480_p9), 1, %s2633_s12   ;;  %s2001_s9 = sshll.u32 (!%p480_p9), %s2641_s14, 4 }
  0x47   : > { %483 = sbr.rel (%p480_p9) target bundleno = 439 (0x1b7), region = 69  ;;  %s2000_s10 = sshll.u32 (!%p480_p9), %s486_s8, 8 }
  0x48   : > { %p525_p10 = scmp.lt.s32.totalorder (!%p480_p9), %s2001_s9, 79  ;;  %s2003_s11 = sshll.u32 (!%p480_p9), %s2645_s15, 6 }
  0x49   : > { %p537_p11 = scmp.lt.s32.totalorder (!%p480_p9), %s2003_s11, 255  ;;  %s2887_s12 = scalar_lea.vmem (!%p480_p9), [#allocation3], %s2000_s10 }
  0x4a   : > { %p2005_p12 = scmp.ne.s32.totalorder (!%p480_p9), %s2641_s14, 0 }
  0x4e   : > { %s3134_s9 = smov (!%p525_p10, %s2001_s9), 79  ;;  %s3136_s11 = smov (!%p537_p11, %s2003_s11), 255 }
  0x4f   : > { %s2002_s21 = sshll.u32 %s3134_s9, 2  ;;  %s2004_s26 = sshll.u32 %s3136_s11, 2  ;;  %v2659_v0 = vmov (!%p2005_p12), 0.0  }
  0x50   : > { %s2880_s24 = scalar_lea.vmem %s3118_s1, %s2002_s21  ;;  %s2885_s29 = scalar_lea.vmem %s3120_s3, %s2004_s26  ;;  %550 = vst [vmem:[#allocation2] sm:$0xff] (!%p2005_p12), %v2659_v0  ;;  %551 = vst [vmem:[#allocation2 + $0x8] sm:$0xff] (!%p2005_p12), %v2659_v0 }
  0x51   : > { %549 = sbr.rel (%p2005_p12) target bundleno = 112 (0x70), region = 77  ;;  %552 = vst [vmem:[#allocation2 + $0x10] sm:$0xff] (!%p2005_p12), %v2659_v0  ;;  %553 = vst [vmem:[#allocation2 + $0x18] sm:$0xff] (!%p2005_p12), %v2659_v0 }
  0x52   : > { %554 = vst [vmem:[#allocation2 + $0x20] sm:$0xff] (!%p2005_p12), %v2659_v0  ;;  %555 = vst [vmem:[#allocation2 + $0x28] sm:$0xff] (!%p2005_p12), %v2659_v0 }
  0x53   : > { %556 = vst [vmem:[#allocation2 + $0x30] sm:$0xff] (!%p2005_p12), %v2659_v0  ;;  %557 = vst [vmem:[#allocation2 + $0x38] sm:$0xff] (!%p2005_p12), %v2659_v0 }
  0x54   : > { %558 = vst [vmem:[#allocation2 + $0x40] sm:$0xff] (!%p2005_p12), %v2659_v0  ;;  %559 = vst [vmem:[#allocation2 + $0x48] sm:$0xff] (!%p2005_p12), %v2659_v0 }
  0x55   : > { %560 = vst [vmem:[#allocation2 + $0x50] sm:$0xff] (!%p2005_p12), %v2659_v0  ;;  %561 = vst [vmem:[#allocation2 + $0x58] sm:$0xff] (!%p2005_p12), %v2659_v0 }
  0x56   : > { %562 = vst [vmem:[#allocation2 + $0x60] sm:$0xff] (!%p2005_p12), %v2659_v0  ;;  %563 = vst [vmem:[#allocation2 + $0x68] sm:$0xff] (!%p2005_p12), %v2659_v0 }
  0x57   : > { %564 = vst [vmem:[#allocation2 + $0x70] sm:$0xff] (!%p2005_p12), %v2659_v0  ;;  %565 = vst [vmem:[#allocation2 + $0x78] sm:$0xff] (!%p2005_p12), %v2659_v0 }
  0x58   : > { %566 = vst [vmem:[#allocation2 + $0x80] sm:$0xff] %v2659_v0  ;;  %567 = vst [vmem:[#allocation2 + $0x88] sm:$0xff] %v2659_v0 }
  0x59   : > { %568 = vst [vmem:[#allocation2 + $0x90] sm:$0xff] %v2659_v0  ;;  %569 = vst [vmem:[#allocation2 + $0x98] sm:$0xff] %v2659_v0 }
  0x5a   : > { %570 = vst [vmem:[#allocation2 + $0xa0] sm:$0xff] %v2659_v0  ;;  %571 = vst [vmem:[#allocation2 + $0xa8] sm:$0xff] %v2659_v0 }
  0x5b   : > { %572 = vst [vmem:[#allocation2 + $0xb0] sm:$0xff] %v2659_v0  ;;  %573 = vst [vmem:[#allocation2 + $0xb8] sm:$0xff] %v2659_v0 }
  0x5c   : > { %574 = vst [vmem:[#allocation2 + $0xc0] sm:$0xff] %v2659_v0  ;;  %575 = vst [vmem:[#allocation2 + $0xc8] sm:$0xff] %v2659_v0 }
  0x5d   : > { %576 = vst [vmem:[#allocation2 + $0xd0] sm:$0xff] %v2659_v0  ;;  %577 = vst [vmem:[#allocation2 + $0xd8] sm:$0xff] %v2659_v0 }
  0x5e   : > { %578 = vst [vmem:[#allocation2 + $0xe0] sm:$0xff] %v2659_v0  ;;  %579 = vst [vmem:[#allocation2 + $0xe8] sm:$0xff] %v2659_v0 }
  0x5f   : > { %580 = vst [vmem:[#allocation2 + $0xf0] sm:$0xff] %v2659_v0  ;;  %581 = vst [vmem:[#allocation2 + $0xf8] sm:$0xff] %v2659_v0 }
  0x60   : > { %582 = vst [vmem:[#allocation2 + $0x100] sm:$0xff] %v2659_v0  ;;  %583 = vst [vmem:[#allocation2 + $0x108] sm:$0xff] %v2659_v0 }
  0x61   : > { %584 = vst [vmem:[#allocation2 + $0x110] sm:$0xff] %v2659_v0  ;;  %585 = vst [vmem:[#allocation2 + $0x118] sm:$0xff] %v2659_v0 }
  0x62   : > { %586 = vst [vmem:[#allocation2 + $0x120] sm:$0xff] %v2659_v0  ;;  %587 = vst [vmem:[#allocation2 + $0x128] sm:$0xff] %v2659_v0 }
  0x63   : > { %588 = vst [vmem:[#allocation2 + $0x130] sm:$0xff] %v2659_v0  ;;  %589 = vst [vmem:[#allocation2 + $0x138] sm:$0xff] %v2659_v0 }
  0x64   : > { %590 = vst [vmem:[#allocation2 + $0x140] sm:$0xff] %v2659_v0  ;;  %591 = vst [vmem:[#allocation2 + $0x148] sm:$0xff] %v2659_v0 }
  0x65   : > { %592 = vst [vmem:[#allocation2 + $0x150] sm:$0xff] %v2659_v0  ;;  %593 = vst [vmem:[#allocation2 + $0x158] sm:$0xff] %v2659_v0 }
  0x66   : > { %594 = vst [vmem:[#allocation2 + $0x160] sm:$0xff] %v2659_v0  ;;  %595 = vst [vmem:[#allocation2 + $0x168] sm:$0xff] %v2659_v0 }
  0x67   : > { %596 = vst [vmem:[#allocation2 + $0x170] sm:$0xff] %v2659_v0  ;;  %597 = vst [vmem:[#allocation2 + $0x178] sm:$0xff] %v2659_v0 }
  0x68   : > { %598 = vst [vmem:[#allocation2 + $0x180] sm:$0xff] %v2659_v0  ;;  %599 = vst [vmem:[#allocation2 + $0x188] sm:$0xff] %v2659_v0 }
  0x69   : > { %600 = vst [vmem:[#allocation2 + $0x190] sm:$0xff] %v2659_v0  ;;  %601 = vst [vmem:[#allocation2 + $0x198] sm:$0xff] %v2659_v0 }
  0x6a   : > { %602 = vst [vmem:[#allocation2 + $0x1a0] sm:$0xff] %v2659_v0  ;;  %603 = vst [vmem:[#allocation2 + $0x1a8] sm:$0xff] %v2659_v0 }
  0x6b   : > { %604 = vst [vmem:[#allocation2 + $0x1b0] sm:$0xff] %v2659_v0  ;;  %605 = vst [vmem:[#allocation2 + $0x1b8] sm:$0xff] %v2659_v0 }
  0x6c   : > { %606 = vst [vmem:[#allocation2 + $0x1c0] sm:$0xff] %v2659_v0  ;;  %607 = vst [vmem:[#allocation2 + $0x1c8] sm:$0xff] %v2659_v0 }
  0x6d   : > { %608 = vst [vmem:[#allocation2 + $0x1d0] sm:$0xff] %v2659_v0  ;;  %609 = vst [vmem:[#allocation2 + $0x1d8] sm:$0xff] %v2659_v0 }
  0x6e   : > { %610 = vst [vmem:[#allocation2 + $0x1e0] sm:$0xff] %v2659_v0  ;;  %611 = vst [vmem:[#allocation2 + $0x1e8] sm:$0xff] %v2659_v0 }
  0x6f   : > { %612 = vst [vmem:[#allocation2 + $0x1f0] sm:$0xff] %v2659_v0  ;;  %613 = vst [vmem:[#allocation2 + $0x1f8] sm:$0xff] %v2659_v0 }
  0x70 PF: > { %v2563_v1 = vld [vmem:[%s2880_s24] sm:$0xff]   ;;  %v2564_v2 = vld [vmem:[%s2880_s24 + $0x8] sm:$0xff]   ;;  %v2565_v3 = vld [vmem:[%s2880_s24 + $0x10] sm:$0xff]   ;;  %p2046_p13 = scmp.ne.s32.totalorder %s2641_s14, 4 }
  0x71   : > { %2409 = vmatprep.subr.bf16.mxu0 %v2563_v1  ;;  %2489 = vmatprep.subr.bf16.mxu1 %v2563_v1  ;;  %v2566_v4 = vld [vmem:[%s2880_s24 + $0x18] sm:$0xff]   ;;  %v2571_v5 = vld [vmem:[%s2887_s12] sm:$0xff]   ;;  %v2568_v8 = vld [vmem:[%s2880_s24 + $0x28] sm:$0xff]  }
  0x72   : > { %2410 = vmatpush3.bf16.msra.mxu0 %v2563_v1  ;;  %2497 = vmatpush3.bf16.msra.mxu1 %v2563_v1  ;;  %v2572_v6 = vld [vmem:[%s2887_s12 + $0x80] sm:$0xff]   ;;  %v2569_v9 = vld [vmem:[%s2880_s24 + $0x30] sm:$0xff]   ;;  %v2570_v10 = vld [vmem:[%s2880_s24 + $0x38] sm:$0xff]  }
  0x73   : > { %2411 = vmatprep.subr.bf16.mxu0 %v2564_v2  ;;  %2490 = vmatprep.subr.bf16.mxu1 %v2564_v2  ;;  %v2567_v7 = vld [vmem:[%s2880_s24 + $0x20] sm:$0xff]   ;;  %v2573_v11 = vld [vmem:[%s2887_s12 + $0x8] sm:$0xff]   ;;  %v2575_v13 = vld [vmem:[%s2887_s12 + $0x10] sm:$0xff]  }
  0x74   : > { %2425 = vmatprep.mubr.bf16.mxu0 %v2571_v5  ;;  %2457 = vmatprep.mubr.bf16.mxu1 %v2572_v6  ;;  %v2574_v12 = vld [vmem:[%s2887_s12 + $0x88] sm:$0xff]   ;;  %v2576_v14 = vld [vmem:[%s2887_s12 + $0x90] sm:$0xff]   ;;  %v2577_v15 = vld [vmem:[%s2887_s12 + $0x18] sm:$0xff]  }
  0x75   : > { %v2578_v16 = vld [vmem:[%s2887_s12 + $0x98] sm:$0xff]   ;;  %v2579_v17 = vld [vmem:[%s2887_s12 + $0x20] sm:$0xff]   ;;  %v2581_v19 = vld [vmem:[%s2887_s12 + $0x28] sm:$0xff]  }
  0x76   : > { %2412 = vmatpush3.bf16.msra.mxu0 %v2564_v2  ;;  %2498 = vmatpush3.bf16.msra.mxu1 %v2564_v2  ;;  %v2580_v18 = vld [vmem:[%s2887_s12 + $0xa0] sm:$0xff]   ;;  %v2582_v20 = vld [vmem:[%s2887_s12 + $0xa8] sm:$0xff]   ;;  %v2583_v21 = vld [vmem:[%s2887_s12 + $0x30] sm:$0xff]  }
  0x77   : > { %2413 = vmatprep.subr.bf16.mxu0 %v2565_v3  ;;  %2491 = vmatprep.subr.bf16.mxu1 %v2565_v3  ;;  %v2584_v22 = vld [vmem:[%s2887_s12 + $0xb0] sm:$0xff]   ;;  %v2585_v23 = vld [vmem:[%s2887_s12 + $0x38] sm:$0xff]   ;;  %v2587_v25 = vld [vmem:[%s2887_s12 + $0x40] sm:$0xff]  }
  0x78   : > { %v2586_v24 = vld [vmem:[%s2887_s12 + $0xb8] sm:$0xff]   ;;  %v2588_v26 = vld [vmem:[%s2887_s12 + $0xc0] sm:$0xff]   ;;  %v2589_v27 = vld [vmem:[%s2887_s12 + $0x48] sm:$0xff]  }
  0x79   : > { %v2590_v28 = vld [vmem:[%s2887_s12 + $0xc8] sm:$0xff]   ;;  %v2591_v29 = vld [vmem:[%s2887_s12 + $0x50] sm:$0xff]   ;;  %v2593_v31 = vld [vmem:[%s2887_s12 + $0x58] sm:$0xff]  }
  0x7a   : > { %2414 = vmatpush3.bf16.msra.mxu0 %v2565_v3  ;;  %2499 = vmatpush3.bf16.msra.mxu1 %v2565_v3  ;;  %v2592_v30 = vld [vmem:[%s2887_s12 + $0xd0] sm:$0xff]   ;;  %v2594_v32 = vld [vmem:[%s2887_s12 + $0xd8] sm:$0xff]   ;;  %v2595_v33 = vld [vmem:[%s2887_s12 + $0x60] sm:$0xff]  }
  0x7b   : > { %2415 = vmatprep.subr.bf16.mxu0 %v2566_v4  ;;  %2492 = vmatprep.subr.bf16.mxu1 %v2566_v4  ;;  %v2596_v34 = vld [vmem:[%s2887_s12 + $0xe0] sm:$0xff]   ;;  %v2597_v35 = vld [vmem:[%s2887_s12 + $0x68] sm:$0xff]   ;;  %v2599_v37 = vld [vmem:[%s2887_s12 + $0x70] sm:$0xff]  }
  0x7c   : > { %v2598_v36 = vld [vmem:[%s2887_s12 + $0xe8] sm:$0xff]   ;;  %v2600_v38 = vld [vmem:[%s2887_s12 + $0xf0] sm:$0xff]   ;;  %v2601_v39 = vld [vmem:[%s2887_s12 + $0x78] sm:$0xff]  }
  0x7d   : > { %v2602_v40 = vld [vmem:[%s2887_s12 + $0xf8] sm:$0xff]   ;;  %v616_v41 = vld [vmem:[#allocation2 + $0x10] sm:$0xff]  ;;  %v614_v43 = vld [vmem:[#allocation2] sm:$0xff] }
  0x7e   : > { %2416 = vmatpush3.bf16.msra.mxu0 %v2566_v4  ;;  %2500 = vmatpush3.bf16.msra.mxu1 %v2566_v4  ;;  %v648_v42 = vld [vmem:[#allocation2 + $0x110] sm:$0xff]  ;;  %v646_v44 = vld [vmem:[#allocation2 + $0x100] sm:$0xff]  ;;  %v617_v47 = vld [vmem:[#allocation2 + $0x18] sm:$0xff] }
  0x7f   : > { %2417 = vmatprep.subr.bf16.mxu0 %v2567_v7  ;;  %2493 = vmatprep.subr.bf16.mxu1 %v2567_v7  ;;  %v649_v48 = vld [vmem:[#allocation2 + $0x118] sm:$0xff]  ;;  %v615_v53 = vld [vmem:[#allocation2 + $0x8] sm:$0xff]  ;;  %v620_v1 = vld [vmem:[#allocation2 + $0x30] sm:$0xff] }
  0x80   : > { %v647_v54 = vld [vmem:[#allocation2 + $0x108] sm:$0xff]  ;;  %v652_v2 = vld [vmem:[#allocation2 + $0x130] sm:$0xff]  ;;  %v618_v3 = vld [vmem:[#allocation2 + $0x20] sm:$0xff] }
  0x81   : > { %v650_v4 = vld [vmem:[#allocation2 + $0x120] sm:$0xff] }
  0x82   : > { %2418 = vmatpush3.bf16.msra.mxu0 %v2567_v7  ;;  %2501 = vmatpush3.bf16.msra.mxu1 %v2567_v7  ;;  %v621_v7 = vld [vmem:[#allocation2 + $0x38] sm:$0xff] }
  0x83   : > { %2419 = vmatprep.subr.bf16.mxu0 %v2568_v8  ;;  %2494 = vmatprep.subr.bf16.mxu1 %v2568_v8 }
  0x86   : > { %2420 = vmatpush3.bf16.msra.mxu0 %v2568_v8  ;;  %2502 = vmatpush3.bf16.msra.mxu1 %v2568_v8  ;;  %v653_v8 = vld [vmem:[#allocation2 + $0x138] sm:$0xff] }
  0x87   : > { %2421 = vmatprep.subr.bf16.mxu0 %v2569_v9  ;;  %2495 = vmatprep.subr.bf16.mxu1 %v2569_v9 }
  0x8a   : > { %2422 = vmatpush3.bf16.msra.mxu0 %v2569_v9  ;;  %2503 = vmatpush3.bf16.msra.mxu1 %v2569_v9 }
  0x8b   : > { %2423 = vmatprep.subr.bf16.mxu0 %v2570_v10  ;;  %2496 = vmatprep.subr.bf16.mxu1 %v2570_v10 }
  0x8e   : > { %2424 = vmatpush3.bf16.msra.mxu0 %v2570_v10  ;;  %2504 = vmatpush3.bf16.msra.mxu1 %v2570_v10 }
  0x91   : > { %2426 = vmatmul.mubr.bf16.vlgmr.msra.gmra.mrb[0].mxu0 %v2573_v11  ;;  %2458 = vmatmul.mubr.bf16.vlgmr.msra.gmra.mrb[0].mxu1 %v2574_v12 }
  0x92   : > { %2429 = vmatprep.mubr.bf16.mxu0 %v2575_v13  ;;  %2461 = vmatprep.mubr.bf16.mxu1 %v2576_v14  ;;  %v619_v13 = vld [vmem:[#allocation2 + $0x28] sm:$0xff] }
  0x93   : > { %v651_v14 = vld [vmem:[#allocation2 + $0x128] sm:$0xff] }
  0x99   : > { %2430 = vmatmul.mubr.bf16.gmra.mrb[4].mxu0 %v2577_v15  ;;  %2462 = vmatmul.mubr.bf16.gmra.mrb[4].mxu1 %v2578_v16 }
  0x9a   : > { %2433 = vmatprep.mubr.bf16.mxu0 %v2579_v17  ;;  %2465 = vmatprep.mubr.bf16.mxu1 %v2580_v18 }
  0xa1   : > { %2434 = vmatmul.mubr.bf16.gmra.mrb[8].mxu0 %v2581_v19  ;;  %2466 = vmatmul.mubr.bf16.gmra.mrb[8].mxu1 %v2582_v20 }
  0xa2   : > { %2437 = vmatprep.mubr.bf16.mxu0 %v2583_v21  ;;  %2469 = vmatprep.mubr.bf16.mxu1 %v2584_v22 }
  0xa9   : > { %2438 = vmatmul.mubr.bf16.gmra.mrb[12].mxu0 %v2585_v23  ;;  %2470 = vmatmul.mubr.bf16.gmra.mrb[12].mxu1 %v2586_v24 }
  0xaa   : > { %2441 = vmatprep.mubr.bf16.mxu0 %v2587_v25  ;;  %2473 = vmatprep.mubr.bf16.mxu1 %v2588_v26  ;;  %v624_v25 = vld [vmem:[#allocation2 + $0x50] sm:$0xff] }
  0xab   : > { %v656_v26 = vld [vmem:[#allocation2 + $0x150] sm:$0xff] }
  0xb1   : > { %2442 = vmatmul.mubr.bf16.gmra.mrb[16].mxu0 %v2589_v27  ;;  %2474 = vmatmul.mubr.bf16.gmra.mrb[16].mxu1 %v2590_v28  ;;  %v622_v27 = vld [vmem:[#allocation2 + $0x40] sm:$0xff] }
  0xb2   : > { %2445 = vmatprep.mubr.bf16.mxu0 %v2591_v29  ;;  %2477 = vmatprep.mubr.bf16.mxu1 %v2592_v30  ;;  %v654_v28 = vld [vmem:[#allocation2 + $0x140] sm:$0xff] }
  0xb9   : > { %2446 = vmatmul.mubr.bf16.gmra.mrb[20].mxu0 %v2593_v31  ;;  %2478 = vmatmul.mubr.bf16.gmra.mrb[20].mxu1 %v2594_v32  ;;  %v625_v31 = vld [vmem:[#allocation2 + $0x58] sm:$0xff] }
  0xba   : > { %2449 = vmatprep.mubr.bf16.mxu0 %v2595_v33  ;;  %2481 = vmatprep.mubr.bf16.mxu1 %v2596_v34  ;;  %v657_v32 = vld [vmem:[#allocation2 + $0x158] sm:$0xff] }
  0xc1   : > { %2450 = vmatmul.mubr.bf16.gmra.mrb[24].mxu0 %v2597_v35  ;;  %2482 = vmatmul.mubr.bf16.gmra.mrb[24].mxu1 %v2598_v36 }
  0xc2   : > { %2453 = vmatprep.mubr.bf16.mxu0 %v2599_v37  ;;  %2485 = vmatprep.mubr.bf16.mxu1 %v2600_v38  ;;  %v623_v37 = vld [vmem:[#allocation2 + $0x48] sm:$0xff] }
  0xc3   : > { %v655_v38 = vld [vmem:[#allocation2 + $0x148] sm:$0xff] }
  0xc9   : > { %2454 = vmatmul.mubr.bf16.gmra.mrb[28].mxu0 %v2601_v39  ;;  %2486 = vmatmul.mubr.bf16.gmra.mrb[28].mxu1 %v2602_v40 }
 0x164   : > { %v2427_v45 = vpop.f32.mrb[0].mxu0  ;;  %v2459_v46 = vpop.f32.mrb[0].mxu1 }
 0x165   : > { %v1289_v49 = vadd.f32 %v2427_v45, %v616_v41  ;;  %v1321_v50 = vadd.f32 %v2459_v46, %v648_v42  ;;  %v1032_v51 = vpop.f32.mrb[1].mxu0  ;;  %v1160_v52 = vpop.f32.mrb[1].mxu1 }
 0x166   : > { %v1287_v55 = vadd.f32 %v1032_v51, %v614_v43  ;;  %v1319_v56 = vadd.f32 %v1160_v52, %v646_v44  ;;  %v2428_v57 = vpop.f32.mrb[2].mxu0  ;;  %v2460_v58 = vpop.f32.mrb[2].mxu1  ;;  %v626_v51 = vld [vmem:[#allocation2 + $0x60] sm:$0xff] }
 0x167   : > { %1353 = vst [vmem:[#allocation2 + $0x10] sm:$0xff] %v1289_v49  ;;  %1385 = vst [vmem:[#allocation2 + $0x110] sm:$0xff] %v1321_v50  ;;  %v1290_v59 = vadd.f32 %v2428_v57, %v617_v47  ;;  %v1322_v60 = vadd.f32 %v2460_v58, %v649_v48  ;;  %v1035_v61 = vpop.f32.mrb[3].mxu0  ;;  %v1163_v62 = vpop.f32.mrb[3].mxu1  ;;  %v628_v49 = vld [vmem:[#allocation2 + $0x70] sm:$0xff]  ;;  %v658_v52 = vld [vmem:[#allocation2 + $0x160] sm:$0xff] }
 0x168   : > { %1351 = vst [vmem:[#allocation2] sm:$0xff] %v1287_v55  ;;  %1383 = vst [vmem:[#allocation2 + $0x100] sm:$0xff] %v1319_v56  ;;  %v1288_v63 = vadd.f32 %v1035_v61, %v615_v53  ;;  %v1320_v0 = vadd.f32 %v1163_v62, %v647_v54  ;;  %v660_v50 = vld [vmem:[#allocation2 + $0x170] sm:$0xff]  ;;  %v629_v55 = vld [vmem:[#allocation2 + $0x78] sm:$0xff] }
 0x169   : > { %1354 = vst [vmem:[#allocation2 + $0x18] sm:$0xff] %v1290_v59  ;;  %1386 = vst [vmem:[#allocation2 + $0x118] sm:$0xff] %v1322_v60  ;;  %v661_v56 = vld [vmem:[#allocation2 + $0x178] sm:$0xff]  ;;  %v627_v61 = vld [vmem:[#allocation2 + $0x68] sm:$0xff] }
 0x16a   : > { %1352 = vst [vmem:[#allocation2 + $0x8] sm:$0xff] %v1288_v63  ;;  %1384 = vst [vmem:[#allocation2 + $0x108] sm:$0xff] %v1320_v0  ;;  %v659_v62 = vld [vmem:[#allocation2 + $0x168] sm:$0xff] }
 0x16c   : > { %v2431_v5 = vpop.f32.mrb[4].mxu0  ;;  %v2463_v6 = vpop.f32.mrb[4].mxu1 }
 0x16d   : > { %v1293_v9 = vadd.f32 %v2431_v5, %v620_v1  ;;  %v1325_v10 = vadd.f32 %v2463_v6, %v652_v2  ;;  %v1048_v11 = vpop.f32.mrb[5].mxu0  ;;  %v1176_v12 = vpop.f32.mrb[5].mxu1 }
 0x16e   : > { %v1291_v15 = vadd.f32 %v1048_v11, %v618_v3  ;;  %v1323_v16 = vadd.f32 %v1176_v12, %v650_v4  ;;  %v2432_v17 = vpop.f32.mrb[6].mxu0  ;;  %v2464_v18 = vpop.f32.mrb[6].mxu1  ;;  %v630_v11 = vld [vmem:[#allocation2 + $0x80] sm:$0xff] }
 0x16f   : > { %1357 = vst [vmem:[#allocation2 + $0x30] sm:$0xff] %v1293_v9  ;;  %1389 = vst [vmem:[#allocation2 + $0x130] sm:$0xff] %v1325_v10  ;;  %v1294_v19 = vadd.f32 %v2432_v17, %v621_v7  ;;  %v1326_v20 = vadd.f32 %v2464_v18, %v653_v8  ;;  %v1051_v21 = vpop.f32.mrb[7].mxu0  ;;  %v1179_v22 = vpop.f32.mrb[7].mxu1  ;;  %v632_v9 = vld [vmem:[#allocation2 + $0x90] sm:$0xff]  ;;  %v662_v12 = vld [vmem:[#allocation2 + $0x180] sm:$0xff] }
 0x170   : > { %1355 = vst [vmem:[#allocation2 + $0x20] sm:$0xff] %v1291_v15  ;;  %1387 = vst [vmem:[#allocation2 + $0x120] sm:$0xff] %v1323_v16  ;;  %v1292_v23 = vadd.f32 %v1051_v21, %v619_v13  ;;  %v1324_v24 = vadd.f32 %v1179_v22, %v651_v14  ;;  %v664_v10 = vld [vmem:[#allocation2 + $0x190] sm:$0xff]  ;;  %v633_v15 = vld [vmem:[#allocation2 + $0x98] sm:$0xff] }
 0x171   : > { %1358 = vst [vmem:[#allocation2 + $0x38] sm:$0xff] %v1294_v19  ;;  %1390 = vst [vmem:[#allocation2 + $0x138] sm:$0xff] %v1326_v20  ;;  %v665_v16 = vld [vmem:[#allocation2 + $0x198] sm:$0xff]  ;;  %v631_v21 = vld [vmem:[#allocation2 + $0x88] sm:$0xff] }
 0x172   : > { %1356 = vst [vmem:[#allocation2 + $0x28] sm:$0xff] %v1292_v23  ;;  %1388 = vst [vmem:[#allocation2 + $0x128] sm:$0xff] %v1324_v24  ;;  %v663_v22 = vld [vmem:[#allocation2 + $0x188] sm:$0xff] }
 0x174   : > { %v2435_v29 = vpop.f32.mrb[8].mxu0  ;;  %v2467_v30 = vpop.f32.mrb[8].mxu1 }
 0x175   : > { %v1297_v33 = vadd.f32 %v2435_v29, %v624_v25  ;;  %v1329_v34 = vadd.f32 %v2467_v30, %v656_v26  ;;  %v1064_v35 = vpop.f32.mrb[9].mxu0  ;;  %v1192_v36 = vpop.f32.mrb[9].mxu1 }
 0x176   : > { %v1295_v39 = vadd.f32 %v1064_v35, %v622_v27  ;;  %v1327_v40 = vadd.f32 %v1192_v36, %v654_v28  ;;  %v2436_v41 = vpop.f32.mrb[10].mxu0  ;;  %v2468_v42 = vpop.f32.mrb[10].mxu1  ;;  %v634_v35 = vld [vmem:[#allocation2 + $0xa0] sm:$0xff] }
 0x177   : > { %1361 = vst [vmem:[#allocation2 + $0x50] sm:$0xff] %v1297_v33  ;;  %1393 = vst [vmem:[#allocation2 + $0x150] sm:$0xff] %v1329_v34  ;;  %v1298_v43 = vadd.f32 %v2436_v41, %v625_v31  ;;  %v1330_v44 = vadd.f32 %v2468_v42, %v657_v32  ;;  %v1067_v45 = vpop.f32.mrb[11].mxu0  ;;  %v1195_v46 = vpop.f32.mrb[11].mxu1  ;;  %v636_v33 = vld [vmem:[#allocation2 + $0xb0] sm:$0xff]  ;;  %v666_v36 = vld [vmem:[#allocation2 + $0x1a0] sm:$0xff] }
 0x178   : > { %1359 = vst [vmem:[#allocation2 + $0x40] sm:$0xff] %v1295_v39  ;;  %1391 = vst [vmem:[#allocation2 + $0x140] sm:$0xff] %v1327_v40  ;;  %v1296_v47 = vadd.f32 %v1067_v45, %v623_v37  ;;  %v1328_v48 = vadd.f32 %v1195_v46, %v655_v38  ;;  %v668_v34 = vld [vmem:[#allocation2 + $0x1b0] sm:$0xff]  ;;  %v637_v39 = vld [vmem:[#allocation2 + $0xb8] sm:$0xff] }
 0x179   : > { %1362 = vst [vmem:[#allocation2 + $0x58] sm:$0xff] %v1298_v43  ;;  %1394 = vst [vmem:[#allocation2 + $0x158] sm:$0xff] %v1330_v44  ;;  %v669_v40 = vld [vmem:[#allocation2 + $0x1b8] sm:$0xff]  ;;  %v635_v45 = vld [vmem:[#allocation2 + $0xa8] sm:$0xff] }
 0x17a   : > { %1360 = vst [vmem:[#allocation2 + $0x48] sm:$0xff] %v1296_v47  ;;  %1392 = vst [vmem:[#allocation2 + $0x148] sm:$0xff] %v1328_v48  ;;  %v667_v46 = vld [vmem:[#allocation2 + $0x1a8] sm:$0xff] }
 0x17c   : > { %v2439_v53 = vpop.f32.mrb[12].mxu0  ;;  %v2471_v54 = vpop.f32.mrb[12].mxu1 }
 0x17d   : > { %v1301_v57 = vadd.f32 %v2439_v53, %v628_v49  ;;  %v1333_v58 = vadd.f32 %v2471_v54, %v660_v50  ;;  %v1080_v59 = vpop.f32.mrb[13].mxu0  ;;  %v1208_v60 = vpop.f32.mrb[13].mxu1 }
 0x17e   : > { %v1299_v63 = vadd.f32 %v1080_v59, %v626_v51  ;;  %v1331_v0 = vadd.f32 %v1208_v60, %v658_v52  ;;  %v2440_v1 = vpop.f32.mrb[14].mxu0  ;;  %v2472_v2 = vpop.f32.mrb[14].mxu1  ;;  %v638_v59 = vld [vmem:[#allocation2 + $0xc0] sm:$0xff] }
 0x17f   : > { %1365 = vst [vmem:[#allocation2 + $0x70] sm:$0xff] %v1301_v57  ;;  %1397 = vst [vmem:[#allocation2 + $0x170] sm:$0xff] %v1333_v58  ;;  %v1302_v3 = vadd.f32 %v2440_v1, %v629_v55  ;;  %v1334_v4 = vadd.f32 %v2472_v2, %v661_v56  ;;  %v1083_v5 = vpop.f32.mrb[15].mxu0  ;;  %v1211_v6 = vpop.f32.mrb[15].mxu1  ;;  %v640_v57 = vld [vmem:[#allocation2 + $0xd0] sm:$0xff]  ;;  %v670_v60 = vld [vmem:[#allocation2 + $0x1c0] sm:$0xff] }
 0x180   : > { %1363 = vst [vmem:[#allocation2 + $0x60] sm:$0xff] %v1299_v63  ;;  %1395 = vst [vmem:[#allocation2 + $0x160] sm:$0xff] %v1331_v0  ;;  %v1300_v7 = vadd.f32 %v1083_v5, %v627_v61  ;;  %v1332_v8 = vadd.f32 %v1211_v6, %v659_v62  ;;  %v672_v58 = vld [vmem:[#allocation2 + $0x1d0] sm:$0xff]  ;;  %v641_v63 = vld [vmem:[#allocation2 + $0xd8] sm:$0xff] }
 0x181   : > { %1366 = vst [vmem:[#allocation2 + $0x78] sm:$0xff] %v1302_v3  ;;  %1398 = vst [vmem:[#allocation2 + $0x178] sm:$0xff] %v1334_v4  ;;  %v673_v0 = vld [vmem:[#allocation2 + $0x1d8] sm:$0xff]  ;;  %v639_v5 = vld [vmem:[#allocation2 + $0xc8] sm:$0xff] }
 0x182   : > { %1364 = vst [vmem:[#allocation2 + $0x68] sm:$0xff] %v1300_v7  ;;  %1396 = vst [vmem:[#allocation2 + $0x168] sm:$0xff] %v1332_v8  ;;  %v671_v6 = vld [vmem:[#allocation2 + $0x1c8] sm:$0xff] }
 0x184   : > { %v2443_v13 = vpop.f32.mrb[16].mxu0  ;;  %v2475_v14 = vpop.f32.mrb[16].mxu1 }
 0x185   : > { %v1305_v17 = vadd.f32 %v2443_v13, %v632_v9  ;;  %v1337_v18 = vadd.f32 %v2475_v14, %v664_v10  ;;  %v1096_v19 = vpop.f32.mrb[17].mxu0  ;;  %v1224_v20 = vpop.f32.mrb[17].mxu1 }
 0x186   : > { %v1303_v23 = vadd.f32 %v1096_v19, %v630_v11  ;;  %v1335_v24 = vadd.f32 %v1224_v20, %v662_v12  ;;  %v2444_v25 = vpop.f32.mrb[18].mxu0  ;;  %v2476_v26 = vpop.f32.mrb[18].mxu1  ;;  %v642_v19 = vld [vmem:[#allocation2 + $0xe0] sm:$0xff] }
 0x187   : > { %1369 = vst [vmem:[#allocation2 + $0x90] sm:$0xff] %v1305_v17  ;;  %1401 = vst [vmem:[#allocation2 + $0x190] sm:$0xff] %v1337_v18  ;;  %v1306_v27 = vadd.f32 %v2444_v25, %v633_v15  ;;  %v1338_v28 = vadd.f32 %v2476_v26, %v665_v16  ;;  %v1099_v29 = vpop.f32.mrb[19].mxu0  ;;  %v1227_v30 = vpop.f32.mrb[19].mxu1  ;;  %v644_v17 = vld [vmem:[#allocation2 + $0xf0] sm:$0xff]  ;;  %v674_v20 = vld [vmem:[#allocation2 + $0x1e0] sm:$0xff] }
 0x188   : > { %1367 = vst [vmem:[#allocation2 + $0x80] sm:$0xff] %v1303_v23  ;;  %1399 = vst [vmem:[#allocation2 + $0x180] sm:$0xff] %v1335_v24  ;;  %v1304_v31 = vadd.f32 %v1099_v29, %v631_v21  ;;  %v1336_v32 = vadd.f32 %v1227_v30, %v663_v22  ;;  %v676_v18 = vld [vmem:[#allocation2 + $0x1f0] sm:$0xff]  ;;  %v645_v23 = vld [vmem:[#allocation2 + $0xf8] sm:$0xff] }
 0x189   : > { %1370 = vst [vmem:[#allocation2 + $0x98] sm:$0xff] %v1306_v27  ;;  %1402 = vst [vmem:[#allocation2 + $0x198] sm:$0xff] %v1338_v28  ;;  %v677_v24 = vld [vmem:[#allocation2 + $0x1f8] sm:$0xff]  ;;  %v643_v29 = vld [vmem:[#allocation2 + $0xe8] sm:$0xff] }
 0x18a   : > { %1368 = vst [vmem:[#allocation2 + $0x88] sm:$0xff] %v1304_v31  ;;  %1400 = vst [vmem:[#allocation2 + $0x188] sm:$0xff] %v1336_v32  ;;  %v675_v30 = vld [vmem:[#allocation2 + $0x1e8] sm:$0xff] }
 0x18c   : > { %v2447_v37 = vpop.f32.mrb[20].mxu0  ;;  %v2479_v38 = vpop.f32.mrb[20].mxu1 }
 0x18d   : > { %v1309_v41 = vadd.f32 %v2447_v37, %v636_v33  ;;  %v1341_v42 = vadd.f32 %v2479_v38, %v668_v34  ;;  %v1112_v43 = vpop.f32.mrb[21].mxu0  ;;  %v1240_v44 = vpop.f32.mrb[21].mxu1 }
 0x18e   : > { %v1307_v47 = vadd.f32 %v1112_v43, %v634_v35  ;;  %v1339_v48 = vadd.f32 %v1240_v44, %v666_v36  ;;  %v2448_v49 = vpop.f32.mrb[22].mxu0  ;;  %v2480_v50 = vpop.f32.mrb[22].mxu1  ;;  %v2998_v43 = vld [vmem:[%s3119_s2] ss:$0 sm:$0xff] (!%p2046_p13) }
 0x18f   : > { %1373 = vst [vmem:[#allocation2 + $0xb0] sm:$0xff] %v1309_v41  ;;  %1405 = vst [vmem:[#allocation2 + $0x1b0] sm:$0xff] %v1341_v42  ;;  %v1310_v51 = vadd.f32 %v2448_v49, %v637_v39  ;;  %v1342_v52 = vadd.f32 %v2480_v50, %v669_v40  ;;  %v1115_v53 = vpop.f32.mrb[23].mxu0  ;;  %v1243_v54 = vpop.f32.mrb[23].mxu1  ;;  %v1419_v41 = vld [vmem:[#allocation2] sm:$0xff] (!%p2046_p13)  ;;  %v1420_v42 = vld [vmem:[#allocation2 + $0x8] sm:$0xff] (!%p2046_p13) }
 0x190   : > { %1371 = vst [vmem:[#allocation2 + $0xa0] sm:$0xff] %v1307_v47  ;;  %1403 = vst [vmem:[#allocation2 + $0x1a0] sm:$0xff] %v1339_v48  ;;  %v1308_v55 = vadd.f32 %v1115_v53, %v635_v45  ;;  %v1340_v56 = vadd.f32 %v1243_v54, %v667_v46  ;;  %v1490_v44 = vadd.f32 (!%p2046_p13), %v2998_v43, %v1419_v41  ;;  %v1421_v46 = vld [vmem:[#allocation2 + $0x10] sm:$0xff] (!%p2046_p13)  ;;  %v1422_v47 = vld [vmem:[#allocation2 + $0x18] sm:$0xff] (!%p2046_p13) }
 0x191   : > { %1374 = vst [vmem:[#allocation2 + $0xb8] sm:$0xff] %v1310_v51  ;;  %1406 = vst [vmem:[#allocation2 + $0x1b8] sm:$0xff] %v1342_v52  ;;  %v1491_v45 = vadd.f32 (!%p2046_p13), %v2998_v43, %v1420_v42  ;;  %v1423_v48 = vld [vmem:[#allocation2 + $0x20] sm:$0xff] (!%p2046_p13)  ;;  %v1492_v49 = vadd.f32 (!%p2046_p13), %v2998_v43, %v1421_v46  ;;  %v1493_v50 = vadd.f32 (!%p2046_p13), %v2998_v43, %v1422_v47  ;;  %v1424_v51 = vld [vmem:[#allocation2 + $0x28] sm:$0xff] (!%p2046_p13) }
 0x192   : > { %1372 = vst [vmem:[#allocation2 + $0xa8] sm:$0xff] %v1308_v55  ;;  %1404 = vst [vmem:[#allocation2 + $0x1a8] sm:$0xff] %v1340_v56  ;;  %v1494_v52 = vadd.f32 (!%p2046_p13), %v2998_v43, %v1423_v48  ;;  %v1425_v53 = vld [vmem:[#allocation2 + $0x30] sm:$0xff] (!%p2046_p13)  ;;  %v1426_v54 = vld [vmem:[#allocation2 + $0x38] sm:$0xff] (!%p2046_p13)  ;;  %v1495_v56 = vadd.f32 (!%p2046_p13), %v2998_v43, %v1424_v51 }
 0x193   : > { %v2181_v55 = vpack.c.bf16 (!%p2046_p13), %v1491_v45, %v1490_v44 }
 0x194   : > { %v2451_v61 = vpop.f32.mrb[24].mxu0  ;;  %v2483_v62 = vpop.f32.mrb[24].mxu1 }
 0x195   : > { %v1313_v1 = vadd.f32 %v2451_v61, %v640_v57  ;;  %v1345_v2 = vadd.f32 %v2483_v62, %v672_v58  ;;  %v1128_v3 = vpop.f32.mrb[25].mxu0  ;;  %v1256_v4 = vpop.f32.mrb[25].mxu1  ;;  %v1496_v57 = vadd.f32 (!%p2046_p13), %v2998_v43, %v1425_v53  ;;  %v1497_v58 = vadd.f32 (!%p2046_p13), %v2998_v43, %v1426_v54  ;;  %v1429_v61 = vld [vmem:[#allocation2 + $0x50] sm:$0xff] (!%p2046_p13)  ;;  %2182 = vst [vmem:[%s2885_s29] sm:$0xff] (!%p2046_p13), %v2181_v55   ;;  %v1452_v53 = vld [vmem:[#allocation2 + $0x108] sm:$0xff] (!%p2046_p13) }
 0x196   : > { %v1311_v7 = vadd.f32 %v1128_v3, %v638_v59  ;;  %v1343_v8 = vadd.f32 %v1256_v4, %v670_v60  ;;  %v2452_v9 = vpop.f32.mrb[26].mxu0  ;;  %v2484_v10 = vpop.f32.mrb[26].mxu1  ;;  %v1427_v59 = vld [vmem:[#allocation2 + $0x40] sm:$0xff] (!%p2046_p13)  ;;  %v1428_v60 = vld [vmem:[#allocation2 + $0x48] sm:$0xff] (!%p2046_p13)  ;;  %v2186_v62 = vpack.c.bf16 (!%p2046_p13), %v1493_v50, %v1492_v49  ;;  %v1453_v54 = vld [vmem:[#allocation2 + $0x110] sm:$0xff] (!%p2046_p13) }
 0x197   : > { %1377 = vst [vmem:[#allocation2 + $0xd0] sm:$0xff] %v1313_v1  ;;  %1409 = vst [vmem:[#allocation2 + $0x1d0] sm:$0xff] %v1345_v2  ;;  %v1314_v11 = vadd.f32 %v2452_v9, %v641_v63  ;;  %v1346_v12 = vadd.f32 %v2484_v10, %v673_v0  ;;  %v1131_v13 = vpop.f32.mrb[27].mxu0  ;;  %v1259_v14 = vpop.f32.mrb[27].mxu1  ;;  %v1498_v63 = vadd.f32 (!%p2046_p13), %v2998_v43, %v1427_v59  ;;  %v1430_v1 = vld [vmem:[#allocation2 + $0x58] sm:$0xff] (!%p2046_p13)  ;;  %v1431_v3 = vld [vmem:[#allocation2 + $0x60] sm:$0xff] (!%p2046_p13) }
 0x198   : > { %1375 = vst [vmem:[#allocation2 + $0xc0] sm:$0xff] %v1311_v7  ;;  %1407 = vst [vmem:[#allocation2 + $0x1c0] sm:$0xff] %v1343_v8  ;;  %v1312_v15 = vadd.f32 %v1131_v13, %v639_v5  ;;  %v1344_v16 = vadd.f32 %v1259_v14, %v671_v6  ;;  %v1499_v0 = vadd.f32 (!%p2046_p13), %v2998_v43, %v1428_v60  ;;  %v1432_v4 = vld [vmem:[#allocation2 + $0x68] sm:$0xff] (!%p2046_p13)  ;;  %v1433_v9 = vld [vmem:[#allocation2 + $0x70] sm:$0xff] (!%p2046_p13) }
 0x199   : > { %1378 = vst [vmem:[#allocation2 + $0xd8] sm:$0xff] %v1314_v11  ;;  %1410 = vst [vmem:[#allocation2 + $0x1d8] sm:$0xff] %v1346_v12  ;;  %v1500_v2 = vadd.f32 (!%p2046_p13), %v2998_v43, %v1429_v61  ;;  %v2191_v5 = vpack.c.bf16 (!%p2046_p13), %v1495_v56, %v1494_v52  ;;  %v2196_v6 = vpack.c.bf16 (!%p2046_p13), %v1497_v58, %v1496_v57  ;;  %v1434_v10 = vld [vmem:[#allocation2 + $0x78] sm:$0xff] (!%p2046_p13)  ;;  %v1435_v11 = vld [vmem:[#allocation2 + $0x80] sm:$0xff] (!%p2046_p13) }
 0x19a   : > { %1376 = vst [vmem:[#allocation2 + $0xc8] sm:$0xff] %v1312_v15  ;;  %1408 = vst [vmem:[#allocation2 + $0x1c8] sm:$0xff] %v1344_v16  ;;  %v1501_v7 = vadd.f32 (!%p2046_p13), %v2998_v43, %v1430_v1  ;;  %v1502_v8 = vadd.f32 (!%p2046_p13), %v2998_v43, %v1431_v3  ;;  %v2201_v12 = vpack.c.bf16 (!%p2046_p13), %v1499_v0, %v1498_v63  ;;  %v1436_v16 = vld [vmem:[#allocation2 + $0x88] sm:$0xff] (!%p2046_p13)  ;;  %v1451_v52 = vld [vmem:[#allocation2 + $0x100] sm:$0xff] (!%p2046_p13) }
 0x19b   : > { %2338 = vst [vmem:[%s2885_s29 + $0x8] sm:$0xff] (!%p2046_p13), %v2186_v62   ;;  %v1503_v13 = vadd.f32 (!%p2046_p13), %v2998_v43, %v1432_v4  ;;  %v1504_v14 = vadd.f32 (!%p2046_p13), %v2998_v43, %v1433_v9  ;;  %v1505_v15 = vadd.f32 (!%p2046_p13), %v2998_v43, %v1434_v10  ;;  %2339 = vst [vmem:[%s2885_s29 + $0x10] sm:$0xff] (!%p2046_p13), %v2191_v5   ;;  %v1454_v59 = vld [vmem:[#allocation2 + $0x118] sm:$0xff] (!%p2046_p13)  ;;  %v1455_v60 = vld [vmem:[#allocation2 + $0x120] sm:$0xff] (!%p2046_p13) }
 0x19c   : > { %v2455_v21 = vpop.f32.mrb[28].mxu0  ;;  %v2487_v22 = vpop.f32.mrb[28].mxu1  ;;  %1418 = sbr.rel (%p2046_p13) target bundleno = 439 (0x1b7), region = 81  ;;  %2340 = vst [vmem:[%s2885_s29 + $0x18] sm:$0xff] (!%p2046_p13), %v2196_v6   ;;  %2341 = vst [vmem:[%s2885_s29 + $0x20] sm:$0xff] (!%p2046_p13), %v2201_v12   ;;  %v1456_v61 = vld [vmem:[#allocation2 + $0x128] sm:$0xff] (!%p2046_p13)  ;;  %v1522_v63 = vadd.f32 (!%p2046_p13), %v2998_v43, %v1451_v52  ;;  %v1523_v0 = vadd.f32 (!%p2046_p13), %v2998_v43, %v1452_v53  ;;  %v1524_v1 = vadd.f32 (!%p2046_p13), %v2998_v43, %v1453_v54 }
 0x19d   : > { %v1317_v25 = vadd.f32 %v2455_v21, %v644_v17  ;;  %v1349_v26 = vadd.f32 %v2487_v22, %v676_v18  ;;  %v1144_v27 = vpop.f32.mrb[29].mxu0  ;;  %v1272_v28 = vpop.f32.mrb[29].mxu1  ;;  %v1437_v17 = vld [vmem:[#allocation2 + $0x90] sm:$0xff] (!%p2046_p13)  ;;  %v1438_v18 = vld [vmem:[#allocation2 + $0x98] sm:$0xff] (!%p2046_p13)  ;;  %v1507_v21 = vadd.f32 (!%p2046_p13), %v2998_v43, %v1436_v16  ;;  %v1459_v4 = vld [vmem:[#allocation2 + $0x140] sm:$0xff] (!%p2046_p13) }
 0x19e   : > { %v1315_v31 = vadd.f32 %v1144_v27, %v642_v19  ;;  %v1347_v32 = vadd.f32 %v1272_v28, %v674_v20  ;;  %v2456_v33 = vpop.f32.mrb[30].mxu0  ;;  %v2488_v34 = vpop.f32.mrb[30].mxu1  ;;  %v2206_v19 = vpack.c.bf16 (!%p2046_p13), %v1501_v7, %v1500_v2  ;;  %v1506_v20 = vadd.f32 (!%p2046_p13), %v2998_v43, %v1435_v11  ;;  %v1457_v2 = vld [vmem:[#allocation2 + $0x130] sm:$0xff] (!%p2046_p13)  ;;  %v1458_v3 = vld [vmem:[#allocation2 + $0x138] sm:$0xff] (!%p2046_p13)  ;;  %v1460_v9 = vld [vmem:[#allocation2 + $0x148] sm:$0xff] (!%p2046_p13) }
 0x19f   : > { %1381 = vst [vmem:[#allocation2 + $0xf0] sm:$0xff] %v1317_v25  ;;  %1413 = vst [vmem:[#allocation2 + $0x1f0] sm:$0xff] %v1349_v26  ;;  %v1318_v35 = vadd.f32 %v2456_v33, %v645_v23  ;;  %v1350_v36 = vadd.f32 %v2488_v34, %v677_v24  ;;  %v1147_v37 = vpop.f32.mrb[31].mxu0  ;;  %v1275_v38 = vpop.f32.mrb[31].mxu1  ;;  %v1508_v22 = vadd.f32 (!%p2046_p13), %v2998_v43, %v1437_v17  ;;  %v1439_v23 = vld [vmem:[#allocation2 + $0xa0] sm:$0xff] (!%p2046_p13)  ;;  %v1440_v24 = vld [vmem:[#allocation2 + $0xa8] sm:$0xff] (!%p2046_p13) }
 0x1a0   : > { %1379 = vst [vmem:[#allocation2 + $0xe0] sm:$0xff] %v1315_v31  ;;  %1411 = vst [vmem:[#allocation2 + $0x1e0] sm:$0xff] %v1347_v32  ;;  %v1316_v39 = vadd.f32 %v1147_v37, %v643_v29  ;;  %v1348_v40 = vadd.f32 %v1275_v38, %v675_v30  ;;  %v1441_v25 = vld [vmem:[#allocation2 + $0xb0] sm:$0xff] (!%p2046_p13)  ;;  %v2211_v26 = vpack.c.bf16 (!%p2046_p13), %v1503_v13, %v1502_v8  ;;  %v1442_v30 = vld [vmem:[#allocation2 + $0xb8] sm:$0xff] (!%p2046_p13) }
 0x1a1   : > { %1382 = vst [vmem:[#allocation2 + $0xf8] sm:$0xff] %v1318_v35  ;;  %1414 = vst [vmem:[#allocation2 + $0x1f8] sm:$0xff] %v1350_v36  ;;  %v2216_v27 = vpack.c.bf16 (!%p2046_p13), %v1505_v15, %v1504_v14  ;;  %v1509_v28 = vadd.f32 (!%p2046_p13), %v2998_v43, %v1438_v18  ;;  %v1510_v29 = vadd.f32 (!%p2046_p13), %v2998_v43, %v1439_v23  ;;  %v1443_v31 = vld [vmem:[#allocation2 + $0xc0] sm:$0xff] (!%p2046_p13)  ;;  %v1444_v32 = vld [vmem:[#allocation2 + $0xc8] sm:$0xff] (!%p2046_p13) }
 0x1a2   : > { %1380 = vst [vmem:[#allocation2 + $0xe8] sm:$0xff] %v1316_v39  ;;  %1412 = vst [vmem:[#allocation2 + $0x1e8] sm:$0xff] %v1348_v40  ;;  %v2221_v33 = vpack.c.bf16 (!%p2046_p13), %v1507_v21, %v1506_v20  ;;  %v1511_v34 = vadd.f32 (!%p2046_p13), %v2998_v43, %v1440_v24  ;;  %v1512_v35 = vadd.f32 (!%p2046_p13), %v2998_v43, %v1441_v25  ;;  %v1445_v37 = vld [vmem:[#allocation2 + $0xd0] sm:$0xff] (!%p2046_p13)  ;;  %v1446_v38 = vld [vmem:[#allocation2 + $0xd8] sm:$0xff] (!%p2046_p13) }
 0x1a3   : > { %2342 = vst [vmem:[%s2885_s29 + $0x28] sm:$0xff] %v2206_v19   ;;  %v1513_v36 = vadd.f32 %v2998_v43, %v1442_v30  ;;  %2343 = vst [vmem:[%s2885_s29 + $0x30] sm:$0xff] %v2211_v26   ;;  %v2226_v40 = vpack.c.bf16 %v1509_v28, %v1508_v22  ;;  %v1514_v41 = vadd.f32 %v2998_v43, %v1443_v31  ;;  %v1461_v10 = vld [vmem:[#allocation2 + $0x150] sm:$0xff]  ;;  %v1462_v11 = vld [vmem:[#allocation2 + $0x158] sm:$0xff] }
 0x1a4   : > { %2344 = vst [vmem:[%s2885_s29 + $0x38] sm:$0xff] %v2216_v27   ;;  %v1515_v42 = vadd.f32 %v2998_v43, %v1444_v32  ;;  %v1516_v44 = vadd.f32 %v2998_v43, %v1445_v37  ;;  %2345 = vst [vmem:[%s2885_s29 + $0x40] sm:$0xff] %v2221_v33   ;;  %v2231_v48 = vpack.c.bf16 %v1511_v34, %v1510_v29  ;;  %v1463_v16 = vld [vmem:[#allocation2 + $0x160] sm:$0xff]  ;;  %v1464_v17 = vld [vmem:[#allocation2 + $0x168] sm:$0xff] }
 0x1a5   : > { %v2236_v49 = vpack.c.bf16 %v1513_v36, %v1512_v35  ;;  %v1517_v50 = vadd.f32 %v2998_v43, %v1446_v38  ;;  %2346 = vst [vmem:[%s2885_s29 + $0x48] sm:$0xff] %v2226_v40   ;;  %v1525_v7 = vadd.f32 %v2998_v43, %v1454_v59  ;;  %v1526_v8 = vadd.f32 %v2998_v43, %v1455_v60  ;;  %v1465_v18 = vld [vmem:[#allocation2 + $0x170] sm:$0xff]  ;;  %v1466_v23 = vld [vmem:[#allocation2 + $0x178] sm:$0xff]  ;;  %v1467_v24 = vld [vmem:[#allocation2 + $0x180] sm:$0xff] }
 0x1a6   : > { %v1449_v46 = vld [vmem:[#allocation2 + $0xf0] sm:$0xff]  ;;  %v2241_v55 = vpack.c.bf16 %v1515_v42, %v1514_v41  ;;  %2347 = vst [vmem:[%s2885_s29 + $0x50] sm:$0xff] %v2231_v48   ;;  %v2261_v12 = vpack.c.bf16 %v1523_v0, %v1522_v63  ;;  %v1527_v13 = vadd.f32 %v2998_v43, %v1456_v61  ;;  %v1528_v14 = vadd.f32 %v2998_v43, %v1457_v2  ;;  %v1468_v25 = vld [vmem:[#allocation2 + $0x188] sm:$0xff]  ;;  %v1470_v31 = vld [vmem:[#allocation2 + $0x198] sm:$0xff] }
 0x1a7   : > { %v1447_v39 = vld [vmem:[#allocation2 + $0xe0] sm:$0xff]  ;;  %v1520_v57 = vadd.f32 %v2998_v43, %v1449_v46  ;;  %2348 = vst [vmem:[%s2885_s29 + $0x58] sm:$0xff] %v2236_v49   ;;  %v2246_v62 = vpack.c.bf16 %v1517_v50, %v1516_v44  ;;  %v1529_v15 = vadd.f32 %v2998_v43, %v1458_v3  ;;  %v2266_v19 = vpack.c.bf16 %v1525_v7, %v1524_v1  ;;  %v1469_v30 = vld [vmem:[#allocation2 + $0x190] sm:$0xff]  ;;  %v1472_v37 = vld [vmem:[#allocation2 + $0x1a8] sm:$0xff] }
 0x1a8   : > { %v1450_v47 = vld [vmem:[#allocation2 + $0xf8] sm:$0xff]  ;;  %v1518_v51 = vadd.f32 %v2998_v43, %v1447_v39  ;;  %2349 = vst [vmem:[%s2885_s29 + $0x60] sm:$0xff] %v2241_v55   ;;  %v1530_v20 = vadd.f32 %v2998_v43, %v1459_v4  ;;  %v1531_v21 = vadd.f32 %v2998_v43, %v1460_v9  ;;  %v1532_v22 = vadd.f32 %v2998_v43, %v1461_v10  ;;  %v1471_v32 = vld [vmem:[#allocation2 + $0x1a0] sm:$0xff]  ;;  %v1473_v38 = vld [vmem:[#allocation2 + $0x1b0] sm:$0xff] }
 0x1a9   : > { %v1448_v45 = vld [vmem:[#allocation2 + $0xe8] sm:$0xff]  ;;  %v1521_v58 = vadd.f32 %v2998_v43, %v1450_v47  ;;  %2350 = vst [vmem:[%s2885_s29 + $0x68] sm:$0xff] %v2246_v62   ;;  %2353 = vst [vmem:[%s2885_s29 + $0x80] sm:$0xff] %v2261_v12   ;;  %v2271_v26 = vpack.c.bf16 %v1527_v13, %v1526_v8  ;;  %v2276_v27 = vpack.c.bf16 %v1529_v15, %v1528_v14  ;;  %v1474_v39 = vld [vmem:[#allocation2 + $0x1b8] sm:$0xff] }
 0x1aa   : > { %v1519_v56 = vadd.f32 %v2998_v43, %v1448_v45  ;;  %v1533_v28 = vadd.f32 %v2998_v43, %v1462_v11  ;;  %v1534_v29 = vadd.f32 %v2998_v43, %v1463_v16  ;;  %2354 = vst [vmem:[%s2885_s29 + $0x88] sm:$0xff] %v2266_v19   ;;  %v2281_v33 = vpack.c.bf16 %v1531_v21, %v1530_v20  ;;  %v1475_v45 = vld [vmem:[#allocation2 + $0x1c0] sm:$0xff]  ;;  %v1476_v46 = vld [vmem:[#allocation2 + $0x1c8] sm:$0xff]  ;;  %v1477_v47 = vld [vmem:[#allocation2 + $0x1d0] sm:$0xff] }
 0x1ab   : > { %v2256_v6 = vpack.c.bf16 %v1521_v58, %v1520_v57  ;;  %v1535_v34 = vadd.f32 %v2998_v43, %v1464_v17  ;;  %v1536_v35 = vadd.f32 %v2998_v43, %v1465_v18  ;;  %v1537_v36 = vadd.f32 %v2998_v43, %v1466_v23  ;;  %2355 = vst [vmem:[%s2885_s29 + $0x90] sm:$0xff] %v2271_v26   ;;  %v1478_v52 = vld [vmem:[#allocation2 + $0x1d8] sm:$0xff]  ;;  %v1479_v53 = vld [vmem:[#allocation2 + $0x1e0] sm:$0xff]  ;;  %v1480_v58 = vld [vmem:[#allocation2 + $0x1e8] sm:$0xff] }
 0x1ac   : > { %v2251_v5 = vpack.c.bf16 %v1519_v56, %v1518_v51  ;;  %2356 = vst [vmem:[%s2885_s29 + $0x98] sm:$0xff] %v2276_v27   ;;  %v2286_v40 = vpack.c.bf16 %v1533_v28, %v1532_v22  ;;  %v1538_v41 = vadd.f32 %v2998_v43, %v1467_v24  ;;  %v1539_v42 = vadd.f32 %v2998_v43, %v1468_v25  ;;  %v1481_v59 = vld [vmem:[#allocation2 + $0x1f0] sm:$0xff]  ;;  %v1482_v60 = vld [vmem:[#allocation2 + $0x1f8] sm:$0xff] }
 0x1ad   : > { %2352 = vst [vmem:[%s2885_s29 + $0x78] sm:$0xff] %v2256_v6   ;;  %v1540_v44 = vadd.f32 %v2998_v43, %v1469_v30  ;;  %2357 = vst [vmem:[%s2885_s29 + $0xa0] sm:$0xff] %v2281_v33   ;;  %v2291_v48 = vpack.c.bf16 %v1535_v34, %v1534_v29  ;;  %v2296_v49 = vpack.c.bf16 %v1537_v36, %v1536_v35 }
 0x1ae   : > { %2351 = vst [vmem:[%s2885_s29 + $0x70] sm:$0xff] %v2251_v5   ;;  %v1541_v50 = vadd.f32 %v2998_v43, %v1470_v31  ;;  %v1542_v51 = vadd.f32 %v2998_v43, %v1471_v32  ;;  %2358 = vst [vmem:[%s2885_s29 + $0xa8] sm:$0xff] %v2286_v40   ;;  %v2301_v54 = vpack.c.bf16 %v1539_v42, %v1538_v41 }
 0x1af   : > { %v1543_v55 = vadd.f32 %v2998_v43, %v1472_v37  ;;  %v1544_v56 = vadd.f32 %v2998_v43, %v1473_v38  ;;  %v1545_v57 = vadd.f32 %v2998_v43, %v1474_v39  ;;  %2359 = vst [vmem:[%s2885_s29 + $0xb0] sm:$0xff] %v2291_v48   ;;  %2360 = vst [vmem:[%s2885_s29 + $0xb8] sm:$0xff] %v2296_v49  }
 0x1b0   : > { %v2306_v61 = vpack.c.bf16 %v1541_v50, %v1540_v44  ;;  %v1546_v62 = vadd.f32 %v2998_v43, %v1475_v45  ;;  %v1547_v63 = vadd.f32 %v2998_v43, %v1476_v46  ;;  %v1548_v0 = vadd.f32 %v2998_v43, %v1477_v47  ;;  %2361 = vst [vmem:[%s2885_s29 + $0xc0] sm:$0xff] %v2301_v54  }
 0x1b1   : > { %v2311_v1 = vpack.c.bf16 %v1543_v55, %v1542_v51  ;;  %v2316_v2 = vpack.c.bf16 %v1545_v57, %v1544_v56  ;;  %v1549_v3 = vadd.f32 %v2998_v43, %v1478_v52  ;;  %v1550_v4 = vadd.f32 %v2998_v43, %v1479_v53 }
 0x1b2   : > { %2362 = vst [vmem:[%s2885_s29 + $0xc8] sm:$0xff] %v2306_v61   ;;  %v2321_v5 = vpack.c.bf16 %v1547_v63, %v1546_v62  ;;  %v1551_v6 = vadd.f32 %v2998_v43, %v1480_v58  ;;  %v1552_v7 = vadd.f32 %v2998_v43, %v1481_v59  ;;  %v1553_v8 = vadd.f32 %v2998_v43, %v1482_v60 }
 0x1b3   : > { %2363 = vst [vmem:[%s2885_s29 + $0xd0] sm:$0xff] %v2311_v1   ;;  %2364 = vst [vmem:[%s2885_s29 + $0xd8] sm:$0xff] %v2316_v2   ;;  %v2326_v9 = vpack.c.bf16 %v1549_v3, %v1548_v0 }
 0x1b4   : > { %2365 = vst [vmem:[%s2885_s29 + $0xe0] sm:$0xff] %v2321_v5   ;;  %v2331_v10 = vpack.c.bf16 %v1551_v6, %v1550_v4  ;;  %v2336_v11 = vpack.c.bf16 %v1553_v8, %v1552_v7 }
 0x1b5   : > { %2366 = vst [vmem:[%s2885_s29 + $0xe8] sm:$0xff] %v2326_v9  }
 0x1b6   : > { %2367 = vst [vmem:[%s2885_s29 + $0xf0] sm:$0xff] %v2331_v10   ;;  %2368 = vst [vmem:[%s2885_s29 + $0xf8] sm:$0xff] %v2336_v11  }
 0x1b7 PF: > { %s13_s18 = sadd.s32 1, %s2657_s18   ;;  %s3121_s12 = smov %s2637_s13 }
 0x1b8   : > { %p10_p0 = scmp.ge.s32.totalorder %s13_s18, 22   ;;  %s3122_s13 = smov %s2731_s25 }
 0x1b9   : > { %s3123_s14 = smov %s2649_s16  ;;  %s3124_s15 = smov %s2653_s17 }
 0x1ba   : > { %s3125_s16 = smov %s3128_s19  ;;  %s3126_s17 = smov %s3132_s20 }
 0x1bb   :  { %12 = sbr.rel (!%p10_p0) target bundleno = 4 (0x4), region = 122 }

// kernel: _lambda_.53
= control target key start
LH: loop header
LB: loop body
LE: loop exit
PB: predicated region body
PF: predicated region fallthrough
CT: control target
= control target key end

     0   :  { %s2763_s12 = smov 0   ;;  %s2765_s13 = smov 0   ;;  %s3257_s0 = inlined_call_operand.vmem [shape: bf16[2048,384], index: 0, kind: input, shape index: {}]   ;;  %s3258_s1 = inlined_call_operand.vmem [shape: bf16[384,128], index: 1, kind: input, shape index: {}]   ;;  %s3259_s2 = inlined_call_operand.vmem [shape: f32[1,128], index: 2, kind: input, shape index: {}]   ;;  %s3260_s3 = inlined_call_operand.vmem [shape: f32[2048,128], index: 3, kind: output, shape index: {}]  }
   0x1   :  { %s2767_s14 = smov 0  }
   0x2 LB: > { %s32_s15 = sadd.s32 1, %s2736_s13  ;;  %p2260_p0 = scmp.ge.s32.totalorder %s2740_s14, 1  ;;  %s2740_s14 = sphi %s2767_s14, %s13_s14   ;;  %s2736_s13 = sphi %s2765_s13, %s3262_s13   ;;  %s2732_s12 = sphi %s2763_s12, %s3261_s12  }
   0x3   : > { %p34_p1 = scmp.ge.s32.totalorder %s32_s15, 4  ;;  %p191_p2 = scmp.lt.s32.totalorder %s2740_s14, 5 }
   0x5   : > { %s3264_s15 = smov (%p34_p1, %s32_s15), 0  ;;  %p192_p3 = pnand %p2260_p0, %p191_p2 }
   0x6   : > { %v2566_v0 = vld [vmem:[%s3258_s1] sm:$0xff] (!%p192_p3)   ;;  %v2742_v1 = vmov (!%p192_p3), 0   ;;  %s2261_s18 = sshll.u32 (!%p192_p3), %s2732_s12, 6  ;;  %v2567_v2 = vld [vmem:[%s3258_s1 + $0x8] sm:$0xff] (!%p192_p3)   ;;  %v2568_v3 = vld [vmem:[%s3258_s1 + $0x10] sm:$0xff] (!%p192_p3)  }
   0x7   : > { %195 = sbr.rel (%p192_p3) target bundleno = 475 (0x1db), region = 32  ;;  %1232 = vmatprep.subr.bf16.mxu0 (!%p192_p3), %v2742_v1  ;;  %2508 = vmatprep.subr.bf16.mxu1 (!%p192_p3), %v2742_v1  ;;  %p236_p4 = scmp.lt.s32.totalorder (!%p192_p3), %s2261_s18, 255  ;;  %v2569_v4 = vld [vmem:[%s3258_s1 + $0x18] sm:$0xff] (!%p192_p3)   ;;  %v2570_v5 = vld [vmem:[%s3258_s1 + $0x20] sm:$0xff] (!%p192_p3)   ;;  %v2571_v7 = vld [vmem:[%s3258_s1 + $0x28] sm:$0xff] (!%p192_p3)  }
   0x8   : > { %1233 = vmatpush1.bf16.msra.mxu0 (!%p192_p3), %v2566_v0  ;;  %2524 = vmatpush1.bf16.msra.mxu1 (!%p192_p3), %v2566_v0  ;;  %v2572_v9 = vld [vmem:[%s3258_s1 + $0x30] sm:$0xff] (!%p192_p3)   ;;  %v2573_v10 = vld [vmem:[%s3258_s1 + $0x38] sm:$0xff] (!%p192_p3)   ;;  %v2574_v11 = vld [vmem:[%s3258_s1 + $0x40] sm:$0xff] (!%p192_p3)  }
   0x9   : > { %1234 = vmatprep.subr.bf16.mxu0 (!%p192_p3), %v2742_v1  ;;  %2509 = vmatprep.subr.bf16.mxu1 (!%p192_p3), %v2742_v1  ;;  %v2575_v12 = vld [vmem:[%s3258_s1 + $0x48] sm:$0xff] (!%p192_p3)   ;;  %v2576_v13 = vld [vmem:[%s3258_s1 + $0x50] sm:$0xff] (!%p192_p3)   ;;  %v2577_v14 = vld [vmem:[%s3258_s1 + $0x58] sm:$0xff] (!%p192_p3)  }
   0xa   : > { %v2578_v15 = vld [vmem:[%s3258_s1 + $0x60] sm:$0xff] (!%p192_p3)   ;;  %v2579_v16 = vld [vmem:[%s3258_s1 + $0x68] sm:$0xff] (!%p192_p3)   ;;  %v2580_v17 = vld [vmem:[%s3258_s1 + $0x70] sm:$0xff] (!%p192_p3)  }
   0xb   : > { %v2581_v18 = vld [vmem:[%s3258_s1 + $0x78] sm:$0xff] (!%p192_p3)   ;;  %v2588_v19 = vld [vmem:[%s3258_s1 + $0x80] sm:$0xff] (!%p192_p3)   ;;  %v2595_v24 = vld [vmem:[%s3258_s1 + $0x88] sm:$0xff] (!%p192_p3)  }
   0xc   : > { %1235 = vmatpush1.bf16.msra.mxu0 (!%p192_p3), %v2567_v2  ;;  %2525 = vmatpush1.bf16.msra.mxu1 (!%p192_p3), %v2567_v2  ;;  %v2602_v25 = vld [vmem:[%s3258_s1 + $0x90] sm:$0xff] (!%p192_p3)   ;;  %v2609_v30 = vld [vmem:[%s3258_s1 + $0x98] sm:$0xff] (!%p192_p3)   ;;  %v2616_v32 = vld [vmem:[%s3258_s1 + $0xa0] sm:$0xff] (!%p192_p3)  }
   0xd   : > { %1236 = vmatprep.subr.bf16.mxu0 (!%p192_p3), %v2742_v1  ;;  %2510 = vmatprep.subr.bf16.mxu1 (!%p192_p3), %v2742_v1  ;;  %v2623_v36 = vld [vmem:[%s3258_s1 + $0xa8] sm:$0xff] (!%p192_p3)   ;;  %v2630_v41 = vld [vmem:[%s3258_s1 + $0xb0] sm:$0xff] (!%p192_p3)   ;;  %v2637_v42 = vld [vmem:[%s3258_s1 + $0xb8] sm:$0xff] (!%p192_p3)  }
   0xe   : > { %s3266_s18 = smov (!%p236_p4, %s2261_s18), 255 }
   0xf   : > { %s2540_s25 = smul.u32 12, %s3266_s18 }
  0x10   : > { %1237 = vmatpush1.bf16.msra.mxu0 %v2568_v3  ;;  %2526 = vmatpush1.bf16.msra.mxu1 %v2568_v3 }
  0x11   : > { %1238 = vmatprep.subr.bf16.mxu0 %v2742_v1  ;;  %2511 = vmatprep.subr.bf16.mxu1 %v2742_v1  ;;  %s2810_s30 = scalar_lea.vmem %s3257_s0, %s2540_s25 }
  0x12   : > { %v2584_v6 = vld [vmem:[%s2810_s30 + $0x4] ss:$12 sps:$4 sm:$0xff]   ;;  %v2582_v20 = vld [vmem:[%s2810_s30] ss:$12 sps:$4 sm:$0xff]   ;;  %v2589_v22 = vld [vmem:[%s2810_s30 + $0x1c] ss:$12 sps:$4 sm:$0xff]  }
  0x13   : > { %v2587_v8 = vld [vmem:[%s2810_s30 + $0x244] ss:$12 sps:$4 sm:$0xff]   ;;  %1264 = vmatprep.mubr.bf16.mxu0 %v2584_v6  ;;  %v2585_v21 = vld [vmem:[%s2810_s30 + $0x240] ss:$12 sps:$4 sm:$0xff]   ;;  %v2591_v23 = vld [vmem:[%s2810_s30 + $0x25c] ss:$12 sps:$4 sm:$0xff]  }
  0x14   : > { %1239 = vmatpush1.bf16.msra.mxu0 %v2569_v4  ;;  %2527 = vmatpush1.bf16.msra.mxu1 %v2569_v4  ;;  %v2593_v26 = vld [vmem:[%s2810_s30 + $0x18] ss:$12 sps:$4 sm:$0xff]   ;;  %v2596_v28 = vld [vmem:[%s2810_s30 + $0x34] ss:$12 sps:$4 sm:$0xff]   ;;  %v2600_v31 = vld [vmem:[%s2810_s30 + $0x30] ss:$12 sps:$4 sm:$0xff]  }
  0x15   : > { %1240 = vmatprep.subr.bf16.mxu0 %v2742_v1  ;;  %2512 = vmatprep.subr.bf16.mxu1 %v2742_v1  ;;  %v2594_v27 = vld [vmem:[%s2810_s30 + $0x258] ss:$12 sps:$4 sm:$0xff]   ;;  %v2598_v29 = vld [vmem:[%s2810_s30 + $0x274] ss:$12 sps:$4 sm:$0xff]   ;;  %v2601_v33 = vld [vmem:[%s2810_s30 + $0x270] ss:$12 sps:$4 sm:$0xff]  }
  0x16   : > { %1456 = vmatprep.mubr.bf16.mxu1 %v2587_v8  ;;  %v2603_v34 = vld [vmem:[%s2810_s30 + $0x4c] ss:$12 sps:$4 sm:$0xff]   ;;  %v2607_v37 = vld [vmem:[%s2810_s30 + $0x48] ss:$12 sps:$4 sm:$0xff]   ;;  %v2610_v39 = vld [vmem:[%s2810_s30 + $0x64] ss:$12 sps:$4 sm:$0xff]  }
  0x17   : > { %v2605_v35 = vld [vmem:[%s2810_s30 + $0x28c] ss:$12 sps:$4 sm:$0xff]   ;;  %v2608_v38 = vld [vmem:[%s2810_s30 + $0x288] ss:$12 sps:$4 sm:$0xff]   ;;  %v2612_v40 = vld [vmem:[%s2810_s30 + $0x2a4] ss:$12 sps:$4 sm:$0xff]  }
  0x18   : > { %1241 = vmatpush1.bf16.msra.mxu0 %v2570_v5  ;;  %2528 = vmatpush1.bf16.msra.mxu1 %v2570_v5  ;;  %v2614_v43 = vld [vmem:[%s2810_s30 + $0x60] ss:$12 sps:$4 sm:$0xff]   ;;  %v2617_v45 = vld [vmem:[%s2810_s30 + $0x7c] ss:$12 sps:$4 sm:$0xff]   ;;  %v2621_v47 = vld [vmem:[%s2810_s30 + $0x78] ss:$12 sps:$4 sm:$0xff]  }
  0x19   : > { %1242 = vmatprep.subr.bf16.mxu0 %v2742_v1  ;;  %2513 = vmatprep.subr.bf16.mxu1 %v2742_v1  ;;  %v2615_v44 = vld [vmem:[%s2810_s30 + $0x2a0] ss:$12 sps:$4 sm:$0xff]   ;;  %v2619_v46 = vld [vmem:[%s2810_s30 + $0x2bc] ss:$12 sps:$4 sm:$0xff]   ;;  %v2622_v48 = vld [vmem:[%s2810_s30 + $0x2b8] ss:$12 sps:$4 sm:$0xff]  }
  0x1a   : > { %v2624_v49 = vld [vmem:[%s2810_s30 + $0x94] ss:$12 sps:$4 sm:$0xff]   ;;  %v2628_v51 = vld [vmem:[%s2810_s30 + $0x90] ss:$12 sps:$4 sm:$0xff]   ;;  %v2631_v53 = vld [vmem:[%s2810_s30 + $0xac] ss:$12 sps:$4 sm:$0xff]  }
  0x1b   : > { %v2626_v50 = vld [vmem:[%s2810_s30 + $0x2d4] ss:$12 sps:$4 sm:$0xff]   ;;  %v2629_v52 = vld [vmem:[%s2810_s30 + $0x2d0] ss:$12 sps:$4 sm:$0xff]   ;;  %v2633_v54 = vld [vmem:[%s2810_s30 + $0x2ec] ss:$12 sps:$4 sm:$0xff]  }
  0x1c   : > { %1243 = vmatpush1.bf16.msra.mxu0 %v2571_v7  ;;  %2529 = vmatpush1.bf16.msra.mxu1 %v2571_v7  ;;  %v2635_v55 = vld [vmem:[%s2810_s30 + $0xa8] ss:$12 sps:$4 sm:$0xff]   ;;  %v2638_v57 = vld [vmem:[%s2810_s30 + $0xc4] ss:$12 sps:$4 sm:$0xff]   ;;  %v2641_v59 = vld [vmem:[%s2810_s30 + $0xc0] ss:$12 sps:$4 sm:$0xff]  }
  0x1d   : > { %1244 = vmatprep.subr.bf16.mxu0 %v2742_v1  ;;  %2514 = vmatprep.subr.bf16.mxu1 %v2742_v1  ;;  %v2636_v56 = vld [vmem:[%s2810_s30 + $0x2e8] ss:$12 sps:$4 sm:$0xff]   ;;  %v2642_v60 = vld [vmem:[%s2810_s30 + $0x20] ss:$12 sps:$4 sm:$0xff]   ;;  %v2645_v62 = vld [vmem:[%s2810_s30 + $0x38] ss:$12 sps:$4 sm:$0xff]  }
  0x1e   : > { %v2640_v58 = vld [vmem:[%s2810_s30 + $0x8] ss:$12 sps:$4 sm:$0xff]   ;;  %v2646_v63 = vld [vmem:[%s2810_s30 + $0xd8] ss:$12 sps:$4 sm:$0xff]   ;;  %v2647_v0 = vld [vmem:[%s2810_s30 + $0x50] ss:$12 sps:$4 sm:$0xff]  }
  0x1f   : > { %v2643_v61 = vld [vmem:[%s2810_s30 + $0xdc] ss:$12 sps:$4 sm:$0xff]   ;;  %v2652_v4 = vld [vmem:[%s2810_s30 + $0x80] ss:$12 sps:$4 sm:$0xff]   ;;  %v2655_v6 = vld [vmem:[%s2810_s30 + $0x98] ss:$12 sps:$4 sm:$0xff]  }
  0x20   : > { %1245 = vmatpush1.bf16.msra.mxu0 %v2572_v9  ;;  %2530 = vmatpush1.bf16.msra.mxu1 %v2572_v9  ;;  %v2650_v2 = vld [vmem:[%s2810_s30 + $0x68] ss:$12 sps:$4 sm:$0xff]   ;;  %v2651_v3 = vld [vmem:[%s2810_s30 + $0xf0] ss:$12 sps:$4 sm:$0xff]   ;;  %v2653_v5 = vld [vmem:[%s2810_s30 + $0x10c] ss:$12 sps:$4 sm:$0xff]  }
  0x21   : > { %1246 = vmatprep.subr.bf16.mxu0 %v2742_v1  ;;  %2515 = vmatprep.subr.bf16.mxu1 %v2742_v1  ;;  %v2656_v7 = vld [vmem:[%s2810_s30 + $0x108] ss:$12 sps:$4 sm:$0xff]   ;;  %v2657_v8 = vld [vmem:[%s2810_s30 + $0xb0] ss:$12 sps:$4 sm:$0xff]  }
  0x22   : > { %v2658_v9 = vld [vmem:[%s2810_s30 + $0x124] ss:$12 sps:$4 sm:$0xff]  }
  0x24   : > { %1247 = vmatpush1.bf16.msra.mxu0 %v2573_v10  ;;  %2531 = vmatpush1.bf16.msra.mxu1 %v2573_v10  ;;  %v2660_v10 = vld [vmem:[%s2810_s30 + $0xc8] ss:$12 sps:$4 sm:$0xff]  }
  0x25   : > { %1248 = vmatprep.subr.bf16.mxu0 %v2742_v1  ;;  %2516 = vmatprep.subr.bf16.mxu1 %v2742_v1 }
  0x28   : > { %1249 = vmatpush1.bf16.msra.mxu0 %v2574_v11  ;;  %2532 = vmatpush1.bf16.msra.mxu1 %v2574_v11  ;;  %v2661_v11 = vld [vmem:[%s2810_s30 + $0x120] ss:$12 sps:$4 sm:$0xff]  }
  0x29   : > { %1250 = vmatprep.subr.bf16.mxu0 %v2742_v1  ;;  %2517 = vmatprep.subr.bf16.mxu1 %v2742_v1 }
  0x2c   : > { %1251 = vmatpush1.bf16.msra.mxu0 %v2575_v12  ;;  %2533 = vmatpush1.bf16.msra.mxu1 %v2575_v12  ;;  %v2662_v12 = vld [vmem:[%s2810_s30 + $0xe0] ss:$12 sps:$4 sm:$0xff]  }
  0x2d   : > { %1252 = vmatprep.subr.bf16.mxu0 %v2742_v1  ;;  %2518 = vmatprep.subr.bf16.mxu1 %v2742_v1 }
  0x30   : > { %1253 = vmatpush1.bf16.msra.mxu0 %v2576_v13  ;;  %2534 = vmatpush1.bf16.msra.mxu1 %v2576_v13  ;;  %v2663_v13 = vld [vmem:[%s2810_s30 + $0x13c] ss:$12 sps:$4 sm:$0xff]  }
  0x31   : > { %1254 = vmatprep.subr.bf16.mxu0 %v2742_v1  ;;  %2519 = vmatprep.subr.bf16.mxu1 %v2742_v1 }
  0x34   : > { %1255 = vmatpush1.bf16.msra.mxu0 %v2577_v14  ;;  %2535 = vmatpush1.bf16.msra.mxu1 %v2577_v14  ;;  %v2665_v14 = vld [vmem:[%s2810_s30 + $0xf8] ss:$12 sps:$4 sm:$0xff]  }
  0x35   : > { %1256 = vmatprep.subr.bf16.mxu0 %v2742_v1  ;;  %2520 = vmatprep.subr.bf16.mxu1 %v2742_v1 }
  0x38   : > { %1257 = vmatpush1.bf16.msra.mxu0 %v2578_v15  ;;  %2536 = vmatpush1.bf16.msra.mxu1 %v2578_v15  ;;  %v2666_v15 = vld [vmem:[%s2810_s30 + $0x138] ss:$12 sps:$4 sm:$0xff]  }
  0x39   : > { %1258 = vmatprep.subr.bf16.mxu0 %v2742_v1  ;;  %2521 = vmatprep.subr.bf16.mxu1 %v2742_v1 }
  0x3c   : > { %1259 = vmatpush1.bf16.msra.mxu0 %v2579_v16  ;;  %2537 = vmatpush1.bf16.msra.mxu1 %v2579_v16  ;;  %v2667_v16 = vld [vmem:[%s2810_s30 + $0x110] ss:$12 sps:$4 sm:$0xff]  }
  0x3d   : > { %1260 = vmatprep.subr.bf16.mxu0 %v2742_v1  ;;  %2522 = vmatprep.subr.bf16.mxu1 %v2742_v1 }
  0x40   : > { %1261 = vmatpush1.bf16.msra.mxu0 %v2580_v17  ;;  %2538 = vmatpush1.bf16.msra.mxu1 %v2580_v17  ;;  %v2668_v17 = vld [vmem:[%s2810_s30 + $0x154] ss:$12 sps:$4 sm:$0xff]  }
  0x41   : > { %1262 = vmatprep.subr.bf16.mxu0 %v2742_v1  ;;  %2523 = vmatprep.subr.bf16.mxu1 %v2742_v1  ;;  %v2648_v1 = vld [vmem:[%s2810_s30 + $0xf4] ss:$12 sps:$4 sm:$0xff]  }
  0x44   : > { %1263 = vmatpush1.bf16.msra.mxu0 %v2581_v18  ;;  %2539 = vmatpush1.bf16.msra.mxu1 %v2581_v18  ;;  %v2670_v18 = vld [vmem:[%s2810_s30 + $0x128] ss:$12 sps:$4 sm:$0xff]  }
  0x45   : > { %2428 = vmatprep.subr.bf16.mxu1 %v2588_v19 }
  0x47   : > { %1265 = vmatmul.mubr.bf16.vlgmr.msra.gmra.mrb[0].mxu0 %v2582_v20  ;;  %1457 = vmatmul.mubr.bf16.vlgmr.msra.gmra.mrb[0].mxu1 %v2585_v21  ;;  %v2672_v20 = vld [vmem:[%s2810_s30 + $0x140] ss:$12 sps:$4 sm:$0xff]  }
  0x48   : > { %2429 = vmatpush3.bf16.msra.mxu1 %v2588_v19  ;;  %1272 = vmatprep.mubr.bf16.mxu0 %v2589_v22  ;;  %v2671_v19 = vld [vmem:[%s2810_s30 + $0x150] ss:$12 sps:$4 sm:$0xff]   ;;  %v2673_v21 = vld [vmem:[%s2810_s30 + $0x16c] ss:$12 sps:$4 sm:$0xff]  }
  0x49   : > { %1464 = vmatprep.mubr.bf16.mxu1 %v2591_v23  ;;  %2430 = vmatprep.subr.bf16.mxu1 %v2595_v24  ;;  %v2675_v22 = vld [vmem:[%s2810_s30 + $0x158] ss:$12 sps:$4 sm:$0xff]   ;;  %v2676_v23 = vld [vmem:[%s2810_s30 + $0x168] ss:$12 sps:$4 sm:$0xff]  }
  0x4c   : > { %2431 = vmatpush3.bf16.msra.mxu1 %v2595_v24  ;;  %v2677_v24 = vld [vmem:[%s2810_s30 + $0x170] ss:$12 sps:$4 sm:$0xff]  }
  0x4d   : > { %2432 = vmatprep.subr.bf16.mxu1 %v2602_v25 }
  0x4f   : > { %1273 = vmatmul.mubr.bf16.gmra.mrb[4].mxu0 %v2593_v26  ;;  %1465 = vmatmul.mubr.bf16.gmra.mrb[4].mxu1 %v2594_v27  ;;  %v2680_v26 = vld [vmem:[%s2810_s30 + $0x188] ss:$12 sps:$4 sm:$0xff]   ;;  %v2681_v27 = vld [vmem:[%s2810_s30 + $0x180] ss:$12 sps:$4 sm:$0xff]  }
  0x50   : > { %1280 = vmatprep.mubr.bf16.mxu0 %v2596_v28  ;;  %1472 = vmatprep.mubr.bf16.mxu1 %v2598_v29  ;;  %v2682_v28 = vld [vmem:[%s2810_s30 + $0x1a0] ss:$12 sps:$4 sm:$0xff]   ;;  %v2683_v29 = vld [vmem:[%s2810_s30 + $0x19c] ss:$12 sps:$4 sm:$0xff]  }
  0x51   : > { %2433 = vmatpush3.bf16.msra.mxu1 %v2602_v25  ;;  %v2678_v25 = vld [vmem:[%s2810_s30 + $0x184] ss:$12 sps:$4 sm:$0xff]  }
  0x52   : > { %2434 = vmatprep.subr.bf16.mxu1 %v2609_v30 }
  0x55   : > { %2435 = vmatpush3.bf16.msra.mxu1 %v2609_v30  ;;  %v2685_v30 = vld [vmem:[%s2810_s30 + $0x1b8] ss:$12 sps:$4 sm:$0xff]  }
  0x56   : > { %2436 = vmatprep.subr.bf16.mxu1 %v2616_v32 }
  0x57   : > { %1281 = vmatmul.mubr.bf16.gmra.mrb[8].mxu0 %v2600_v31  ;;  %1473 = vmatmul.mubr.bf16.gmra.mrb[8].mxu1 %v2601_v33  ;;  %v2686_v31 = vld [vmem:[%s2810_s30 + $0x198] ss:$12 sps:$4 sm:$0xff]   ;;  %v2688_v33 = vld [vmem:[%s2810_s30 + $0x1b4] ss:$12 sps:$4 sm:$0xff]  }
  0x58   : > { %1288 = vmatprep.mubr.bf16.mxu0 %v2603_v34  ;;  %1480 = vmatprep.mubr.bf16.mxu1 %v2605_v35  ;;  %v2690_v34 = vld [vmem:[%s2810_s30 + $0x1e8] ss:$12 sps:$4 sm:$0xff]   ;;  %v2691_v35 = vld [vmem:[%s2810_s30 + $0x1b0] ss:$12 sps:$4 sm:$0xff]  }
  0x59   : > { %2437 = vmatpush3.bf16.msra.mxu1 %v2616_v32  ;;  %v2687_v32 = vld [vmem:[%s2810_s30 + $0x1d0] ss:$12 sps:$4 sm:$0xff]  }
  0x5a   : > { %2438 = vmatprep.subr.bf16.mxu1 %v2623_v36 }
  0x5d   : > { %2439 = vmatpush3.bf16.msra.mxu1 %v2623_v36  ;;  %v2692_v36 = vld [vmem:[%s2810_s30 + $0x200] ss:$12 sps:$4 sm:$0xff]  }
  0x5e   : > { %2440 = vmatprep.subr.bf16.mxu1 %v2630_v41 }
  0x5f   : > { %1289 = vmatmul.mubr.bf16.gmra.mrb[12].mxu0 %v2607_v37  ;;  %1481 = vmatmul.mubr.bf16.gmra.mrb[12].mxu1 %v2608_v38  ;;  %v2693_v37 = vld [vmem:[%s2810_s30 + $0x1cc] ss:$12 sps:$4 sm:$0xff]  }
  0x60   : > { %1296 = vmatprep.mubr.bf16.mxu0 %v2610_v39  ;;  %1488 = vmatprep.mubr.bf16.mxu1 %v2612_v40  ;;  %v2695_v38 = vld [vmem:[%s2810_s30 + $0x218] ss:$12 sps:$4 sm:$0xff]   ;;  %v2696_v39 = vld [vmem:[%s2810_s30 + $0x1c8] ss:$12 sps:$4 sm:$0xff]   ;;  %v2697_v40 = vld [vmem:[%s2810_s30 + $0x230] ss:$12 sps:$4 sm:$0xff]  }
  0x61   : > { %2441 = vmatpush3.bf16.msra.mxu1 %v2630_v41  ;;  %v2698_v41 = vld [vmem:[%s2810_s30 + $0x1e4] ss:$12 sps:$4 sm:$0xff]  }
  0x62   : > { %2442 = vmatprep.subr.bf16.mxu1 %v2637_v42 }
  0x65   : > { %2443 = vmatpush3.bf16.msra.mxu1 %v2637_v42  ;;  %v2700_v42 = vld [vmem:[%s2810_s30 + $0x248] ss:$12 sps:$4 sm:$0xff]  }
  0x67   : > { %1297 = vmatmul.mubr.bf16.gmra.mrb[16].mxu0 %v2614_v43  ;;  %1489 = vmatmul.mubr.bf16.gmra.mrb[16].mxu1 %v2615_v44  ;;  %v2701_v43 = vld [vmem:[%s2810_s30 + $0x1e0] ss:$12 sps:$4 sm:$0xff]  }
  0x68   : > { %1304 = vmatprep.mubr.bf16.mxu0 %v2617_v45  ;;  %1496 = vmatprep.mubr.bf16.mxu1 %v2619_v46  ;;  %v2702_v44 = vld [vmem:[%s2810_s30 + $0x260] ss:$12 sps:$4 sm:$0xff]   ;;  %v2703_v45 = vld [vmem:[%s2810_s30 + $0x1fc] ss:$12 sps:$4 sm:$0xff]   ;;  %v2705_v46 = vld [vmem:[%s2810_s30 + $0x278] ss:$12 sps:$4 sm:$0xff]  }
  0x6f   : > { %1305 = vmatmul.mubr.bf16.gmra.mrb[20].mxu0 %v2621_v47  ;;  %1497 = vmatmul.mubr.bf16.gmra.mrb[20].mxu1 %v2622_v48  ;;  %v2706_v47 = vld [vmem:[%s2810_s30 + $0x1f8] ss:$12 sps:$4 sm:$0xff]   ;;  %v2707_v48 = vld [vmem:[%s2810_s30 + $0x290] ss:$12 sps:$4 sm:$0xff]  }
  0x70   : > { %1312 = vmatprep.mubr.bf16.mxu0 %v2624_v49  ;;  %1504 = vmatprep.mubr.bf16.mxu1 %v2626_v50  ;;  %v2708_v49 = vld [vmem:[%s2810_s30 + $0x214] ss:$12 sps:$4 sm:$0xff]  }
  0x71   : > { %v2710_v50 = vld [vmem:[%s2810_s30 + $0x2a8] ss:$12 sps:$4 sm:$0xff]  }
  0x77   : > { %1313 = vmatmul.mubr.bf16.gmra.mrb[24].mxu0 %v2628_v51  ;;  %1505 = vmatmul.mubr.bf16.gmra.mrb[24].mxu1 %v2629_v52  ;;  %v2711_v51 = vld [vmem:[%s2810_s30 + $0x210] ss:$12 sps:$4 sm:$0xff]   ;;  %v2712_v52 = vld [vmem:[%s2810_s30 + $0x2c0] ss:$12 sps:$4 sm:$0xff]  }
  0x78   : > { %1320 = vmatprep.mubr.bf16.mxu0 %v2631_v53  ;;  %1512 = vmatprep.mubr.bf16.mxu1 %v2633_v54  ;;  %v2713_v53 = vld [vmem:[%s2810_s30 + $0x22c] ss:$12 sps:$4 sm:$0xff]  }
  0x79   : > { %v2715_v54 = vld [vmem:[%s2810_s30 + $0x2d8] ss:$12 sps:$4 sm:$0xff]  }
  0x7f   : > { %1321 = vmatmul.mubr.bf16.gmra.mrb[28].mxu0 %v2635_v55  ;;  %1513 = vmatmul.mubr.bf16.gmra.mrb[28].mxu1 %v2636_v56  ;;  %v2716_v55 = vld [vmem:[%s2810_s30 + $0x228] ss:$12 sps:$4 sm:$0xff]   ;;  %v2717_v56 = vld [vmem:[%s2810_s30 + $0x2f0] ss:$12 sps:$4 sm:$0xff]   ;;  %s2264_s30 = sshll.u32 %s3266_s18, 3 }
  0x80   : > { %1328 = vmatprep.mubr.bf16.mxu0 %v2638_v57  ;;  %2444 = vmatprep.mubr.bf16.mxu1 %v2640_v58  ;;  %s3062_s28 = scalar_lea.vmem %s3260_s3, %s2264_s30 }
  0x87   : > { %1329 = vmatmul.mubr.bf16.gmra.mrb[32].mxu0 %v2641_v59  ;;  %2445 = vmatmul.mubr.bf16.vlgmr.msra.gmra.mrb[32].mxu1 %v2642_v60 }
  0x88   : > { %1336 = vmatprep.mubr.bf16.mxu0 %v2643_v61  ;;  %2448 = vmatprep.mubr.bf16.mxu1 %v2645_v62 }
  0x8f   : > { %1337 = vmatmul.mubr.bf16.gmra.mrb[36].mxu0 %v2646_v63  ;;  %2449 = vmatmul.mubr.bf16.gmra.mrb[36].mxu1 %v2647_v0 }
  0x90   : > { %1344 = vmatprep.mubr.bf16.mxu0 %v2648_v1  ;;  %2452 = vmatprep.mubr.bf16.mxu1 %v2650_v2 }
  0x97   : > { %1345 = vmatmul.mubr.bf16.gmra.mrb[40].mxu0 %v2651_v3  ;;  %2453 = vmatmul.mubr.bf16.gmra.mrb[40].mxu1 %v2652_v4 }
  0x98   : > { %1352 = vmatprep.mubr.bf16.mxu0 %v2653_v5  ;;  %2456 = vmatprep.mubr.bf16.mxu1 %v2655_v6 }
  0x9f   : > { %1353 = vmatmul.mubr.bf16.gmra.mrb[44].mxu0 %v2656_v7  ;;  %2457 = vmatmul.mubr.bf16.gmra.mrb[44].mxu1 %v2657_v8 }
  0xa0   : > { %1360 = vmatprep.mubr.bf16.mxu0 %v2658_v9  ;;  %2460 = vmatprep.mubr.bf16.mxu1 %v2660_v10 }
  0xa7   : > { %1361 = vmatmul.mubr.bf16.gmra.mrb[48].mxu0 %v2661_v11  ;;  %2461 = vmatmul.mubr.bf16.gmra.mrb[48].mxu1 %v2662_v12 }
  0xa8   : > { %1368 = vmatprep.mubr.bf16.mxu0 %v2663_v13  ;;  %2464 = vmatprep.mubr.bf16.mxu1 %v2665_v14 }
  0xaf   : > { %1369 = vmatmul.mubr.bf16.gmra.mrb[52].mxu0 %v2666_v15  ;;  %2465 = vmatmul.mubr.bf16.gmra.mrb[52].mxu1 %v2667_v16 }
  0xb0   : > { %1376 = vmatprep.mubr.bf16.mxu0 %v2668_v17  ;;  %2468 = vmatprep.mubr.bf16.mxu1 %v2670_v18 }
  0xb7   : > { %1377 = vmatmul.mubr.bf16.gmra.mrb[56].mxu0 %v2671_v19  ;;  %2469 = vmatmul.mubr.bf16.gmra.mrb[56].mxu1 %v2672_v20 }
  0xb8   : > { %1384 = vmatprep.mubr.bf16.mxu0 %v2673_v21  ;;  %2472 = vmatprep.mubr.bf16.mxu1 %v2675_v22 }
  0xbf   : > { %1385 = vmatmul.mubr.bf16.gmra.mrb[60].mxu0 %v2676_v23  ;;  %2473 = vmatmul.mubr.bf16.gmra.mrb[60].mxu1 %v2677_v24 }
  0xc0   : > { %1392 = vmatprep.mubr.bf16.mxu0 %v2678_v25  ;;  %2476 = vmatprep.mubr.bf16.mxu1 %v2680_v26 }
  0xc7   : > { %1393 = vmatmul.mubr.bf16.gmra.mrb[64].mxu0 %v2681_v27  ;;  %2477 = vmatmul.mubr.bf16.gmra.mrb[64].mxu1 %v2682_v28 }
  0xc8   : > { %1400 = vmatprep.mubr.bf16.mxu0 %v2683_v29  ;;  %2480 = vmatprep.mubr.bf16.mxu1 %v2685_v30 }
  0xcf   : > { %1401 = vmatmul.mubr.bf16.gmra.mrb[68].mxu0 %v2686_v31  ;;  %2481 = vmatmul.mubr.bf16.gmra.mrb[68].mxu1 %v2687_v32 }
  0xd0   : > { %1408 = vmatprep.mubr.bf16.mxu0 %v2688_v33  ;;  %2484 = vmatprep.mubr.bf16.mxu1 %v2690_v34 }
  0xd7   : > { %1409 = vmatmul.mubr.bf16.gmra.mrb[72].mxu0 %v2691_v35  ;;  %2485 = vmatmul.mubr.bf16.gmra.mrb[72].mxu1 %v2692_v36 }
  0xd8   : > { %1416 = vmatprep.mubr.bf16.mxu0 %v2693_v37  ;;  %2488 = vmatprep.mubr.bf16.mxu1 %v2695_v38 }
  0xdf   : > { %1417 = vmatmul.mubr.bf16.gmra.mrb[76].mxu0 %v2696_v39  ;;  %2489 = vmatmul.mubr.bf16.gmra.mrb[76].mxu1 %v2697_v40 }
  0xe0   : > { %1424 = vmatprep.mubr.bf16.mxu0 %v2698_v41  ;;  %2492 = vmatprep.mubr.bf16.mxu1 %v2700_v42 }
  0xe7   : > { %1425 = vmatmul.mubr.bf16.gmra.mrb[80].mxu0 %v2701_v43  ;;  %2493 = vmatmul.mubr.bf16.gmra.mrb[80].mxu1 %v2702_v44 }
  0xe8   : > { %1432 = vmatprep.mubr.bf16.mxu0 %v2703_v45  ;;  %2496 = vmatprep.mubr.bf16.mxu1 %v2705_v46 }
  0xef   : > { %1433 = vmatmul.mubr.bf16.gmra.mrb[84].mxu0 %v2706_v47  ;;  %2497 = vmatmul.mubr.bf16.gmra.mrb[84].mxu1 %v2707_v48 }
  0xf0   : > { %1440 = vmatprep.mubr.bf16.mxu0 %v2708_v49  ;;  %2500 = vmatprep.mubr.bf16.mxu1 %v2710_v50 }
  0xf7   : > { %1441 = vmatmul.mubr.bf16.gmra.mrb[88].mxu0 %v2711_v51  ;;  %2501 = vmatmul.mubr.bf16.gmra.mrb[88].mxu1 %v2712_v52 }
  0xf8   : > { %1448 = vmatprep.mubr.bf16.mxu0 %v2713_v53  ;;  %2504 = vmatprep.mubr.bf16.mxu1 %v2715_v54 }
  0xff   : > { %1449 = vmatmul.mubr.bf16.gmra.mrb[92].mxu0 %v2716_v55  ;;  %2505 = vmatmul.mubr.bf16.gmra.mrb[92].mxu1 %v2717_v56 }
 0x11a   : > { %v2989_v57 = vpop.f32.mrb[0].mxu0  ;;  %v2991_v58 = vpop.f32.mrb[0].mxu1 }
 0x11b   : > { %v1268_v59 = vpop.f32.mrb[1].mxu0  ;;  %v1460_v60 = vpop.f32.mrb[1].mxu1 }
 0x11c   : > { %v2993_v61 = vpop.f32.mrb[2].mxu0  ;;  %v2995_v62 = vpop.f32.mrb[2].mxu1 }
 0x11d   : > { %v1271_v63 = vpop.f32.mrb[3].mxu0  ;;  %v1463_v0 = vpop.f32.mrb[3].mxu1 }
 0x11e   : > { %v3057_v63 = vld [vmem:[%s3259_s2] ss:$0 sm:$0xff] }
 0x122   : > { %v1274_v1 = vpop.f32.mrb[4].mxu0  ;;  %v2997_v2 = vpop.f32.mrb[4].mxu1 }
 0x123   : > { %v1276_v3 = vpop.f32.mrb[5].mxu0  ;;  %v1468_v4 = vpop.f32.mrb[5].mxu1 }
 0x124   : > { %v2999_v5 = vpop.f32.mrb[6].mxu0  ;;  %v3001_v6 = vpop.f32.mrb[6].mxu1 }
 0x125   : > { %v1279_v7 = vpop.f32.mrb[7].mxu0  ;;  %v1471_v8 = vpop.f32.mrb[7].mxu1 }
 0x12a   : > { %v3003_v9 = vpop.f32.mrb[8].mxu0  ;;  %v3005_v10 = vpop.f32.mrb[8].mxu1 }
 0x12b   : > { %v1284_v11 = vpop.f32.mrb[9].mxu0  ;;  %v1476_v12 = vpop.f32.mrb[9].mxu1 }
 0x12c   : > { %v3007_v13 = vpop.f32.mrb[10].mxu0  ;;  %v3009_v14 = vpop.f32.mrb[10].mxu1 }
 0x12d   : > { %v1287_v15 = vpop.f32.mrb[11].mxu0  ;;  %v1479_v16 = vpop.f32.mrb[11].mxu1 }
 0x132   : > { %v3011_v17 = vpop.f32.mrb[12].mxu0  ;;  %v3013_v18 = vpop.f32.mrb[12].mxu1 }
 0x133   : > { %v1292_v19 = vpop.f32.mrb[13].mxu0  ;;  %v1484_v20 = vpop.f32.mrb[13].mxu1 }
 0x134   : > { %v3015_v21 = vpop.f32.mrb[14].mxu0  ;;  %v3017_v22 = vpop.f32.mrb[14].mxu1 }
 0x135   : > { %v1295_v23 = vpop.f32.mrb[15].mxu0  ;;  %v1487_v24 = vpop.f32.mrb[15].mxu1 }
 0x13a   : > { %v3019_v25 = vpop.f32.mrb[16].mxu0  ;;  %v3021_v26 = vpop.f32.mrb[16].mxu1 }
 0x13b   : > { %v1300_v27 = vpop.f32.mrb[17].mxu0  ;;  %v1492_v28 = vpop.f32.mrb[17].mxu1 }
 0x13c   : > { %v3023_v29 = vpop.f32.mrb[18].mxu0  ;;  %v3025_v30 = vpop.f32.mrb[18].mxu1 }
 0x13d   : > { %v1303_v31 = vpop.f32.mrb[19].mxu0  ;;  %v1495_v32 = vpop.f32.mrb[19].mxu1 }
 0x142   : > { %v3027_v33 = vpop.f32.mrb[20].mxu0  ;;  %v3029_v34 = vpop.f32.mrb[20].mxu1 }
 0x143   : > { %v1308_v35 = vpop.f32.mrb[21].mxu0  ;;  %v1500_v36 = vpop.f32.mrb[21].mxu1 }
 0x144   : > { %v3031_v37 = vpop.f32.mrb[22].mxu0  ;;  %v3033_v38 = vpop.f32.mrb[22].mxu1 }
 0x145   : > { %v1311_v39 = vpop.f32.mrb[23].mxu0  ;;  %v1503_v40 = vpop.f32.mrb[23].mxu1 }
 0x14a   : > { %v3035_v41 = vpop.f32.mrb[24].mxu0  ;;  %v3037_v42 = vpop.f32.mrb[24].mxu1 }
 0x14b   : > { %v1316_v43 = vpop.f32.mrb[25].mxu0  ;;  %v1508_v44 = vpop.f32.mrb[25].mxu1 }
 0x14c   : > { %v3039_v45 = vpop.f32.mrb[26].mxu0  ;;  %v3041_v46 = vpop.f32.mrb[26].mxu1 }
 0x14d   : > { %v1319_v47 = vpop.f32.mrb[27].mxu0  ;;  %v1511_v48 = vpop.f32.mrb[27].mxu1 }
 0x152   : > { %v3043_v49 = vpop.f32.mrb[28].mxu0  ;;  %v3045_v50 = vpop.f32.mrb[28].mxu1 }
 0x153   : > { %v1324_v51 = vpop.f32.mrb[29].mxu0  ;;  %v1516_v52 = vpop.f32.mrb[29].mxu1 }
 0x154   : > { %v3047_v53 = vpop.f32.mrb[30].mxu0  ;;  %v3049_v54 = vpop.f32.mrb[30].mxu1 }
 0x155   : > { %v1327_v55 = vpop.f32.mrb[31].mxu0  ;;  %v1519_v56 = vpop.f32.mrb[31].mxu1 }
 0x15a   : > { %v3052_v59 = vpop.f32.mrb[32].mxu0  ;;  %v2446_v60 = vpop.f32.mrb[32].mxu1 }
 0x15b   : > { %v1564_v0 = vadd.f32 %v2446_v60, %v1274_v1  ;;  %v1332_v3 = vpop.f32.mrb[33].mxu0  ;;  %v1555_v4 = vpop.f32.mrb[33].mxu1 }
 0x15c   : > { %v1556_v7 = vadd.f32 %v1555_v4, %v2989_v57  ;;  %v3065_v8 = vpop.f32.mrb[34].mxu0  ;;  %v2447_v11 = vpop.f32.mrb[34].mxu1 }
 0x15d   : > { %v2014_v12 = vadd.f32 %v3057_v63, %v1564_v0  ;;  %v1567_v1 = vadd.f32 %v2447_v11, %v2999_v5  ;;  %v1335_v15 = vpop.f32.mrb[35].mxu0  ;;  %v1558_v16 = vpop.f32.mrb[35].mxu1 }
 0x15e   : > { %v2012_v19 = vadd.f32 %v3057_v63, %v1556_v7  ;;  %v1559_v20 = vadd.f32 %v1558_v16, %v2993_v61 }
 0x15f   : > { %2078 = vst [vmem:[%s3062_s28 + $0x10] sm:$0xff] %v2014_v12  ;;  %v2015_v23 = vadd.f32 %v3057_v63, %v1567_v1 }
 0x160   : > { %2076 = vst [vmem:[%s3062_s28] sm:$0xff] %v2012_v19  ;;  %v2013_v24 = vadd.f32 %v3057_v63, %v1559_v20 }
 0x161   : > { %2079 = vst [vmem:[%s3062_s28 + $0x18] sm:$0xff] %v2015_v23 }
 0x162   : > { %2077 = vst [vmem:[%s3062_s28 + $0x8] sm:$0xff] %v2013_v24  ;;  %v1338_v57 = vpop.f32.mrb[36].mxu0  ;;  %v2450_v27 = vpop.f32.mrb[36].mxu1 }
 0x163   : > { %v1580_v5 = vadd.f32 %v2450_v27, %v3011_v17  ;;  %v1340_v28 = vpop.f32.mrb[37].mxu0  ;;  %v1571_v31 = vpop.f32.mrb[37].mxu1 }
 0x164   : > { %v1572_v61 = vadd.f32 %v1571_v31, %v3003_v9  ;;  %v3079_v32 = vpop.f32.mrb[38].mxu0  ;;  %v2451_v35 = vpop.f32.mrb[38].mxu1 }
 0x165   : > { %v2018_v36 = vadd.f32 %v3057_v63, %v1580_v5  ;;  %v1583_v39 = vadd.f32 %v2451_v35, %v3015_v21  ;;  %v1343_v40 = vpop.f32.mrb[39].mxu0  ;;  %v1574_v43 = vpop.f32.mrb[39].mxu1 }
 0x166   : > { %v2016_v44 = vadd.f32 %v3057_v63, %v1572_v61  ;;  %v1575_v47 = vadd.f32 %v1574_v43, %v3007_v13 }
 0x167   : > { %2082 = vst [vmem:[%s3062_s28 + $0x30] sm:$0xff] %v2018_v36  ;;  %v2019_v17 = vadd.f32 %v3057_v63, %v1583_v39 }
 0x168   : > { %2080 = vst [vmem:[%s3062_s28 + $0x20] sm:$0xff] %v2016_v44  ;;  %v2017_v48 = vadd.f32 %v3057_v63, %v1575_v47 }
 0x169   : > { %2083 = vst [vmem:[%s3062_s28 + $0x38] sm:$0xff] %v2019_v17 }
 0x16a   : > { %2081 = vst [vmem:[%s3062_s28 + $0x28] sm:$0xff] %v2017_v48  ;;  %v3091_v9 = vpop.f32.mrb[40].mxu0  ;;  %v2454_v51 = vpop.f32.mrb[40].mxu1 }
 0x16b   : > { %v1596_v21 = vadd.f32 %v2454_v51, %v3027_v33  ;;  %v1348_v52 = vpop.f32.mrb[41].mxu0  ;;  %v1587_v55 = vpop.f32.mrb[41].mxu1 }
 0x16c   : > { %v1588_v13 = vadd.f32 %v1587_v55, %v3019_v25  ;;  %v3095_v56 = vpop.f32.mrb[42].mxu0  ;;  %v2455_v60 = vpop.f32.mrb[42].mxu1 }
 0x16d   : > { %v2022_v0 = vadd.f32 %v3057_v63, %v1596_v21  ;;  %v1599_v3 = vadd.f32 %v2455_v60, %v3031_v37  ;;  %v1351_v4 = vpop.f32.mrb[43].mxu0  ;;  %v1590_v7 = vpop.f32.mrb[43].mxu1 }
 0x16e   : > { %v2020_v11 = vadd.f32 %v3057_v63, %v1588_v13  ;;  %v1591_v12 = vadd.f32 %v1590_v7, %v3023_v29 }
 0x16f   : > { %2086 = vst [vmem:[%s3062_s28 + $0x50] sm:$0xff] %v2022_v0  ;;  %v2023_v33 = vadd.f32 %v3057_v63, %v1599_v3 }
 0x170   : > { %2084 = vst [vmem:[%s3062_s28 + $0x40] sm:$0xff] %v2020_v11  ;;  %v2021_v1 = vadd.f32 %v3057_v63, %v1591_v12 }
 0x171   : > { %2087 = vst [vmem:[%s3062_s28 + $0x58] sm:$0xff] %v2023_v33 }
 0x172   : > { %2085 = vst [vmem:[%s3062_s28 + $0x48] sm:$0xff] %v2021_v1  ;;  %v1354_v25 = vpop.f32.mrb[44].mxu0  ;;  %v2458_v15 = vpop.f32.mrb[44].mxu1 }
 0x173   : > { %v1612_v37 = vadd.f32 %v2458_v15, %v3043_v49  ;;  %v1356_v16 = vpop.f32.mrb[45].mxu0  ;;  %v1603_v19 = vpop.f32.mrb[45].mxu1 }
 0x174   : > { %v1604_v29 = vadd.f32 %v1603_v19, %v3035_v41  ;;  %v1357_v20 = vpop.f32.mrb[46].mxu0  ;;  %v2459_v23 = vpop.f32.mrb[46].mxu1 }
 0x175   : > { %v2026_v24 = vadd.f32 %v3057_v63, %v1612_v37  ;;  %v1615_v27 = vadd.f32 %v2459_v23, %v3047_v53  ;;  %v1359_v5 = vpop.f32.mrb[47].mxu0  ;;  %v1606_v28 = vpop.f32.mrb[47].mxu1 }
 0x176   : > { %v2024_v31 = vadd.f32 %v3057_v63, %v1604_v29  ;;  %v1607_v61 = vadd.f32 %v1606_v28, %v3039_v45 }
 0x177   : > { %2090 = vst [vmem:[%s3062_s28 + $0x70] sm:$0xff] %v2026_v24  ;;  %v2027_v49 = vadd.f32 %v3057_v63, %v1615_v27 }
 0x178   : > { %2088 = vst [vmem:[%s3062_s28 + $0x60] sm:$0xff] %v2024_v31  ;;  %v2025_v35 = vadd.f32 %v3057_v63, %v1607_v61 }
 0x179   : > { %2091 = vst [vmem:[%s3062_s28 + $0x78] sm:$0xff] %v2027_v49 }
 0x17a   : > { %2089 = vst [vmem:[%s3062_s28 + $0x68] sm:$0xff] %v2025_v35  ;;  %v1362_v41 = vpop.f32.mrb[48].mxu0  ;;  %v2462_v36 = vpop.f32.mrb[48].mxu1 }
 0x17b   : > { %v1628_v39 = vadd.f32 %v2462_v36, %v1338_v57  ;;  %v1364_v53 = vpop.f32.mrb[49].mxu0  ;;  %v1619_v40 = vpop.f32.mrb[49].mxu1 }
 0x17c   : > { %v1620_v43 = vadd.f32 %v1619_v40, %v3052_v59  ;;  %v1365_v45 = vpop.f32.mrb[50].mxu0  ;;  %v2463_v44 = vpop.f32.mrb[50].mxu1 }
 0x17d   : > { %v2030_v47 = vadd.f32 %v3057_v63, %v1628_v39  ;;  %v1631_v17 = vadd.f32 %v2463_v44, %v3079_v32  ;;  %v1367_v48 = vpop.f32.mrb[51].mxu0  ;;  %v1622_v51 = vpop.f32.mrb[51].mxu1 }
 0x17e   : > { %v2028_v21 = vadd.f32 %v3057_v63, %v1620_v43  ;;  %v1623_v52 = vadd.f32 %v1622_v51, %v3065_v8 }
 0x17f   : > { %2094 = vst [vmem:[%s3062_s28 + $0x90] sm:$0xff] %v2030_v47  ;;  %v2031_v57 = vadd.f32 %v3057_v63, %v1631_v17 }
 0x180   : > { %2092 = vst [vmem:[%s3062_s28 + $0x80] sm:$0xff] %v2028_v21  ;;  %v2029_v55 = vadd.f32 %v3057_v63, %v1623_v52 }
 0x181   : > { %2095 = vst [vmem:[%s3062_s28 + $0x98] sm:$0xff] %v2031_v57 }
 0x182   : > { %2093 = vst [vmem:[%s3062_s28 + $0x88] sm:$0xff] %v2029_v55  ;;  %v1370_v59 = vpop.f32.mrb[52].mxu0  ;;  %v2466_v13 = vpop.f32.mrb[52].mxu1 }
 0x183   : > { %v1644_v60 = vadd.f32 %v2466_v13, %v1354_v25  ;;  %v1372_v32 = vpop.f32.mrb[53].mxu0  ;;  %v1635_v0 = vpop.f32.mrb[53].mxu1 }
 0x184   : > { %v1636_v3 = vadd.f32 %v1635_v0, %v3091_v9  ;;  %v1373_v8 = vpop.f32.mrb[54].mxu0  ;;  %v2467_v4 = vpop.f32.mrb[54].mxu1 }
 0x185   : > { %v2034_v7 = vadd.f32 %v3057_v63, %v1644_v60  ;;  %v1647_v11 = vadd.f32 %v2467_v4, %v1357_v20  ;;  %v1375_v12 = vpop.f32.mrb[55].mxu0  ;;  %v1638_v33 = vpop.f32.mrb[55].mxu1 }
 0x186   : > { %v2032_v1 = vadd.f32 %v3057_v63, %v1636_v3  ;;  %v1639_v15 = vadd.f32 %v1638_v33, %v3095_v56 }
 0x187   : > { %2098 = vst [vmem:[%s3062_s28 + $0xb0] sm:$0xff] %v2034_v7  ;;  %v2035_v25 = vadd.f32 %v3057_v63, %v1647_v11 }
 0x188   : > { %2096 = vst [vmem:[%s3062_s28 + $0xa0] sm:$0xff] %v2032_v1  ;;  %v2033_v37 = vadd.f32 %v3057_v63, %v1639_v15 }
 0x189   : > { %2099 = vst [vmem:[%s3062_s28 + $0xb8] sm:$0xff] %v2035_v25 }
 0x18a   : > { %2097 = vst [vmem:[%s3062_s28 + $0xa8] sm:$0xff] %v2033_v37  ;;  %v1378_v9 = vpop.f32.mrb[56].mxu0  ;;  %v2470_v16 = vpop.f32.mrb[56].mxu1 }
 0x18b   : > { %v1660_v19 = vadd.f32 %v2470_v16, %v1370_v59  ;;  %v1380_v29 = vpop.f32.mrb[57].mxu0  ;;  %v1651_v20 = vpop.f32.mrb[57].mxu1 }
 0x18c   : > { %v1652_v23 = vadd.f32 %v1651_v20, %v1362_v41  ;;  %v1381_v24 = vpop.f32.mrb[58].mxu0  ;;  %v2471_v56 = vpop.f32.mrb[58].mxu1 }
 0x18d   : > { %v2038_v27 = vadd.f32 %v3057_v63, %v1660_v19  ;;  %v1663_v5 = vadd.f32 %v2471_v56, %v1373_v8  ;;  %v1383_v28 = vpop.f32.mrb[59].mxu0  ;;  %v1654_v31 = vpop.f32.mrb[59].mxu1 }
 0x18e   : > { %v2036_v61 = vadd.f32 %v3057_v63, %v1652_v23  ;;  %v1655_v49 = vadd.f32 %v1654_v31, %v1365_v45 }
 0x18f   : > { %2102 = vst [vmem:[%s3062_s28 + $0xd0] sm:$0xff] %v2038_v27  ;;  %v2039_v35 = vadd.f32 %v3057_v63, %v1663_v5 }
 0x190   : > { %2100 = vst [vmem:[%s3062_s28 + $0xc0] sm:$0xff] %v2036_v61  ;;  %v2037_v36 = vadd.f32 %v3057_v63, %v1655_v49 }
 0x191   : > { %2103 = vst [vmem:[%s3062_s28 + $0xd8] sm:$0xff] %v2039_v35 }
 0x192   : > { %2101 = vst [vmem:[%s3062_s28 + $0xc8] sm:$0xff] %v2037_v36  ;;  %v1386_v41 = vpop.f32.mrb[60].mxu0  ;;  %v2474_v39 = vpop.f32.mrb[60].mxu1 }
 0x193   : > { %v1676_v53 = vadd.f32 %v2474_v39, %v1386_v41  ;;  %v1388_v40 = vpop.f32.mrb[61].mxu0  ;;  %v1667_v43 = vpop.f32.mrb[61].mxu1 }
 0x194   : > { %v1668_v44 = vadd.f32 %v1667_v43, %v1378_v9  ;;  %v1389_v47 = vpop.f32.mrb[62].mxu0  ;;  %v2475_v45 = vpop.f32.mrb[62].mxu1 }
 0x195   : > { %v2042_v17 = vadd.f32 %v3057_v63, %v1676_v53  ;;  %v1679_v48 = vadd.f32 %v2475_v45, %v1389_v47  ;;  %v1391_v51 = vpop.f32.mrb[63].mxu0  ;;  %v1670_v21 = vpop.f32.mrb[63].mxu1 }
 0x196   : > { %v2040_v52 = vadd.f32 %v3057_v63, %v1668_v44  ;;  %v1671_v57 = vadd.f32 %v1670_v21, %v1381_v24 }
 0x197   : > { %2106 = vst [vmem:[%s3062_s28 + $0xf0] sm:$0xff] %v2042_v17  ;;  %v2043_v55 = vadd.f32 %v3057_v63, %v1679_v48 }
 0x198   : > { %2104 = vst [vmem:[%s3062_s28 + $0xe0] sm:$0xff] %v2040_v52  ;;  %v2041_v59 = vadd.f32 %v3057_v63, %v1671_v57 }
 0x199   : > { %2107 = vst [vmem:[%s3062_s28 + $0xf8] sm:$0xff] %v2043_v55 }
 0x19a   : > { %2105 = vst [vmem:[%s3062_s28 + $0xe8] sm:$0xff] %v2041_v59  ;;  %v1394_v13 = vpop.f32.mrb[64].mxu0  ;;  %v2478_v60 = vpop.f32.mrb[64].mxu1 }
 0x19b   : > { %v1396_v32 = vpop.f32.mrb[65].mxu0  ;;  %v1683_v0 = vpop.f32.mrb[65].mxu1 }
 0x19c   : > { %v1684_v3 = vadd.f32 %v1683_v0, %v1394_v13  ;;  %v1397_v8 = vpop.f32.mrb[66].mxu0  ;;  %v2479_v4 = vpop.f32.mrb[66].mxu1 }
 0x19d   : > { %v1399_v7 = vpop.f32.mrb[67].mxu0  ;;  %v1686_v11 = vpop.f32.mrb[67].mxu1 }
 0x19e   : > { %v2044_v12 = vadd.f32 %v3057_v63, %v1684_v3  ;;  %v1687_v33 = vadd.f32 %v1686_v11, %v1397_v8 }
 0x1a0   : > { %2108 = vst [vmem:[%s3062_s28 + $0x100] sm:$0xff] %v2044_v12  ;;  %v2045_v1 = vadd.f32 %v3057_v63, %v1687_v33 }
 0x1a2   : > { %2109 = vst [vmem:[%s3062_s28 + $0x108] sm:$0xff] %v2045_v1  ;;  %v1402_v15 = vpop.f32.mrb[68].mxu0  ;;  %v2482_v25 = vpop.f32.mrb[68].mxu1 }
 0x1a3   : > { %v1692_v37 = vadd.f32 %v2478_v60, %v1402_v15  ;;  %v1404_v9 = vpop.f32.mrb[69].mxu0  ;;  %v1699_v16 = vpop.f32.mrb[69].mxu1 }
 0x1a4   : > { %v1405_v19 = vpop.f32.mrb[70].mxu0  ;;  %v2483_v29 = vpop.f32.mrb[70].mxu1 }
 0x1a5   : > { %v2046_v20 = vadd.f32 %v3057_v63, %v1692_v37  ;;  %v1695_v23 = vadd.f32 %v2479_v4, %v1405_v19  ;;  %v1407_v24 = vpop.f32.mrb[71].mxu0  ;;  %v1702_v56 = vpop.f32.mrb[71].mxu1 }
 0x1a7   : > { %2110 = vst [vmem:[%s3062_s28 + $0x110] sm:$0xff] %v2046_v20  ;;  %v2047_v27 = vadd.f32 %v3057_v63, %v1695_v23 }
 0x1a9   : > { %2111 = vst [vmem:[%s3062_s28 + $0x118] sm:$0xff] %v2047_v27 }
 0x1aa   : > { %v1410_v5 = vpop.f32.mrb[72].mxu0  ;;  %v2486_v28 = vpop.f32.mrb[72].mxu1 }
 0x1ab   : > { %v1700_v31 = vadd.f32 %v1699_v16, %v1410_v5  ;;  %v1412_v61 = vpop.f32.mrb[73].mxu0  ;;  %v1715_v49 = vpop.f32.mrb[73].mxu1 }
 0x1ac   : > { %v1413_v35 = vpop.f32.mrb[74].mxu0  ;;  %v2487_v36 = vpop.f32.mrb[74].mxu1 }
 0x1ad   : > { %v2048_v41 = vadd.f32 %v3057_v63, %v1700_v31  ;;  %v1703_v39 = vadd.f32 %v1702_v56, %v1413_v35  ;;  %v1415_v53 = vpop.f32.mrb[75].mxu0  ;;  %v1718_v40 = vpop.f32.mrb[75].mxu1 }
 0x1af   : > { %2112 = vst [vmem:[%s3062_s28 + $0x120] sm:$0xff] %v2048_v41  ;;  %v2049_v43 = vadd.f32 %v3057_v63, %v1703_v39 }
 0x1b1   : > { %2113 = vst [vmem:[%s3062_s28 + $0x128] sm:$0xff] %v2049_v43 }
 0x1b2   : > { %v1418_v44 = vpop.f32.mrb[76].mxu0  ;;  %v3168_v47 = vpop.f32.mrb[76].mxu1 }
 0x1b3   : > { %v1708_v45 = vadd.f32 %v2482_v25, %v1418_v44  ;;  %v1420_v17 = vpop.f32.mrb[77].mxu0  ;;  %v3170_v48 = vpop.f32.mrb[77].mxu1 }
 0x1b4   : > { %v1421_v51 = vpop.f32.mrb[78].mxu0  ;;  %v3172_v21 = vpop.f32.mrb[78].mxu1 }
 0x1b5   : > { %v2050_v52 = vadd.f32 %v3057_v63, %v1708_v45  ;;  %v1711_v57 = vadd.f32 %v2483_v29, %v1421_v51  ;;  %v1423_v55 = vpop.f32.mrb[79].mxu0  ;;  %v3175_v59 = vpop.f32.mrb[79].mxu1 }
 0x1b7   : > { %2114 = vst [vmem:[%s3062_s28 + $0x130] sm:$0xff] %v2050_v52  ;;  %v2051_v13 = vadd.f32 %v3057_v63, %v1711_v57 }
 0x1b9   : > { %2115 = vst [vmem:[%s3062_s28 + $0x138] sm:$0xff] %v2051_v13 }
 0x1ba   : > { %v1426_v60 = vpop.f32.mrb[80].mxu0  ;;  %v2494_v32 = vpop.f32.mrb[80].mxu1 }
 0x1bb   : > { %v1716_v0 = vadd.f32 %v1715_v49, %v1426_v60  ;;  %v1756_v3 = vadd.f32 %v2494_v32, %v2997_v2  ;;  %v1428_v8 = vpop.f32.mrb[81].mxu0  ;;  %v1747_v4 = vpop.f32.mrb[81].mxu1 }
 0x1bc   : > { %v1748_v7 = vadd.f32 %v1747_v4, %v2991_v58  ;;  %v1429_v11 = vpop.f32.mrb[82].mxu0  ;;  %v2495_v12 = vpop.f32.mrb[82].mxu1 }
 0x1bd   : > { %v2052_v33 = vadd.f32 %v3057_v63, %v1716_v0  ;;  %v2062_v1 = vadd.f32 %v3057_v63, %v1756_v3  ;;  %v1719_v15 = vadd.f32 %v1718_v40, %v1429_v11  ;;  %v1759_v25 = vadd.f32 %v2495_v12, %v3001_v6  ;;  %v1431_v37 = vpop.f32.mrb[83].mxu0  ;;  %v1750_v9 = vpop.f32.mrb[83].mxu1 }
 0x1be   : > { %v2060_v2 = vadd.f32 %v3057_v63, %v1748_v7  ;;  %v1751_v16 = vadd.f32 %v1750_v9, %v2995_v62 }
 0x1bf   : > { %2116 = vst [vmem:[%s3062_s28 + $0x140] sm:$0xff] %v2052_v33  ;;  %2126 = vst [vmem:[%s3062_s28 + $0x190] sm:$0xff] %v2062_v1  ;;  %v2053_v58 = vadd.f32 %v3057_v63, %v1719_v15  ;;  %v2063_v19 = vadd.f32 %v3057_v63, %v1759_v25 }
 0x1c0   : > { %2124 = vst [vmem:[%s3062_s28 + $0x180] sm:$0xff] %v2060_v2  ;;  %v2061_v29 = vadd.f32 %v3057_v63, %v1751_v16 }
 0x1c1   : > { %2117 = vst [vmem:[%s3062_s28 + $0x148] sm:$0xff] %v2053_v58  ;;  %2127 = vst [vmem:[%s3062_s28 + $0x198] sm:$0xff] %v2063_v19 }
 0x1c2   : > { %2125 = vst [vmem:[%s3062_s28 + $0x188] sm:$0xff] %v2061_v29  ;;  %v1434_v20 = vpop.f32.mrb[84].mxu0  ;;  %v2498_v6 = vpop.f32.mrb[84].mxu1 }
 0x1c3   : > { %v1724_v23 = vadd.f32 %v2486_v28, %v1434_v20  ;;  %v1772_v24 = vadd.f32 %v2498_v6, %v3013_v18  ;;  %v1436_v62 = vpop.f32.mrb[85].mxu0  ;;  %v1763_v56 = vpop.f32.mrb[85].mxu1 }
 0x1c4   : > { %v1764_v27 = vadd.f32 %v1763_v56, %v3005_v10  ;;  %v1437_v5 = vpop.f32.mrb[86].mxu0  ;;  %v2499_v31 = vpop.f32.mrb[86].mxu1 }
 0x1c5   : > { %v2054_v61 = vadd.f32 %v3057_v63, %v1724_v23  ;;  %v2066_v49 = vadd.f32 %v3057_v63, %v1772_v24  ;;  %v1727_v35 = vadd.f32 %v2487_v36, %v1437_v5  ;;  %v1775_v28 = vadd.f32 %v2499_v31, %v3017_v22  ;;  %v1439_v41 = vpop.f32.mrb[87].mxu0  ;;  %v1766_v39 = vpop.f32.mrb[87].mxu1 }
 0x1c6   : > { %v2064_v18 = vadd.f32 %v3057_v63, %v1764_v27  ;;  %v1767_v53 = vadd.f32 %v1766_v39, %v3009_v14 }
 0x1c7   : > { %2118 = vst [vmem:[%s3062_s28 + $0x150] sm:$0xff] %v2054_v61  ;;  %2130 = vst [vmem:[%s3062_s28 + $0x1b0] sm:$0xff] %v2066_v49  ;;  %v2055_v10 = vadd.f32 %v3057_v63, %v1727_v35  ;;  %v2067_v40 = vadd.f32 %v3057_v63, %v1775_v28 }
 0x1c8   : > { %2128 = vst [vmem:[%s3062_s28 + $0x1a0] sm:$0xff] %v2064_v18  ;;  %v2065_v43 = vadd.f32 %v3057_v63, %v1767_v53 }
 0x1c9   : > { %2119 = vst [vmem:[%s3062_s28 + $0x158] sm:$0xff] %v2055_v10  ;;  %2131 = vst [vmem:[%s3062_s28 + $0x1b8] sm:$0xff] %v2067_v40 }
 0x1ca   : > { %2129 = vst [vmem:[%s3062_s28 + $0x1a8] sm:$0xff] %v2065_v43  ;;  %v1442_v36 = vpop.f32.mrb[88].mxu0  ;;  %v2502_v22 = vpop.f32.mrb[88].mxu1 }
 0x1cb   : > { %v1732_v44 = vadd.f32 %v3170_v48, %v1442_v36  ;;  %v1788_v14 = vadd.f32 %v2502_v22, %v3029_v34  ;;  %v1444_v45 = vpop.f32.mrb[89].mxu0  ;;  %v1779_v17 = vpop.f32.mrb[89].mxu1 }
 0x1cc   : > { %v1780_v51 = vadd.f32 %v1779_v17, %v3021_v26  ;;  %v1445_v52 = vpop.f32.mrb[90].mxu0  ;;  %v2503_v57 = vpop.f32.mrb[90].mxu1 }
 0x1cd   : > { %v2056_v55 = vadd.f32 %v3057_v63, %v1732_v44  ;;  %v2070_v13 = vadd.f32 %v3057_v63, %v1788_v14  ;;  %v1735_v60 = vadd.f32 %v3175_v59, %v1445_v52  ;;  %v1791_v48 = vadd.f32 %v2503_v57, %v3033_v38  ;;  %v1447_v32 = vpop.f32.mrb[91].mxu0  ;;  %v1782_v34 = vpop.f32.mrb[91].mxu1 }
 0x1ce   : > { %v2068_v0 = vadd.f32 %v3057_v63, %v1780_v51  ;;  %v1783_v3 = vadd.f32 %v1782_v34, %v3025_v30 }
 0x1cf   : > { %2120 = vst [vmem:[%s3062_s28 + $0x160] sm:$0xff] %v2056_v55  ;;  %2134 = vst [vmem:[%s3062_s28 + $0x1d0] sm:$0xff] %v2070_v13  ;;  %v2057_v26 = vadd.f32 %v3057_v63, %v1735_v60  ;;  %v2071_v8 = vadd.f32 %v3057_v63, %v1791_v48 }
 0x1d0   : > { %2132 = vst [vmem:[%s3062_s28 + $0x1c0] sm:$0xff] %v2068_v0  ;;  %v2069_v4 = vadd.f32 %v3057_v63, %v1783_v3 }
 0x1d1   : > { %2121 = vst [vmem:[%s3062_s28 + $0x168] sm:$0xff] %v2057_v26  ;;  %2135 = vst [vmem:[%s3062_s28 + $0x1d8] sm:$0xff] %v2071_v8 }
 0x1d2   : > { %2133 = vst [vmem:[%s3062_s28 + $0x1c8] sm:$0xff] %v2069_v4  ;;  %v1450_v59 = vpop.f32.mrb[92].mxu0  ;;  %v2506_v38 = vpop.f32.mrb[92].mxu1 }
 0x1d3   : > { %v1740_v7 = vadd.f32 %v3168_v47, %v1450_v59  ;;  %v1804_v30 = vadd.f32 %v2506_v38, %v3045_v50  ;;  %v1452_v11 = vpop.f32.mrb[93].mxu0  ;;  %v1795_v12 = vpop.f32.mrb[93].mxu1 }
 0x1d4   : > { %v1796_v33 = vadd.f32 %v1795_v12, %v3037_v42  ;;  %v1453_v1 = vpop.f32.mrb[94].mxu0  ;;  %v2507_v15 = vpop.f32.mrb[94].mxu1 }
 0x1d5   : > { %v2058_v25 = vadd.f32 %v3057_v63, %v1740_v7  ;;  %v2074_v37 = vadd.f32 %v3057_v63, %v1804_v30  ;;  %v1743_v9 = vadd.f32 %v3172_v21, %v1453_v1  ;;  %v1807_v47 = vadd.f32 %v2507_v15, %v3049_v54  ;;  %v1455_v2 = vpop.f32.mrb[95].mxu0  ;;  %v1798_v50 = vpop.f32.mrb[95].mxu1 }
 0x1d6   : > { %v2072_v16 = vadd.f32 %v3057_v63, %v1796_v33  ;;  %v1799_v58 = vadd.f32 %v1798_v50, %v3041_v46 }
 0x1d7   : > { %2122 = vst [vmem:[%s3062_s28 + $0x170] sm:$0xff] %v2058_v25  ;;  %2138 = vst [vmem:[%s3062_s28 + $0x1f0] sm:$0xff] %v2074_v37  ;;  %v2059_v42 = vadd.f32 %v3057_v63, %v1743_v9  ;;  %v2075_v19 = vadd.f32 %v3057_v63, %v1807_v47 }
 0x1d8   : > { %2136 = vst [vmem:[%s3062_s28 + $0x1e0] sm:$0xff] %v2072_v16  ;;  %v2073_v29 = vadd.f32 %v3057_v63, %v1799_v58 }
 0x1d9   : > { %2123 = vst [vmem:[%s3062_s28 + $0x178] sm:$0xff] %v2059_v42  ;;  %2139 = vst [vmem:[%s3062_s28 + $0x1f8] sm:$0xff] %v2075_v19 }
 0x1da   : > { %2137 = vst [vmem:[%s3062_s28 + $0x1e8] sm:$0xff] %v2073_v29 }
 0x1db PF: > { %s13_s14 = sadd.s32 1, %s2740_s14   ;;  %s3261_s12 = smov %s2736_s13 }
 0x1dc   : > { %p10_p5 = scmp.ge.s32.totalorder %s13_s14, 6   ;;  %s3262_s13 = smov %s3264_s15 }
 0x1de   :  { %12 = sbr.rel (!%p10_p5) target bundleno = 2 (0x2), region = 76 }

</bundles_post_ra>
